<compile_context>
chip_gen: v7x
topology: tpu7x:2x2x1
jax: 0.10.0
libtpu: 0.0.40
codegen_flags: <defaults>
</compile_context>

<pallas_src>
import functools

import numpy as np
import jax
import jax.numpy as jnp
from jax import lax
from jax.experimental import pallas as pl
from jax.experimental.pallas import tpu as pltpu

VMEM_LIMIT = 32 * 1024 * 1024  # explicit scoped-VMEM budget, safe on v5e/v6e/v7x


def _round_up(a, b):
    return (a + b - 1) // b * b


def _pick_tile_m(M, max_tile=256):
    # At least 2 grid steps when possible (lets v7x shard across its 2 TensorCores),
    # capped so input+weight+output tiles stay far below the VMEM budget.
    half = _round_up(max(pl.cdiv(M, 2), 1), 8)
    return max(8, min(max_tile, half))


# ---------------------------------------------------------------------------
# Kernel 1: fused passlayer (conv3x3 -> GN+ReLU -> conv3x3 -> GN+ReLU -> conv1x1)
# ---------------------------------------------------------------------------

def _passlayer_kernel(x_ref, w1_ref, b1_ref, g1_ref, be1_ref,
                      w2_ref, b2_ref, g2_ref, be2_ref,
                      w3_ref, b3_ref, o_ref, buf_ref, *, H, W, OFF):
    HW = H * W

    # Column-wrap masks: tap dx=0 reads column w-1 (invalid at w==0), dx=2 reads
    # column w+1 (invalid at w==W-1).  Row (H) boundaries are handled by the zero
    # rows surrounding the image inside the scratch slab.
    col = lax.broadcasted_iota(jnp.int32, (HW, 1), 0) % W
    not_left = col != 0
    not_right = col != (W - 1)

    buf_ref[...] = jnp.zeros(buf_ref.shape, jnp.float32)
    buf_ref[pl.ds(OFF, HW), :] = x_ref[...].astype(jnp.float32)

    def conv3x3(w_ref_, b_ref_):
        acc = jnp.zeros((HW, w_ref_.shape[-1]), jnp.float32)
        for dy in range(3):
            for dx in range(3):
                start = OFF + (dy - 1) * W + (dx - 1)          # static offset
                slab = buf_ref[pl.ds(start, HW), :]            # (HW, Cin) f32
                if dx == 0:
                    slab = jnp.where(not_left, slab, 0.0)
                elif dx == 2:
                    slab = jnp.where(not_right, slab, 0.0)
                acc = acc + jnp.dot(slab.astype(jnp.bfloat16),
                                    w_ref_[dy * 3 + dx].astype(jnp.bfloat16),
                                    preferred_element_type=jnp.float32)
        return acc + b_ref_[...].astype(jnp.float32)

    def gn_relu(y, g_ref_, be_ref_):
        # GroupNorm(num_groups=1): normalize over the whole (HW, C) sample.
        mean = jnp.mean(y, keepdims=True)
        var = jnp.mean((y - mean) ** 2, keepdims=True)
        yn = (y - mean) * lax.rsqrt(var + 1e-5)
        yn = yn * g_ref_[...].astype(jnp.float32) + be_ref_[...].astype(jnp.float32)
        return jnp.maximum(yn, 0.0)

    y = gn_relu(conv3x3(w1_ref, b1_ref), g1_ref, be1_ref)
    buf_ref[pl.ds(OFF, HW), :] = y                              # re-pad for stage 2
    y = gn_relu(conv3x3(w2_ref, b2_ref), g2_ref, be2_ref)
    y = jnp.dot(y.astype(jnp.bfloat16), w3_ref[...].astype(jnp.bfloat16),
                preferred_element_type=jnp.float32) + b3_ref[...].astype(jnp.float32)
    o_ref[...] = y.astype(o_ref.dtype)


def pallas_passlayer(x, p, H, W):
    """x: (B, L, C) tokens in row-major (h*W + w) order."""
    B, L, C = x.shape
    OFF = _round_up(W + 1, 8)                   # zero rows above the image
    PADL = _round_up(OFF + L + W + 1, 8)        # zero rows below the image
    kernel = functools.partial(_passlayer_kernel, H=H, W=W, OFF=OFF)
    vec = lambda i: (0, 0)
    return pl.pallas_call(
        kernel,
        out_shape=jax.ShapeDtypeStruct((B, L, C), x.dtype),
        grid=(B,),
        in_specs=[
            pl.BlockSpec((None, L, C), lambda i: (i, 0, 0)),
            pl.BlockSpec((9, C, C), lambda i: (0, 0, 0)), pl.BlockSpec((1, C), vec),
            pl.BlockSpec((1, C), vec), pl.BlockSpec((1, C), vec),
            pl.BlockSpec((9, C, C), lambda i: (0, 0, 0)), pl.BlockSpec((1, C), vec),
            pl.BlockSpec((1, C), vec), pl.BlockSpec((1, C), vec),
            pl.BlockSpec((C, C), vec), pl.BlockSpec((1, C), vec),
        ],
        out_specs=pl.BlockSpec((None, L, C), lambda i: (i, 0, 0)),
        scratch_shapes=[pltpu.VMEM((PADL, C), jnp.float32)],
        compiler_params=pltpu.CompilerParams(
            dimension_semantics=("parallel",), vmem_limit_bytes=VMEM_LIMIT),
    )(x, p["conv1_w"], p["conv1_b"], p["gn1_g"], p["gn1_b"],
      p["conv2_w"], p["conv2_b"], p["gn2_g"], p["gn2_b"],
      p["conv3_w"], p["conv3_b"])


# ---------------------------------------------------------------------------
# Kernel 2: fused LayerNorm + Linear (LN1 -> qkv projection)
# ---------------------------------------------------------------------------

def _ln_linear_kernel(x_ref, g_ref, b_ref, w_ref, wb_ref, o_ref):
    x = x_ref[...].astype(jnp.float32)
    mean = jnp.mean(x, axis=-1, keepdims=True)
    var = jnp.mean((x - mean) ** 2, axis=-1, keepdims=True)
    xn = (x - mean) * lax.rsqrt(var + 1e-5)
    xn = xn * g_ref[...].astype(jnp.float32) + b_ref[...].astype(jnp.float32)
    y = jnp.dot(xn.astype(jnp.bfloat16), w_ref[...].astype(jnp.bfloat16),
                preferred_element_type=jnp.float32) + wb_ref[...].astype(jnp.float32)
    o_ref[...] = y.astype(o_ref.dtype)


def pallas_ln_linear(x, g, b, w, wb):
    """y = LayerNorm(x) @ w + wb.  x: (M, C), w: (C, N)."""
    M, C = x.shape
    N = w.shape[1]
    tm = _pick_tile_m(M)
    Mp = _round_up(M, tm)
    xi = jnp.pad(x, ((0, Mp - M), (0, 0))) if Mp != M else x
    out = pl.pallas_call(
        _ln_linear_kernel,
        out_shape=jax.ShapeDtypeStruct((Mp, N), x.dtype),
        grid=(Mp // tm,),
        in_specs=[
            pl.BlockSpec((tm, C), lambda i: (i, 0)),
            pl.BlockSpec((1, C), lambda i: (0, 0)),
            pl.BlockSpec((1, C), lambda i: (0, 0)),
            pl.BlockSpec((C, N), lambda i: (0, 0)),
            pl.BlockSpec((1, N), lambda i: (0, 0)),
        ],
        out_specs=pl.BlockSpec((tm, N), lambda i: (i, 0)),
        compiler_params=pltpu.CompilerParams(
            dimension_semantics=("parallel",), vmem_limit_bytes=VMEM_LIMIT),
    )(xi, g, b, w, wb)
    return out[:M] if Mp != M else out


# ---------------------------------------------------------------------------
# Kernel 3: window attention (all heads + all windows of one sample per step,
#           head-merge + output projection fused, lane-dense (N, C) store)
# ---------------------------------------------------------------------------

def _window_attn_kernel(q_ref, k_ref, v_ref, bm_ref, pw_ref, pb_ref, o_ref,
                        *, nH, nW, scale):
    G, N, hd = q_ref.shape
    C = o_ref.shape[-1]
    q = q_ref[...].astype(jnp.float32) * scale          # (G, N, hd), G = nH*nW
    k = k_ref[...].astype(jnp.float32)
    v = v_ref[...].astype(jnp.float32)
    bm = bm_ref[...].astype(jnp.float32)                 # (G, N, N) bias + shift mask

    out = jnp.zeros((nW, N, C), jnp.float32)
    for h in range(nH):
        lo = h * nW
        qh = q[lo:lo + nW].astype(jnp.bfloat16)           # (nW, N, hd)
        kh = k[lo:lo + nW].astype(jnp.bfloat16)
        vh = v[lo:lo + nW].astype(jnp.bfloat16)
        s = jnp.einsum('wnd,wmd->wnm', qh, kh,
                       preferred_element_type=jnp.float32)
        s = s + bm[lo:lo + nW]
        s = s - jnp.max(s, axis=-1, keepdims=True)
        p = jnp.exp(s)
        l = jnp.sum(p, axis=-1, keepdims=True)
        p = p * pl.reciprocal(l, approx=True)
        oh = jnp.einsum('wnm,wmd->wnd', p.astype(jnp.bfloat16), vh,
                        preferred_element_type=jnp.float32)
        # head-merged projection: sum_h (o_h @ proj_w[h*hd:(h+1)*hd, :])
        pwh = jnp.broadcast_to(pw_ref[h].astype(jnp.bfloat16), (nW, hd, C))
        out = out + jnp.einsum('wnd,wdc->wnc', oh.astype(jnp.bfloat16), pwh,
                               preferred_element_type=jnp.float32)
    out = out + pb_ref[...].astype(jnp.float32)
    o_ref[...] = out.astype(o_ref.dtype)


def pallas_window_attention(q, k, v, bm, pw, pb, scale, nH, nW):
    """q,k,v: (B, nH*nW, N, hd); bm: (nH*nW, N, N); pw: (nH, hd, C); pb: (1, C)."""
    B, G, N, hd = q.shape
    C = pw.shape[-1]
    kernel = functools.partial(_window_attn_kernel, nH=nH, nW=nW, scale=scale)
    qspec = pl.BlockSpec((None, G, N, hd), lambda b: (b, 0, 0, 0))
    return pl.pallas_call(
        kernel,
        out_shape=jax.ShapeDtypeStruct((B, nW, N, C), q.dtype),
        grid=(B,),
        in_specs=[
            qspec, qspec, qspec,
            pl.BlockSpec((G, N, N), lambda b: (0, 0, 0)),
            pl.BlockSpec((nH, hd, C), lambda b: (0, 0, 0)),
            pl.BlockSpec((1, C), lambda b: (0, 0)),
        ],
        out_specs=pl.BlockSpec((None, nW, N, C), lambda b: (b, 0, 0, 0)),
        compiler_params=pltpu.CompilerParams(
            dimension_semantics=("parallel",), vmem_limit_bytes=VMEM_LIMIT),
    )(q, k, v, bm, pw, pb)


# ---------------------------------------------------------------------------
# Kernel 4: fused residual add + LN2 + MLP(ReLU) + residual
# ---------------------------------------------------------------------------

def _res_mlp_kernel(s_ref, a_ref, p_ref, g_ref, b_ref,
                    w1_ref, b1_ref, w2_ref, b2_ref, o_ref):
    x = (s_ref[...].astype(jnp.float32) + a_ref[...].astype(jnp.float32)
         + p_ref[...].astype(jnp.float32))
    mean = jnp.mean(x, axis=-1, keepdims=True)
    var = jnp.mean((x - mean) ** 2, axis=-1, keepdims=True)
    xn = (x - mean) * lax.rsqrt(var + 1e-5)
    xn = xn * g_ref[...].astype(jnp.float32) + b_ref[...].astype(jnp.float32)
    h = jnp.dot(xn.astype(jnp.bfloat16), w1_ref[...].astype(jnp.bfloat16),
                preferred_element_type=jnp.float32) + b1_ref[...].astype(jnp.float32)
    h = jnp.maximum(h, 0.0)
    y = jnp.dot(h.astype(jnp.bfloat16), w2_ref[...].astype(jnp.bfloat16),
                preferred_element_type=jnp.float32) + b2_ref[...].astype(jnp.float32)
    o_ref[...] = (x + y).astype(o_ref.dtype)


def pallas_res_mlp(shortcut, attn, passfeat, g, b, w1, b1, w2, b2):
    """out = x + MLP(LN(x)),  x = shortcut + attn + passfeat.  All (M, C)."""
    M, C = shortcut.shape
    Hd = w1.shape[1]
    tm = _pick_tile_m(M)
    Mp = _round_up(M, tm)
    if Mp != M:
        cfg = ((0, Mp - M), (0, 0))
        shortcut = jnp.pad(shortcut, cfg)
        attn = jnp.pad(attn, cfg)
        passfeat = jnp.pad(passfeat, cfg)
    out = pl.pallas_call(
        _res_mlp_kernel,
        out_shape=jax.ShapeDtypeStruct((Mp, C), shortcut.dtype),
        grid=(Mp // tm,),
        in_specs=[
            pl.BlockSpec((tm, C), lambda i: (i, 0)),
            pl.BlockSpec((tm, C), lambda i: (i, 0)),
            pl.BlockSpec((tm, C), lambda i: (i, 0)),
            pl.BlockSpec((1, C), lambda i: (0, 0)),
            pl.BlockSpec((1, C), lambda i: (0, 0)),
            pl.BlockSpec((C, Hd), lambda i: (0, 0)),
            pl.BlockSpec((1, Hd), lambda i: (0, 0)),
            pl.BlockSpec((Hd, C), lambda i: (0, 0)),
            pl.BlockSpec((1, C), lambda i: (0, 0)),
        ],
        out_specs=pl.BlockSpec((tm, C), lambda i: (i, 0)),
        compiler_params=pltpu.CompilerParams(
            dimension_semantics=("parallel",), vmem_limit_bytes=VMEM_LIMIT),
    )(shortcut, attn, passfeat, g, b, w1, b1, w2, b2)
    return out[:M] if Mp != M else out


# ---------------------------------------------------------------------------
# Glue (windowing, masks, relative position bias)
# ---------------------------------------------------------------------------

def window_partition(x, ws):
    B, H, W, C = x.shape
    x = x.reshape(B, H // ws, ws, W // ws, ws, C)
    return jnp.transpose(x, (0, 1, 3, 2, 4, 5)).reshape(-1, ws, ws, C)


def window_reverse(windows, ws, H, W):
    B = windows.shape[0] // ((H // ws) * (W // ws))
    x = windows.reshape(B, H // ws, W // ws, ws, ws, -1)
    return jnp.transpose(x, (0, 1, 3, 2, 4, 5)).reshape(B, H, W, -1)


def relative_position_index(ws):
    coords = np.stack(np.meshgrid(np.arange(ws), np.arange(ws), indexing="ij"))
    cf = coords.reshape(2, -1)
    rel = cf[:, :, None] - cf[:, None, :]
    rel = rel.transpose(1, 2, 0).astype(np.int64)
    rel[:, :, 0] += ws - 1
    rel[:, :, 1] += ws - 1
    rel[:, :, 0] *= 2 * ws - 1
    return rel.sum(-1)                               # (N, N)


def compute_shift_mask(H, W, ws, ss):
    """(nW, N, N) additive mask (0 / -100) for shifted-window blocks."""
    Hp = int(np.ceil(H / ws)) * ws
    Wp = int(np.ceil(W / ws)) * ws
    img_mask = np.zeros((1, Hp, Wp, 1), np.float32)
    slices = (slice(0, -ws), slice(-ws, -ss), slice(-ss, None))
    cnt = 0
    for h in slices:
        for w in slices:
            img_mask[:, h, w, :] = cnt
            cnt += 1
    m = img_mask.reshape(1, Hp // ws, ws, Wp // ws, ws, 1)
    m = m.transpose(0, 1, 3, 2, 4, 5).reshape(-1, ws * ws)
    attn_mask = m[:, None, :] - m[:, :, None]
    return np.where(attn_mask != 0, -100.0, 0.0).astype(np.float32)


# ---------------------------------------------------------------------------
# LocalRTBLOCK / LRT forward
# ---------------------------------------------------------------------------

def block_forward(x, p, H, W, ws, ss, num_heads, rpi_np, shift_mask_np):
    B, L, C = x.shape
    nH = num_heads
    hd = C // nH
    scale = hd ** -0.5
    shortcut = x

    # ---- passlayer (one fused Pallas kernel per sample) ----
    passfeat = pallas_passlayer(x, p, H, W)                      # (B, L, C)

    # ---- window attention branch ----
    qkv = pallas_ln_linear(x.reshape(B * L, C), p["ln1_g"], p["ln1_b"],
                           p["qkv_w"], p["qkv_b"])               # (B*L, 3C)
    qkv_img = qkv.reshape(B, H, W, 3 * C)

    pad_b = (ws - H % ws) % ws
    pad_r = (ws - W % ws) % ws
    Hp, Wp = H + pad_b, W + pad_r
    if pad_b or pad_r:
        # reference pads x_norm with zeros BEFORE the qkv matmul -> padded tokens
        # carry exactly the qkv bias.
        base = jnp.broadcast_to(p["qkv_b"].reshape(1, 1, 1, 3 * C),
                                (B, Hp, Wp, 3 * C))
        qkv_img = base.at[:, :H, :W, :].set(qkv_img)
    if ss > 0:
        qkv_img = jnp.roll(qkv_img, (-ss, -ss), axis=(1, 2))

    N = ws * ws
    nW = (Hp // ws) * (Wp // ws)
    win = window_partition(qkv_img, ws).reshape(B, nW, N, 3, nH, hd)

    def heads_first(t):                                           # -> (B, nH*nW, N, hd)
        return jnp.transpose(t, (0, 3, 1, 2, 4)).reshape(B, nH * nW, N, hd)

    q = heads_first(win[:, :, :, 0])
    k = heads_first(win[:, :, :, 1])
    v = heads_first(win[:, :, :, 2])

    bias = p["rpb_table"][jnp.asarray(rpi_np.reshape(-1))].reshape(N, N, nH)
    bias = jnp.transpose(bias, (2, 0, 1))                         # (nH, N, N)
    if ss > 0:
        mask = jnp.asarray(shift_mask_np)                         # (nW, N, N)
    else:
        mask = jnp.zeros((nW, N, N), jnp.float32)
    bm = (bias[:, None, :, :] + mask[None, :, :, :]).reshape(nH * nW, N, N)

    pw = p["proj_w"].reshape(nH, hd, C)
    ao = pallas_window_attention(q, k, v, bm, pw, p["proj_b"], scale, nH, nW)

    ao = ao.reshape(B * nW, ws, ws, C)
    shifted = window_reverse(ao, ws, Hp, Wp)
    if ss > 0:
        shifted = jnp.roll(shifted, (ss, ss), axis=(1, 2))
    xw = shifted[:, :H, :W, :].reshape(B * L, C)

    # ---- fused residual + LN2 + MLP + residual ----
    out = pallas_res_mlp(shortcut.reshape(B * L, C), xw, passfeat.reshape(B * L, C),
                         p["ln2_g"], p["ln2_b"], p["fc1_w"], p["fc1_b"],
                         p["fc2_w"], p["fc2_b"])
    return out.reshape(B, L, C)


def lrt_forward(x_nchw, params, *, window_size, num_heads):
    B, C, H, W = x_nchw.shape
    ws = window_size
    ss = ws // 2
    x = jnp.transpose(x_nchw, (0, 2, 3, 1)).reshape(B, H * W, C)   # b (h w) c
    rpi_np = relative_position_index(ws)
    shift_mask_np = compute_shift_mask(H, W, ws, ss)
    for i, p in enumerate(params):
        blk_ss = 0 if i % 2 == 0 else ss
        x = block_forward(x, p, H, W, ws, blk_ss, num_heads, rpi_np, shift_mask_np)
    return jnp.transpose(x.reshape(B, H, W, C), (0, 3, 1, 2))


# ---------------------------------------------------------------------------
# Deterministic parameter init (synthetic — shapes follow the module __init__)
# ---------------------------------------------------------------------------

def init_block_params(key, dim, num_heads, window_size, mlp_ratio):
    hidden = int(dim * mlp_ratio)
    ks = jax.random.split(key, 8)

    def w(k, shape, std=0.02):
        return jax.random.normal(k, shape, jnp.float32) * std

    return {
        # conv weights stored as (tap, Cin, Cout), tap = dy*3 + dx
        "conv1_w": w(ks[0], (9, dim, dim)), "conv1_b": jnp.zeros((1, dim), jnp.float32),
        "gn1_g": jnp.ones((1, dim), jnp.float32), "gn1_b": jnp.zeros((1, dim), jnp.float32),
        "conv2_w": w(ks[1], (9, dim, dim)), "conv2_b": jnp.zeros((1, dim), jnp.float32),
        "gn2_g": jnp.ones((1, dim), jnp.float32), "gn2_b": jnp.zeros((1, dim), jnp.float32),
        "conv3_w": w(ks[2], (dim, dim)), "conv3_b": jnp.zeros((1, dim), jnp.float32),
        "ln1_g": jnp.ones((1, dim), jnp.float32), "ln1_b": jnp.zeros((1, dim), jnp.float32),
        "qkv_w": w(ks[3], (dim, 3 * dim)), "qkv_b": jnp.zeros((1, 3 * dim), jnp.float32),
        "proj_w": w(ks[4], (dim, dim)), "proj_b": jnp.zeros((1, dim), jnp.float32),
        "rpb_table": w(ks[5], ((2 * window_size - 1) ** 2, num_heads)),
        "ln2_g": jnp.ones((1, dim), jnp.float32), "ln2_b": jnp.zeros((1, dim), jnp.float32),
        "fc1_w": w(ks[6], (dim, hidden)), "fc1_b": jnp.zeros((1, hidden), jnp.float32),
        "fc2_w": w(ks[7], (hidden, dim)), "fc2_b": jnp.zeros((1, dim), jnp.float32),
    }


if __name__ == "__main__":
    # LRT(dim=32, depth=2, num_heads=4, window_size=5) on input (B, C, H, W) = (2, 32, 10, 10)
    B, C, H, W = 2, 32, 10, 10
    dim, depth, num_heads, window_size, mlp_ratio = C, 2, 4, 5, 4.0

    key = jax.random.PRNGKey(0)
    xkey, pkey = jax.random.split(key)
    x = jax.random.normal(xkey, (B, C, H, W), jnp.float32)

    bkeys = jax.random.split(pkey, depth)
    params = [init_block_params(bkeys[i], dim, num_heads, window_size, mlp_ratio)
              for i in range(depth)]

    fwd = jax.jit(functools.partial(lrt_forward, window_size=window_size,
                                    num_heads=num_heads))
    out = jax.block_until_ready(fwd(x, params))
    assert out.shape == (B, C, H, W)
    assert bool(jnp.all(jnp.isfinite(out)))
    print("KERNEL_OK")
</pallas_src>

<mosaic_0001>
module attributes {stable_mosaic.version = 11 : i64} {
  func.func @_ln_linear_kernel(%arg0: i32, %arg1: memref<104x32xf32, #tpu.memory_space<vmem>>, %arg2: memref<1x32xf32, #tpu.memory_space<vmem>>, %arg3: memref<1x32xf32, #tpu.memory_space<vmem>>, %arg4: memref<32x96xf32, #tpu.memory_space<vmem>>, %arg5: memref<1x96xf32, #tpu.memory_space<vmem>>, %arg6: memref<104x96xf32, #tpu.memory_space<vmem>>) attributes {dimension_semantics = [#tpu.dimension_semantics<parallel>], iteration_bounds = array<i64: 2>, scalar_prefetch = 0 : i64, scratch_operands = 0 : i64, tpu.core_type = #tpu.core_type<tc>, window_params = [{transform_indices = @transform_0, window_bounds = array<i64: 104, 32>}, {pipeline_mode = #tpu.pipeline_mode<synchronous>, transform_indices = @transform_1, window_bounds = array<i64: 1, 32>}, {pipeline_mode = #tpu.pipeline_mode<synchronous>, transform_indices = @transform_2, window_bounds = array<i64: 1, 32>}, {pipeline_mode = #tpu.pipeline_mode<synchronous>, transform_indices = @transform_3, window_bounds = array<i64: 32, 96>}, {pipeline_mode = #tpu.pipeline_mode<synchronous>, transform_indices = @transform_4, window_bounds = array<i64: 1, 96>}, {transform_indices = @transform_5, window_bounds = array<i64: 104, 96>}]} {
    %c0 = arith.constant 0 : index
    %c0_0 = arith.constant 0 : index
    %0 = vector.load %arg1[%c0, %c0_0] : memref<104x32xf32, #tpu.memory_space<vmem>>, vector<104x32xf32>
    %cst = arith.constant dense<0.000000e+00> : vector<104xf32>
    %1 = vector.multi_reduction <add>, %0, %cst [1] : vector<104x32xf32> to vector<104xf32>
    %2 = vector.shape_cast %1 : vector<104xf32> to vector<104x1xf32>
    %cst_1 = arith.constant 3.200000e+01 : f32
    %3 = vector.broadcast %cst_1 : f32 to vector<104x1xf32>
    %4 = arith.divf %2, %3 : vector<104x1xf32>
    %5 = vector.broadcast %4 : vector<104x1xf32> to vector<104x32xf32>
    %6 = arith.subf %0, %5 : vector<104x32xf32>
    %7 = arith.mulf %6, %6 : vector<104x32xf32>
    %cst_2 = arith.constant dense<0.000000e+00> : vector<104xf32>
    %8 = vector.multi_reduction <add>, %7, %cst_2 [1] : vector<104x32xf32> to vector<104xf32>
    %9 = vector.shape_cast %8 : vector<104xf32> to vector<104x1xf32>
    %cst_3 = arith.constant 3.200000e+01 : f32
    %10 = vector.broadcast %cst_3 : f32 to vector<104x1xf32>
    %11 = arith.divf %9, %10 : vector<104x1xf32>
    %12 = vector.broadcast %4 : vector<104x1xf32> to vector<104x32xf32>
    %13 = arith.subf %0, %12 : vector<104x32xf32>
    %cst_4 = arith.constant 9.99999974E-6 : f32
    %14 = vector.broadcast %cst_4 : f32 to vector<104x1xf32>
    %15 = arith.addf %11, %14 : vector<104x1xf32>
    %16 = math.rsqrt %15 : vector<104x1xf32>
    %17 = vector.broadcast %16 : vector<104x1xf32> to vector<104x32xf32>
    %18 = arith.mulf %13, %17 : vector<104x32xf32>
    %c0_5 = arith.constant 0 : index
    %c0_6 = arith.constant 0 : index
    %19 = vector.load %arg2[%c0_5, %c0_6] : memref<1x32xf32, #tpu.memory_space<vmem>>, vector<1x32xf32>
    %20 = vector.broadcast %19 : vector<1x32xf32> to vector<104x32xf32>
    %21 = arith.mulf %18, %20 : vector<104x32xf32>
    %c0_7 = arith.constant 0 : index
    %c0_8 = arith.constant 0 : index
    %22 = vector.load %arg3[%c0_7, %c0_8] : memref<1x32xf32, #tpu.memory_space<vmem>>, vector<1x32xf32>
    %23 = vector.broadcast %22 : vector<1x32xf32> to vector<104x32xf32>
    %24 = arith.addf %21, %23 : vector<104x32xf32>
    %25 = arith.truncf %24 : vector<104x32xf32> to vector<104x32xbf16>
    %c0_9 = arith.constant 0 : index
    %c0_10 = arith.constant 0 : index
    %26 = vector.load %arg4[%c0_9, %c0_10] : memref<32x96xf32, #tpu.memory_space<vmem>>, vector<32x96xf32>
    %27 = arith.truncf %26 : vector<32x96xf32> to vector<32x96xbf16>
    %cst_11 = arith.constant dense<0.000000e+00> : vector<104x96xf32>
    %28 = tpu.matmul %25, %27, %cst_11 {dimension_numbers = #tpu.dot_dimension_numbers<[1], [0], [0], [1], [0, 0, 1, 1], [], []>} : vector<104x32xbf16>, vector<32x96xbf16>, vector<104x96xf32> -> vector<104x96xf32>
    %c0_12 = arith.constant 0 : index
    %c0_13 = arith.constant 0 : index
    %29 = vector.load %arg5[%c0_12, %c0_13] : memref<1x96xf32, #tpu.memory_space<vmem>>, vector<1x96xf32>
    %30 = vector.broadcast %29 : vector<1x96xf32> to vector<104x96xf32>
    %31 = arith.addf %28, %30 : vector<104x96xf32>
    %c0_14 = arith.constant 0 : index
    %c0_15 = arith.constant 0 : index
    %32 = vector.load %arg6[%c0_14, %c0_15] : memref<104x96xf32, #tpu.memory_space<vmem>>, vector<104x96xf32>
    tpu.vector_store %arg6[%c0_14, %c0_15], %31 {strides = array<i32>} : memref<104x96xf32, #tpu.memory_space<vmem>>, vector<104x96xf32>,
    return
  }
  func.func @transform_0(%arg0: i32) -> (i32, i32) {
    %c0_i32 = arith.constant 0 : i32
    %c0_i32_0 = arith.constant 0 : i32
    return %arg0, %c0_i32 : i32, i32
  }
  func.func @transform_1(%arg0: i32) -> (i32, i32) {
    %c0_i32 = arith.constant 0 : i32
    %c0_i32_0 = arith.constant 0 : i32
    %c0_i32_1 = arith.constant 0 : i32
    return %c0_i32, %c0_i32_0 : i32, i32
  }
  func.func @transform_2(%arg0: i32) -> (i32, i32) {
    %c0_i32 = arith.constant 0 : i32
    %c0_i32_0 = arith.constant 0 : i32
    %c0_i32_1 = arith.constant 0 : i32
    return %c0_i32, %c0_i32_0 : i32, i32
  }
  func.func @transform_3(%arg0: i32) -> (i32, i32) {
    %c0_i32 = arith.constant 0 : i32
    %c0_i32_0 = arith.constant 0 : i32
    %c0_i32_1 = arith.constant 0 : i32
    return %c0_i32, %c0_i32_0 : i32, i32
  }
  func.func @transform_4(%arg0: i32) -> (i32, i32) {
    %c0_i32 = arith.constant 0 : i32
    %c0_i32_0 = arith.constant 0 : i32
    %c0_i32_1 = arith.constant 0 : i32
    return %c0_i32, %c0_i32_0 : i32, i32
  }
  func.func @transform_5(%arg0: i32) -> (i32, i32) {
    %c0_i32 = arith.constant 0 : i32
    %c0_i32_0 = arith.constant 0 : i32
    return %arg0, %c0_i32 : i32, i32
  }
}

module attributes {stable_mosaic.version = 11 : i64} {
  func.func @_window_attn_kernel(%arg0: i32, %arg1: memref<1x16x25x8xf32, #tpu.memory_space<vmem>>, %arg2: memref<1x16x25x8xf32, #tpu.memory_space<vmem>>, %arg3: memref<1x16x25x8xf32, #tpu.memory_space<vmem>>, %arg4: memref<16x25x25xf32, #tpu.memory_space<vmem>>, %arg5: memref<4x8x32xf32, #tpu.memory_space<vmem>>, %arg6: memref<1x32xf32, #tpu.memory_space<vmem>>, %arg7: memref<1x4x25x32xf32, #tpu.memory_space<vmem>>) attributes {dimension_semantics = [#tpu.dimension_semantics<parallel>], iteration_bounds = array<i64: 2>, scalar_prefetch = 0 : i64, scratch_operands = 0 : i64, tpu.core_type = #tpu.core_type<tc>, window_params = [{transform_indices = @transform_0, window_bounds = array<i64: 1, 16, 25, 8>}, {transform_indices = @transform_1, window_bounds = array<i64: 1, 16, 25, 8>}, {transform_indices = @transform_2, window_bounds = array<i64: 1, 16, 25, 8>}, {pipeline_mode = #tpu.pipeline_mode<synchronous>, transform_indices = @transform_3, window_bounds = array<i64: 16, 25, 25>}, {pipeline_mode = #tpu.pipeline_mode<synchronous>, transform_indices = @transform_4, window_bounds = array<i64: 4, 8, 32>}, {pipeline_mode = #tpu.pipeline_mode<synchronous>, transform_indices = @transform_5, window_bounds = array<i64: 1, 32>}, {transform_indices = @transform_6, window_bounds = array<i64: 1, 4, 25, 32>}]} {
    %c0 = arith.constant 0 : index
    %c0_0 = arith.constant 0 : index
    %c0_1 = arith.constant 0 : index
    %c0_2 = arith.constant 0 : index
    %0 = vector.load %arg1[%c0, %c0_0, %c0_1, %c0_2] : memref<1x16x25x8xf32, #tpu.memory_space<vmem>>, vector<1x16x25x8xf32>
    %1 = vector.shape_cast %0 : vector<1x16x25x8xf32> to vector<16x25x8xf32>
    %cst = arith.constant 0.353553385 : f32
    %2 = vector.broadcast %cst : f32 to vector<16x25x8xf32>
    %3 = arith.mulf %1, %2 : vector<16x25x8xf32>
    %c0_3 = arith.constant 0 : index
    %c0_4 = arith.constant 0 : index
    %c0_5 = arith.constant 0 : index
    %c0_6 = arith.constant 0 : index
    %4 = vector.load %arg2[%c0_3, %c0_4, %c0_5, %c0_6] : memref<1x16x25x8xf32, #tpu.memory_space<vmem>>, vector<1x16x25x8xf32>
    %5 = vector.shape_cast %4 : vector<1x16x25x8xf32> to vector<16x25x8xf32>
    %c0_7 = arith.constant 0 : index
    %c0_8 = arith.constant 0 : index
    %c0_9 = arith.constant 0 : index
    %c0_10 = arith.constant 0 : index
    %6 = vector.load %arg3[%c0_7, %c0_8, %c0_9, %c0_10] : memref<1x16x25x8xf32, #tpu.memory_space<vmem>>, vector<1x16x25x8xf32>
    %7 = vector.shape_cast %6 : vector<1x16x25x8xf32> to vector<16x25x8xf32>
    %c0_11 = arith.constant 0 : index
    %c0_12 = arith.constant 0 : index
    %c0_13 = arith.constant 0 : index
    %8 = vector.load %arg4[%c0_11, %c0_12, %c0_13] : memref<16x25x25xf32, #tpu.memory_space<vmem>>, vector<16x25x25xf32>
    %cst_14 = arith.constant 0.000000e+00 : f32
    %9 = vector.broadcast %cst_14 : f32 to vector<4x25x32xf32>
    %10 = vector.extract_strided_slice %3 {offsets = [0, 0, 0], sizes = [4, 25, 8], strides = [1, 1, 1]} : vector<16x25x8xf32> to vector<4x25x8xf32>
    %11 = arith.truncf %10 : vector<4x25x8xf32> to vector<4x25x8xbf16>
    %12 = vector.extract_strided_slice %5 {offsets = [0, 0, 0], sizes = [4, 25, 8], strides = [1, 1, 1]} : vector<16x25x8xf32> to vector<4x25x8xf32>
    %13 = arith.truncf %12 : vector<4x25x8xf32> to vector<4x25x8xbf16>
    %14 = vector.extract_strided_slice %7 {offsets = [0, 0, 0], sizes = [4, 25, 8], strides = [1, 1, 1]} : vector<16x25x8xf32> to vector<4x25x8xf32>
    %15 = arith.truncf %14 : vector<4x25x8xf32> to vector<4x25x8xbf16>
    "tpu.trace_start"() <{level = 10 : i32, message = "wnd,wmd->wnm"}> : () -> ()
    %cst_15 = arith.constant dense<0.000000e+00> : vector<4x25x25xf32>
    %16 = tpu.matmul %11, %13, %cst_15 {dimension_numbers = #tpu.dot_dimension_numbers<[2], [2], [1], [1], [0, 0, 0, 1, 1, 1], [0], [0]>} : vector<4x25x8xbf16>, vector<4x25x8xbf16>, vector<4x25x25xf32> -> vector<4x25x25xf32>
    "tpu.trace_stop"() : () -> ()
    %17 = vector.extract_strided_slice %8 {offsets = [0, 0, 0], sizes = [4, 25, 25], strides = [1, 1, 1]} : vector<16x25x25xf32> to vector<4x25x25xf32>
    %18 = arith.addf %16, %17 : vector<4x25x25xf32>
    %cst_16 = arith.constant dense<0xFF800000> : vector<4x25xf32>
    %19 = vector.multi_reduction <maximumf>, %18, %cst_16 [2] : vector<4x25x25xf32> to vector<4x25xf32>
    %20 = vector.shape_cast %19 : vector<4x25xf32> to vector<4x25x1xf32>
    %21 = vector.broadcast %20 : vector<4x25x1xf32> to vector<4x25x25xf32>
    %22 = arith.subf %18, %21 : vector<4x25x25xf32>
    %23 = math.exp %22 : vector<4x25x25xf32>
    %cst_17 = arith.constant dense<0.000000e+00> : vector<4x25xf32>
    %24 = vector.multi_reduction <add>, %23, %cst_17 [2] : vector<4x25x25xf32> to vector<4x25xf32>
    %25 = vector.shape_cast %24 : vector<4x25xf32> to vector<4x25x1xf32>
    %26 = tpu.reciprocal %25 {approx = true} : vector<4x25x1xf32> -> vector<4x25x1xf32>
    %27 = vector.broadcast %26 : vector<4x25x1xf32> to vector<4x25x25xf32>
    %28 = arith.mulf %23, %27 : vector<4x25x25xf32>
    %29 = arith.truncf %28 : vector<4x25x25xf32> to vector<4x25x25xbf16>
    "tpu.trace_start"() <{level = 10 : i32, message = "wnm,wmd->wnd"}> : () -> ()
    %cst_18 = arith.constant dense<0.000000e+00> : vector<4x25x8xf32>
    %30 = tpu.matmul %29, %15, %cst_18 {dimension_numbers = #tpu.dot_dimension_numbers<[2], [1], [1], [2], [0, 0, 0, 1, 1, 2], [0], [0]>} : vector<4x25x25xbf16>, vector<4x25x8xbf16>, vector<4x25x8xf32> -> vector<4x25x8xf32>
    "tpu.trace_stop"() : () -> ()
    %c0_19 = arith.constant 0 : index
    %c0_20 = arith.constant 0 : index
    %c0_21 = arith.constant 0 : index
    %31 = vector.load %arg5[%c0_19, %c0_20, %c0_21] : memref<4x8x32xf32, #tpu.memory_space<vmem>>, vector<1x8x32xf32>
    %32 = vector.shape_cast %31 : vector<1x8x32xf32> to vector<8x32xf32>
    %33 = arith.truncf %32 : vector<8x32xf32> to vector<8x32xbf16>
    %34 = vector.shape_cast %33 : vector<8x32xbf16> to vector<1x8x32xbf16>
    %35 = vector.broadcast %34 : vector<1x8x32xbf16> to vector<4x8x32xbf16>
    %36 = arith.truncf %30 : vector<4x25x8xf32> to vector<4x25x8xbf16>
    "tpu.trace_start"() <{level = 10 : i32, message = "wnd,wdc->wnc"}> : () -> ()
    %cst_22 = arith.constant dense<0.000000e+00> : vector<4x25x32xf32>
    %37 = tpu.matmul %36, %35, %cst_22 {dimension_numbers = #tpu.dot_dimension_numbers<[2], [1], [1], [2], [0, 0, 0, 1, 1, 2], [0], [0]>} : vector<4x25x8xbf16>, vector<4x8x32xbf16>, vector<4x25x32xf32> -> vector<4x25x32xf32>
    "tpu.trace_stop"() : () -> ()
    %38 = arith.addf %9, %37 : vector<4x25x32xf32>
    %39 = vector.extract_strided_slice %3 {offsets = [4, 0, 0], sizes = [4, 25, 8], strides = [1, 1, 1]} : vector<16x25x8xf32> to vector<4x25x8xf32>
    %40 = arith.truncf %39 : vector<4x25x8xf32> to vector<4x25x8xbf16>
    %41 = vector.extract_strided_slice %5 {offsets = [4, 0, 0], sizes = [4, 25, 8], strides = [1, 1, 1]} : vector<16x25x8xf32> to vector<4x25x8xf32>
    %42 = arith.truncf %41 : vector<4x25x8xf32> to vector<4x25x8xbf16>
    %43 = vector.extract_strided_slice %7 {offsets = [4, 0, 0], sizes = [4, 25, 8], strides = [1, 1, 1]} : vector<16x25x8xf32> to vector<4x25x8xf32>
    %44 = arith.truncf %43 : vector<4x25x8xf32> to vector<4x25x8xbf16>
    "tpu.trace_start"() <{level = 10 : i32, message = "wnd,wmd->wnm"}> : () -> ()
    %cst_23 = arith.constant dense<0.000000e+00> : vector<4x25x25xf32>
    %45 = tpu.matmul %40, %42, %cst_23 {dimension_numbers = #tpu.dot_dimension_numbers<[2], [2], [1], [1], [0, 0, 0, 1, 1, 1], [0], [0]>} : vector<4x25x8xbf16>, vector<4x25x8xbf16>, vector<4x25x25xf32> -> vector<4x25x25xf32>
    "tpu.trace_stop"() : () -> ()
    %46 = vector.extract_strided_slice %8 {offsets = [4, 0, 0], sizes = [4, 25, 25], strides = [1, 1, 1]} : vector<16x25x25xf32> to vector<4x25x25xf32>
    %47 = arith.addf %45, %46 : vector<4x25x25xf32>
    %cst_24 = arith.constant dense<0xFF800000> : vector<4x25xf32>
    %48 = vector.multi_reduction <maximumf>, %47, %cst_24 [2] : vector<4x25x25xf32> to vector<4x25xf32>
    %49 = vector.shape_cast %48 : vector<4x25xf32> to vector<4x25x1xf32>
    %50 = vector.broadcast %49 : vector<4x25x1xf32> to vector<4x25x25xf32>
    %51 = arith.subf %47, %50 : vector<4x25x25xf32>
    %52 = math.exp %51 : vector<4x25x25xf32>
    %cst_25 = arith.constant dense<0.000000e+00> : vector<4x25xf32>
    %53 = vector.multi_reduction <add>, %52, %cst_25 [2] : vector<4x25x25xf32> to vector<4x25xf32>
    %54 = vector.shape_cast %53 : vector<4x25xf32> to vector<4x25x1xf32>
    %55 = tpu.reciprocal %54 {approx = true} : vector<4x25x1xf32> -> vector<4x25x1xf32>
    %56 = vector.broadcast %55 : vector<4x25x1xf32> to vector<4x25x25xf32>
    %57 = arith.mulf %52, %56 : vector<4x25x25xf32>
    %58 = arith.truncf %57 : vector<4x25x25xf32> to vector<4x25x25xbf16>
    "tpu.trace_start"() <{level = 10 : i32, message = "wnm,wmd->wnd"}> : () -> ()
    %cst_26 = arith.constant dense<0.000000e+00> : vector<4x25x8xf32>
    %59 = tpu.matmul %58, %44, %cst_26 {dimension_numbers = #tpu.dot_dimension_numbers<[2], [1], [1], [2], [0, 0, 0, 1, 1, 2], [0], [0]>} : vector<4x25x25xbf16>, vector<4x25x8xbf16>, vector<4x25x8xf32> -> vector<4x25x8xf32>
    "tpu.trace_stop"() : () -> ()
    %c1 = arith.constant 1 : index
    %c0_27 = arith.constant 0 : index
    %c0_28 = arith.constant 0 : index
    %60 = vector.load %arg5[%c1, %c0_27, %c0_28] : memref<4x8x32xf32, #tpu.memory_space<vmem>>, vector<1x8x32xf32>
    %61 = vector.shape_cast %60 : vector<1x8x32xf32> to vector<8x32xf32>
    %62 = arith.truncf %61 : vector<8x32xf32> to vector<8x32xbf16>
    %63 = vector.shape_cast %62 : vector<8x32xbf16> to vector<1x8x32xbf16>
    %64 = vector.broadcast %63 : vector<1x8x32xbf16> to vector<4x8x32xbf16>
    %65 = arith.truncf %59 : vector<4x25x8xf32> to vector<4x25x8xbf16>
    "tpu.trace_start"() <{level = 10 : i32, message = "wnd,wdc->wnc"}> : () -> ()
    %cst_29 = arith.constant dense<0.000000e+00> : vector<4x25x32xf32>
    %66 = tpu.matmul %65, %64, %cst_29 {dimension_numbers = #tpu.dot_dimension_numbers<[2], [1], [1], [2], [0, 0, 0, 1, 1, 2], [0], [0]>} : vector<4x25x8xbf16>, vector<4x8x32xbf16>, vector<4x25x32xf32> -> vector<4x25x32xf32>
    "tpu.trace_stop"() : () -> ()
    %67 = arith.addf %38, %66 : vector<4x25x32xf32>
    %68 = vector.extract_strided_slice %3 {offsets = [8, 0, 0], sizes = [4, 25, 8], strides = [1, 1, 1]} : vector<16x25x8xf32> to vector<4x25x8xf32>
    %69 = arith.truncf %68 : vector<4x25x8xf32> to vector<4x25x8xbf16>
    %70 = vector.extract_strided_slice %5 {offsets = [8, 0, 0], sizes = [4, 25, 8], strides = [1, 1, 1]} : vector<16x25x8xf32> to vector<4x25x8xf32>
    %71 = arith.truncf %70 : vector<4x25x8xf32> to vector<4x25x8xbf16>
    %72 = vector.extract_strided_slice %7 {offsets = [8, 0, 0], sizes = [4, 25, 8], strides = [1, 1, 1]} : vector<16x25x8xf32> to vector<4x25x8xf32>
    %73 = arith.truncf %72 : vector<4x25x8xf32> to vector<4x25x8xbf16>
    "tpu.trace_start"() <{level = 10 : i32, message = "wnd,wmd->wnm"}> : () -> ()
    %cst_30 = arith.constant dense<0.000000e+00> : vector<4x25x25xf32>
    %74 = tpu.matmul %69, %71, %cst_30 {dimension_numbers = #tpu.dot_dimension_numbers<[2], [2], [1], [1], [0, 0, 0, 1, 1, 1], [0], [0]>} : vector<4x25x8xbf16>, vector<4x25x8xbf16>, vector<4x25x25xf32> -> vector<4x25x25xf32>
    "tpu.trace_stop"() : () -> ()
    %75 = vector.extract_strided_slice %8 {offsets = [8, 0, 0], sizes = [4, 25, 25], strides = [1, 1, 1]} : vector<16x25x25xf32> to vector<4x25x25xf32>
    %76 = arith.addf %74, %75 : vector<4x25x25xf32>
    %cst_31 = arith.constant dense<0xFF800000> : vector<4x25xf32>
    %77 = vector.multi_reduction <maximumf>, %76, %cst_31 [2] : vector<4x25x25xf32> to vector<4x25xf32>
    %78 = vector.shape_cast %77 : vector<4x25xf32> to vector<4x25x1xf32>
    %79 = vector.broadcast %78 : vector<4x25x1xf32> to vector<4x25x25xf32>
    %80 = arith.subf %76, %79 : vector<4x25x25xf32>
    %81 = math.exp %80 : vector<4x25x25xf32>
    %cst_32 = arith.constant dense<0.000000e+00> : vector<4x25xf32>
    %82 = vector.multi_reduction <add>, %81, %cst_32 [2] : vector<4x25x25xf32> to vector<4x25xf32>
    %83 = vector.shape_cast %82 : vector<4x25xf32> to vector<4x25x1xf32>
    %84 = tpu.reciprocal %83 {approx = true} : vector<4x25x1xf32> -> vector<4x25x1xf32>
    %85 = vector.broadcast %84 : vector<4x25x1xf32> to vector<4x25x25xf32>
    %86 = arith.mulf %81, %85 : vector<4x25x25xf32>
    %87 = arith.truncf %86 : vector<4x25x25xf32> to vector<4x25x25xbf16>
    "tpu.trace_start"() <{level = 10 : i32, message = "wnm,wmd->wnd"}> : () -> ()
    %cst_33 = arith.constant dense<0.000000e+00> : vector<4x25x8xf32>
    %88 = tpu.matmul %87, %73, %cst_33 {dimension_numbers = #tpu.dot_dimension_numbers<[2], [1], [1], [2], [0, 0, 0, 1, 1, 2], [0], [0]>} : vector<4x25x25xbf16>, vector<4x25x8xbf16>, vector<4x25x8xf32> -> vector<4x25x8xf32>
    "tpu.trace_stop"() : () -> ()
    %c2 = arith.constant 2 : index
    %c0_34 = arith.constant 0 : index
    %c0_35 = arith.constant 0 : index
    %89 = vector.load %arg5[%c2, %c0_34, %c0_35] : memref<4x8x32xf32, #tpu.memory_space<vmem>>, vector<1x8x32xf32>
    %90 = vector.shape_cast %89 : vector<1x8x32xf32> to vector<8x32xf32>
    %91 = arith.truncf %90 : vector<8x32xf32> to vector<8x32xbf16>
    %92 = vector.shape_cast %91 : vector<8x32xbf16> to vector<1x8x32xbf16>
    %93 = vector.broadcast %92 : vector<1x8x32xbf16> to vector<4x8x32xbf16>
    %94 = arith.truncf %88 : vector<4x25x8xf32> to vector<4x25x8xbf16>
    "tpu.trace_start"() <{level = 10 : i32, message = "wnd,wdc->wnc"}> : () -> ()
    %cst_36 = arith.constant dense<0.000000e+00> : vector<4x25x32xf32>
    %95 = tpu.matmul %94, %93, %cst_36 {dimension_numbers = #tpu.dot_dimension_numbers<[2], [1], [1], [2], [0, 0, 0, 1, 1, 2], [0], [0]>} : vector<4x25x8xbf16>, vector<4x8x32xbf16>, vector<4x25x32xf32> -> vector<4x25x32xf32>
    "tpu.trace_stop"() : () -> ()
    %96 = arith.addf %67, %95 : vector<4x25x32xf32>
    %97 = vector.extract_strided_slice %3 {offsets = [12, 0, 0], sizes = [4, 25, 8], strides = [1, 1, 1]} : vector<16x25x8xf32> to vector<4x25x8xf32>
    %98 = arith.truncf %97 : vector<4x25x8xf32> to vector<4x25x8xbf16>
    %99 = vector.extract_strided_slice %5 {offsets = [12, 0, 0], sizes = [4, 25, 8], strides = [1, 1, 1]} : vector<16x25x8xf32> to vector<4x25x8xf32>
    %100 = arith.truncf %99 : vector<4x25x8xf32> to vector<4x25x8xbf16>
    %101 = vector.extract_strided_slice %7 {offsets = [12, 0, 0], sizes = [4, 25, 8], strides = [1, 1, 1]} : vector<16x25x8xf32> to vector<4x25x8xf32>
    %102 = arith.truncf %101 : vector<4x25x8xf32> to vector<4x25x8xbf16>
    "tpu.trace_start"() <{level = 10 : i32, message = "wnd,wmd->wnm"}> : () -> ()
    %cst_37 = arith.constant dense<0.000000e+00> : vector<4x25x25xf32>
    %103 = tpu.matmul %98, %100, %cst_37 {dimension_numbers = #tpu.dot_dimension_numbers<[2], [2], [1], [1], [0, 0, 0, 1, 1, 1], [0], [0]>} : vector<4x25x8xbf16>, vector<4x25x8xbf16>, vector<4x25x25xf32> -> vector<4x25x25xf32>
    "tpu.trace_stop"() : () -> ()
    %104 = vector.extract_strided_slice %8 {offsets = [12, 0, 0], sizes = [4, 25, 25], strides = [1, 1, 1]} : vector<16x25x25xf32> to vector<4x25x25xf32>
    %105 = arith.addf %103, %104 : vector<4x25x25xf32>
    %cst_38 = arith.constant dense<0xFF800000> : vector<4x25xf32>
    %106 = vector.multi_reduction <maximumf>, %105, %cst_38 [2] : vector<4x25x25xf32> to vector<4x25xf32>
    %107 = vector.shape_cast %106 : vector<4x25xf32> to vector<4x25x1xf32>
    %108 = vector.broadcast %107 : vector<4x25x1xf32> to vector<4x25x25xf32>
    %109 = arith.subf %105, %108 : vector<4x25x25xf32>
    %110 = math.exp %109 : vector<4x25x25xf32>
    %cst_39 = arith.constant dense<0.000000e+00> : vector<4x25xf32>
    %111 = vector.multi_reduction <add>, %110, %cst_39 [2] : vector<4x25x25xf32> to vector<4x25xf32>
    %112 = vector.shape_cast %111 : vector<4x25xf32> to vector<4x25x1xf32>
    %113 = tpu.reciprocal %112 {approx = true} : vector<4x25x1xf32> -> vector<4x25x1xf32>
    %114 = vector.broadcast %113 : vector<4x25x1xf32> to vector<4x25x25xf32>
    %115 = arith.mulf %110, %114 : vector<4x25x25xf32>
    %116 = arith.truncf %115 : vector<4x25x25xf32> to vector<4x25x25xbf16>
    "tpu.trace_start"() <{level = 10 : i32, message = "wnm,wmd->wnd"}> : () -> ()
    %cst_40 = arith.constant dense<0.000000e+00> : vector<4x25x8xf32>
    %117 = tpu.matmul %116, %102, %cst_40 {dimension_numbers = #tpu.dot_dimension_numbers<[2], [1], [1], [2], [0, 0, 0, 1, 1, 2], [0], [0]>} : vector<4x25x25xbf16>, vector<4x25x8xbf16>, vector<4x25x8xf32> -> vector<4x25x8xf32>
    "tpu.trace_stop"() : () -> ()
    %c3 = arith.constant 3 : index
    %c0_41 = arith.constant 0 : index
    %c0_42 = arith.constant 0 : index
    %118 = vector.load %arg5[%c3, %c0_41, %c0_42] : memref<4x8x32xf32, #tpu.memory_space<vmem>>, vector<1x8x32xf32>
    %119 = vector.shape_cast %118 : vector<1x8x32xf32> to vector<8x32xf32>
    %120 = arith.truncf %119 : vector<8x32xf32> to vector<8x32xbf16>
    %121 = vector.shape_cast %120 : vector<8x32xbf16> to vector<1x8x32xbf16>
    %122 = vector.broadcast %121 : vector<1x8x32xbf16> to vector<4x8x32xbf16>
    %123 = arith.truncf %117 : vector<4x25x8xf32> to vector<4x25x8xbf16>
    "tpu.trace_start"() <{level = 10 : i32, message = "wnd,wdc->wnc"}> : () -> ()
    %cst_43 = arith.constant dense<0.000000e+00> : vector<4x25x32xf32>
    %124 = tpu.matmul %123, %122, %cst_43 {dimension_numbers = #tpu.dot_dimension_numbers<[2], [1], [1], [2], [0, 0, 0, 1, 1, 2], [0], [0]>} : vector<4x25x8xbf16>, vector<4x8x32xbf16>, vector<4x25x32xf32> -> vector<4x25x32xf32>
    "tpu.trace_stop"() : () -> ()
    %125 = arith.addf %96, %124 : vector<4x25x32xf32>
    %c0_44 = arith.constant 0 : index
    %c0_45 = arith.constant 0 : index
    %126 = vector.load %arg6[%c0_44, %c0_45] : memref<1x32xf32, #tpu.memory_space<vmem>>, vector<1x32xf32>
    %127 = vector.shape_cast %126 : vector<1x32xf32> to vector<1x1x32xf32>
    %128 = vector.broadcast %127 : vector<1x1x32xf32> to vector<4x25x32xf32>
    %129 = arith.addf %125, %128 : vector<4x25x32xf32>
    %c0_46 = arith.constant 0 : index
    %c0_47 = arith.constant 0 : index
    %c0_48 = arith.constant 0 : index
    %c0_49 = arith.constant 0 : index
    %130 = vector.load %arg7[%c0_46, %c0_47, %c0_48, %c0_49] : memref<1x4x25x32xf32, #tpu.memory_space<vmem>>, vector<1x4x25x32xf32>
    %131 = vector.shape_cast %130 : vector<1x4x25x32xf32> to vector<4x25x32xf32>
    %132 = vector.shape_cast %129 : vector<4x25x32xf32> to vector<1x4x25x32xf32>
    tpu.vector_store %arg7[%c0_46, %c0_47, %c0_48, %c0_49], %132 {strides = array<i32>} : memref<1x4x25x32xf32, #tpu.memory_space<vmem>>, vector<1x4x25x32xf32>,
    return
  }
  func.func @transform_0(%arg0: i32) -> (i32, i32, i32, i32) {
    %c0_i32 = arith.constant 0 : i32
    %c0_i32_0 = arith.constant 0 : i32
    %c0_i32_1 = arith.constant 0 : i32
    %c0_i32_2 = arith.constant 0 : i32
    return %arg0, %c0_i32, %c0_i32_0, %c0_i32_1 : i32, i32, i32, i32
  }
  func.func @transform_1(%arg0: i32) -> (i32, i32, i32, i32) {
    %c0_i32 = arith.constant 0 : i32
    %c0_i32_0 = arith.constant 0 : i32
    %c0_i32_1 = arith.constant 0 : i32
    %c0_i32_2 = arith.constant 0 : i32
    return %arg0, %c0_i32, %c0_i32_0, %c0_i32_1 : i32, i32, i32, i32
  }
  func.func @transform_2(%arg0: i32) -> (i32, i32, i32, i32) {
    %c0_i32 = arith.constant 0 : i32
    %c0_i32_0 = arith.constant 0 : i32
    %c0_i32_1 = arith.constant 0 : i32
    %c0_i32_2 = arith.constant 0 : i32
    return %arg0, %c0_i32, %c0_i32_0, %c0_i32_1 : i32, i32, i32, i32
  }
  func.func @transform_3(%arg0: i32) -> (i32, i32, i32) {
    %c0_i32 = arith.constant 0 : i32
    %c0_i32_0 = arith.constant 0 : i32
    %c0_i32_1 = arith.constant 0 : i32
    %c0_i32_2 = arith.constant 0 : i32
    return %c0_i32, %c0_i32_0, %c0_i32_1 : i32, i32, i32
  }
  func.func @transform_4(%arg0: i32) -> (i32, i32, i32) {
    %c0_i32 = arith.constant 0 : i32
    %c0_i32_0 = arith.constant 0 : i32
    %c0_i32_1 = arith.constant 0 : i32
    %c0_i32_2 = arith.constant 0 : i32
    return %c0_i32, %c0_i32_0, %c0_i32_1 : i32, i32, i32
  }
  func.func @transform_5(%arg0: i32) -> (i32, i32) {
    %c0_i32 = arith.constant 0 : i32
    %c0_i32_0 = arith.constant 0 : i32
    %c0_i32_1 = arith.constant 0 : i32
    return %c0_i32, %c0_i32_0 : i32, i32
  }
  func.func @transform_6(%arg0: i32) -> (i32, i32, i32, i32) {
    %c0_i32 = arith.constant 0 : i32
    %c0_i32_0 = arith.constant 0 : i32
    %c0_i32_1 = arith.constant 0 : i32
    %c0_i32_2 = arith.constant 0 : i32
    return %arg0, %c0_i32, %c0_i32_0, %c0_i32_1 : i32, i32, i32, i32
  }
}

module attributes {stable_mosaic.version = 11 : i64} {
  func.func @_res_mlp_kernel(%arg0: i32, %arg1: memref<104x32xf32, #tpu.memory_space<vmem>>, %arg2: memref<104x32xf32, #tpu.memory_space<vmem>>, %arg3: memref<104x32xf32, #tpu.memory_space<vmem>>, %arg4: memref<1x32xf32, #tpu.memory_space<vmem>>, %arg5: memref<1x32xf32, #tpu.memory_space<vmem>>, %arg6: memref<32x128xf32, #tpu.memory_space<vmem>>, %arg7: memref<1x128xf32, #tpu.memory_space<vmem>>, %arg8: memref<128x32xf32, #tpu.memory_space<vmem>>, %arg9: memref<1x32xf32, #tpu.memory_space<vmem>>, %arg10: memref<104x32xf32, #tpu.memory_space<vmem>>) attributes {dimension_semantics = [#tpu.dimension_semantics<parallel>], iteration_bounds = array<i64: 2>, scalar_prefetch = 0 : i64, scratch_operands = 0 : i64, tpu.core_type = #tpu.core_type<tc>, window_params = [{transform_indices = @transform_0, window_bounds = array<i64: 104, 32>}, {transform_indices = @transform_1, window_bounds = array<i64: 104, 32>}, {transform_indices = @transform_2, window_bounds = array<i64: 104, 32>}, {pipeline_mode = #tpu.pipeline_mode<synchronous>, transform_indices = @transform_3, window_bounds = array<i64: 1, 32>}, {pipeline_mode = #tpu.pipeline_mode<synchronous>, transform_indices = @transform_4, window_bounds = array<i64: 1, 32>}, {pipeline_mode = #tpu.pipeline_mode<synchronous>, transform_indices = @transform_5, window_bounds = array<i64: 32, 128>}, {pipeline_mode = #tpu.pipeline_mode<synchronous>, transform_indices = @transform_6, window_bounds = array<i64: 1, 128>}, {pipeline_mode = #tpu.pipeline_mode<synchronous>, transform_indices = @transform_7, window_bounds = array<i64: 128, 32>}, {pipeline_mode = #tpu.pipeline_mode<synchronous>, transform_indices = @transform_8, window_bounds = array<i64: 1, 32>}, {transform_indices = @transform_9, window_bounds = array<i64: 104, 32>}]} {
    %c0 = arith.constant 0 : index
    %c0_0 = arith.constant 0 : index
    %0 = vector.load %arg1[%c0, %c0_0] : memref<104x32xf32, #tpu.memory_space<vmem>>, vector<104x32xf32>
    %c0_1 = arith.constant 0 : index
    %c0_2 = arith.constant 0 : index
    %1 = vector.load %arg2[%c0_1, %c0_2] : memref<104x32xf32, #tpu.memory_space<vmem>>, vector<104x32xf32>
    %2 = arith.addf %0, %1 : vector<104x32xf32>
    %c0_3 = arith.constant 0 : index
    %c0_4 = arith.constant 0 : index
    %3 = vector.load %arg3[%c0_3, %c0_4] : memref<104x32xf32, #tpu.memory_space<vmem>>, vector<104x32xf32>
    %4 = arith.addf %2, %3 : vector<104x32xf32>
    %cst = arith.constant dense<0.000000e+00> : vector<104xf32>
    %5 = vector.multi_reduction <add>, %4, %cst [1] : vector<104x32xf32> to vector<104xf32>
    %6 = vector.shape_cast %5 : vector<104xf32> to vector<104x1xf32>
    %cst_5 = arith.constant 3.200000e+01 : f32
    %7 = vector.broadcast %cst_5 : f32 to vector<104x1xf32>
    %8 = arith.divf %6, %7 : vector<104x1xf32>
    %9 = vector.broadcast %8 : vector<104x1xf32> to vector<104x32xf32>
    %10 = arith.subf %4, %9 : vector<104x32xf32>
    %11 = arith.mulf %10, %10 : vector<104x32xf32>
    %cst_6 = arith.constant dense<0.000000e+00> : vector<104xf32>
    %12 = vector.multi_reduction <add>, %11, %cst_6 [1] : vector<104x32xf32> to vector<104xf32>
    %13 = vector.shape_cast %12 : vector<104xf32> to vector<104x1xf32>
    %cst_7 = arith.constant 3.200000e+01 : f32
    %14 = vector.broadcast %cst_7 : f32 to vector<104x1xf32>
    %15 = arith.divf %13, %14 : vector<104x1xf32>
    %16 = vector.broadcast %8 : vector<104x1xf32> to vector<104x32xf32>
    %17 = arith.subf %4, %16 : vector<104x32xf32>
    %cst_8 = arith.constant 9.99999974E-6 : f32
    %18 = vector.broadcast %cst_8 : f32 to vector<104x1xf32>
    %19 = arith.addf %15, %18 : vector<104x1xf32>
    %20 = math.rsqrt %19 : vector<104x1xf32>
    %21 = vector.broadcast %20 : vector<104x1xf32> to vector<104x32xf32>
    %22 = arith.mulf %17, %21 : vector<104x32xf32>
    %c0_9 = arith.constant 0 : index
    %c0_10 = arith.constant 0 : index
    %23 = vector.load %arg4[%c0_9, %c0_10] : memref<1x32xf32, #tpu.memory_space<vmem>>, vector<1x32xf32>
    %24 = vector.broadcast %23 : vector<1x32xf32> to vector<104x32xf32>
    %25 = arith.mulf %22, %24 : vector<104x32xf32>
    %c0_11 = arith.constant 0 : index
    %c0_12 = arith.constant 0 : index
    %26 = vector.load %arg5[%c0_11, %c0_12] : memref<1x32xf32, #tpu.memory_space<vmem>>, vector<1x32xf32>
    %27 = vector.broadcast %26 : vector<1x32xf32> to vector<104x32xf32>
    %28 = arith.addf %25, %27 : vector<104x32xf32>
    %29 = arith.truncf %28 : vector<104x32xf32> to vector<104x32xbf16>
    %c0_13 = arith.constant 0 : index
    %c0_14 = arith.constant 0 : index
    %30 = vector.load %arg6[%c0_13, %c0_14] : memref<32x128xf32, #tpu.memory_space<vmem>>, vector<32x128xf32>
    %31 = arith.truncf %30 : vector<32x128xf32> to vector<32x128xbf16>
    %cst_15 = arith.constant dense<0.000000e+00> : vector<104x128xf32>
    %32 = tpu.matmul %29, %31, %cst_15 {dimension_numbers = #tpu.dot_dimension_numbers<[1], [0], [0], [1], [0, 0, 1, 1], [], []>} : vector<104x32xbf16>, vector<32x128xbf16>, vector<104x128xf32> -> vector<104x128xf32>
    %c0_16 = arith.constant 0 : index
    %c0_17 = arith.constant 0 : index
    %33 = vector.load %arg7[%c0_16, %c0_17] : memref<1x128xf32, #tpu.memory_space<vmem>>, vector<1x128xf32>
    %34 = vector.broadcast %33 : vector<1x128xf32> to vector<104x128xf32>
    %35 = arith.addf %32, %34 : vector<104x128xf32>
    %cst_18 = arith.constant 0.000000e+00 : f32
    %36 = vector.broadcast %cst_18 : f32 to vector<104x128xf32>
    %37 = arith.maximumf %35, %36 : vector<104x128xf32>
    %38 = arith.truncf %37 : vector<104x128xf32> to vector<104x128xbf16>
    %c0_19 = arith.constant 0 : index
    %c0_20 = arith.constant 0 : index
    %39 = vector.load %arg8[%c0_19, %c0_20] : memref<128x32xf32, #tpu.memory_space<vmem>>, vector<128x32xf32>
    %40 = arith.truncf %39 : vector<128x32xf32> to vector<128x32xbf16>
    %cst_21 = arith.constant dense<0.000000e+00> : vector<104x32xf32>
    %41 = tpu.matmul %38, %40, %cst_21 {dimension_numbers = #tpu.dot_dimension_numbers<[1], [0], [0], [1], [0, 0, 1, 1], [], []>} : vector<104x128xbf16>, vector<128x32xbf16>, vector<104x32xf32> -> vector<104x32xf32>
    %c0_22 = arith.constant 0 : index
    %c0_23 = arith.constant 0 : index
    %42 = vector.load %arg9[%c0_22, %c0_23] : memref<1x32xf32, #tpu.memory_space<vmem>>, vector<1x32xf32>
    %43 = vector.broadcast %42 : vector<1x32xf32> to vector<104x32xf32>
    %44 = arith.addf %41, %43 : vector<104x32xf32>
    %45 = arith.addf %4, %44 : vector<104x32xf32>
    %c0_24 = arith.constant 0 : index
    %c0_25 = arith.constant 0 : index
    %46 = vector.load %arg10[%c0_24, %c0_25] : memref<104x32xf32, #tpu.memory_space<vmem>>, vector<104x32xf32>
    tpu.vector_store %arg10[%c0_24, %c0_25], %45 {strides = array<i32>} : memref<104x32xf32, #tpu.memory_space<vmem>>, vector<104x32xf32>,
    return
  }
  func.func @transform_0(%arg0: i32) -> (i32, i32) {
    %c0_i32 = arith.constant 0 : i32
    %c0_i32_0 = arith.constant 0 : i32
    return %arg0, %c0_i32 : i32, i32
  }
  func.func @transform_1(%arg0: i32) -> (i32, i32) {
    %c0_i32 = arith.constant 0 : i32
    %c0_i32_0 = arith.constant 0 : i32
    return %arg0, %c0_i32 : i32, i32
  }
  func.func @transform_2(%arg0: i32) -> (i32, i32) {
    %c0_i32 = arith.constant 0 : i32
    %c0_i32_0 = arith.constant 0 : i32
    return %arg0, %c0_i32 : i32, i32
  }
  func.func @transform_3(%arg0: i32) -> (i32, i32) {
    %c0_i32 = arith.constant 0 : i32
    %c0_i32_0 = arith.constant 0 : i32
    %c0_i32_1 = arith.constant 0 : i32
    return %c0_i32, %c0_i32_0 : i32, i32
  }
  func.func @transform_4(%arg0: i32) -> (i32, i32) {
    %c0_i32 = arith.constant 0 : i32
    %c0_i32_0 = arith.constant 0 : i32
    %c0_i32_1 = arith.constant 0 : i32
    return %c0_i32, %c0_i32_0 : i32, i32
  }
  func.func @transform_5(%arg0: i32) -> (i32, i32) {
    %c0_i32 = arith.constant 0 : i32
    %c0_i32_0 = arith.constant 0 : i32
    %c0_i32_1 = arith.constant 0 : i32
    return %c0_i32, %c0_i32_0 : i32, i32
  }
  func.func @transform_6(%arg0: i32) -> (i32, i32) {
    %c0_i32 = arith.constant 0 : i32
    %c0_i32_0 = arith.constant 0 : i32
    %c0_i32_1 = arith.constant 0 : i32
    return %c0_i32, %c0_i32_0 : i32, i32
  }
  func.func @transform_7(%arg0: i32) -> (i32, i32) {
    %c0_i32 = arith.constant 0 : i32
    %c0_i32_0 = arith.constant 0 : i32
    %c0_i32_1 = arith.constant 0 : i32
    return %c0_i32, %c0_i32_0 : i32, i32
  }
  func.func @transform_8(%arg0: i32) -> (i32, i32) {
    %c0_i32 = arith.constant 0 : i32
    %c0_i32_0 = arith.constant 0 : i32
    %c0_i32_1 = arith.constant 0 : i32
    return %c0_i32, %c0_i32_0 : i32, i32
  }
  func.func @transform_9(%arg0: i32) -> (i32, i32) {
    %c0_i32 = arith.constant 0 : i32
    %c0_i32_0 = arith.constant 0 : i32
    return %arg0, %c0_i32 : i32, i32
  }
}

module attributes {stable_mosaic.version = 11 : i64} {
  func.func @_passlayer_kernel(%arg0: i32, %arg1: memref<1x100x32xf32, #tpu.memory_space<vmem>>, %arg2: memref<9x32x32xf32, #tpu.memory_space<vmem>>, %arg3: memref<1x32xf32, #tpu.memory_space<vmem>>, %arg4: memref<1x32xf32, #tpu.memory_space<vmem>>, %arg5: memref<1x32xf32, #tpu.memory_space<vmem>>, %arg6: memref<9x32x32xf32, #tpu.memory_space<vmem>>, %arg7: memref<1x32xf32, #tpu.memory_space<vmem>>, %arg8: memref<1x32xf32, #tpu.memory_space<vmem>>, %arg9: memref<1x32xf32, #tpu.memory_space<vmem>>, %arg10: memref<32x32xf32, #tpu.memory_space<vmem>>, %arg11: memref<1x32xf32, #tpu.memory_space<vmem>>, %arg12: memref<1x100x32xf32, #tpu.memory_space<vmem>>, %arg13: memref<128x32xf32, #tpu.memory_space<vmem>>) attributes {dimension_semantics = [#tpu.dimension_semantics<parallel>], iteration_bounds = array<i64: 2>, scalar_prefetch = 0 : i64, scratch_operands = 1 : i64, tpu.core_type = #tpu.core_type<tc>, window_params = [{transform_indices = @transform_0, window_bounds = array<i64: 1, 100, 32>}, {pipeline_mode = #tpu.pipeline_mode<synchronous>, transform_indices = @transform_1, window_bounds = array<i64: 9, 32, 32>}, {pipeline_mode = #tpu.pipeline_mode<synchronous>, transform_indices = @transform_2, window_bounds = array<i64: 1, 32>}, {pipeline_mode = #tpu.pipeline_mode<synchronous>, transform_indices = @transform_3, window_bounds = array<i64: 1, 32>}, {pipeline_mode = #tpu.pipeline_mode<synchronous>, transform_indices = @transform_4, window_bounds = array<i64: 1, 32>}, {pipeline_mode = #tpu.pipeline_mode<synchronous>, transform_indices = @transform_5, window_bounds = array<i64: 9, 32, 32>}, {pipeline_mode = #tpu.pipeline_mode<synchronous>, transform_indices = @transform_6, window_bounds = array<i64: 1, 32>}, {pipeline_mode = #tpu.pipeline_mode<synchronous>, transform_indices = @transform_7, window_bounds = array<i64: 1, 32>}, {pipeline_mode = #tpu.pipeline_mode<synchronous>, transform_indices = @transform_8, window_bounds = array<i64: 1, 32>}, {pipeline_mode = #tpu.pipeline_mode<synchronous>, transform_indices = @transform_9, window_bounds = array<i64: 32, 32>}, {pipeline_mode = #tpu.pipeline_mode<synchronous>, transform_indices = @transform_10, window_bounds = array<i64: 1, 32>}, {transform_indices = @transform_11, window_bounds = array<i64: 1, 100, 32>}]} {
    %0 = tpu.iota {dimensions = array<i32: 0>} : vector<100x1xi32>
    %c10_i32 = arith.constant 10 : i32
    %c0_i32 = arith.constant 0 : i32
    %1 = arith.cmpi eq, %c10_i32, %c0_i32 : i32
    %c1_i32 = arith.constant 1 : i32
    %2 = arith.select %1, %c1_i32, %c10_i32 : i32
    %3 = vector.broadcast %2 : i32 to vector<100x1xi32>
    %4 = arith.remsi %0, %3 : vector<100x1xi32>
    %c0_i32_0 = arith.constant 0 : i32
    %5 = vector.broadcast %c0_i32_0 : i32 to vector<100x1xi32>
    %6 = arith.cmpi ne, %4, %5 : vector<100x1xi32>
    %c0_i32_1 = arith.constant 0 : i32
    %7 = vector.broadcast %c0_i32_1 : i32 to vector<100x1xi32>
    %8 = arith.cmpi slt, %4, %7 : vector<100x1xi32>
    %c0_i32_2 = arith.constant 0 : i32
    %9 = arith.cmpi slt, %2, %c0_i32_2 : i32
    %10 = vector.broadcast %9 : i1 to vector<100x1xi1>
    %11 = vector.broadcast %10 : vector<100x1xi1> to vector<100x1xi1>
    %12 = arith.xori %8, %11 : vector<100x1xi1>
    %13 = arith.andi %12, %6 : vector<100x1xi1>
    %14 = vector.broadcast %2 : i32 to vector<100x1xi32>
    %15 = arith.addi %4, %14 : vector<100x1xi32>
    %16 = arith.select %13, %15, %4 : vector<100x1xi1>, vector<100x1xi32>
    %c0_i32_3 = arith.constant 0 : i32
    %17 = vector.broadcast %c0_i32_3 : i32 to vector<100x1xi32>
    %18 = arith.cmpi ne, %16, %17 : vector<100x1xi32>
    %c9_i32 = arith.constant 9 : i32
    %19 = vector.broadcast %c9_i32 : i32 to vector<100x1xi32>
    %20 = arith.cmpi ne, %16, %19 : vector<100x1xi32>
    %cst = arith.constant 0.000000e+00 : f32
    %21 = vector.broadcast %cst : f32 to vector<128x32xf32>
    %c0 = arith.constant 0 : index
    %c0_4 = arith.constant 0 : index
    %22 = vector.load %arg13[%c0, %c0_4] : memref<128x32xf32, #tpu.memory_space<vmem>>, vector<128x32xf32>
    tpu.vector_store %arg13[%c0, %c0_4], %21 {strides = array<i32>} : memref<128x32xf32, #tpu.memory_space<vmem>>, vector<128x32xf32>,
    %c0_5 = arith.constant 0 : index
    %c0_6 = arith.constant 0 : index
    %c0_7 = arith.constant 0 : index
    %23 = vector.load %arg1[%c0_5, %c0_6, %c0_7] : memref<1x100x32xf32, #tpu.memory_space<vmem>>, vector<1x100x32xf32>
    %24 = vector.shape_cast %23 : vector<1x100x32xf32> to vector<100x32xf32>
    %c16 = arith.constant 16 : index
    %c0_8 = arith.constant 0 : index
    %25 = vector.load %arg13[%c16, %c0_8] : memref<128x32xf32, #tpu.memory_space<vmem>>, vector<100x32xf32>
    tpu.vector_store %arg13[%c16, %c0_8], %24 {strides = array<i32>} : memref<128x32xf32, #tpu.memory_space<vmem>>, vector<100x32xf32>,
    %cst_9 = arith.constant 0.000000e+00 : f32
    %26 = vector.broadcast %cst_9 : f32 to vector<100x32xf32>
    %c5 = arith.constant 5 : index
    %c0_10 = arith.constant 0 : index
    %27 = vector.load %arg13[%c5, %c0_10] : memref<128x32xf32, #tpu.memory_space<vmem>>, vector<100x32xf32>
    %cst_11 = arith.constant 0.000000e+00 : f32
    %28 = vector.shape_cast %18 : vector<100x1xi1> to vector<100x1xi1>
    %29 = vector.broadcast %28 : vector<100x1xi1> to vector<100x32xi1>
    %30 = vector.broadcast %cst_11 : f32 to vector<100x32xf32>
    %31 = arith.select %29, %27, %30 : vector<100x32xi1>, vector<100x32xf32>
    %32 = arith.truncf %31 : vector<100x32xf32> to vector<100x32xbf16>
    %c0_12 = arith.constant 0 : index
    %c0_13 = arith.constant 0 : index
    %c0_14 = arith.constant 0 : index
    %33 = vector.load %arg2[%c0_12, %c0_13, %c0_14] : memref<9x32x32xf32, #tpu.memory_space<vmem>>, vector<1x32x32xf32>
    %34 = vector.shape_cast %33 : vector<1x32x32xf32> to vector<32x32xf32>
    %35 = arith.truncf %34 : vector<32x32xf32> to vector<32x32xbf16>
    %cst_15 = arith.constant dense<0.000000e+00> : vector<100x32xf32>
    %36 = tpu.matmul %32, %35, %cst_15 {dimension_numbers = #tpu.dot_dimension_numbers<[1], [0], [0], [1], [0, 0, 1, 1], [], []>} : vector<100x32xbf16>, vector<32x32xbf16>, vector<100x32xf32> -> vector<100x32xf32>
    %37 = arith.addf %26, %36 : vector<100x32xf32>
    %c6 = arith.constant 6 : index
    %c0_16 = arith.constant 0 : index
    %38 = vector.load %arg13[%c6, %c0_16] : memref<128x32xf32, #tpu.memory_space<vmem>>, vector<100x32xf32>
    %39 = arith.truncf %38 : vector<100x32xf32> to vector<100x32xbf16>
    %c1 = arith.constant 1 : index
    %c0_17 = arith.constant 0 : index
    %c0_18 = arith.constant 0 : index
    %40 = vector.load %arg2[%c1, %c0_17, %c0_18] : memref<9x32x32xf32, #tpu.memory_space<vmem>>, vector<1x32x32xf32>
    %41 = vector.shape_cast %40 : vector<1x32x32xf32> to vector<32x32xf32>
    %42 = arith.truncf %41 : vector<32x32xf32> to vector<32x32xbf16>
    %cst_19 = arith.constant dense<0.000000e+00> : vector<100x32xf32>
    %43 = tpu.matmul %39, %42, %cst_19 {dimension_numbers = #tpu.dot_dimension_numbers<[1], [0], [0], [1], [0, 0, 1, 1], [], []>} : vector<100x32xbf16>, vector<32x32xbf16>, vector<100x32xf32> -> vector<100x32xf32>
    %44 = arith.addf %37, %43 : vector<100x32xf32>
    %c7 = arith.constant 7 : index
    %c0_20 = arith.constant 0 : index
    %45 = vector.load %arg13[%c7, %c0_20] : memref<128x32xf32, #tpu.memory_space<vmem>>, vector<100x32xf32>
    %cst_21 = arith.constant 0.000000e+00 : f32
    %46 = vector.shape_cast %20 : vector<100x1xi1> to vector<100x1xi1>
    %47 = vector.broadcast %46 : vector<100x1xi1> to vector<100x32xi1>
    %48 = vector.broadcast %cst_21 : f32 to vector<100x32xf32>
    %49 = arith.select %47, %45, %48 : vector<100x32xi1>, vector<100x32xf32>
    %50 = arith.truncf %49 : vector<100x32xf32> to vector<100x32xbf16>
    %c2 = arith.constant 2 : index
    %c0_22 = arith.constant 0 : index
    %c0_23 = arith.constant 0 : index
    %51 = vector.load %arg2[%c2, %c0_22, %c0_23] : memref<9x32x32xf32, #tpu.memory_space<vmem>>, vector<1x32x32xf32>
    %52 = vector.shape_cast %51 : vector<1x32x32xf32> to vector<32x32xf32>
    %53 = arith.truncf %52 : vector<32x32xf32> to vector<32x32xbf16>
    %cst_24 = arith.constant dense<0.000000e+00> : vector<100x32xf32>
    %54 = tpu.matmul %50, %53, %cst_24 {dimension_numbers = #tpu.dot_dimension_numbers<[1], [0], [0], [1], [0, 0, 1, 1], [], []>} : vector<100x32xbf16>, vector<32x32xbf16>, vector<100x32xf32> -> vector<100x32xf32>
    %55 = arith.addf %44, %54 : vector<100x32xf32>
    %c15 = arith.constant 15 : index
    %c0_25 = arith.constant 0 : index
    %56 = vector.load %arg13[%c15, %c0_25] : memref<128x32xf32, #tpu.memory_space<vmem>>, vector<100x32xf32>
    %cst_26 = arith.constant 0.000000e+00 : f32
    %57 = vector.shape_cast %18 : vector<100x1xi1> to vector<100x1xi1>
    %58 = vector.broadcast %57 : vector<100x1xi1> to vector<100x32xi1>
    %59 = vector.broadcast %cst_26 : f32 to vector<100x32xf32>
    %60 = arith.select %58, %56, %59 : vector<100x32xi1>, vector<100x32xf32>
    %61 = arith.truncf %60 : vector<100x32xf32> to vector<100x32xbf16>
    %c3 = arith.constant 3 : index
    %c0_27 = arith.constant 0 : index
    %c0_28 = arith.constant 0 : index
    %62 = vector.load %arg2[%c3, %c0_27, %c0_28] : memref<9x32x32xf32, #tpu.memory_space<vmem>>, vector<1x32x32xf32>
    %63 = vector.shape_cast %62 : vector<1x32x32xf32> to vector<32x32xf32>
    %64 = arith.truncf %63 : vector<32x32xf32> to vector<32x32xbf16>
    %cst_29 = arith.constant dense<0.000000e+00> : vector<100x32xf32>
    %65 = tpu.matmul %61, %64, %cst_29 {dimension_numbers = #tpu.dot_dimension_numbers<[1], [0], [0], [1], [0, 0, 1, 1], [], []>} : vector<100x32xbf16>, vector<32x32xbf16>, vector<100x32xf32> -> vector<100x32xf32>
    %66 = arith.addf %55, %65 : vector<100x32xf32>
    %c16_30 = arith.constant 16 : index
    %c0_31 = arith.constant 0 : index
    %67 = vector.load %arg13[%c16_30, %c0_31] : memref<128x32xf32, #tpu.memory_space<vmem>>, vector<100x32xf32>
    %68 = arith.truncf %67 : vector<100x32xf32> to vector<100x32xbf16>
    %c4 = arith.constant 4 : index
    %c0_32 = arith.constant 0 : index
    %c0_33 = arith.constant 0 : index
    %69 = vector.load %arg2[%c4, %c0_32, %c0_33] : memref<9x32x32xf32, #tpu.memory_space<vmem>>, vector<1x32x32xf32>
    %70 = vector.shape_cast %69 : vector<1x32x32xf32> to vector<32x32xf32>
    %71 = arith.truncf %70 : vector<32x32xf32> to vector<32x32xbf16>
    %cst_34 = arith.constant dense<0.000000e+00> : vector<100x32xf32>
    %72 = tpu.matmul %68, %71, %cst_34 {dimension_numbers = #tpu.dot_dimension_numbers<[1], [0], [0], [1], [0, 0, 1, 1], [], []>} : vector<100x32xbf16>, vector<32x32xbf16>, vector<100x32xf32> -> vector<100x32xf32>
    %73 = arith.addf %66, %72 : vector<100x32xf32>
    %c17 = arith.constant 17 : index
    %c0_35 = arith.constant 0 : index
    %74 = vector.load %arg13[%c17, %c0_35] : memref<128x32xf32, #tpu.memory_space<vmem>>, vector<100x32xf32>
    %cst_36 = arith.constant 0.000000e+00 : f32
    %75 = vector.shape_cast %20 : vector<100x1xi1> to vector<100x1xi1>
    %76 = vector.broadcast %75 : vector<100x1xi1> to vector<100x32xi1>
    %77 = vector.broadcast %cst_36 : f32 to vector<100x32xf32>
    %78 = arith.select %76, %74, %77 : vector<100x32xi1>, vector<100x32xf32>
    %79 = arith.truncf %78 : vector<100x32xf32> to vector<100x32xbf16>
    %c5_37 = arith.constant 5 : index
    %c0_38 = arith.constant 0 : index
    %c0_39 = arith.constant 0 : index
    %80 = vector.load %arg2[%c5_37, %c0_38, %c0_39] : memref<9x32x32xf32, #tpu.memory_space<vmem>>, vector<1x32x32xf32>
    %81 = vector.shape_cast %80 : vector<1x32x32xf32> to vector<32x32xf32>
    %82 = arith.truncf %81 : vector<32x32xf32> to vector<32x32xbf16>
    %cst_40 = arith.constant dense<0.000000e+00> : vector<100x32xf32>
    %83 = tpu.matmul %79, %82, %cst_40 {dimension_numbers = #tpu.dot_dimension_numbers<[1], [0], [0], [1], [0, 0, 1, 1], [], []>} : vector<100x32xbf16>, vector<32x32xbf16>, vector<100x32xf32> -> vector<100x32xf32>
    %84 = arith.addf %73, %83 : vector<100x32xf32>
    %c25 = arith.constant 25 : index
    %c0_41 = arith.constant 0 : index
    %85 = vector.load %arg13[%c25, %c0_41] : memref<128x32xf32, #tpu.memory_space<vmem>>, vector<100x32xf32>
    %cst_42 = arith.constant 0.000000e+00 : f32
    %86 = vector.shape_cast %18 : vector<100x1xi1> to vector<100x1xi1>
    %87 = vector.broadcast %86 : vector<100x1xi1> to vector<100x32xi1>
    %88 = vector.broadcast %cst_42 : f32 to vector<100x32xf32>
    %89 = arith.select %87, %85, %88 : vector<100x32xi1>, vector<100x32xf32>
    %90 = arith.truncf %89 : vector<100x32xf32> to vector<100x32xbf16>
    %c6_43 = arith.constant 6 : index
    %c0_44 = arith.constant 0 : index
    %c0_45 = arith.constant 0 : index
    %91 = vector.load %arg2[%c6_43, %c0_44, %c0_45] : memref<9x32x32xf32, #tpu.memory_space<vmem>>, vector<1x32x32xf32>
    %92 = vector.shape_cast %91 : vector<1x32x32xf32> to vector<32x32xf32>
    %93 = arith.truncf %92 : vector<32x32xf32> to vector<32x32xbf16>
    %cst_46 = arith.constant dense<0.000000e+00> : vector<100x32xf32>
    %94 = tpu.matmul %90, %93, %cst_46 {dimension_numbers = #tpu.dot_dimension_numbers<[1], [0], [0], [1], [0, 0, 1, 1], [], []>} : vector<100x32xbf16>, vector<32x32xbf16>, vector<100x32xf32> -> vector<100x32xf32>
    %95 = arith.addf %84, %94 : vector<100x32xf32>
    %c26 = arith.constant 26 : index
    %c0_47 = arith.constant 0 : index
    %96 = vector.load %arg13[%c26, %c0_47] : memref<128x32xf32, #tpu.memory_space<vmem>>, vector<100x32xf32>
    %97 = arith.truncf %96 : vector<100x32xf32> to vector<100x32xbf16>
    %c7_48 = arith.constant 7 : index
    %c0_49 = arith.constant 0 : index
    %c0_50 = arith.constant 0 : index
    %98 = vector.load %arg2[%c7_48, %c0_49, %c0_50] : memref<9x32x32xf32, #tpu.memory_space<vmem>>, vector<1x32x32xf32>
    %99 = vector.shape_cast %98 : vector<1x32x32xf32> to vector<32x32xf32>
    %100 = arith.truncf %99 : vector<32x32xf32> to vector<32x32xbf16>
    %cst_51 = arith.constant dense<0.000000e+00> : vector<100x32xf32>
    %101 = tpu.matmul %97, %100, %cst_51 {dimension_numbers = #tpu.dot_dimension_numbers<[1], [0], [0], [1], [0, 0, 1, 1], [], []>} : vector<100x32xbf16>, vector<32x32xbf16>, vector<100x32xf32> -> vector<100x32xf32>
    %102 = arith.addf %95, %101 : vector<100x32xf32>
    %c27 = arith.constant 27 : index
    %c0_52 = arith.constant 0 : index
    %103 = vector.load %arg13[%c27, %c0_52] : memref<128x32xf32, #tpu.memory_space<vmem>>, vector<100x32xf32>
    %cst_53 = arith.constant 0.000000e+00 : f32
    %104 = vector.shape_cast %20 : vector<100x1xi1> to vector<100x1xi1>
    %105 = vector.broadcast %104 : vector<100x1xi1> to vector<100x32xi1>
    %106 = vector.broadcast %cst_53 : f32 to vector<100x32xf32>
    %107 = arith.select %105, %103, %106 : vector<100x32xi1>, vector<100x32xf32>
    %108 = arith.truncf %107 : vector<100x32xf32> to vector<100x32xbf16>
    %c8 = arith.constant 8 : index
    %c0_54 = arith.constant 0 : index
    %c0_55 = arith.constant 0 : index
    %109 = vector.load %arg2[%c8, %c0_54, %c0_55] : memref<9x32x32xf32, #tpu.memory_space<vmem>>, vector<1x32x32xf32>
    %110 = vector.shape_cast %109 : vector<1x32x32xf32> to vector<32x32xf32>
    %111 = arith.truncf %110 : vector<32x32xf32> to vector<32x32xbf16>
    %cst_56 = arith.constant dense<0.000000e+00> : vector<100x32xf32>
    %112 = tpu.matmul %108, %111, %cst_56 {dimension_numbers = #tpu.dot_dimension_numbers<[1], [0], [0], [1], [0, 0, 1, 1], [], []>} : vector<100x32xbf16>, vector<32x32xbf16>, vector<100x32xf32> -> vector<100x32xf32>
    %113 = arith.addf %102, %112 : vector<100x32xf32>
    %c0_57 = arith.constant 0 : index
    %c0_58 = arith.constant 0 : index
    %114 = vector.load %arg3[%c0_57, %c0_58] : memref<1x32xf32, #tpu.memory_space<vmem>>, vector<1x32xf32>
    %115 = vector.broadcast %114 : vector<1x32xf32> to vector<100x32xf32>
    %116 = arith.addf %113, %115 : vector<100x32xf32>
    %117 = vector.shape_cast %116 : vector<100x32xf32> to vector<1x100x32xf32>
    %cst_59 = arith.constant dense<0.000000e+00> : vector<1xf32>
    %118 = vector.multi_reduction <add>, %117, %cst_59 [1, 2] : vector<1x100x32xf32> to vector<1xf32>
    %119 = vector.shape_cast %118 : vector<1xf32> to vector<1x1x1xf32>
    %120 = vector.extract %119[0, 0, 0] : f32 from vector<1x1x1xf32>
    %121 = vector.broadcast %120 : f32 to vector<1x1xf32>
    %cst_60 = arith.constant 3.200000e+03 : f32
    %122 = vector.broadcast %cst_60 : f32 to vector<1x1xf32>
    %123 = arith.divf %121, %122 : vector<1x1xf32>
    %124 = vector.broadcast %123 : vector<1x1xf32> to vector<100x32xf32>
    %125 = arith.subf %116, %124 : vector<100x32xf32>
    %126 = arith.mulf %125, %125 : vector<100x32xf32>
    %127 = vector.shape_cast %126 : vector<100x32xf32> to vector<1x100x32xf32>
    %cst_61 = arith.constant dense<0.000000e+00> : vector<1xf32>
    %128 = vector.multi_reduction <add>, %127, %cst_61 [1, 2] : vector<1x100x32xf32> to vector<1xf32>
    %129 = vector.shape_cast %128 : vector<1xf32> to vector<1x1x1xf32>
    %130 = vector.extract %129[0, 0, 0] : f32 from vector<1x1x1xf32>
    %131 = vector.broadcast %130 : f32 to vector<1x1xf32>
    %cst_62 = arith.constant 3.200000e+03 : f32
    %132 = vector.broadcast %cst_62 : f32 to vector<1x1xf32>
    %133 = arith.divf %131, %132 : vector<1x1xf32>
    %134 = vector.broadcast %123 : vector<1x1xf32> to vector<100x32xf32>
    %135 = arith.subf %116, %134 : vector<100x32xf32>
    %cst_63 = arith.constant 9.99999974E-6 : f32
    %136 = vector.broadcast %cst_63 : f32 to vector<1x1xf32>
    %137 = arith.addf %133, %136 : vector<1x1xf32>
    %138 = math.rsqrt %137 : vector<1x1xf32>
    %139 = vector.broadcast %138 : vector<1x1xf32> to vector<100x32xf32>
    %140 = arith.mulf %135, %139 : vector<100x32xf32>
    %c0_64 = arith.constant 0 : index
    %c0_65 = arith.constant 0 : index
    %141 = vector.load %arg4[%c0_64, %c0_65] : memref<1x32xf32, #tpu.memory_space<vmem>>, vector<1x32xf32>
    %142 = vector.broadcast %141 : vector<1x32xf32> to vector<100x32xf32>
    %143 = arith.mulf %140, %142 : vector<100x32xf32>
    %c0_66 = arith.constant 0 : index
    %c0_67 = arith.constant 0 : index
    %144 = vector.load %arg5[%c0_66, %c0_67] : memref<1x32xf32, #tpu.memory_space<vmem>>, vector<1x32xf32>
    %145 = vector.broadcast %144 : vector<1x32xf32> to vector<100x32xf32>
    %146 = arith.addf %143, %145 : vector<100x32xf32>
    %cst_68 = arith.constant 0.000000e+00 : f32
    %147 = vector.broadcast %cst_68 : f32 to vector<100x32xf32>
    %148 = arith.maximumf %146, %147 : vector<100x32xf32>
    %c16_69 = arith.constant 16 : index
    %c0_70 = arith.constant 0 : index
    %149 = vector.load %arg13[%c16_69, %c0_70] : memref<128x32xf32, #tpu.memory_space<vmem>>, vector<100x32xf32>
    tpu.vector_store %arg13[%c16_69, %c0_70], %148 {strides = array<i32>} : memref<128x32xf32, #tpu.memory_space<vmem>>, vector<100x32xf32>,
    %cst_71 = arith.constant 0.000000e+00 : f32
    %150 = vector.broadcast %cst_71 : f32 to vector<100x32xf32>
    %c5_72 = arith.constant 5 : index
    %c0_73 = arith.constant 0 : index
    %151 = vector.load %arg13[%c5_72, %c0_73] : memref<128x32xf32, #tpu.memory_space<vmem>>, vector<100x32xf32>
    %cst_74 = arith.constant 0.000000e+00 : f32
    %152 = vector.shape_cast %18 : vector<100x1xi1> to vector<100x1xi1>
    %153 = vector.broadcast %152 : vector<100x1xi1> to vector<100x32xi1>
    %154 = vector.broadcast %cst_74 : f32 to vector<100x32xf32>
    %155 = arith.select %153, %151, %154 : vector<100x32xi1>, vector<100x32xf32>
    %156 = arith.truncf %155 : vector<100x32xf32> to vector<100x32xbf16>
    %c0_75 = arith.constant 0 : index
    %c0_76 = arith.constant 0 : index
    %c0_77 = arith.constant 0 : index
    %157 = vector.load %arg6[%c0_75, %c0_76, %c0_77] : memref<9x32x32xf32, #tpu.memory_space<vmem>>, vector<1x32x32xf32>
    %158 = vector.shape_cast %157 : vector<1x32x32xf32> to vector<32x32xf32>
    %159 = arith.truncf %158 : vector<32x32xf32> to vector<32x32xbf16>
    %cst_78 = arith.constant dense<0.000000e+00> : vector<100x32xf32>
    %160 = tpu.matmul %156, %159, %cst_78 {dimension_numbers = #tpu.dot_dimension_numbers<[1], [0], [0], [1], [0, 0, 1, 1], [], []>} : vector<100x32xbf16>, vector<32x32xbf16>, vector<100x32xf32> -> vector<100x32xf32>
    %161 = arith.addf %150, %160 : vector<100x32xf32>
    %c6_79 = arith.constant 6 : index
    %c0_80 = arith.constant 0 : index
    %162 = vector.load %arg13[%c6_79, %c0_80] : memref<128x32xf32, #tpu.memory_space<vmem>>, vector<100x32xf32>
    %163 = arith.truncf %162 : vector<100x32xf32> to vector<100x32xbf16>
    %c1_81 = arith.constant 1 : index
    %c0_82 = arith.constant 0 : index
    %c0_83 = arith.constant 0 : index
    %164 = vector.load %arg6[%c1_81, %c0_82, %c0_83] : memref<9x32x32xf32, #tpu.memory_space<vmem>>, vector<1x32x32xf32>
    %165 = vector.shape_cast %164 : vector<1x32x32xf32> to vector<32x32xf32>
    %166 = arith.truncf %165 : vector<32x32xf32> to vector<32x32xbf16>
    %cst_84 = arith.constant dense<0.000000e+00> : vector<100x32xf32>
    %167 = tpu.matmul %163, %166, %cst_84 {dimension_numbers = #tpu.dot_dimension_numbers<[1], [0], [0], [1], [0, 0, 1, 1], [], []>} : vector<100x32xbf16>, vector<32x32xbf16>, vector<100x32xf32> -> vector<100x32xf32>
    %168 = arith.addf %161, %167 : vector<100x32xf32>
    %c7_85 = arith.constant 7 : index
    %c0_86 = arith.constant 0 : index
    %169 = vector.load %arg13[%c7_85, %c0_86] : memref<128x32xf32, #tpu.memory_space<vmem>>, vector<100x32xf32>
    %cst_87 = arith.constant 0.000000e+00 : f32
    %170 = vector.shape_cast %20 : vector<100x1xi1> to vector<100x1xi1>
    %171 = vector.broadcast %170 : vector<100x1xi1> to vector<100x32xi1>
    %172 = vector.broadcast %cst_87 : f32 to vector<100x32xf32>
    %173 = arith.select %171, %169, %172 : vector<100x32xi1>, vector<100x32xf32>
    %174 = arith.truncf %173 : vector<100x32xf32> to vector<100x32xbf16>
    %c2_88 = arith.constant 2 : index
    %c0_89 = arith.constant 0 : index
    %c0_90 = arith.constant 0 : index
    %175 = vector.load %arg6[%c2_88, %c0_89, %c0_90] : memref<9x32x32xf32, #tpu.memory_space<vmem>>, vector<1x32x32xf32>
    %176 = vector.shape_cast %175 : vector<1x32x32xf32> to vector<32x32xf32>
    %177 = arith.truncf %176 : vector<32x32xf32> to vector<32x32xbf16>
    %cst_91 = arith.constant dense<0.000000e+00> : vector<100x32xf32>
    %178 = tpu.matmul %174, %177, %cst_91 {dimension_numbers = #tpu.dot_dimension_numbers<[1], [0], [0], [1], [0, 0, 1, 1], [], []>} : vector<100x32xbf16>, vector<32x32xbf16>, vector<100x32xf32> -> vector<100x32xf32>
    %179 = arith.addf %168, %178 : vector<100x32xf32>
    %c15_92 = arith.constant 15 : index
    %c0_93 = arith.constant 0 : index
    %180 = vector.load %arg13[%c15_92, %c0_93] : memref<128x32xf32, #tpu.memory_space<vmem>>, vector<100x32xf32>
    %cst_94 = arith.constant 0.000000e+00 : f32
    %181 = vector.shape_cast %18 : vector<100x1xi1> to vector<100x1xi1>
    %182 = vector.broadcast %181 : vector<100x1xi1> to vector<100x32xi1>
    %183 = vector.broadcast %cst_94 : f32 to vector<100x32xf32>
    %184 = arith.select %182, %180, %183 : vector<100x32xi1>, vector<100x32xf32>
    %185 = arith.truncf %184 : vector<100x32xf32> to vector<100x32xbf16>
    %c3_95 = arith.constant 3 : index
    %c0_96 = arith.constant 0 : index
    %c0_97 = arith.constant 0 : index
    %186 = vector.load %arg6[%c3_95, %c0_96, %c0_97] : memref<9x32x32xf32, #tpu.memory_space<vmem>>, vector<1x32x32xf32>
    %187 = vector.shape_cast %186 : vector<1x32x32xf32> to vector<32x32xf32>
    %188 = arith.truncf %187 : vector<32x32xf32> to vector<32x32xbf16>
    %cst_98 = arith.constant dense<0.000000e+00> : vector<100x32xf32>
    %189 = tpu.matmul %185, %188, %cst_98 {dimension_numbers = #tpu.dot_dimension_numbers<[1], [0], [0], [1], [0, 0, 1, 1], [], []>} : vector<100x32xbf16>, vector<32x32xbf16>, vector<100x32xf32> -> vector<100x32xf32>
    %190 = arith.addf %179, %189 : vector<100x32xf32>
    %c16_99 = arith.constant 16 : index
    %c0_100 = arith.constant 0 : index
    %191 = vector.load %arg13[%c16_99, %c0_100] : memref<128x32xf32, #tpu.memory_space<vmem>>, vector<100x32xf32>
    %192 = arith.truncf %191 : vector<100x32xf32> to vector<100x32xbf16>
    %c4_101 = arith.constant 4 : index
    %c0_102 = arith.constant 0 : index
    %c0_103 = arith.constant 0 : index
    %193 = vector.load %arg6[%c4_101, %c0_102, %c0_103] : memref<9x32x32xf32, #tpu.memory_space<vmem>>, vector<1x32x32xf32>
    %194 = vector.shape_cast %193 : vector<1x32x32xf32> to vector<32x32xf32>
    %195 = arith.truncf %194 : vector<32x32xf32> to vector<32x32xbf16>
    %cst_104 = arith.constant dense<0.000000e+00> : vector<100x32xf32>
    %196 = tpu.matmul %192, %195, %cst_104 {dimension_numbers = #tpu.dot_dimension_numbers<[1], [0], [0], [1], [0, 0, 1, 1], [], []>} : vector<100x32xbf16>, vector<32x32xbf16>, vector<100x32xf32> -> vector<100x32xf32>
    %197 = arith.addf %190, %196 : vector<100x32xf32>
    %c17_105 = arith.constant 17 : index
    %c0_106 = arith.constant 0 : index
    %198 = vector.load %arg13[%c17_105, %c0_106] : memref<128x32xf32, #tpu.memory_space<vmem>>, vector<100x32xf32>
    %cst_107 = arith.constant 0.000000e+00 : f32
    %199 = vector.shape_cast %20 : vector<100x1xi1> to vector<100x1xi1>
    %200 = vector.broadcast %199 : vector<100x1xi1> to vector<100x32xi1>
    %201 = vector.broadcast %cst_107 : f32 to vector<100x32xf32>
    %202 = arith.select %200, %198, %201 : vector<100x32xi1>, vector<100x32xf32>
    %203 = arith.truncf %202 : vector<100x32xf32> to vector<100x32xbf16>
    %c5_108 = arith.constant 5 : index
    %c0_109 = arith.constant 0 : index
    %c0_110 = arith.constant 0 : index
    %204 = vector.load %arg6[%c5_108, %c0_109, %c0_110] : memref<9x32x32xf32, #tpu.memory_space<vmem>>, vector<1x32x32xf32>
    %205 = vector.shape_cast %204 : vector<1x32x32xf32> to vector<32x32xf32>
    %206 = arith.truncf %205 : vector<32x32xf32> to vector<32x32xbf16>
    %cst_111 = arith.constant dense<0.000000e+00> : vector<100x32xf32>
    %207 = tpu.matmul %203, %206, %cst_111 {dimension_numbers = #tpu.dot_dimension_numbers<[1], [0], [0], [1], [0, 0, 1, 1], [], []>} : vector<100x32xbf16>, vector<32x32xbf16>, vector<100x32xf32> -> vector<100x32xf32>
    %208 = arith.addf %197, %207 : vector<100x32xf32>
    %c25_112 = arith.constant 25 : index
    %c0_113 = arith.constant 0 : index
    %209 = vector.load %arg13[%c25_112, %c0_113] : memref<128x32xf32, #tpu.memory_space<vmem>>, vector<100x32xf32>
    %cst_114 = arith.constant 0.000000e+00 : f32
    %210 = vector.shape_cast %18 : vector<100x1xi1> to vector<100x1xi1>
    %211 = vector.broadcast %210 : vector<100x1xi1> to vector<100x32xi1>
    %212 = vector.broadcast %cst_114 : f32 to vector<100x32xf32>
    %213 = arith.select %211, %209, %212 : vector<100x32xi1>, vector<100x32xf32>
    %214 = arith.truncf %213 : vector<100x32xf32> to vector<100x32xbf16>
    %c6_115 = arith.constant 6 : index
    %c0_116 = arith.constant 0 : index
    %c0_117 = arith.constant 0 : index
    %215 = vector.load %arg6[%c6_115, %c0_116, %c0_117] : memref<9x32x32xf32, #tpu.memory_space<vmem>>, vector<1x32x32xf32>
    %216 = vector.shape_cast %215 : vector<1x32x32xf32> to vector<32x32xf32>
    %217 = arith.truncf %216 : vector<32x32xf32> to vector<32x32xbf16>
    %cst_118 = arith.constant dense<0.000000e+00> : vector<100x32xf32>
    %218 = tpu.matmul %214, %217, %cst_118 {dimension_numbers = #tpu.dot_dimension_numbers<[1], [0], [0], [1], [0, 0, 1, 1], [], []>} : vector<100x32xbf16>, vector<32x32xbf16>, vector<100x32xf32> -> vector<100x32xf32>
    %219 = arith.addf %208, %218 : vector<100x32xf32>
    %c26_119 = arith.constant 26 : index
    %c0_120 = arith.constant 0 : index
    %220 = vector.load %arg13[%c26_119, %c0_120] : memref<128x32xf32, #tpu.memory_space<vmem>>, vector<100x32xf32>
    %221 = arith.truncf %220 : vector<100x32xf32> to vector<100x32xbf16>
    %c7_121 = arith.constant 7 : index
    %c0_122 = arith.constant 0 : index
    %c0_123 = arith.constant 0 : index
    %222 = vector.load %arg6[%c7_121, %c0_122, %c0_123] : memref<9x32x32xf32, #tpu.memory_space<vmem>>, vector<1x32x32xf32>
    %223 = vector.shape_cast %222 : vector<1x32x32xf32> to vector<32x32xf32>
    %224 = arith.truncf %223 : vector<32x32xf32> to vector<32x32xbf16>
    %cst_124 = arith.constant dense<0.000000e+00> : vector<100x32xf32>
    %225 = tpu.matmul %221, %224, %cst_124 {dimension_numbers = #tpu.dot_dimension_numbers<[1], [0], [0], [1], [0, 0, 1, 1], [], []>} : vector<100x32xbf16>, vector<32x32xbf16>, vector<100x32xf32> -> vector<100x32xf32>
    %226 = arith.addf %219, %225 : vector<100x32xf32>
    %c27_125 = arith.constant 27 : index
    %c0_126 = arith.constant 0 : index
    %227 = vector.load %arg13[%c27_125, %c0_126] : memref<128x32xf32, #tpu.memory_space<vmem>>, vector<100x32xf32>
    %cst_127 = arith.constant 0.000000e+00 : f32
    %228 = vector.shape_cast %20 : vector<100x1xi1> to vector<100x1xi1>
    %229 = vector.broadcast %228 : vector<100x1xi1> to vector<100x32xi1>
    %230 = vector.broadcast %cst_127 : f32 to vector<100x32xf32>
    %231 = arith.select %229, %227, %230 : vector<100x32xi1>, vector<100x32xf32>
    %232 = arith.truncf %231 : vector<100x32xf32> to vector<100x32xbf16>
    %c8_128 = arith.constant 8 : index
    %c0_129 = arith.constant 0 : index
    %c0_130 = arith.constant 0 : index
    %233 = vector.load %arg6[%c8_128, %c0_129, %c0_130] : memref<9x32x32xf32, #tpu.memory_space<vmem>>, vector<1x32x32xf32>
    %234 = vector.shape_cast %233 : vector<1x32x32xf32> to vector<32x32xf32>
    %235 = arith.truncf %234 : vector<32x32xf32> to vector<32x32xbf16>
    %cst_131 = arith.constant dense<0.000000e+00> : vector<100x32xf32>
    %236 = tpu.matmul %232, %235, %cst_131 {dimension_numbers = #tpu.dot_dimension_numbers<[1], [0], [0], [1], [0, 0, 1, 1], [], []>} : vector<100x32xbf16>, vector<32x32xbf16>, vector<100x32xf32> -> vector<100x32xf32>
    %237 = arith.addf %226, %236 : vector<100x32xf32>
    %c0_132 = arith.constant 0 : index
    %c0_133 = arith.constant 0 : index
    %238 = vector.load %arg7[%c0_132, %c0_133] : memref<1x32xf32, #tpu.memory_space<vmem>>, vector<1x32xf32>
    %239 = vector.broadcast %238 : vector<1x32xf32> to vector<100x32xf32>
    %240 = arith.addf %237, %239 : vector<100x32xf32>
    %241 = vector.shape_cast %240 : vector<100x32xf32> to vector<1x100x32xf32>
    %cst_134 = arith.constant dense<0.000000e+00> : vector<1xf32>
    %242 = vector.multi_reduction <add>, %241, %cst_134 [1, 2] : vector<1x100x32xf32> to vector<1xf32>
    %243 = vector.shape_cast %242 : vector<1xf32> to vector<1x1x1xf32>
    %244 = vector.extract %243[0, 0, 0] : f32 from vector<1x1x1xf32>
    %245 = vector.broadcast %244 : f32 to vector<1x1xf32>
    %cst_135 = arith.constant 3.200000e+03 : f32
    %246 = vector.broadcast %cst_135 : f32 to vector<1x1xf32>
    %247 = arith.divf %245, %246 : vector<1x1xf32>
    %248 = vector.broadcast %247 : vector<1x1xf32> to vector<100x32xf32>
    %249 = arith.subf %240, %248 : vector<100x32xf32>
    %250 = arith.mulf %249, %249 : vector<100x32xf32>
    %251 = vector.shape_cast %250 : vector<100x32xf32> to vector<1x100x32xf32>
    %cst_136 = arith.constant dense<0.000000e+00> : vector<1xf32>
    %252 = vector.multi_reduction <add>, %251, %cst_136 [1, 2] : vector<1x100x32xf32> to vector<1xf32>
    %253 = vector.shape_cast %252 : vector<1xf32> to vector<1x1x1xf32>
    %254 = vector.extract %253[0, 0, 0] : f32 from vector<1x1x1xf32>
    %255 = vector.broadcast %254 : f32 to vector<1x1xf32>
    %cst_137 = arith.constant 3.200000e+03 : f32
    %256 = vector.broadcast %cst_137 : f32 to vector<1x1xf32>
    %257 = arith.divf %255, %256 : vector<1x1xf32>
    %258 = vector.broadcast %247 : vector<1x1xf32> to vector<100x32xf32>
    %259 = arith.subf %240, %258 : vector<100x32xf32>
    %cst_138 = arith.constant 9.99999974E-6 : f32
    %260 = vector.broadcast %cst_138 : f32 to vector<1x1xf32>
    %261 = arith.addf %257, %260 : vector<1x1xf32>
    %262 = math.rsqrt %261 : vector<1x1xf32>
    %263 = vector.broadcast %262 : vector<1x1xf32> to vector<100x32xf32>
    %264 = arith.mulf %259, %263 : vector<100x32xf32>
    %c0_139 = arith.constant 0 : index
    %c0_140 = arith.constant 0 : index
    %265 = vector.load %arg8[%c0_139, %c0_140] : memref<1x32xf32, #tpu.memory_space<vmem>>, vector<1x32xf32>
    %266 = vector.broadcast %265 : vector<1x32xf32> to vector<100x32xf32>
    %267 = arith.mulf %264, %266 : vector<100x32xf32>
    %c0_141 = arith.constant 0 : index
    %c0_142 = arith.constant 0 : index
    %268 = vector.load %arg9[%c0_141, %c0_142] : memref<1x32xf32, #tpu.memory_space<vmem>>, vector<1x32xf32>
    %269 = vector.broadcast %268 : vector<1x32xf32> to vector<100x32xf32>
    %270 = arith.addf %267, %269 : vector<100x32xf32>
    %cst_143 = arith.constant 0.000000e+00 : f32
    %271 = vector.broadcast %cst_143 : f32 to vector<100x32xf32>
    %272 = arith.maximumf %270, %271 : vector<100x32xf32>
    %273 = arith.truncf %272 : vector<100x32xf32> to vector<100x32xbf16>
    %c0_144 = arith.constant 0 : index
    %c0_145 = arith.constant 0 : index
    %274 = vector.load %arg10[%c0_144, %c0_145] : memref<32x32xf32, #tpu.memory_space<vmem>>, vector<32x32xf32>
    %275 = arith.truncf %274 : vector<32x32xf32> to vector<32x32xbf16>
    %cst_146 = arith.constant dense<0.000000e+00> : vector<100x32xf32>
    %276 = tpu.matmul %273, %275, %cst_146 {dimension_numbers = #tpu.dot_dimension_numbers<[1], [0], [0], [1], [0, 0, 1, 1], [], []>} : vector<100x32xbf16>, vector<32x32xbf16>, vector<100x32xf32> -> vector<100x32xf32>
    %c0_147 = arith.constant 0 : index
    %c0_148 = arith.constant 0 : index
    %277 = vector.load %arg11[%c0_147, %c0_148] : memref<1x32xf32, #tpu.memory_space<vmem>>, vector<1x32xf32>
    %278 = vector.broadcast %277 : vector<1x32xf32> to vector<100x32xf32>
    %279 = arith.addf %276, %278 : vector<100x32xf32>
    %c0_149 = arith.constant 0 : index
    %c0_150 = arith.constant 0 : index
    %c0_151 = arith.constant 0 : index
    %280 = vector.load %arg12[%c0_149, %c0_150, %c0_151] : memref<1x100x32xf32, #tpu.memory_space<vmem>>, vector<1x100x32xf32>
    %281 = vector.shape_cast %280 : vector<1x100x32xf32> to vector<100x32xf32>
    %282 = vector.shape_cast %279 : vector<100x32xf32> to vector<1x100x32xf32>
    tpu.vector_store %arg12[%c0_149, %c0_150, %c0_151], %282 {strides = array<i32>} : memref<1x100x32xf32, #tpu.memory_space<vmem>>, vector<1x100x32xf32>,
    return
  }
  func.func @transform_0(%arg0: i32) -> (i32, i32, i32) {
    %c0_i32 = arith.constant 0 : i32
    %c0_i32_0 = arith.constant 0 : i32
    %c0_i32_1 = arith.constant 0 : i32
    return %arg0, %c0_i32, %c0_i32_0 : i32, i32, i32
  }
  func.func @transform_1(%arg0: i32) -> (i32, i32, i32) {
    %c0_i32 = arith.constant 0 : i32
    %c0_i32_0 = arith.constant 0 : i32
    %c0_i32_1 = arith.constant 0 : i32
    %c0_i32_2 = arith.constant 0 : i32
    return %c0_i32, %c0_i32_0, %c0_i32_1 : i32, i32, i32
  }
  func.func @transform_2(%arg0: i32) -> (i32, i32) {
    %c0_i32 = arith.constant 0 : i32
    %c0_i32_0 = arith.constant 0 : i32
    %c0_i32_1 = arith.constant 0 : i32
    return %c0_i32, %c0_i32_0 : i32, i32
  }
  func.func @transform_3(%arg0: i32) -> (i32, i32) {
    %c0_i32 = arith.constant 0 : i32
    %c0_i32_0 = arith.constant 0 : i32
    %c0_i32_1 = arith.constant 0 : i32
    return %c0_i32, %c0_i32_0 : i32, i32
  }
  func.func @transform_4(%arg0: i32) -> (i32, i32) {
    %c0_i32 = arith.constant 0 : i32
    %c0_i32_0 = arith.constant 0 : i32
    %c0_i32_1 = arith.constant 0 : i32
    return %c0_i32, %c0_i32_0 : i32, i32
  }
  func.func @transform_5(%arg0: i32) -> (i32, i32, i32) {
    %c0_i32 = arith.constant 0 : i32
    %c0_i32_0 = arith.constant 0 : i32
    %c0_i32_1 = arith.constant 0 : i32
    %c0_i32_2 = arith.constant 0 : i32
    return %c0_i32, %c0_i32_0, %c0_i32_1 : i32, i32, i32
  }
  func.func @transform_6(%arg0: i32) -> (i32, i32) {
    %c0_i32 = arith.constant 0 : i32
    %c0_i32_0 = arith.constant 0 : i32
    %c0_i32_1 = arith.constant 0 : i32
    return %c0_i32, %c0_i32_0 : i32, i32
  }
  func.func @transform_7(%arg0: i32) -> (i32, i32) {
    %c0_i32 = arith.constant 0 : i32
    %c0_i32_0 = arith.constant 0 : i32
    %c0_i32_1 = arith.constant 0 : i32
    return %c0_i32, %c0_i32_0 : i32, i32
  }
  func.func @transform_8(%arg0: i32) -> (i32, i32) {
    %c0_i32 = arith.constant 0 : i32
    %c0_i32_0 = arith.constant 0 : i32
    %c0_i32_1 = arith.constant 0 : i32
    return %c0_i32, %c0_i32_0 : i32, i32
  }
  func.func @transform_9(%arg0: i32) -> (i32, i32) {
    %c0_i32 = arith.constant 0 : i32
    %c0_i32_0 = arith.constant 0 : i32
    %c0_i32_1 = arith.constant 0 : i32
    return %c0_i32, %c0_i32_0 : i32, i32
  }
  func.func @transform_10(%arg0: i32) -> (i32, i32) {
    %c0_i32 = arith.constant 0 : i32
    %c0_i32_0 = arith.constant 0 : i32
    %c0_i32_1 = arith.constant 0 : i32
    return %c0_i32, %c0_i32_0 : i32, i32
  }
  func.func @transform_11(%arg0: i32) -> (i32, i32, i32) {
    %c0_i32 = arith.constant 0 : i32
    %c0_i32_0 = arith.constant 0 : i32
    %c0_i32_1 = arith.constant 0 : i32
    return %arg0, %c0_i32, %c0_i32_0 : i32, i32, i32
  }
}

module attributes {stable_mosaic.version = 11 : i64} {
  func.func @_ln_linear_kernel(%arg0: i32, %arg1: memref<104x32xf32, #tpu.memory_space<vmem>>, %arg2: memref<1x32xf32, #tpu.memory_space<vmem>>, %arg3: memref<1x32xf32, #tpu.memory_space<vmem>>, %arg4: memref<32x96xf32, #tpu.memory_space<vmem>>, %arg5: memref<1x96xf32, #tpu.memory_space<vmem>>, %arg6: memref<104x96xf32, #tpu.memory_space<vmem>>) attributes {dimension_semantics = [#tpu.dimension_semantics<parallel>], iteration_bounds = array<i64: 2>, scalar_prefetch = 0 : i64, scratch_operands = 0 : i64, tpu.core_type = #tpu.core_type<tc>, window_params = [{transform_indices = @transform_0, window_bounds = array<i64: 104, 32>}, {pipeline_mode = #tpu.pipeline_mode<synchronous>, transform_indices = @transform_1, window_bounds = array<i64: 1, 32>}, {pipeline_mode = #tpu.pipeline_mode<synchronous>, transform_indices = @transform_2, window_bounds = array<i64: 1, 32>}, {pipeline_mode = #tpu.pipeline_mode<synchronous>, transform_indices = @transform_3, window_bounds = array<i64: 32, 96>}, {pipeline_mode = #tpu.pipeline_mode<synchronous>, transform_indices = @transform_4, window_bounds = array<i64: 1, 96>}, {transform_indices = @transform_5, window_bounds = array<i64: 104, 96>}]} {
    %c0 = arith.constant 0 : index
    %c0_0 = arith.constant 0 : index
    %0 = vector.load %arg1[%c0, %c0_0] : memref<104x32xf32, #tpu.memory_space<vmem>>, vector<104x32xf32>
    %cst = arith.constant dense<0.000000e+00> : vector<104xf32>
    %1 = vector.multi_reduction <add>, %0, %cst [1] : vector<104x32xf32> to vector<104xf32>
    %2 = vector.shape_cast %1 : vector<104xf32> to vector<104x1xf32>
    %cst_1 = arith.constant 3.200000e+01 : f32
    %3 = vector.broadcast %cst_1 : f32 to vector<104x1xf32>
    %4 = arith.divf %2, %3 : vector<104x1xf32>
    %5 = vector.broadcast %4 : vector<104x1xf32> to vector<104x32xf32>
    %6 = arith.subf %0, %5 : vector<104x32xf32>
    %7 = arith.mulf %6, %6 : vector<104x32xf32>
    %cst_2 = arith.constant dense<0.000000e+00> : vector<104xf32>
    %8 = vector.multi_reduction <add>, %7, %cst_2 [1] : vector<104x32xf32> to vector<104xf32>
    %9 = vector.shape_cast %8 : vector<104xf32> to vector<104x1xf32>
    %cst_3 = arith.constant 3.200000e+01 : f32
    %10 = vector.broadcast %cst_3 : f32 to vector<104x1xf32>
    %11 = arith.divf %9, %10 : vector<104x1xf32>
    %12 = vector.broadcast %4 : vector<104x1xf32> to vector<104x32xf32>
    %13 = arith.subf %0, %12 : vector<104x32xf32>
    %cst_4 = arith.constant 9.99999974E-6 : f32
    %14 = vector.broadcast %cst_4 : f32 to vector<104x1xf32>
    %15 = arith.addf %11, %14 : vector<104x1xf32>
    %16 = math.rsqrt %15 : vector<104x1xf32>
    %17 = vector.broadcast %16 : vector<104x1xf32> to vector<104x32xf32>
    %18 = arith.mulf %13, %17 : vector<104x32xf32>
    %c0_5 = arith.constant 0 : index
    %c0_6 = arith.constant 0 : index
    %19 = vector.load %arg2[%c0_5, %c0_6] : memref<1x32xf32, #tpu.memory_space<vmem>>, vector<1x32xf32>
    %20 = vector.broadcast %19 : vector<1x32xf32> to vector<104x32xf32>
    %21 = arith.mulf %18, %20 : vector<104x32xf32>
    %c0_7 = arith.constant 0 : index
    %c0_8 = arith.constant 0 : index
    %22 = vector.load %arg3[%c0_7, %c0_8] : memref<1x32xf32, #tpu.memory_space<vmem>>, vector<1x32xf32>
    %23 = vector.broadcast %22 : vector<1x32xf32> to vector<104x32xf32>
    %24 = arith.addf %21, %23 : vector<104x32xf32>
    %25 = arith.truncf %24 : vector<104x32xf32> to vector<104x32xbf16>
    %c0_9 = arith.constant 0 : index
    %c0_10 = arith.constant 0 : index
    %26 = vector.load %arg4[%c0_9, %c0_10] : memref<32x96xf32, #tpu.memory_space<vmem>>, vector<32x96xf32>
    %27 = arith.truncf %26 : vector<32x96xf32> to vector<32x96xbf16>
    %cst_11 = arith.constant dense<0.000000e+00> : vector<104x96xf32>
    %28 = tpu.matmul %25, %27, %cst_11 {dimension_numbers = #tpu.dot_dimension_numbers<[1], [0], [0], [1], [0, 0, 1, 1], [], []>} : vector<104x32xbf16>, vector<32x96xbf16>, vector<104x96xf32> -> vector<104x96xf32>
    %c0_12 = arith.constant 0 : index
    %c0_13 = arith.constant 0 : index
    %29 = vector.load %arg5[%c0_12, %c0_13] : memref<1x96xf32, #tpu.memory_space<vmem>>, vector<1x96xf32>
    %30 = vector.broadcast %29 : vector<1x96xf32> to vector<104x96xf32>
    %31 = arith.addf %28, %30 : vector<104x96xf32>
    %c0_14 = arith.constant 0 : index
    %c0_15 = arith.constant 0 : index
    %32 = vector.load %arg6[%c0_14, %c0_15] : memref<104x96xf32, #tpu.memory_space<vmem>>, vector<104x96xf32>
    tpu.vector_store %arg6[%c0_14, %c0_15], %31 {strides = array<i32>} : memref<104x96xf32, #tpu.memory_space<vmem>>, vector<104x96xf32>,
    return
  }
  func.func @transform_0(%arg0: i32) -> (i32, i32) {
    %c0_i32 = arith.constant 0 : i32
    %c0_i32_0 = arith.constant 0 : i32
    return %arg0, %c0_i32 : i32, i32
  }
  func.func @transform_1(%arg0: i32) -> (i32, i32) {
    %c0_i32 = arith.constant 0 : i32
    %c0_i32_0 = arith.constant 0 : i32
    %c0_i32_1 = arith.constant 0 : i32
    return %c0_i32, %c0_i32_0 : i32, i32
  }
  func.func @transform_2(%arg0: i32) -> (i32, i32) {
    %c0_i32 = arith.constant 0 : i32
    %c0_i32_0 = arith.constant 0 : i32
    %c0_i32_1 = arith.constant 0 : i32
    return %c0_i32, %c0_i32_0 : i32, i32
  }
  func.func @transform_3(%arg0: i32) -> (i32, i32) {
    %c0_i32 = arith.constant 0 : i32
    %c0_i32_0 = arith.constant 0 : i32
    %c0_i32_1 = arith.constant 0 : i32
    return %c0_i32, %c0_i32_0 : i32, i32
  }
  func.func @transform_4(%arg0: i32) -> (i32, i32) {
    %c0_i32 = arith.constant 0 : i32
    %c0_i32_0 = arith.constant 0 : i32
    %c0_i32_1 = arith.constant 0 : i32
    return %c0_i32, %c0_i32_0 : i32, i32
  }
  func.func @transform_5(%arg0: i32) -> (i32, i32) {
    %c0_i32 = arith.constant 0 : i32
    %c0_i32_0 = arith.constant 0 : i32
    return %arg0, %c0_i32 : i32, i32
  }
}

</mosaic_0001>

<bundles_post_ra>
// kernel: lrt_forward.9
= control target key start
LH: loop header
LB: loop body
LE: loop exit
PB: predicated region body
PF: predicated region fallthrough
CT: control target
= control target key end

     0   :  { %10 = vsyncpa [#allocation3], 0  ;;  %s1438_s0 = inlined_call_operand.vmem [shape: f32[208,32], index: 0, kind: input, shape index: {}]   ;;  %s1439_s1 = inlined_call_operand.hbm [shape: f32[1,32], index: 1, kind: input, shape index: {}]   ;;  %s1440_s2 = inlined_call_operand.hbm [shape: f32[1,32], index: 2, kind: input, shape index: {}]   ;;  %s1441_s3 = inlined_call_operand.hbm [shape: f32[32,96], index: 3, kind: input, shape index: {}]   ;;  %s1442_s4 = inlined_call_operand.hbm [shape: f32[1,96], index: 4, kind: input, shape index: {}]   ;;  %s1443_s5 = inlined_call_operand.vmem [shape: f32[208,96], index: 5, kind: output, shape index: {}]  }
   0x1   :  { %11 = vsyncpa [#allocation5], 0 }
   0x2   :  { %12 = vsyncpa [#allocation8], 0  ;;  %s1067_s18 = smov 0  }
   0x3 LB: > { %s1029_s19 = smov [#allocation4]   ;;  %s746_s21 = sadd.s32 4294967295, %s1027_s18   ;;  %s1027_s18 = sphi %s1067_s18, %s18_s18  }
   0x4   : > { %s183_s20 = sshll.u32 %s1029_s19, 4  ;;  %p748_p0 = scmp.ge.s32.totalorder %s1027_s18, 1  ;;  %s1081_s20 = int_to_ptr.vmem [resolvable:$true] %s183_s20 }
   0x5   : > { %p159_p1 = scmp.lt.s32.totalorder %s1027_s18, 3  ;;  %p1077_p2 = scmp.eq.s32.totalorder %s746_s21, 0 }
   0x6   : > { %s1030_s24 = smov [#allocation2]   ;;  %s1031_s26 = smov [#allocation6]  }
   0x7   : > { %s1447_s22 = scalar_select %p1077_p2, 1, 0 }
   0x8   : > { %p1083_p3 = pnand %p748_p0, %p159_p1  ;;  %s172_s25 = sshll.u32 %s1030_s24, 4  ;;  %s1089_s25 = int_to_ptr.vmem [resolvable:$true] %s172_s25 }
   0x9   : > { %s193_s27 = sshll.u32 %s1031_s26, 4  ;;  %s1032_s29 = smov [#allocation7]   ;;  %s1097_s27 = int_to_ptr.vmem [resolvable:$true] %s193_s27 }
   0xa   : > { %s1448_s23 = scalar_select %p1083_p3, 1, 0 }
   0xb   : > { %p834_p4 = pneg %p1083_p3  ;;  %s1099_s30 = sshll.u32 %s1032_s29, 4  ;;  %s208_s30 = int_to_ptr.vmem [resolvable:$true] %s1099_s30 }
   0xc   : > { %s897_s8 = scalar_lea.hbm %s1440_s2, 16 }
   0xd   : > { %p1093_p5 = pnand %p1077_p2, %p834_p4  ;;  %p898_p6 = scmp.ne.s32.totalorder %s1440_s2, %s897_s8 }
   0xe   : > { %p904_p10 = scmp.lt.u32.totalorder %s897_s8, %s1440_s2 }
   0xf   : > { %p1109_p7 = pneg %p1093_p5 }
  0x11   : > { %p900_p8 = pnand %p1109_p7, %p898_p6 }
  0x13   : > { %p901_p9 = pneg %p900_p8 }
  0x15   : > { %p906_p11 = pnand %p904_p10, %p901_p9 }
  0x17   : > { %909 = shalt.err (!%p906_p11)
}
  0x18   : > { %s910_s14 = scalar_lea.vmem %s1081_s20, 16  ;;  %s917_s15 = scalar_lea.vmem %s1081_s20, 32 }
  0x19   : > { %p911_p12 = scmp.ne.s32.totalorder %s1081_s20, %s910_s14  ;;  %p918_p1 = scmp.lt.s32.totalorder %s1081_s20, %s1081_s20 }
  0x1a   : > { %p919_p4 = scmp.lt.s32.totalorder %s917_s15, %s910_s14 }
  0x1b   : > { %p913_p13 = pnand %p911_p12, %p1109_p7 }
  0x1c   : > { %p920_p6 = por %p919_p4, %p918_p1 }
  0x1d   : > { %p914_p0 = pneg %p913_p13 }
  0x1f   : > { %p921_p8 = pnand %p920_p6, %p914_p0 }
  0x21   : > { %924 = shalt.err (!%p921_p8)
}
  0x22   : > { %840 = dma.hbm_to_vmem [thread:$0]  (!%p1093_p5), %s1440_s2, 16, %s1081_s20, [#allocation5]  }
  0x23   : > { %s925_s26 = scalar_lea.hbm %s1439_s1, 16 }
  0x24   : > { %p926_p9 = scmp.ne.s32.totalorder %s1439_s1, %s925_s26  ;;  %p932_p12 = scmp.lt.u32.totalorder %s925_s26, %s1439_s1 }
  0x26   : > { %p928_p10 = pnand %p926_p9, %p1109_p7 }
  0x28   : > { %p929_p11 = pneg %p928_p10 }
  0x2a   : > { %p934_p13 = pnand %p932_p12, %p929_p11 }
  0x2c   : > { %937 = shalt.err (!%p934_p13)
}
  0x2d   : > { %s938_s20 = scalar_lea.vmem %s1089_s25, 16  ;;  %s945_s9 = scalar_lea.vmem %s1089_s25, 32 }
  0x2e   : > { %p939_p0 = scmp.ne.s32.totalorder %s1089_s25, %s938_s20  ;;  %p946_p6 = scmp.lt.s32.totalorder %s1089_s25, %s1089_s25 }
  0x2f   : > { %p947_p8 = scmp.lt.s32.totalorder %s945_s9, %s938_s20 }
  0x30   : > { %p941_p1 = pnand %p939_p0, %p1109_p7 }
  0x31   : > { %p948_p9 = por %p947_p8, %p946_p6 }
  0x32   : > { %p942_p4 = pneg %p941_p1 }
  0x34   : > { %p949_p10 = pnand %p948_p9, %p942_p4 }
  0x36   : > { %952 = shalt.err (!%p949_p10)
}
  0x37   : > { %837 = dma.hbm_to_vmem [thread:$0]  (!%p1093_p5), %s1439_s1, 16, %s1089_s25, [#allocation3]  }
  0x38   : > { %s953_s15 = scalar_lea.hbm %s1441_s3, 512 }
  0x39   : > { %p954_p11 = scmp.ne.s32.totalorder %s1441_s3, %s953_s15  ;;  %p960_p0 = scmp.lt.u32.totalorder %s953_s15, %s1441_s3 }
  0x3b   : > { %p956_p12 = pnand %p954_p11, %p1109_p7 }
  0x3d   : > { %p957_p13 = pneg %p956_p12 }
  0x3f   : > { %p962_p1 = pnand %p960_p0, %p957_p13 }
  0x41   : > { %965 = shalt.err (!%p962_p1)
}
  0x42   : > { %s966_s25 = scalar_lea.vmem %s1097_s27, 512  ;;  %p974_p9 = scmp.lt.s32.totalorder %s1097_s27, %s1097_s27 }
  0x43   : > { %p967_p4 = scmp.ne.s32.totalorder %s1097_s27, %s966_s25  ;;  %p975_p10 = scmp.lt.s32.totalorder %s966_s25, %s966_s25 }
  0x45   : > { %p969_p6 = pnand %p967_p4, %p1109_p7  ;;  %p976_p11 = por %p975_p10, %p974_p9 }
  0x47   : > { %p970_p8 = pneg %p969_p6 }
  0x49   : > { %p977_p12 = pnand %p976_p11, %p970_p8 }
  0x4b   : > { %980 = shalt.err (!%p977_p12)
}
  0x4c   : > { %s1033_s26 = smov 128   ;;  %s1034_s29 = smov 8  }
  0x4d   : > { %843 = dma.hbm_to_vmem [thread:$0]  (!%p1093_p5), %s1441_s3, 512, %s1097_s27, [#allocation5], %s1033_s26, %s1033_s26, %s1034_s29  }
  0x4e   : > { %s981_s9 = scalar_lea.hbm %s1442_s4, 16 }
  0x4f   : > { %p982_p13 = scmp.ne.s32.totalorder %s1442_s4, %s981_s9  ;;  %p988_p4 = scmp.lt.u32.totalorder %s981_s9, %s1442_s4 }
  0x51   : > { %p984_p0 = pnand %p982_p13, %p1109_p7 }
  0x53   : > { %p985_p1 = pneg %p984_p0 }
  0x55   : > { %p990_p6 = pnand %p988_p4, %p985_p1 }
  0x57   : > { %993 = shalt.err (!%p990_p6)
}
  0x58   : > { %s994_s15 = scalar_lea.vmem %s208_s30, 16  ;;  %s1001_s27 = scalar_lea.vmem %s208_s30, 32 }
  0x59   : > { %p995_p8 = scmp.ne.s32.totalorder %s208_s30, %s994_s15  ;;  %p1002_p11 = scmp.lt.s32.totalorder %s208_s30, %s208_s30 }
  0x5a   : > { %p1003_p12 = scmp.lt.s32.totalorder %s1001_s27, %s994_s15 }
  0x5b   : > { %p997_p9 = pnand %p995_p8, %p1109_p7 }
  0x5c   : > { %p1004_p2 = por %p1003_p12, %p1002_p11 }
  0x5d   : > { %p998_p10 = pneg %p997_p9 }
  0x5f   : > { %p1005_p3 = pnand %p1004_p2, %p998_p10 }
  0x61   : > { %1008 = shalt.err (!%p1005_p3)
}
  0x62   : > { %846 = dma.hbm_to_vmem [thread:$0]  (!%p1093_p5), %s1442_s4, 16, %s208_s30, [#allocation8]  }
  0x63   : > { %p1451_p13 = scmp.ne.s32.totalorder %s1448_s23, 0 }
  0x64   : > { %p1452_p0 = scmp.ne.s32.totalorder (!%p1451_p13), %s1447_s22, 0 }
  0x65   : > { %229 = sbr.rel (%p1451_p13) target bundleno = 681 (0x2a9), region = 40 }
  0x6c   : > { %1014 = dma.done.wait (%p1452_p0), [#allocation3], 16  }
  0x6d   : > { %1016 = vsyncadd (%p1452_p0), [#allocation3], 4294967280 }
  0x6e   : > { %1018 = dma.done.wait (%p1452_p0), [#allocation5], 528  }
  0x6f   : > { %1020 = vsyncadd (%p1452_p0), [#allocation5], 4294966768 }
  0x70   : > { %1022 = dma.done.wait (%p1452_p0), [#allocation8], 16  }
  0x71   : > { %1024 = vsyncadd (%p1452_p0), [#allocation8], 4294967280  ;;  %s269_s23 = smul.u32 13, %s746_s21  ;;  %vm295_vm0 = vcmask 261120   ;;  %vm1036_vm1 = vmmov 0   ;;  %vm635_vm2 = vcmask 785408  }
  0x73   : > { %p270_p2 = scmp.lt.s32.totalorder %s269_s23, 25 }
  0x75   : > { %s1454_s23 = smov (!%p270_p2, %s269_s23), 25 }
  0x76   : > { %s759_s28 = sshll.u32 %s1454_s23, 3 }
  0x77   : > { %s1221_s19 = scalar_lea.vmem %s1438_s0, %s759_s28  ;;  %s1407_s24 = scalar_lea.vmem %s1443_s5, %s759_s28 }
  0x78   : > { %v282_v0 = vld [vmem:[%s1221_s19] sm:$0xff]  ;;  %v284_v1 = vld [vmem:[%s1221_s19 + $0x10] sm:$0xff]  ;;  %v283_v2 = vld [vmem:[%s1221_s19 + $0x8] sm:$0xff] }
  0x79   : > { %v296_v3 = vsel %vm295_vm0, %v282_v0, 0.0  ;;  %v302_v4 = vsel %vm295_vm0, %v284_v1, 0.0  ;;  %v285_v5 = vld [vmem:[%s1221_s19 + $0x18] sm:$0xff]  ;;  %v299_v6 = vsel %vm295_vm0, %v283_v2, 0.0  ;;  %v290_v8 = vld [vmem:[%s1221_s19 + $0x40] sm:$0xff]  ;;  %v291_v9 = vld [vmem:[%s1221_s19 + $0x48] sm:$0xff] }
  0x7a   : > { %297 = vadd.xlane.f32.xlu0 %v296_v3  ;;  %303 = vadd.xlane.f32.xlu1 %v302_v4  ;;  %v305_v7 = vsel %vm295_vm0, %v285_v5, 0.0  ;;  %v320_v10 = vsel %vm295_vm0, %v290_v8, 0.0  ;;  %v323_v11 = vsel %vm295_vm0, %v291_v9, 0.0  ;;  %v286_v12 = vld [vmem:[%s1221_s19 + $0x20] sm:$0xff]  ;;  %v287_v13 = vld [vmem:[%s1221_s19 + $0x28] sm:$0xff]  ;;  %v1240_v16 = vld [vmem:[%s1221_s19 + $0x50] sm:$0xff] }
  0x7b   : > { %v308_v14 = vsel %vm295_vm0, %v286_v12, 0.0  ;;  %v311_v15 = vsel %vm295_vm0, %v287_v13, 0.0  ;;  %v1243_v17 = vld [vmem:[%s1221_s19 + $0x58] sm:$0xff]  ;;  %v326_v18 = vsel %vm295_vm0, %v1240_v16, 0.0  ;;  %v1250_v20 = vld [vmem:[%s1221_s19 + $0x30] sm:$0xff]  ;;  %v1260_v24 = vld [vmem:[%s1221_s19 + $0x60] sm:$0xff] }
  0x7c   : > { %v329_v19 = vsel %vm295_vm0, %v1243_v17, 0.0  ;;  %v1253_v21 = vld [vmem:[%s1221_s19 + $0x38] sm:$0xff]  ;;  %v314_v22 = vsel %vm295_vm0, %v1250_v20, 0.0  ;;  %v332_v25 = vsel %vm295_vm0, %v1260_v24, 0.0 }
  0x7d   : > { %v317_v23 = vsel %vm295_vm0, %v1253_v21, 0.0 }
  0x7e   : > { %300 = vadd.xlane.f32.xlu0 %v299_v6  ;;  %306 = vadd.xlane.f32.xlu1 %v305_v7 }
  0x82   : > { %321 = vadd.xlane.f32.xlu0 %v320_v10  ;;  %324 = vadd.xlane.f32.xlu1 %v323_v11 }
  0x86   : > { %309 = vadd.xlane.f32.xlu0 %v308_v14  ;;  %312 = vadd.xlane.f32.xlu1 %v311_v15 }
  0x8a   : > { %327 = vadd.xlane.f32.xlu0 %v326_v18  ;;  %330 = vadd.xlane.f32.xlu1 %v329_v19 }
  0x8e   : > { %315 = vadd.xlane.f32.xlu0 %v314_v22  ;;  %318 = vadd.xlane.f32.xlu1 %v317_v23 }
  0x92   : > { %333 = vadd.xlane.f32.xlu0 %v332_v25 }
 0x107   : > { %v298_v26 = vpop.xlane.xlu0 %297  ;;  %v304_v27 = vpop.xlane.xlu1 %303 }
 0x108   : > { %v336_v28 = vmul.f32 0.03125, %v298_v26  ;;  %v338_v29 = vmul.f32 0.03125, %v304_v27 }
 0x10a   : > { %v1264_v30 = vsub.f32 %v282_v0, %v336_v28  ;;  %v1266_v31 = vsub.f32 %v284_v1, %v338_v29  ;;  %v513_v28 = vld [vmem:[#allocation6] sm:$0xff]  ;;  %v514_v29 = vld [vmem:[#allocation6 + $0x8] sm:$0xff] }
 0x10b   : > { %v301_v32 = vpop.xlane.xlu0 %300  ;;  %v307_v33 = vpop.xlane.xlu1 %306 }
 0x10c   : > { %v337_v34 = vmul.f32 0.03125, %v301_v32  ;;  %v339_v35 = vmul.f32 0.03125, %v307_v33  ;;  %v362_v36 = vmul.f32 %v1264_v30, %v1264_v30  ;;  %v364_v37 = vmul.f32 %v1266_v31, %v1266_v31 }
 0x10d   : > { %v517_v32 = vpack.c.bf16 %v514_v29, %v513_v28  ;;  %v1035_v33 = vmov 0.0  }
 0x10e   : > { %v1272_v38 = vsub.f32 %v283_v2, %v337_v34  ;;  %v1274_v39 = vsub.f32 %v285_v5, %v339_v35  ;;  %v375_v40 = vsel %vm295_vm0, %v362_v36, 0.0  ;;  %v381_v43 = vsel %vm295_vm0, %v364_v37, 0.0  ;;  %782 = vmatprep.subr.bf16.mxu0 %v1035_v33  ;;  %814 = vmatprep.subr.bf16.mxu1 %v1035_v33  ;;  %v516_v34 = vld [vmem:[#allocation6 + $0x18] sm:$0xff] }
 0x10f   : > { %376 = vadd.xlane.f32.xlu1 %v375_v40  ;;  %v322_v41 = vpop.xlane.xlu0 %321  ;;  %v325_v42 = vpop.xlane.xlu1 %324  ;;  %783 = vmatpush3.bf16.msra.mxu0 %v517_v32 }
 0x110   : > { %v344_v44 = vmul.f32 0.03125, %v322_v41  ;;  %v345_v45 = vmul.f32 0.03125, %v325_v42  ;;  %v363_v46 = vmul.f32 %v1272_v38, %v1272_v38  ;;  %v365_v47 = vmul.f32 %v1274_v39, %v1274_v39  ;;  %816 = vmatpush3.bf16.msra.mxu1 %v517_v32  ;;  %784 = vmatprep.subr.bf16.mxu0 %v1035_v33 }
 0x111   : > { %815 = vmatprep.subr.bf16.mxu1 %v1035_v33  ;;  %786 = vmatprep.mubr.msk.bf16.mxu0 %vm1036_vm1, %v1035_v33 }
 0x112   : > { %v1282_v48 = vsub.f32 %v290_v8, %v344_v44  ;;  %v1284_v49 = vsub.f32 %v291_v9, %v345_v45  ;;  %v378_v50 = vsel %vm295_vm0, %v363_v46, 0.0  ;;  %v384_v53 = vsel %vm295_vm0, %v365_v47, 0.0  ;;  %802 = vmatprep.mubr.msk.bf16.mxu1 %vm1036_vm1, %v1035_v33 }
 0x113   : > { %382 = vadd.xlane.f32.xlu1 %v381_v43  ;;  %379 = vadd.xlane.f32.xlu0 %v378_v50  ;;  %v310_v51 = vpop.xlane.xlu0 %309  ;;  %v313_v52 = vpop.xlane.xlu1 %312 }
 0x114   : > { %v340_v54 = vmul.f32 0.03125, %v310_v51  ;;  %v341_v55 = vmul.f32 0.03125, %v313_v52  ;;  %v370_v56 = vmul.f32 %v1282_v48, %v1282_v48  ;;  %v371_v57 = vmul.f32 %v1284_v49, %v1284_v49 }
 0x116   : > { %v1292_v58 = vsub.f32 %v286_v12, %v340_v54  ;;  %v1294_v59 = vsub.f32 %v287_v13, %v341_v55  ;;  %v399_v60 = vsel %vm295_vm0, %v370_v56, 0.0  ;;  %v402_v63 = vsel %vm295_vm0, %v371_v57, 0.0 }
 0x117   : > { %385 = vadd.xlane.f32.xlu0 %v384_v53  ;;  %400 = vadd.xlane.f32.xlu1 %v399_v60  ;;  %v328_v61 = vpop.xlane.xlu0 %327  ;;  %v331_v62 = vpop.xlane.xlu1 %330 }
 0x118   : > { %v346_v0 = vmul.f32 0.03125, %v328_v61  ;;  %v347_v1 = vmul.f32 0.03125, %v331_v62  ;;  %v366_v2 = vmul.f32 %v1292_v58, %v1292_v58  ;;  %v367_v3 = vmul.f32 %v1294_v59, %v1294_v59 }
 0x11a   : > { %v1303_v4 = vsub.f32 %v1240_v16, %v346_v0  ;;  %v1306_v5 = vsub.f32 %v1243_v17, %v347_v1  ;;  %v387_v6 = vsel %vm295_vm0, %v366_v2, 0.0  ;;  %v390_v9 = vsel %vm295_vm0, %v367_v3, 0.0 }
 0x11b   : > { %403 = vadd.xlane.f32.xlu0 %v402_v63  ;;  %388 = vadd.xlane.f32.xlu1 %v387_v6  ;;  %v316_v7 = vpop.xlane.xlu0 %315  ;;  %v319_v8 = vpop.xlane.xlu1 %318 }
 0x11c   : > { %v342_v10 = vmul.f32 0.03125, %v316_v7  ;;  %v343_v11 = vmul.f32 0.03125, %v319_v8  ;;  %v372_v12 = vmul.f32 %v1303_v4, %v1303_v4  ;;  %v373_v13 = vmul.f32 %v1306_v5, %v1306_v5 }
 0x11e   : > { %v1315_v14 = vsub.f32 %v1250_v20, %v342_v10  ;;  %v1318_v15 = vsub.f32 %v1253_v21, %v343_v11  ;;  %v405_v16 = vsel %vm295_vm0, %v372_v12, 0.0  ;;  %v408_v19 = vsel %vm295_vm0, %v373_v13, 0.0 }
 0x11f   : > { %391 = vadd.xlane.f32.xlu0 %v390_v9  ;;  %406 = vadd.xlane.f32.xlu1 %v405_v16  ;;  %v334_v17 = vpop.xlane.xlu0 %333  ;;  %v1343_v9 = vld [vmem:[#allocation2] ss:$0 sm:$0xff] }
 0x120   : > { %v348_v18 = vmul.f32 0.03125, %v334_v17  ;;  %v368_v22 = vmul.f32 %v1315_v14, %v1315_v14  ;;  %v369_v23 = vmul.f32 %v1318_v15, %v1318_v15 }
 0x122   : > { %v1327_v20 = vsub.f32 %v1260_v24, %v348_v18  ;;  %v393_v21 = vsel %vm295_vm0, %v368_v22, 0.0  ;;  %v396_v25 = vsel %vm295_vm0, %v369_v23, 0.0  ;;  %v515_v24 = vld [vmem:[#allocation6 + $0x10] sm:$0xff] }
 0x123   : > { %409 = vadd.xlane.f32.xlu0 %v408_v19  ;;  %394 = vadd.xlane.f32.xlu1 %v393_v21  ;;  %v518_v35 = vpack.c.bf16 %v516_v34, %v515_v24  ;;  %v1348_v21 = vld [vmem:[#allocation4] ss:$0 sm:$0xff] }
 0x124   : > { %v374_v26 = vmul.f32 %v1327_v20, %v1327_v20 }
 0x125   : > { %785 = vmatpush3.bf16.msra.mxu0 %v518_v35  ;;  %817 = vmatpush3.bf16.msra.mxu1 %v518_v35 }
 0x126   : > { %v411_v27 = vsel %vm295_vm0, %v374_v26, 0.0 }
 0x127   : > { %397 = vadd.xlane.f32.xlu0 %v396_v25  ;;  %412 = vadd.xlane.f32.xlu1 %v411_v27 }
 0x19c   : > { %v377_v36 = vpop.xlane.xlu1 %376 }
 0x19d   : > { %v414_v37 = vmul.f32 0.03125, %v377_v36 }
 0x19f   : > { %v427_v40 = vadd.f32 1e-05, %v414_v37 }
 0x1a0   : > { %v383_v41 = vpop.xlane.xlu1 %382  ;;  %v380_v42 = vpop.xlane.xlu0 %379 }
 0x1a1   : > { %871 = vrsqrt.f32 %v427_v40  ;;  %v416_v43 = vmul.f32 0.03125, %v383_v41  ;;  %v415_v44 = vmul.f32 0.03125, %v380_v42 }
 0x1a3   : > { %v428_v45 = vadd.f32 1e-05, %v415_v44  ;;  %v429_v46 = vadd.f32 1e-05, %v416_v43 }
 0x1a4   : > { %v401_v47 = vpop.xlane.xlu1 %400  ;;  %v386_v50 = vpop.xlane.xlu0 %385 }
 0x1a5   : > { %v422_v51 = vmul.f32 0.03125, %v401_v47  ;;  %v417_v52 = vmul.f32 0.03125, %v386_v50  ;;  %873 = vrsqrt.f32 %v428_v45 }
 0x1a6   : > { %875 = vrsqrt.f32 %v429_v46 }
 0x1a7   : > { %v435_v53 = vadd.f32 1e-05, %v422_v51  ;;  %v430_v54 = vadd.f32 1e-05, %v417_v52 }
 0x1a8   : > { %v389_v55 = vpop.xlane.xlu1 %388  ;;  %v404_v56 = vpop.xlane.xlu0 %403 }
 0x1a9   : > { %877 = vrsqrt.f32 %v435_v53  ;;  %v418_v57 = vmul.f32 0.03125, %v389_v55  ;;  %v423_v60 = vmul.f32 0.03125, %v404_v56 }
 0x1aa   : > { %879 = vrsqrt.f32 %v430_v54 }
 0x1ab   : > { %v872_v61 = vpop.eup %871  ;;  %v436_v62 = vadd.f32 1e-05, %v423_v60  ;;  %v431_v63 = vadd.f32 1e-05, %v418_v57 }
 0x1ac   : > { %v407_v0 = vpop.xlane.xlu1 %406  ;;  %v392_v1 = vpop.xlane.xlu0 %391  ;;  %v453_v6 = vmul.f32 %v872_v61, %v1264_v30 }
 0x1ad   : > { %v424_v2 = vmul.f32 0.03125, %v407_v0  ;;  %v419_v3 = vmul.f32 0.03125, %v392_v1  ;;  %881 = vrsqrt.f32 %v436_v62 }
 0x1ae   : > { %883 = vrsqrt.f32 %v431_v63  ;;  %v473_v19 = vmul.f32 %v1343_v9, %v453_v6 }
 0x1af   : > { %v437_v7 = vadd.f32 1e-05, %v424_v2  ;;  %v432_v8 = vadd.f32 1e-05, %v419_v3  ;;  %v874_v10 = vpop.eup %873 }
 0x1b0   : > { %v395_v11 = vpop.xlane.xlu1 %394  ;;  %v410_v12 = vpop.xlane.xlu0 %409  ;;  %v454_v13 = vmul.f32 %v874_v10, %v1272_v38  ;;  %v493_v35 = vadd.f32 %v1348_v21, %v473_v19 }
 0x1b1   : > { %885 = vrsqrt.f32 %v437_v7  ;;  %v420_v16 = vmul.f32 0.03125, %v395_v11  ;;  %v425_v17 = vmul.f32 0.03125, %v410_v12  ;;  %v876_v18 = vpop.eup %875 }
 0x1b2   : > { %887 = vrsqrt.f32 %v432_v8  ;;  %v474_v23 = vmul.f32 %v1343_v9, %v454_v13  ;;  %v455_v34 = vmul.f32 %v876_v18, %v1266_v31 }
 0x1b3   : > { %v878_v22 = vpop.eup %877  ;;  %v438_v30 = vadd.f32 1e-05, %v425_v17  ;;  %v433_v26 = vadd.f32 1e-05, %v420_v16 }
 0x1b4   : > { %v880_v25 = vpop.eup %879  ;;  %v413_v27 = vpop.xlane.xlu1 %412  ;;  %v461_v29 = vmul.f32 %v878_v22, %v1282_v48  ;;  %v494_v36 = vadd.f32 %v1348_v21, %v474_v23  ;;  %v475_v31 = vmul.f32 %v1343_v9, %v455_v34  ;;  %v763_v22 = vld [vmem:[#allocation7] ss:$0 sm:$0xff] }
 0x1b5   : > { %v398_v28 = vpop.xlane.xlu0 %397  ;;  %v456_v38 = vmul.f32 %v880_v25, %v1274_v39  ;;  %v426_v32 = vmul.f32 0.03125, %v413_v27  ;;  %889 = vrsqrt.f32 %v438_v30 }
 0x1b6   : > { %v421_v24 = vmul.f32 0.03125, %v398_v28  ;;  %891 = vrsqrt.f32 %v433_v26  ;;  %v506_v42 = vpack.c.bf16 %v494_v36, %v493_v35  ;;  %v481_v39 = vmul.f32 %v1343_v9, %v461_v29 }
 0x1b7   : > { %v439_v37 = vadd.f32 1e-05, %v426_v32  ;;  %v882_v41 = vpop.eup %881  ;;  %v476_v43 = vmul.f32 %v1343_v9, %v456_v38  ;;  %v495_v55 = vadd.f32 %v1348_v21, %v475_v31 }
 0x1b8   : > { %v434_v40 = vadd.f32 1e-05, %v421_v24  ;;  %v462_v48 = vmul.f32 %v882_v41, %v1284_v49  ;;  %v884_v44 = vpop.eup %883  ;;  %787 = vmatmul.mubr.msk.bf16.vlgmr.msra.gmra.mrb[0].mxu0 %vm295_vm0, %v506_v42  ;;  %v501_v52 = vadd.f32 %v1348_v21, %v481_v39 }
 0x1b9   : > { %893 = vrsqrt.f32 %v439_v37  ;;  %790 = vmatprep.mubr.msk.bf16.mxu0 %vm1036_vm1, %v1035_v33  ;;  %v496_v50 = vadd.f32 %v1348_v21, %v476_v43  ;;  %v457_v54 = vmul.f32 %v884_v44, %v1292_v58 }
 0x1ba   : > { %895 = vrsqrt.f32 %v434_v40  ;;  %v482_v46 = vmul.f32 %v1343_v9, %v462_v48 }
 0x1bb   : > { %v886_v45 = vpop.eup %885  ;;  %v507_v60 = vpack.c.bf16 %v496_v50, %v495_v55  ;;  %v477_v58 = vmul.f32 %v1343_v9, %v457_v54 }
 0x1bc   : > { %v888_v47 = vpop.eup %887  ;;  %v463_v49 = vmul.f32 %v886_v45, %v1303_v4  ;;  %v502_v53 = vadd.f32 %v1348_v21, %v482_v46 }
 0x1bd   : > { %v458_v51 = vmul.f32 %v888_v47, %v1294_v59  ;;  %v497_v10 = vadd.f32 %v1348_v21, %v477_v58 }
 0x1be   : > { %v510_v56 = vpack.c.bf16 %v502_v53, %v501_v52  ;;  %v483_v4 = vmul.f32 %v1343_v9, %v463_v49 }
 0x1bf   : > { %v890_v57 = vpop.eup %889  ;;  %v478_v61 = vmul.f32 %v1343_v9, %v458_v51 }
 0x1c0   : > { %v464_v62 = vmul.f32 %v890_v57, %v1306_v5  ;;  %803 = vmatmul.mubr.msk.bf16.vlgmr.msra.gmra.mrb[0].mxu1 %vm295_vm0, %v510_v56  ;;  %v892_v59 = vpop.eup %891  ;;  %791 = vmatmul.mubr.msk.bf16.gmra.mrb[4].mxu0 %vm295_vm0, %v507_v60  ;;  %v503_v6 = vadd.f32 %v1348_v21, %v483_v4 }
 0x1c1   : > { %806 = vmatprep.mubr.msk.bf16.mxu1 %vm1036_vm1, %v1035_v33  ;;  %794 = vmatprep.mubr.msk.bf16.mxu0 %vm1036_vm1, %v1035_v33  ;;  %v498_v2 = vadd.f32 %v1348_v21, %v478_v61  ;;  %v459_v8 = vmul.f32 %v892_v59, %v1315_v14 }
 0x1c2   : > { %v484_v0 = vmul.f32 %v1343_v9, %v464_v62 }
 0x1c3   : > { %v894_v63 = vpop.eup %893  ;;  %v508_v13 = vpack.c.bf16 %v498_v2, %v497_v10 }
 0x1c4   : > { %v896_v1 = vpop.eup %895  ;;  %v465_v5 = vmul.f32 %v894_v63, %v1327_v20  ;;  %v504_v7 = vadd.f32 %v1348_v21, %v484_v0 }
 0x1c5   : > { %v460_v3 = vmul.f32 %v896_v1, %v1318_v15  ;;  %v479_v15 = vmul.f32 %v1343_v9, %v459_v8 }
 0x1c6   : > { %v511_v11 = vpack.c.bf16 %v504_v7, %v503_v6  ;;  %v485_v12 = vmul.f32 %v1343_v9, %v465_v5 }
 0x1c7   : > { %v480_v16 = vmul.f32 %v1343_v9, %v460_v3  ;;  %v499_v17 = vadd.f32 %v1348_v21, %v479_v15 }
 0x1c8   : > { %807 = vmatmul.mubr.msk.bf16.gmra.mrb[4].mxu1 %vm295_vm0, %v511_v11  ;;  %795 = vmatmul.mubr.msk.bf16.gmra.mrb[8].mxu0 %vm295_vm0, %v508_v13  ;;  %v505_v14 = vadd.f32 %v1348_v21, %v485_v12 }
 0x1c9   : > { %810 = vmatprep.mubr.msk.bf16.mxu1 %vm1036_vm1, %v1035_v33  ;;  %798 = vmatprep.mubr.msk.bf16.mxu0 %vm1036_vm1, %v1035_v33  ;;  %v500_v20 = vadd.f32 %v1348_v21, %v480_v16 }
 0x1ca   : > { %v512_v18 = vpack.c.bf16 %v505_v14, %v505_v14 }
 0x1cb   : > { %v509_v19 = vpack.c.bf16 %v500_v20, %v499_v17 }
 0x1d0   : > { %811 = vmatmul.mubr.msk.bf16.gmra.mrb[8].mxu1 %vm295_vm0, %v512_v18  ;;  %799 = vmatmul.mubr.msk.bf16.gmra.mrb[12].mxu0 %vm295_vm0, %v509_v19 }
 0x28b   : > { %v581_v33 = vpop.f32.mrb[0].mxu0 }
 0x28c   : > { %v582_v9 = vadd.f32 %v763_v22, %v581_v33  ;;  %v788_v30 = vpop.f32.mrb[1].mxu0 }
 0x28d   : > { %v584_v23 = vpop.f32.mrb[2].mxu0 }
 0x28e   : > { %636 = vst.msk [vmem:[%s1407_s24] sm:$0xff] %vm635_vm2, %v582_v9  ;;  %v585_v21 = vadd.f32 %v763_v22, %v584_v23  ;;  %v789_v25 = vpop.f32.mrb[3].mxu0 }
 0x290   : > { %637 = vst.msk [vmem:[%s1407_s24 + $0x8] sm:$0xff] %vm635_vm2, %v585_v21 }
 0x293   : > { %v613_v26 = vpop.f32.mrb[0].mxu1  ;;  %v589_v27 = vpop.f32.mrb[4].mxu0 }
 0x294   : > { %v614_v28 = vadd.f32 %v763_v22, %v613_v26  ;;  %v804_v29 = vpop.f32.mrb[1].mxu1  ;;  %v590_v38 = vadd.f32 %v763_v22, %v589_v27  ;;  %v792_v32 = vpop.f32.mrb[5].mxu0 }
 0x295   : > { %v616_v24 = vpop.f32.mrb[2].mxu1  ;;  %v592_v34 = vpop.f32.mrb[6].mxu0 }
 0x296   : > { %644 = vst.msk [vmem:[%s1407_s24 + $0x40] sm:$0xff] %vm635_vm2, %v614_v28  ;;  %v617_v35 = vadd.f32 %v763_v22, %v616_v24  ;;  %v805_v36 = vpop.f32.mrb[3].mxu1  ;;  %638 = vst.msk [vmem:[%s1407_s24 + $0x10] sm:$0xff] %vm635_vm2, %v590_v38  ;;  %v593_v37 = vadd.f32 %v763_v22, %v592_v34  ;;  %v793_v40 = vpop.f32.mrb[7].mxu0 }
 0x298   : > { %645 = vst.msk [vmem:[%s1407_s24 + $0x48] sm:$0xff] %vm635_vm2, %v617_v35  ;;  %639 = vst.msk [vmem:[%s1407_s24 + $0x18] sm:$0xff] %vm635_vm2, %v593_v37 }
 0x29b   : > { %v621_v41 = vpop.f32.mrb[4].mxu1  ;;  %v597_v42 = vpop.f32.mrb[8].mxu0 }
 0x29c   : > { %v622_v43 = vadd.f32 %v763_v22, %v621_v41  ;;  %v808_v48 = vpop.f32.mrb[5].mxu1  ;;  %v598_v39 = vadd.f32 %v763_v22, %v597_v42  ;;  %v796_v44 = vpop.f32.mrb[9].mxu0 }
 0x29d   : > { %v624_v31 = vpop.f32.mrb[6].mxu1  ;;  %v600_v45 = vpop.f32.mrb[10].mxu0 }
 0x29e   : > { %646 = vst.msk [vmem:[%s1407_s24 + $0x50] sm:$0xff] %vm635_vm2, %v622_v43  ;;  %v625_v46 = vadd.f32 %v763_v22, %v624_v31  ;;  %v809_v47 = vpop.f32.mrb[7].mxu1  ;;  %640 = vst.msk [vmem:[%s1407_s24 + $0x20] sm:$0xff] %vm635_vm2, %v598_v39  ;;  %v601_v50 = vadd.f32 %v763_v22, %v600_v45  ;;  %v797_v49 = vpop.f32.mrb[11].mxu0 }
 0x2a0   : > { %647 = vst.msk [vmem:[%s1407_s24 + $0x58] sm:$0xff] %vm635_vm2, %v625_v46  ;;  %641 = vst.msk [vmem:[%s1407_s24 + $0x28] sm:$0xff] %vm635_vm2, %v601_v50 }
 0x2a3   : > { %v629_v51 = vpop.f32.mrb[8].mxu1  ;;  %v605_v52 = vpop.f32.mrb[12].mxu0 }
 0x2a4   : > { %v630_v53 = vadd.f32 %v763_v22, %v629_v51  ;;  %v812_v54 = vpop.f32.mrb[9].mxu1  ;;  %v606_v55 = vadd.f32 %v763_v22, %v605_v52  ;;  %v800_v56 = vpop.f32.mrb[13].mxu0 }
 0x2a5   : > { %v632_v57 = vpop.f32.mrb[10].mxu1  ;;  %v608_v60 = vpop.f32.mrb[14].mxu0 }
 0x2a6   : > { %648 = vst.msk [vmem:[%s1407_s24 + $0x60] sm:$0xff] %vm635_vm2, %v630_v53  ;;  %v813_v61 = vpop.f32.mrb[11].mxu1  ;;  %642 = vst.msk [vmem:[%s1407_s24 + $0x30] sm:$0xff] %vm635_vm2, %v606_v55  ;;  %v609_v62 = vadd.f32 %v763_v22, %v608_v60  ;;  %v801_v4 = vpop.f32.mrb[15].mxu0 }
 0x2a8   : > { %643 = vst.msk [vmem:[%s1407_s24 + $0x38] sm:$0xff] %vm635_vm2, %v609_v62 }
 0x2a9 PF: > { %s18_s18 = sadd.s32 1, %s1027_s18  }
 0x2aa   : > { %p15_p3 = scmp.ge.s32.totalorder %s18_s18, 4  }
 0x2ac   :  { %17 = sbr.rel (!%p15_p3) target bundleno = 3 (0x3), region = 87 }
 0x2b3   :  { %671 = vsyncpa [#allocation3], 1 }
 0x2b4   :  { %673 = vsyncpa [#allocation3 + $0x1], 1 }
 0x2b5   :  { %674 = vsyncpa [#allocation5], 1 }
 0x2b6   :  { %675 = vsyncpa [#allocation8], 1 }

// kernel: lrt_forward.11
= control target key start
LH: loop header
LB: loop body
LE: loop exit
PB: predicated region body
PF: predicated region fallthrough
CT: control target
= control target key end

     0   :  { %s1265_s30 = smov 0   ;;  %s1732_s0 = inlined_call_operand.vmem [shape: f32[208,32], index: 0, kind: input, shape index: {}]   ;;  %s1733_s1 = inlined_call_operand.vmem [shape: f32[208,32], index: 1, kind: input, shape index: {}]   ;;  %s1734_s2 = inlined_call_operand.vmem [shape: f32[208,32], index: 2, kind: input, shape index: {}]   ;;  %s1735_s3 = inlined_call_operand.vmem [shape: f32[1,32], index: 3, kind: input, shape index: {}]   ;;  %s1736_s4 = inlined_call_operand.vmem [shape: f32[1,32], index: 4, kind: input, shape index: {}]   ;;  %s1737_s5 = inlined_call_operand.vmem [shape: f32[32,128], index: 5, kind: input, shape index: {}]   ;;  %s1738_s6 = inlined_call_operand.vmem [shape: f32[1,128], index: 6, kind: input, shape index: {}]   ;;  %s1739_s7 = inlined_call_operand.vmem [shape: f32[128,32], index: 7, kind: input, shape index: {}]   ;;  %s1740_s8 = inlined_call_operand.vmem [shape: f32[1,32], index: 8, kind: input, shape index: {}]   ;;  %s1741_s9 = inlined_call_operand.vmem [shape: f32[208,32], index: 9, kind: output, shape index: {}]  }
   0x1 LB: > { %s1031_s10 = sadd.s32 4294967295, %s1211_s30   ;;  %p1035_p0 = scmp.ge.s32.totalorder %s1211_s30, 1  ;;  %s1211_s30 = sphi %s1265_s30, %s19_s30  }
   0x2   : > { %p310_p1 = scmp.lt.s32.totalorder %s1211_s30, 3 }
   0x4   : > { %p311_p2 = pnand %p1035_p0, %p310_p1 }
   0x5   : > { %s356_s11 = smul.u32 (!%p311_p2), 13, %s1031_s10  ;;  %vm446_vm0 = vcmask (!%p311_p2), 261120   ;;  %vm1214_vm1 = vmmov (!%p311_p2), 0  }
   0x6   : > { %314 = sbr.rel (%p311_p2) target bundleno = 826 (0x33a), region = 56 }
   0x7   : > { %p357_p3 = scmp.lt.s32.totalorder (!%p311_p2), %s356_s11, 25 }
   0xd   : > { %s1743_s11 = smov (!%p357_p3, %s356_s11), 25 }
   0xe   : > { %s1273_s12 = sshll.u32 %s1743_s11, 3 }
   0xf   : > { %s1279_s15 = scalar_lea.vmem %s1732_s0, %s1273_s12  ;;  %s1285_s18 = scalar_lea.vmem %s1733_s1, %s1273_s12 }
  0x10   : > { %s1291_s21 = scalar_lea.vmem %s1734_s2, %s1273_s12  ;;  %v381_v0 = vld [vmem:[%s1279_s15] sm:$0xff]  ;;  %v383_v2 = vld [vmem:[%s1279_s15 + $0x10] sm:$0xff]  ;;  %v382_v8 = vld [vmem:[%s1279_s15 + $0x8] sm:$0xff] }
  0x11   : > { %v394_v1 = vld [vmem:[%s1285_s18] sm:$0xff]  ;;  %v396_v5 = vld [vmem:[%s1285_s18 + $0x10] sm:$0xff]  ;;  %v395_v9 = vld [vmem:[%s1285_s18 + $0x8] sm:$0xff] }
  0x12   : > { %v407_v3 = vadd.f32 %v394_v1, %v381_v0  ;;  %v420_v4 = vld [vmem:[%s1291_s21] sm:$0xff]  ;;  %v422_v6 = vld [vmem:[%s1291_s21 + $0x10] sm:$0xff]  ;;  %v409_v7 = vadd.f32 %v396_v5, %v383_v2  ;;  %v421_v10 = vld [vmem:[%s1291_s21 + $0x8] sm:$0xff]  ;;  %v408_v12 = vadd.f32 %v395_v9, %v382_v8 }
  0x13   : > { %v384_v13 = vld [vmem:[%s1279_s15 + $0x18] sm:$0xff]  ;;  %v385_v18 = vld [vmem:[%s1279_s15 + $0x20] sm:$0xff]  ;;  %v386_v24 = vld [vmem:[%s1279_s15 + $0x28] sm:$0xff] }
  0x14   : > { %v1302_v11 = vadd.f32 %v420_v4, %v407_v3  ;;  %v397_v14 = vld [vmem:[%s1285_s18 + $0x18] sm:$0xff]  ;;  %v1307_v16 = vadd.f32 %v422_v6, %v409_v7  ;;  %v398_v19 = vld [vmem:[%s1285_s18 + $0x20] sm:$0xff]  ;;  %v1314_v22 = vadd.f32 %v421_v10, %v408_v12  ;;  %v399_v25 = vld [vmem:[%s1285_s18 + $0x28] sm:$0xff] }
  0x15   : > { %v423_v15 = vld [vmem:[%s1291_s21 + $0x18] sm:$0xff]  ;;  %v410_v17 = vadd.f32 %v397_v14, %v384_v13  ;;  %v424_v20 = vld [vmem:[%s1291_s21 + $0x20] sm:$0xff]  ;;  %v411_v23 = vadd.f32 %v398_v19, %v385_v18  ;;  %v425_v26 = vld [vmem:[%s1291_s21 + $0x28] sm:$0xff]  ;;  %v412_v29 = vadd.f32 %v399_v25, %v386_v24 }
  0x16   : > { %v447_v21 = vsel %vm446_vm0, %v1302_v11, 0.0  ;;  %v453_v27 = vsel %vm446_vm0, %v1307_v16, 0.0  ;;  %v387_v30 = vld [vmem:[%s1279_s15 + $0x30] sm:$0xff]  ;;  %v450_v32 = vsel %vm446_vm0, %v1314_v22, 0.0  ;;  %v388_v35 = vld [vmem:[%s1279_s15 + $0x38] sm:$0xff]  ;;  %v389_v41 = vld [vmem:[%s1279_s15 + $0x40] sm:$0xff] }
  0x17   : > { %448 = vadd.xlane.f32.xlu0 %v447_v21  ;;  %v1321_v28 = vadd.f32 %v423_v15, %v410_v17  ;;  %v400_v31 = vld [vmem:[%s1285_s18 + $0x30] sm:$0xff]  ;;  %454 = vadd.xlane.f32.xlu1 %v453_v27  ;;  %v1327_v33 = vadd.f32 %v424_v20, %v411_v23  ;;  %v401_v36 = vld [vmem:[%s1285_s18 + $0x38] sm:$0xff]  ;;  %v1333_v38 = vadd.f32 %v425_v26, %v412_v29  ;;  %v402_v42 = vld [vmem:[%s1285_s18 + $0x40] sm:$0xff] }
  0x18   : > { %v413_v34 = vadd.f32 %v400_v31, %v387_v30  ;;  %v426_v39 = vld [vmem:[%s1291_s21 + $0x30] sm:$0xff]  ;;  %v414_v40 = vadd.f32 %v401_v36, %v388_v35  ;;  %v427_v43 = vld [vmem:[%s1291_s21 + $0x38] sm:$0xff]  ;;  %v390_v44 = vld [vmem:[%s1279_s15 + $0x48] sm:$0xff]  ;;  %v415_v48 = vadd.f32 %v402_v42, %v389_v41 }
  0x19   : > { %v456_v37 = vsel %vm446_vm0, %v1321_v28, 0.0  ;;  %v403_v45 = vld [vmem:[%s1285_s18 + $0x48] sm:$0xff]  ;;  %v459_v46 = vsel %vm446_vm0, %v1327_v33, 0.0  ;;  %v462_v49 = vsel %vm446_vm0, %v1333_v38, 0.0  ;;  %v428_v51 = vld [vmem:[%s1291_s21 + $0x40] sm:$0xff]  ;;  %v391_v53 = vld [vmem:[%s1279_s15 + $0x50] sm:$0xff] }
  0x1a   : > { %v1343_v47 = vadd.f32 %v426_v39, %v413_v34  ;;  %v1347_v50 = vadd.f32 %v427_v43, %v414_v40  ;;  %v416_v52 = vadd.f32 %v403_v45, %v390_v44  ;;  %v404_v54 = vld [vmem:[%s1285_s18 + $0x50] sm:$0xff]  ;;  %v429_v55 = vld [vmem:[%s1291_s21 + $0x48] sm:$0xff]  ;;  %v392_v56 = vld [vmem:[%s1279_s15 + $0x58] sm:$0xff]  ;;  %v1357_v59 = vadd.f32 %v428_v51, %v415_v48 }
  0x1b   : > { %451 = vadd.xlane.f32.xlu0 %v450_v32  ;;  %457 = vadd.xlane.f32.xlu1 %v456_v37  ;;  %v405_v57 = vld [vmem:[%s1285_s18 + $0x58] sm:$0xff]  ;;  %v417_v60 = vadd.f32 %v404_v54, %v391_v53  ;;  %v430_v63 = vld [vmem:[%s1291_s21 + $0x50] sm:$0xff]  ;;  %v393_v1 = vld [vmem:[%s1279_s15 + $0x60] sm:$0xff]  ;;  %s1676_s15 = scalar_lea.vmem %s1741_s9, %s1273_s12 }
  0x1c   : > { %v465_v58 = vsel %vm446_vm0, %v1343_v47, 0.0  ;;  %v468_v61 = vsel %vm446_vm0, %v1347_v50, 0.0  ;;  %v1361_v62 = vadd.f32 %v429_v55, %v416_v52  ;;  %v418_v0 = vadd.f32 %v405_v57, %v392_v56  ;;  %v406_v2 = vld [vmem:[%s1285_s18 + $0x60] sm:$0xff]  ;;  %v431_v3 = vld [vmem:[%s1291_s21 + $0x58] sm:$0xff] }
  0x1d   : > { %v471_v4 = vsel %vm446_vm0, %v1357_v59, 0.0  ;;  %v1369_v5 = vadd.f32 %v430_v63, %v417_v60  ;;  %v419_v6 = vadd.f32 %v406_v2, %v393_v1  ;;  %v432_v9 = vld [vmem:[%s1291_s21 + $0x60] sm:$0xff] }
  0x1e   : > { %v474_v7 = vsel %vm446_vm0, %v1361_v62, 0.0  ;;  %v1373_v8 = vadd.f32 %v431_v3, %v418_v0 }
  0x1f   : > { %460 = vadd.xlane.f32.xlu0 %v459_v46  ;;  %463 = vadd.xlane.f32.xlu1 %v462_v49  ;;  %v477_v10 = vsel %vm446_vm0, %v1369_v5, 0.0  ;;  %v1378_v12 = vadd.f32 %v432_v9, %v419_v6 }
  0x20   : > { %v480_v13 = vsel %vm446_vm0, %v1373_v8, 0.0 }
  0x21   : > { %v483_v14 = vsel %vm446_vm0, %v1378_v12, 0.0 }
  0x23   : > { %466 = vadd.xlane.f32.xlu0 %v465_v58  ;;  %469 = vadd.xlane.f32.xlu1 %v468_v61 }
  0x27   : > { %472 = vadd.xlane.f32.xlu0 %v471_v4  ;;  %475 = vadd.xlane.f32.xlu1 %v474_v7 }
  0x2b   : > { %478 = vadd.xlane.f32.xlu0 %v477_v10  ;;  %481 = vadd.xlane.f32.xlu1 %v480_v13 }
  0x2f   : > { %484 = vadd.xlane.f32.xlu0 %v483_v14 }
  0xa4   : > { %v449_v15 = vpop.xlane.xlu0 %448  ;;  %v455_v18 = vpop.xlane.xlu1 %454 }
  0xa5   : > { %v487_v17 = vmul.f32 0.03125, %v449_v15  ;;  %v489_v19 = vmul.f32 0.03125, %v455_v18 }
  0xa7   : > { %v1385_v20 = vsub.f32 %v1302_v11, %v487_v17  ;;  %v1388_v21 = vsub.f32 %v1307_v16, %v489_v19 }
  0xa8   : > { %v452_v23 = vpop.xlane.xlu0 %451  ;;  %v458_v25 = vpop.xlane.xlu1 %457 }
  0xa9   : > { %v488_v24 = vmul.f32 0.03125, %v452_v23  ;;  %v513_v26 = vmul.f32 %v1385_v20, %v1385_v20  ;;  %v490_v27 = vmul.f32 0.03125, %v458_v25  ;;  %v515_v29 = vmul.f32 %v1388_v21, %v1388_v21 }
  0xab   : > { %v1395_v30 = vsub.f32 %v1314_v22, %v488_v24  ;;  %v526_v31 = vsel %vm446_vm0, %v513_v26, 0.0  ;;  %v1399_v32 = vsub.f32 %v1321_v28, %v490_v27  ;;  %v532_v37 = vsel %vm446_vm0, %v515_v29, 0.0 }
  0xac   : > { %527 = vadd.xlane.f32.xlu1 %v526_v31  ;;  %v461_v34 = vpop.xlane.xlu0 %460  ;;  %v464_v36 = vpop.xlane.xlu1 %463 }
  0xad   : > { %v491_v35 = vmul.f32 0.03125, %v461_v34  ;;  %v514_v39 = vmul.f32 %v1395_v30, %v1395_v30  ;;  %v492_v40 = vmul.f32 0.03125, %v464_v36  ;;  %v516_v41 = vmul.f32 %v1399_v32, %v1399_v32 }
  0xaf   : > { %v1407_v42 = vsub.f32 %v1327_v33, %v491_v35  ;;  %v529_v43 = vsel %vm446_vm0, %v514_v39, 0.0  ;;  %v1411_v44 = vsub.f32 %v1333_v38, %v492_v40  ;;  %v535_v49 = vsel %vm446_vm0, %v516_v41, 0.0  ;;  %v665_v39 = vld [vmem:[%s1737_s5 + $0x8] sm:$0xff] }
  0xb0   : > { %533 = vadd.xlane.f32.xlu1 %v532_v37  ;;  %530 = vadd.xlane.f32.xlu0 %v529_v43  ;;  %v467_v45 = vpop.xlane.xlu0 %466  ;;  %v470_v48 = vpop.xlane.xlu1 %469  ;;  %v664_v37 = vld [vmem:[%s1737_s5] sm:$0xff]  ;;  %v1213_v41 = vmov 0.0   ;;  %v666_v43 = vld [vmem:[%s1737_s5 + $0x10] sm:$0xff] }
  0xb1   : > { %v493_v46 = vmul.f32 0.03125, %v467_v45  ;;  %v517_v51 = vmul.f32 %v1407_v42, %v1407_v42  ;;  %v494_v52 = vmul.f32 0.03125, %v470_v48  ;;  %v518_v53 = vmul.f32 %v1411_v44, %v1411_v44  ;;  %1077 = vmatprep.subr.bf16.mxu0 %v1213_v41  ;;  %1153 = vmatprep.subr.bf16.mxu1 %v1213_v41  ;;  %v667_v45 = vld [vmem:[%s1737_s5 + $0x18] sm:$0xff]  ;;  %v806_v48 = vld [vmem:[%s1739_s7] sm:$0xff] }
  0xb2   : > { %v668_v40 = vpack.c.bf16 %v665_v39, %v664_v37  ;;  %1081 = vmatprep.mubr.msk.bf16.mxu0 %vm1214_vm1, %v1213_v41  ;;  %1129 = vmatprep.mubr.msk.bf16.mxu1 %vm1214_vm1, %v1213_v41 }
  0xb3   : > { %v1419_v54 = vsub.f32 %v1343_v47, %v493_v46  ;;  %v538_v55 = vsel %vm446_vm0, %v517_v51, 0.0  ;;  %v1423_v56 = vsub.f32 %v1347_v50, %v494_v52  ;;  %v541_v61 = vsel %vm446_vm0, %v518_v53, 0.0  ;;  %v808_v52 = vld [vmem:[%s1739_s7 + $0x10] sm:$0xff]  ;;  %v809_v53 = vld [vmem:[%s1739_s7 + $0x18] sm:$0xff] }
  0xb4   : > { %536 = vadd.xlane.f32.xlu0 %v535_v49  ;;  %539 = vadd.xlane.f32.xlu1 %v538_v55  ;;  %v473_v57 = vpop.xlane.xlu0 %472  ;;  %v476_v60 = vpop.xlane.xlu1 %475  ;;  %v669_v46 = vpack.c.bf16 %v667_v45, %v666_v43  ;;  %v807_v49 = vld [vmem:[%s1739_s7 + $0x8] sm:$0xff]  ;;  %v1498_v55 = vpack.c.bf16 %v809_v53, %v808_v52 }
  0xb5   : > { %v495_v58 = vmul.f32 0.03125, %v473_v57  ;;  %v519_v63 = vmul.f32 %v1419_v54, %v1419_v54  ;;  %v496_v0 = vmul.f32 0.03125, %v476_v60  ;;  %v520_v1 = vmul.f32 %v1423_v56, %v1423_v56  ;;  %1078 = vmatpush3.bf16.msra.mxu0 %v668_v40  ;;  %v810_v57 = vld [vmem:[%s1739_s7 + $0x20] sm:$0xff] }
  0xb6   : > { %1079 = vmatprep.subr.bf16.mxu0 %v1213_v41  ;;  %v1488_v51 = vpack.c.bf16 %v807_v49, %v806_v48 }
  0xb7   : > { %v1431_v2 = vsub.f32 %v1357_v59, %v495_v58  ;;  %v544_v3 = vsel %vm446_vm0, %v519_v63, 0.0  ;;  %v1435_v4 = vsub.f32 %v1361_v62, %v496_v0  ;;  %v547_v10 = vsel %vm446_vm0, %v520_v1, 0.0  ;;  %v811_v58 = vld [vmem:[%s1739_s7 + $0x28] sm:$0xff]  ;;  %v813_v63 = vld [vmem:[%s1739_s7 + $0x38] sm:$0xff]  ;;  %v814_v1 = vld [vmem:[%s1739_s7 + $0x40] sm:$0xff] }
  0xb8   : > { %542 = vadd.xlane.f32.xlu0 %v541_v61  ;;  %545 = vadd.xlane.f32.xlu1 %v544_v3  ;;  %v479_v6 = vpop.xlane.xlu0 %478  ;;  %v482_v9 = vpop.xlane.xlu1 %481  ;;  %v1508_v60 = vpack.c.bf16 %v811_v58, %v810_v57  ;;  %v812_v61 = vld [vmem:[%s1739_s7 + $0x30] sm:$0xff]  ;;  %v815_v3 = vld [vmem:[%s1739_s7 + $0x48] sm:$0xff]  ;;  %v1546_v57 = vld [vmem:[%s1735_s3] ss:$0 sm:$0xff] }
  0xb9   : > { %v497_v7 = vmul.f32 0.03125, %v479_v6  ;;  %v521_v13 = vmul.f32 %v1431_v2, %v1431_v2  ;;  %v498_v14 = vmul.f32 0.03125, %v482_v9  ;;  %v522_v15 = vmul.f32 %v1435_v4, %v1435_v4  ;;  %1080 = vmatpush3.bf16.msra.mxu0 %v669_v46  ;;  %1161 = vmatpush3.bf16.msra.mxu1 %v1488_v51  ;;  %v817_v9 = vld [vmem:[%s1739_s7 + $0x58] sm:$0xff] }
  0xba   : > { %1109 = vmatprep.subr.bf16.mxu0 %v1213_v41  ;;  %1154 = vmatprep.subr.bf16.mxu1 %v1213_v41  ;;  %v1518_v0 = vpack.c.bf16 %v813_v63, %v812_v61  ;;  %v1528_v6 = vpack.c.bf16 %v815_v3, %v814_v1 }
  0xbb   : > { %v1443_v17 = vsub.f32 %v1369_v5, %v497_v7  ;;  %v550_v18 = vsel %vm446_vm0, %v521_v13, 0.0  ;;  %v1447_v19 = vsub.f32 %v1373_v8, %v498_v14  ;;  %v553_v25 = vsel %vm446_vm0, %v522_v15, 0.0  ;;  %v816_v7 = vld [vmem:[%s1739_s7 + $0x50] sm:$0xff] }
  0xbc   : > { %548 = vadd.xlane.f32.xlu0 %v547_v10  ;;  %551 = vadd.xlane.f32.xlu1 %v550_v18  ;;  %v485_v23 = vpop.xlane.xlu0 %484  ;;  %v1538_v10 = vpack.c.bf16 %v817_v9, %v816_v7 }
  0xbd   : > { %v499_v24 = vmul.f32 0.03125, %v485_v23  ;;  %v523_v26 = vmul.f32 %v1443_v17, %v1443_v17  ;;  %v524_v27 = vmul.f32 %v1447_v19, %v1447_v19  ;;  %1162 = vmatpush3.bf16.msra.mxu1 %v1498_v55 }
  0xbe   : > { %1155 = vmatprep.subr.bf16.mxu1 %v1213_v41 }
  0xbf   : > { %v1455_v29 = vsub.f32 %v1378_v12, %v499_v24  ;;  %v556_v31 = vsel %vm446_vm0, %v523_v26, 0.0  ;;  %v559_v34 = vsel %vm446_vm0, %v524_v27, 0.0 }
  0xc0   : > { %554 = vadd.xlane.f32.xlu0 %v553_v25  ;;  %557 = vadd.xlane.f32.xlu1 %v556_v31 }
  0xc1   : > { %v525_v35 = vmul.f32 %v1455_v29, %v1455_v29  ;;  %1163 = vmatpush3.bf16.msra.mxu1 %v1508_v60 }
  0xc2   : > { %1156 = vmatprep.subr.bf16.mxu1 %v1213_v41 }
  0xc3   : > { %v562_v36 = vsel %vm446_vm0, %v525_v35, 0.0 }
  0xc4   : > { %560 = vadd.xlane.f32.xlu0 %v559_v34  ;;  %563 = vadd.xlane.f32.xlu1 %v562_v36 }
  0xc5   : > { %1164 = vmatpush3.bf16.msra.mxu1 %v1518_v0 }
  0xc6   : > { %1157 = vmatprep.subr.bf16.mxu1 %v1213_v41 }
  0xc9   : > { %1165 = vmatpush3.bf16.msra.mxu1 %v1528_v6 }
  0xca   : > { %1158 = vmatprep.subr.bf16.mxu1 %v1213_v41 }
  0xcd   : > { %1166 = vmatpush3.bf16.msra.mxu1 %v1538_v10 }
  0xce   : > { %1159 = vmatprep.subr.bf16.mxu1 %v1213_v41 }
 0x139   : > { %v528_v13 = vpop.xlane.xlu1 %527 }
 0x13a   : > { %v565_v14 = vmul.f32 0.03125, %v528_v13 }
 0x13c   : > { %v578_v15 = vadd.f32 1e-05, %v565_v14 }
 0x13d   : > { %v534_v18 = vpop.xlane.xlu1 %533  ;;  %v531_v23 = vpop.xlane.xlu0 %530 }
 0x13e   : > { %1179 = vrsqrt.f32 %v578_v15  ;;  %v567_v24 = vmul.f32 0.03125, %v534_v18  ;;  %v566_v25 = vmul.f32 0.03125, %v531_v23 }
 0x140   : > { %v579_v26 = vadd.f32 1e-05, %v566_v25  ;;  %v580_v31 = vadd.f32 1e-05, %v567_v24 }
 0x141   : > { %v537_v27 = vpop.xlane.xlu0 %536  ;;  %v540_v35 = vpop.xlane.xlu1 %539 }
 0x142   : > { %v568_v34 = vmul.f32 0.03125, %v537_v27  ;;  %1181 = vrsqrt.f32 %v579_v26  ;;  %v569_v39 = vmul.f32 0.03125, %v540_v35 }
 0x143   : > { %1183 = vrsqrt.f32 %v580_v31 }
 0x144   : > { %v581_v36 = vadd.f32 1e-05, %v568_v34  ;;  %v582_v48 = vadd.f32 1e-05, %v569_v39 }
 0x145   : > { %v543_v37 = vpop.xlane.xlu0 %542  ;;  %v546_v52 = vpop.xlane.xlu1 %545 }
 0x146   : > { %v570_v40 = vmul.f32 0.03125, %v543_v37  ;;  %1185 = vrsqrt.f32 %v581_v36  ;;  %v571_v63 = vmul.f32 0.03125, %v546_v52 }
 0x148   : > { %v1180_v43 = vpop.eup %1179  ;;  %v583_v45 = vadd.f32 1e-05, %v570_v40  ;;  %v584_v18 = vadd.f32 1e-05, %v571_v63 }
 0x149   : > { %v549_v46 = vpop.xlane.xlu0 %548  ;;  %v604_v49 = vmul.f32 %v1180_v43, %v1385_v20  ;;  %v1554_v20 = vld [vmem:[%s1736_s4] ss:$0 sm:$0xff]  ;;  %v552_v23 = vpop.xlane.xlu1 %551 }
 0x14a   : > { %1187 = vrsqrt.f32 %v583_v45  ;;  %v572_v53 = vmul.f32 0.03125, %v549_v46  ;;  %v573_v35 = vmul.f32 0.03125, %v552_v23 }
 0x14b   : > { %1189 = vrsqrt.f32 %v582_v48  ;;  %v624_v1 = vmul.f32 %v1546_v57, %v604_v49 }
 0x14c   : > { %v1182_v58 = vpop.eup %1181  ;;  %v585_v7 = vadd.f32 1e-05, %v572_v53  ;;  %v586_v43 = vadd.f32 1e-05, %v573_v35 }
 0x14d   : > { %v605_v61 = vmul.f32 %v1182_v58, %v1395_v30  ;;  %v1184_v3 = vpop.eup %1183  ;;  %v555_v14 = vpop.xlane.xlu0 %554  ;;  %v644_v24 = vadd.f32 %v1554_v20, %v624_v1 }
 0x14e   : > { %v606_v30 = vmul.f32 %v1184_v3, %v1388_v21  ;;  %1191 = vrsqrt.f32 %v585_v7  ;;  %v574_v26 = vmul.f32 0.03125, %v555_v14  ;;  %v558_v46 = vpop.xlane.xlu1 %557 }
 0x14f   : > { %v625_v9 = vmul.f32 %v1546_v57, %v605_v61  ;;  %1193 = vrsqrt.f32 %v584_v18  ;;  %v575_v53 = vmul.f32 0.03125, %v558_v46 }
 0x150   : > { %v1186_v13 = vpop.eup %1185  ;;  %v587_v37 = vadd.f32 1e-05, %v574_v26 }
 0x151   : > { %v607_v15 = vmul.f32 %v1186_v13, %v1399_v32  ;;  %v645_v25 = vadd.f32 %v1554_v20, %v625_v9  ;;  %v626_v32 = vmul.f32 %v1546_v57, %v606_v30  ;;  %v561_v39 = vpop.xlane.xlu0 %560  ;;  %v588_v3 = vadd.f32 1e-05, %v575_v53 }
 0x152   : > { %1195 = vrsqrt.f32 %v587_v37  ;;  %v576_v49 = vmul.f32 0.03125, %v561_v39  ;;  %v564_v63 = vpop.xlane.xlu1 %563 }
 0x153   : > { %v657_v27 = vpack.c.bf16 %v645_v25, %v644_v24  ;;  %v627_v31 = vmul.f32 %v1546_v57, %v607_v15  ;;  %v646_v48 = vadd.f32 %v1554_v20, %v626_v32  ;;  %1197 = vrsqrt.f32 %v586_v43 }
 0x154   : > { %v1188_v34 = vpop.eup %1187  ;;  %v589_v61 = vadd.f32 1e-05, %v576_v49  ;;  %v577_v13 = vmul.f32 0.03125, %v564_v63 }
 0x155   : > { %1082 = vmatmul.mubr.msk.bf16.vlgmr.msra.gmra.mrb[0].mxu0 %vm446_vm0, %v657_v27  ;;  %v1190_v36 = vpop.eup %1189  ;;  %v609_v21 = vmul.f32 %v1188_v34, %v1411_v44  ;;  %v647_v40 = vadd.f32 %v1554_v20, %v627_v31 }
 0x156   : > { %1085 = vmatprep.mubr.msk.bf16.mxu0 %vm1214_vm1, %v1213_v41  ;;  %1110 = vmatpush3.bf16.msra.mxu0 %v1488_v51  ;;  %v608_v45 = vmul.f32 %v1190_v36, %v1407_v42  ;;  %1199 = vrsqrt.f32 %v589_v61  ;;  %v590_v30 = vadd.f32 1e-05, %v577_v13 }
 0x157   : > { %1111 = vmatprep.subr.bf16.mxu0 %v1213_v41  ;;  %v658_v52 = vpack.c.bf16 %v647_v40, %v646_v48  ;;  %v629_v51 = vmul.f32 %v1546_v57, %v609_v21  ;;  %1201 = vrsqrt.f32 %v588_v3  ;;  %v821_v48 = vld [vmem:[%s1739_s7 + $0x78] sm:$0xff] }
 0x158   : > { %v1192_v44 = vpop.eup %1191  ;;  %v628_v58 = vmul.f32 %v1546_v57, %v608_v45  ;;  %1203 = vrsqrt.f32 %v590_v30 }
 0x159   : > { %v1194_v42 = vpop.eup %1193  ;;  %v649_v1 = vadd.f32 %v1554_v20, %v629_v51 }
 0x15a   : > { %1112 = vmatpush3.bf16.msra.mxu0 %v1498_v55  ;;  %v611_v55 = vmul.f32 %v1192_v44, %v1423_v56  ;;  %v610_v7 = vmul.f32 %v1194_v42, %v1419_v54  ;;  %v648_v9 = vadd.f32 %v1554_v20, %v628_v58 }
 0x15b   : > { %1113 = vmatprep.subr.bf16.mxu0 %v1213_v41 }
 0x15c   : > { %v659_v14 = vpack.c.bf16 %v649_v1, %v648_v9  ;;  %v631_v15 = vmul.f32 %v1546_v57, %v611_v55  ;;  %v1196_v56 = vpop.eup %1195 }
 0x15d   : > { %1086 = vmatmul.mubr.msk.bf16.gmra.mrb[4].mxu0 %vm446_vm0, %v658_v52  ;;  %v1198_v18 = vpop.eup %1197  ;;  %v613_v54 = vmul.f32 %v1196_v56, %v1435_v4  ;;  %v1641_v52 = vld [vmem:[%s1738_s6] ss:$0 sm:$0xff] }
 0x15e   : > { %1089 = vmatprep.mubr.msk.bf16.mxu0 %vm1214_vm1, %v1213_v41  ;;  %1114 = vmatpush3.bf16.msra.mxu0 %v1508_v60  ;;  %v630_v60 = vmul.f32 %v1546_v57, %v610_v7  ;;  %v612_v23 = vmul.f32 %v1198_v18, %v1431_v2 }
 0x15f   : > { %1115 = vmatprep.subr.bf16.mxu0 %v1213_v41  ;;  %v633_v26 = vmul.f32 %v1546_v57, %v613_v54 }
 0x160   : > { %v650_v24 = vadd.f32 %v1554_v20, %v630_v60  ;;  %v1200_v27 = vpop.eup %1199  ;;  %v632_v4 = vmul.f32 %v1546_v57, %v612_v23 }
 0x161   : > { %v615_v2 = vmul.f32 %v1200_v27, %v1447_v19  ;;  %v653_v31 = vadd.f32 %v1554_v20, %v633_v26 }
 0x162   : > { %1116 = vmatpush3.bf16.msra.mxu0 %v1518_v0  ;;  %v651_v0 = vadd.f32 %v1554_v20, %v631_v15  ;;  %v652_v34 = vadd.f32 %v1554_v20, %v632_v4 }
 0x163   : > { %1117 = vmatprep.subr.bf16.mxu0 %v1213_v41  ;;  %v635_v32 = vmul.f32 %v1546_v57, %v615_v2 }
 0x164   : > { %v660_v25 = vpack.c.bf16 %v651_v0, %v650_v24  ;;  %v661_v35 = vpack.c.bf16 %v653_v31, %v652_v34 }
 0x165   : > { %1090 = vmatmul.mubr.msk.bf16.gmra.mrb[8].mxu0 %vm446_vm0, %v659_v14  ;;  %v655_v19 = vadd.f32 %v1554_v20, %v635_v32 }
 0x166   : > { %1093 = vmatprep.mubr.msk.bf16.mxu0 %vm1214_vm1, %v1213_v41  ;;  %1118 = vmatpush3.bf16.msra.mxu0 %v1528_v6  ;;  %v1202_v6 = vpop.eup %1201 }
 0x167   : > { %1119 = vmatprep.subr.bf16.mxu0 %v1213_v41  ;;  %v1204_v36 = vpop.eup %1203 }
 0x168   : > { %v616_v21 = vmul.f32 %v1204_v36, %v1455_v29  ;;  %v818_v29 = vld [vmem:[%s1739_s7 + $0x60] sm:$0xff] }
 0x16a   : > { %1120 = vmatpush3.bf16.msra.mxu0 %v1538_v10  ;;  %v614_v10 = vmul.f32 %v1202_v6, %v1443_v17  ;;  %v636_v40 = vmul.f32 %v1546_v57, %v616_v21 }
 0x16b   : > { %1121 = vmatprep.subr.bf16.mxu0 %v1213_v41 }
 0x16c   : > { %v634_v37 = vmul.f32 %v1546_v57, %v614_v10  ;;  %v656_v43 = vadd.f32 %v1554_v20, %v636_v40  ;;  %v819_v57 = vld [vmem:[%s1739_s7 + $0x68] sm:$0xff] }
 0x16d   : > { %1094 = vmatmul.mubr.msk.bf16.gmra.mrb[12].mxu0 %vm446_vm0, %v660_v25  ;;  %v828_v46 = vpack.c.bf16 %v819_v57, %v818_v29 }
 0x16e   : > { %1097 = vmatprep.mubr.msk.bf16.mxu0 %vm1214_vm1, %v1213_v41  ;;  %v654_v39 = vadd.f32 %v1554_v20, %v634_v37  ;;  %v663_v45 = vpack.c.bf16 %v656_v43, %v656_v43  ;;  %v820_v20 = vld [vmem:[%s1739_s7 + $0x70] sm:$0xff] }
 0x16f   : > { %1122 = vmatpush3.bf16.msra.mxu0 %v828_v46  ;;  %1167 = vmatpush3.bf16.msra.mxu1 %v828_v46  ;;  %v829_v49 = vpack.c.bf16 %v821_v48, %v820_v20 }
 0x170   : > { %v662_v17 = vpack.c.bf16 %v655_v19, %v654_v39  ;;  %1123 = vmatprep.subr.bf16.mxu0 %v1213_v41  ;;  %1160 = vmatprep.subr.bf16.mxu1 %v1213_v41 }
 0x173   : > { %1124 = vmatpush3.bf16.msra.mxu0 %v829_v49  ;;  %1168 = vmatpush3.bf16.msra.mxu1 %v829_v49 }
 0x175   : > { %1098 = vmatmul.mubr.msk.bf16.gmra.mrb[16].mxu0 %vm446_vm0, %v661_v35 }
 0x176   : > { %1101 = vmatprep.mubr.msk.bf16.mxu0 %vm1214_vm1, %v1213_v41 }
 0x17d   : > { %1102 = vmatmul.mubr.msk.bf16.gmra.mrb[20].mxu0 %vm446_vm0, %v662_v17 }
 0x17e   : > { %1105 = vmatprep.mubr.msk.bf16.mxu0 %vm1214_vm1, %v1213_v41 }
 0x185   : > { %1106 = vmatmul.mubr.msk.bf16.gmra.mrb[24].mxu0 %vm446_vm0, %v663_v45 }
 0x186   : > { %1125 = vmatprep.mubr.msk.bf16.mxu0 %vm1214_vm1, %v1213_v41 }
 0x228   : > { %v732_v51 = vpop.f32.mrb[0].mxu0 }
 0x229   : > { %v733_v44 = vadd.f32 %v1641_v52, %v732_v51  ;;  %v1083_v53 = vpop.f32.mrb[1].mxu0 }
 0x22a   : > { %v735_v58 = vpop.f32.mrb[2].mxu0 }
 0x22b   : > { %v736_v42 = vadd.f32 %v1641_v52, %v735_v58  ;;  %v1084_v61 = vpop.f32.mrb[3].mxu0  ;;  %v786_v55 = vmax.f32 %v733_v44, 0.0 }
 0x22d   : > { %v787_v63 = vmax.f32 %v736_v42, 0.0 }
 0x22f   : > { %v799_v1 = vpack.c.bf16 %v787_v63, %v786_v55 }
 0x230   : > { %v740_v3 = vpop.f32.mrb[4].mxu0 }
 0x231   : > { %v741_v7 = vadd.f32 %v1641_v52, %v740_v3  ;;  %v1087_v9 = vpop.f32.mrb[5].mxu0  ;;  %1126 = vmatmul.mubr.bf16.vlgmr.msra.gmra.mrb[28].mxu0 %v799_v1 }
 0x232   : > { %v743_v13 = vpop.f32.mrb[6].mxu0 }
 0x233   : > { %v744_v14 = vadd.f32 %v1641_v52, %v743_v13  ;;  %v1088_v15 = vpop.f32.mrb[7].mxu0  ;;  %v788_v56 = vmax.f32 %v741_v7, 0.0  ;;  %v1669_v13 = vld [vmem:[%s1740_s8] ss:$0 sm:$0xff] }
 0x235   : > { %v789_v60 = vmax.f32 %v744_v14, 0.0 }
 0x237   : > { %v800_v18 = vpack.c.bf16 %v789_v60, %v788_v56 }
 0x238   : > { %v748_v30 = vpop.f32.mrb[8].mxu0 }
 0x239   : > { %v749_v54 = vadd.f32 %v1641_v52, %v748_v30  ;;  %v1091_v0 = vpop.f32.mrb[9].mxu0  ;;  %1130 = vmatmul.mubr.bf16.vlgmr.msra.gmra.mrb[0].mxu1 %v800_v18 }
 0x23a   : > { %v751_v23 = vpop.f32.mrb[10].mxu0  ;;  %1133 = vmatprep.mubr.msk.bf16.mxu1 %vm1214_vm1, %v1213_v41 }
 0x23b   : > { %v752_v24 = vadd.f32 %v1641_v52, %v751_v23  ;;  %v1092_v25 = vpop.f32.mrb[11].mxu0  ;;  %v790_v26 = vmax.f32 %v749_v54, 0.0 }
 0x23d   : > { %v791_v27 = vmax.f32 %v752_v24, 0.0 }
 0x23f   : > { %v801_v4 = vpack.c.bf16 %v791_v27, %v790_v26 }
 0x240   : > { %v756_v6 = vpop.f32.mrb[12].mxu0 }
 0x241   : > { %v757_v2 = vadd.f32 %v1641_v52, %v756_v6  ;;  %v1095_v31 = vpop.f32.mrb[13].mxu0  ;;  %1134 = vmatmul.mubr.bf16.gmra.mrb[4].mxu1 %v801_v4 }
 0x242   : > { %v759_v10 = vpop.f32.mrb[14].mxu0  ;;  %1137 = vmatprep.mubr.msk.bf16.mxu1 %vm1214_vm1, %v1213_v41 }
 0x243   : > { %v760_v34 = vadd.f32 %v1641_v52, %v759_v10  ;;  %v1096_v35 = vpop.f32.mrb[15].mxu0  ;;  %v792_v32 = vmax.f32 %v757_v2, 0.0 }
 0x245   : > { %v793_v36 = vmax.f32 %v760_v34, 0.0 }
 0x247   : > { %v802_v37 = vpack.c.bf16 %v793_v36, %v792_v32 }
 0x248   : > { %v764_v21 = vpop.f32.mrb[16].mxu0 }
 0x249   : > { %v765_v19 = vadd.f32 %v1641_v52, %v764_v21  ;;  %v1099_v39 = vpop.f32.mrb[17].mxu0  ;;  %1138 = vmatmul.mubr.bf16.gmra.mrb[8].mxu1 %v802_v37 }
 0x24a   : > { %v767_v17 = vpop.f32.mrb[18].mxu0  ;;  %1141 = vmatprep.mubr.msk.bf16.mxu1 %vm1214_vm1, %v1213_v41 }
 0x24b   : > { %v768_v40 = vadd.f32 %v1641_v52, %v767_v17  ;;  %v1100_v43 = vpop.f32.mrb[19].mxu0  ;;  %v794_v45 = vmax.f32 %v765_v19, 0.0 }
 0x24d   : > { %v795_v29 = vmax.f32 %v768_v40, 0.0 }
 0x24f   : > { %v803_v57 = vpack.c.bf16 %v795_v29, %v794_v45 }
 0x250   : > { %v772_v46 = vpop.f32.mrb[20].mxu0 }
 0x251   : > { %v773_v20 = vadd.f32 %v1641_v52, %v772_v46  ;;  %v1103_v48 = vpop.f32.mrb[21].mxu0  ;;  %1142 = vmatmul.mubr.bf16.gmra.mrb[12].mxu1 %v803_v57 }
 0x252   : > { %v775_v49 = vpop.f32.mrb[22].mxu0  ;;  %1145 = vmatprep.mubr.msk.bf16.mxu1 %vm1214_vm1, %v1213_v41 }
 0x253   : > { %v776_v51 = vadd.f32 %v1641_v52, %v775_v49  ;;  %v1104_v44 = vpop.f32.mrb[23].mxu0  ;;  %v796_v53 = vmax.f32 %v773_v20, 0.0 }
 0x255   : > { %v797_v58 = vmax.f32 %v776_v51, 0.0 }
 0x257   : > { %v804_v42 = vpack.c.bf16 %v797_v58, %v796_v53 }
 0x258   : > { %v780_v61 = vpop.f32.mrb[24].mxu0 }
 0x259   : > { %v781_v55 = vadd.f32 %v1641_v52, %v780_v61  ;;  %v1107_v63 = vpop.f32.mrb[25].mxu0  ;;  %1146 = vmatmul.mubr.bf16.gmra.mrb[16].mxu1 %v804_v42 }
 0x25a   : > { %v783_v1 = vpop.f32.mrb[26].mxu0  ;;  %1149 = vmatprep.mubr.msk.bf16.mxu1 %vm1214_vm1, %v1213_v41 }
 0x25b   : > { %v798_v3 = vmax.f32 %v781_v55, 0.0  ;;  %v1108_v7 = vpop.f32.mrb[27].mxu0 }
 0x25d   : > { %v805_v9 = vpack.c.bf16 %v798_v3, %v798_v3 }
 0x261   : > { %1150 = vmatmul.mubr.bf16.gmra.mrb[20].mxu1 %v805_v9 }
 0x304   : > { %v871_v14 = vpop.f32.mrb[28].mxu0 }
 0x305   : > { %v872_v15 = vadd.f32 %v1669_v13, %v871_v14  ;;  %v1127_v56 = vpop.f32.mrb[29].mxu0 }
 0x306   : > { %v874_v41 = vpop.f32.mrb[30].mxu0 }
 0x307   : > { %v925_v52 = vadd.f32 %v872_v15, %v1302_v11  ;;  %v875_v60 = vadd.f32 %v1669_v13, %v874_v41  ;;  %v1128_v18 = vpop.f32.mrb[31].mxu0 }
 0x309   : > { %938 = vst.msk [vmem:[%s1676_s15] sm:$0xff] %vm446_vm0, %v925_v52  ;;  %v926_v30 = vadd.f32 %v875_v60, %v1314_v22 }
 0x30b   : > { %939 = vst.msk [vmem:[%s1676_s15 + $0x8] sm:$0xff] %vm446_vm0, %v926_v30 }
 0x30c   : > { %v879_v54 = vpop.f32.mrb[0].mxu1 }
 0x30d   : > { %v880_v0 = vadd.f32 %v1669_v13, %v879_v54  ;;  %v1131_v23 = vpop.f32.mrb[1].mxu1 }
 0x30e   : > { %v882_v24 = vpop.f32.mrb[2].mxu1 }
 0x30f   : > { %v927_v25 = vadd.f32 %v880_v0, %v1307_v16  ;;  %v883_v11 = vadd.f32 %v1669_v13, %v882_v24  ;;  %v1132_v26 = vpop.f32.mrb[3].mxu1 }
 0x311   : > { %940 = vst.msk [vmem:[%s1676_s15 + $0x10] sm:$0xff] %vm446_vm0, %v927_v25  ;;  %v928_v27 = vadd.f32 %v883_v11, %v1321_v28 }
 0x313   : > { %941 = vst.msk [vmem:[%s1676_s15 + $0x18] sm:$0xff] %vm446_vm0, %v928_v27 }
 0x314   : > { %v887_v22 = vpop.f32.mrb[4].mxu1 }
 0x315   : > { %v888_v4 = vadd.f32 %v1669_v13, %v887_v22  ;;  %v1135_v6 = vpop.f32.mrb[5].mxu1 }
 0x316   : > { %v890_v2 = vpop.f32.mrb[6].mxu1 }
 0x317   : > { %v929_v31 = vadd.f32 %v888_v4, %v1327_v33  ;;  %v891_v16 = vadd.f32 %v1669_v13, %v890_v2  ;;  %v1136_v10 = vpop.f32.mrb[7].mxu1 }
 0x319   : > { %942 = vst.msk [vmem:[%s1676_s15 + $0x20] sm:$0xff] %vm446_vm0, %v929_v31  ;;  %v930_v34 = vadd.f32 %v891_v16, %v1333_v38 }
 0x31b   : > { %943 = vst.msk [vmem:[%s1676_s15 + $0x28] sm:$0xff] %vm446_vm0, %v930_v34 }
 0x31c   : > { %v895_v28 = vpop.f32.mrb[8].mxu1 }
 0x31d   : > { %v896_v35 = vadd.f32 %v1669_v13, %v895_v28  ;;  %v1139_v32 = vpop.f32.mrb[9].mxu1 }
 0x31e   : > { %v898_v36 = vpop.f32.mrb[10].mxu1 }
 0x31f   : > { %v931_v37 = vadd.f32 %v896_v35, %v1343_v47  ;;  %v899_v33 = vadd.f32 %v1669_v13, %v898_v36  ;;  %v1140_v21 = vpop.f32.mrb[11].mxu1 }
 0x321   : > { %944 = vst.msk [vmem:[%s1676_s15 + $0x30] sm:$0xff] %vm446_vm0, %v931_v37  ;;  %v932_v19 = vadd.f32 %v899_v33, %v1347_v50 }
 0x323   : > { %945 = vst.msk [vmem:[%s1676_s15 + $0x38] sm:$0xff] %vm446_vm0, %v932_v19 }
 0x324   : > { %v903_v38 = vpop.f32.mrb[12].mxu1 }
 0x325   : > { %v904_v39 = vadd.f32 %v1669_v13, %v903_v38  ;;  %v1143_v17 = vpop.f32.mrb[13].mxu1 }
 0x326   : > { %v906_v40 = vpop.f32.mrb[14].mxu1 }
 0x327   : > { %v933_v43 = vadd.f32 %v904_v39, %v1357_v59  ;;  %v907_v47 = vadd.f32 %v1669_v13, %v906_v40  ;;  %v1144_v45 = vpop.f32.mrb[15].mxu1 }
 0x329   : > { %946 = vst.msk [vmem:[%s1676_s15 + $0x40] sm:$0xff] %vm446_vm0, %v933_v43  ;;  %v934_v29 = vadd.f32 %v907_v47, %v1361_v62 }
 0x32b   : > { %947 = vst.msk [vmem:[%s1676_s15 + $0x48] sm:$0xff] %vm446_vm0, %v934_v29 }
 0x32c   : > { %v911_v50 = vpop.f32.mrb[16].mxu1 }
 0x32d   : > { %v912_v57 = vadd.f32 %v1669_v13, %v911_v50  ;;  %v1147_v46 = vpop.f32.mrb[17].mxu1 }
 0x32e   : > { %v914_v20 = vpop.f32.mrb[18].mxu1 }
 0x32f   : > { %v935_v48 = vadd.f32 %v912_v57, %v1369_v5  ;;  %v915_v49 = vadd.f32 %v1669_v13, %v914_v20  ;;  %v1148_v59 = vpop.f32.mrb[19].mxu1 }
 0x331   : > { %948 = vst.msk [vmem:[%s1676_s15 + $0x50] sm:$0xff] %vm446_vm0, %v935_v48  ;;  %v936_v51 = vadd.f32 %v915_v49, %v1373_v8 }
 0x333   : > { %949 = vst.msk [vmem:[%s1676_s15 + $0x58] sm:$0xff] %vm446_vm0, %v936_v51 }
 0x334   : > { %v919_v62 = vpop.f32.mrb[20].mxu1 }
 0x335   : > { %v920_v44 = vadd.f32 %v1669_v13, %v919_v62  ;;  %v1151_v53 = vpop.f32.mrb[21].mxu1 }
 0x336   : > { %v922_v58 = vpop.f32.mrb[22].mxu1 }
 0x337   : > { %v937_v42 = vadd.f32 %v920_v44, %v1378_v12  ;;  %v1152_v61 = vpop.f32.mrb[23].mxu1 }
 0x339   : > { %950 = vst.msk [vmem:[%s1676_s15 + $0x60] sm:$0xff] %vm446_vm0, %v937_v42 }
 0x33a PF: > { %s19_s30 = sadd.s32 1, %s1211_s30  }
 0x33b   : > { %p16_p4 = scmp.ge.s32.totalorder %s19_s30, 4  }
 0x33d   :  { %18 = sbr.rel (!%p16_p4) target bundleno = 1 (0x1), region = 92 }

// kernel: lrt_forward.10
= control target key start
LH: loop header
LB: loop body
LE: loop exit
PB: predicated region body
PF: predicated region fallthrough
CT: control target
= control target key end

     0   :  { %s5495_s21 = smov 0   ;;  %s6909_s0 = inlined_call_operand.vmem [shape: f32[2,16,25,8], index: 0, kind: input, shape index: {}]   ;;  %s6910_s1 = inlined_call_operand.vmem [shape: f32[2,16,25,8], index: 1, kind: input, shape index: {}]   ;;  %s6911_s2 = inlined_call_operand.vmem [shape: f32[2,16,25,8], index: 2, kind: input, shape index: {}]   ;;  %s6912_s3 = inlined_call_operand.vmem [shape: f32[16,25,25], index: 3, kind: input, shape index: {}]   ;;  %s6913_s4 = inlined_call_operand.vmem [shape: f32[4,8,32], index: 4, kind: input, shape index: {}]   ;;  %s6914_s5 = inlined_call_operand.vmem [shape: f32[1,32], index: 5, kind: input, shape index: {}]   ;;  %s6915_s6 = inlined_call_operand.vmem [shape: f32[2,4,25,32], index: 6, kind: output, shape index: {}]  }
   0x1 LB: > { %s4443_s22 = sadd.s32 4294967295, %s5457_s21   ;;  %p4447_p0 = scmp.ge.s32.totalorder %s5457_s21, 1  ;;  %s5457_s21 = sphi %s5495_s21, %s16_s21  }
   0x2   : > { %p232_p1 = scmp.lt.s32.totalorder %s5457_s21, 3 }
   0x4   : > { %p233_p2 = pnand %p4447_p0, %p232_p1 }
   0x5   : > { %p272_p3 = scmp.lt.s32.totalorder (!%p233_p2), %s4443_s22, 1  ;;  %vm637_vm0 = vcmask (!%p233_p2), 64512   ;;  %vm882_vm1 = vcmask (!%p233_p2), 203776   ;;  %vm892_vm2 = vcmask (!%p233_p2), 196608   ;;  %vm1074_vm3 = vcmask (!%p233_p2), 1043456  }
   0x6   : > { %236 = sbr.rel (%p233_p2) target bundleno = 3204 (0xc84), region = 44  ;;  %vm1075_vm4 = vcmask (!%p233_p2), 1044480   ;;  %vm4346_vm5 = vcmask (!%p233_p2), 261120   ;;  %vm4350_vm6 = vcmask (!%p233_p2), 253952  }
   0xd   : > { %s6917_s22 = smov (!%p272_p3, %s4443_s22), 1 }
   0xe   : > { %s5506_s23 = sshll.u32 %s6917_s22, 9  ;;  %s4561_s30 = sshll.u32 %s6917_s22, 7 }
   0xf   : > { %s5512_s26 = scalar_lea.vmem %s6910_s1, %s5506_s23  ;;  %s5518_s29 = scalar_lea.vmem %s6909_s0, %s5506_s23 }
  0x10   : > { %v421_v0 = vld [vmem:[%s5512_s26] sm:$0xff]  ;;  %v422_v1 = vld [vmem:[%s5512_s26 + $0x8] sm:$0xff]  ;;  %v423_v5 = vld [vmem:[%s5512_s26 + $0x10] sm:$0xff]  ;;  %s5770_s24 = scalar_lea.vmem %s6911_s2, %s5506_s23  ;;  %s6872_s11 = scalar_lea.vmem %s6915_s6, %s4561_s30 }
  0x11   : > { %v425_v2 = vld [vmem:[%s5512_s26 + $0x20] sm:$0xff]  ;;  %v621_v3 = vpack.c.bf16 %v422_v1, %v421_v0  ;;  %v426_v4 = vld [vmem:[%s5512_s26 + $0x28] sm:$0xff]  ;;  %v424_v6 = vld [vmem:[%s5512_s26 + $0x18] sm:$0x1] }
  0x12   : > { %v623_v7 = vpack.c.bf16 %v426_v4, %v425_v2  ;;  %v622_v8 = vpack.c.bf16 %v424_v6, %v423_v5  ;;  %v427_v9 = vld [vmem:[%s5512_s26 + $0x30] sm:$0xff]  ;;  %v428_v10 = vld [vmem:[%s5512_s26 + $0x38] sm:$0x1]  ;;  %v293_v11 = vld [vmem:[%s5518_s29] sm:$0xff] }
  0x13   : > { %5138 = vmatprep.subr.msk.bf16.mxu0 %vm637_vm0, %v621_v3  ;;  %v645_v12 = vsel %vm637_vm0, %v621_v3, 0  ;;  %v624_v13 = vpack.c.bf16 %v428_v10, %v427_v9  ;;  %v294_v14 = vld [vmem:[%s5518_s29 + $0x8] sm:$0xff]  ;;  %v357_v15 = vmul.f32 0.35355338, %v293_v11  ;;  %v297_v16 = vld [vmem:[%s5518_s29 + $0x20] sm:$0xff]  ;;  %v295_v27 = vld [vmem:[%s5518_s29 + $0x10] sm:$0xff] }
  0x14   : > { %v298_v17 = vld [vmem:[%s5518_s29 + $0x28] sm:$0xff]  ;;  %5140 = vmatprep.subr.msk.bf16.mxu1 %vm637_vm0, %v623_v7  ;;  %4739 = vmatpush3.bf16.xpose.msra.mxu0 %v645_v12  ;;  %v706_v18 = vsel %vm637_vm0, %v623_v7, 0  ;;  %v358_v19 = vmul.f32 0.35355338, %v294_v14  ;;  %v361_v20 = vmul.f32 0.35355338, %v297_v16 }
  0x15   : > { %4747 = vmatpush3.bf16.xpose.msra.mxu1 %v706_v18  ;;  %5139 = vmatprep.subr.msk.bf16.mxu0 %vm637_vm0, %v622_v8  ;;  %v362_v21 = vmul.f32 0.35355338, %v298_v17  ;;  %v429_v23 = vld [vmem:[%s5512_s26 + $0x40] sm:$0xff]  ;;  %v430_v25 = vld [vmem:[%s5512_s26 + $0x48] sm:$0xff]  ;;  %v296_v28 = vld [vmem:[%s5518_s29 + $0x18] sm:$0x1] }
  0x16   : > { %5141 = vmatprep.subr.msk.bf16.mxu1 %vm637_vm0, %v624_v13  ;;  %v613_v22 = vpack.c.bf16 %v358_v19, %v357_v15  ;;  %v433_v26 = vld [vmem:[%s5512_s26 + $0x60] sm:$0xff]  ;;  %v434_v29 = vld [vmem:[%s5512_s26 + $0x68] sm:$0xff]  ;;  %v648_v30 = vsel %vm637_vm0, %v622_v8, 0  ;;  %v299_v31 = vld [vmem:[%s5518_s29 + $0x30] sm:$0xff]  ;;  %v625_v33 = vpack.c.bf16 %v430_v25, %v429_v23  ;;  %v709_v34 = vsel %vm637_vm0, %v624_v13, 0 }
  0x17   : > { %v615_v24 = vpack.c.bf16 %v362_v21, %v361_v20  ;;  %v300_v32 = vld [vmem:[%s5518_s29 + $0x38] sm:$0x1]  ;;  %v627_v35 = vpack.c.bf16 %v434_v29, %v433_v26  ;;  %v359_v36 = vmul.f32 0.35355338, %v295_v27  ;;  %v360_v37 = vmul.f32 0.35355338, %v296_v28 }
  0x18   : > { %4742 = vmatprep.mubr.msk.bf16.mxu0 %vm637_vm0, %v613_v22  ;;  %v301_v38 = vld [vmem:[%s5518_s29 + $0x40] sm:$0xff]  ;;  %v302_v39 = vld [vmem:[%s5518_s29 + $0x48] sm:$0xff]  ;;  %v363_v40 = vmul.f32 0.35355338, %v299_v31  ;;  %v364_v41 = vmul.f32 0.35355338, %v300_v32 }
  0x19   : > { %4750 = vmatprep.mubr.msk.bf16.mxu1 %vm637_vm0, %v615_v24  ;;  %v305_v42 = vld [vmem:[%s5518_s29 + $0x60] sm:$0xff]  ;;  %v306_v43 = vld [vmem:[%s5518_s29 + $0x68] sm:$0xff]  ;;  %v432_v44 = vld [vmem:[%s5512_s26 + $0x58] sm:$0x1]  ;;  %v365_v46 = vmul.f32 0.35355338, %v301_v38  ;;  %v614_v49 = vpack.c.bf16 %v360_v37, %v359_v36 }
  0x1a   : > { %v431_v45 = vld [vmem:[%s5512_s26 + $0x50] sm:$0xff]  ;;  %v366_v47 = vmul.f32 0.35355338, %v302_v39  ;;  %v436_v50 = vld [vmem:[%s5512_s26 + $0x78] sm:$0x1]  ;;  %v616_v53 = vpack.c.bf16 %v364_v41, %v363_v40  ;;  %v767_v54 = vsel %vm637_vm0, %v625_v33, 0 }
  0x1b   : > { %v435_v48 = vld [vmem:[%s5512_s26 + $0x70] sm:$0xff]  ;;  %v369_v51 = vmul.f32 0.35355338, %v305_v42  ;;  %v370_v52 = vmul.f32 0.35355338, %v306_v43  ;;  %v626_v55 = vpack.c.bf16 %v432_v44, %v431_v45  ;;  %v828_v56 = vsel %vm637_vm0, %v627_v35, 0 }
  0x1c   : > { %4741 = vmatpush3.bf16.xpose.msra.mxu0 %v648_v30  ;;  %v617_v57 = vpack.c.bf16 %v366_v47, %v365_v46  ;;  %v628_v58 = vpack.c.bf16 %v436_v50, %v435_v48  ;;  %v303_v60 = vld [vmem:[%s5518_s29 + $0x50] sm:$0xff]  ;;  %v304_v61 = vld [vmem:[%s5518_s29 + $0x58] sm:$0x1]  ;;  %v553_v11 = vld [vmem:[%s6912_s3 + $0x20] sm:$0xff] }
  0x1d   : > { %4749 = vmatpush3.bf16.xpose.msra.mxu1 %v709_v34  ;;  %5142 = vmatprep.subr.msk.bf16.mxu0 %vm637_vm0, %v625_v33  ;;  %v619_v59 = vpack.c.bf16 %v370_v52, %v369_v51  ;;  %v770_v62 = vsel %vm637_vm0, %v626_v55, 0  ;;  %v307_v63 = vld [vmem:[%s5518_s29 + $0x70] sm:$0xff]  ;;  %v308_v0 = vld [vmem:[%s5518_s29 + $0x78] sm:$0x1]  ;;  %v367_v2 = vmul.f32 0.35355338, %v303_v60 }
  0x1e   : > { %5144 = vmatprep.subr.msk.bf16.mxu1 %vm637_vm0, %v627_v35  ;;  %v831_v1 = vsel %vm637_vm0, %v628_v58, 0  ;;  %v368_v3 = vmul.f32 0.35355338, %v304_v61  ;;  %v371_v4 = vmul.f32 0.35355338, %v307_v63  ;;  %v551_v8 = vld [vmem:[%s6912_s3 + $0x10] sm:$0xff] }
  0x1f   : > { %v372_v5 = vmul.f32 0.35355338, %v308_v0  ;;  %v555_v10 = vld [vmem:[%s6912_s3 + $0x30] sm:$0xff]  ;;  %v552_v16 = vld [vmem:[%s6912_s3 + $0x18] sm:$0x1]  ;;  %v549_v23 = vld [vmem:[%s6912_s3] sm:$0xff] }
  0x20   : > { %v618_v6 = vpack.c.bf16 %v368_v3, %v367_v2  ;;  %v556_v27 = vld [vmem:[%s6912_s3 + $0x38] sm:$0x1]  ;;  %v550_v30 = vld [vmem:[%s6912_s3 + $0x8] sm:$0xff]  ;;  %v559_v38 = vld [vmem:[%s6912_s3 + $0x50] sm:$0xff] }
  0x21   : > { %v620_v7 = vpack.c.bf16 %v372_v5, %v371_v4  ;;  %v554_v33 = vld [vmem:[%s6912_s3 + $0x28] sm:$0xff]  ;;  %v557_v40 = vld [vmem:[%s6912_s3 + $0x40] sm:$0xff]  ;;  %v560_v42 = vld [vmem:[%s6912_s3 + $0x58] sm:$0x1] }
  0x22   : > { %v561_v51 = vld [vmem:[%s6912_s3 + $0x60] sm:$0xff]  ;;  %v563_v63 = vld [vmem:[%s6912_s3 + $0x70] sm:$0xff]  ;;  %v564_v2 = vld [vmem:[%s6912_s3 + $0x78] sm:$0x1] }
  0x23   : > { %4743 = vmatmul.mubr.msk.bf16.vlgmr.msra.gmra.mrb[0].mxu0 %vm637_vm0, %v614_v49  ;;  %v558_v49 = vld [vmem:[%s6912_s3 + $0x48] sm:$0xff] }
  0x24   : > { %4751 = vmatmul.mubr.msk.bf16.vlgmr.msra.gmra.mrb[0].mxu1 %vm637_vm0, %v616_v53  ;;  %4755 = vmatpush3.bf16.xpose.msra.mxu0 %v767_v54 }
  0x25   : > { %5143 = vmatprep.subr.msk.bf16.mxu0 %vm637_vm0, %v626_v55  ;;  %4763 = vmatpush3.bf16.xpose.msra.mxu1 %v828_v56 }
  0x26   : > { %4758 = vmatprep.mubr.msk.bf16.mxu0 %vm637_vm0, %v617_v57  ;;  %5145 = vmatprep.subr.msk.bf16.mxu1 %vm637_vm0, %v628_v58  ;;  %v562_v57 = vld [vmem:[%s6912_s3 + $0x68] sm:$0xff] }
  0x27   : > { %4766 = vmatprep.mubr.msk.bf16.mxu1 %vm637_vm0, %v619_v59 }
  0x2c   : > { %4757 = vmatpush3.bf16.xpose.msra.mxu0 %v770_v62 }
  0x2d   : > { %4765 = vmatpush3.bf16.xpose.msra.mxu1 %v831_v1 }
  0x33   : > { %4759 = vmatmul.mubr.msk.bf16.vlgmr.msra.gmra.mrb[4].mxu0 %vm637_vm0, %v618_v6 }
  0x34   : > { %4767 = vmatmul.mubr.msk.bf16.vlgmr.msra.gmra.mrb[4].mxu1 %vm637_vm0, %v620_v7 }
  0xf6   : > { %v4744_v9 = vpop.f32.mrb[0].mxu0 }
  0xf7   : > { %v5585_v12 = vadd.f32 %v4744_v9, %v551_v8  ;;  %v4752_v13 = vpop.f32.mrb[0].mxu1  ;;  %v684_v14 = vpop.f32.mrb[1].mxu0 }
  0xf8   : > { %v745_v15 = vpop.f32.mrb[1].mxu1  ;;  %v4745_v17 = vpop.f32.mrb[2].mxu0  ;;  %v5590_v18 = vadd.f32 %v4752_v13, %v555_v10  ;;  %v5606_v28 = vadd.f32 %v684_v14, %v549_v23 }
  0xf9   : > { %v5592_v19 = vadd.f32 %v745_v15, %v553_v11  ;;  %v4753_v20 = vpop.f32.mrb[2].mxu1  ;;  %v687_v21 = vpop.f32.mrb[3].mxu0  ;;  %v889_v22 = vsel %vm882_vm1, %v5585_v12, -inf  ;;  %v5599_v25 = vadd.f32 %v4745_v17, %v552_v16 }
  0xfa   : > { %v748_v24 = vpop.f32.mrb[3].mxu1  ;;  %890 = vmax.xlane.f32.xlu0 %v889_v22  ;;  %v902_v29 = vsel %vm882_vm1, %v5590_v18, -inf  ;;  %v5613_v31 = vadd.f32 %v4753_v20, %v556_v27  ;;  %v5620_v34 = vadd.f32 %v687_v21, %v550_v30  ;;  %v883_v35 = vsel %vm882_vm1, %v5606_v28, -inf }
  0xfb   : > { %v896_v26 = vsel %vm882_vm1, %v5592_v19, -inf  ;;  %v893_v32 = vsel %vm892_vm2, %v5599_v25, -inf  ;;  %v5624_v36 = vadd.f32 %v748_v24, %v554_v33 }
  0xfc   : > { %897 = vmax.xlane.f32.xlu1 %v896_v26  ;;  %v905_v37 = vsel %vm892_vm2, %v5613_v31, -inf  ;;  %v886_v39 = vsel %vm882_vm1, %v5620_v34, -inf }
  0xfd   : > { %v899_v44 = vsel %vm882_vm1, %v5624_v36, -inf }
  0xfe   : > { %903 = vmax.xlane.f32.xlu0 %v902_v29 }
 0x100   : > { %894 = vmax.xlane.f32.xlu1 %v893_v32 }
 0x102   : > { %884 = vmax.xlane.f32.xlu0 %v883_v35 }
 0x104   : > { %906 = vmax.xlane.f32.xlu1 %v905_v37 }
 0x106   : > { %v4760_v41 = vpop.f32.mrb[4].mxu0  ;;  %887 = vmax.xlane.f32.xlu0 %v886_v39 }
 0x107   : > { %v5639_v43 = vadd.f32 %v4760_v41, %v559_v38  ;;  %v806_v45 = vpop.f32.mrb[5].mxu0  ;;  %v4768_v46 = vpop.f32.mrb[4].mxu1 }
 0x108   : > { %900 = vmax.xlane.f32.xlu1 %v899_v44  ;;  %v5643_v47 = vadd.f32 %v806_v45, %v557_v40  ;;  %v4761_v48 = vpop.f32.mrb[6].mxu0  ;;  %v867_v50 = vpop.f32.mrb[5].mxu1  ;;  %v5678_v3 = vadd.f32 %v4768_v46, %v563_v63 }
 0x109   : > { %v5651_v52 = vadd.f32 %v4761_v48, %v560_v42  ;;  %v809_v53 = vpop.f32.mrb[7].mxu0  ;;  %v914_v54 = vsel %vm882_vm1, %v5639_v43, -inf  ;;  %v4769_v55 = vpop.f32.mrb[6].mxu1  ;;  %v5662_v60 = vadd.f32 %v867_v50, %v561_v51 }
 0x10a   : > { %915 = vmax.xlane.f32.xlu0 %v914_v54  ;;  %v870_v56 = vpop.f32.mrb[7].mxu1  ;;  %v5658_v58 = vadd.f32 %v809_v53, %v558_v49  ;;  %v908_v61 = vsel %vm882_vm1, %v5643_v47, -inf  ;;  %v5682_v5 = vadd.f32 %v4769_v55, %v564_v2  ;;  %v926_v6 = vsel %vm882_vm1, %v5678_v3, -inf }
 0x10b   : > { %v917_v59 = vsel %vm892_vm2, %v5651_v52, -inf  ;;  %v5666_v62 = vadd.f32 %v870_v56, %v562_v57  ;;  %v920_v1 = vsel %vm882_vm1, %v5662_v60, -inf }
 0x10c   : > { %918 = vmax.xlane.f32.xlu1 %v917_v59  ;;  %v911_v0 = vsel %vm882_vm1, %v5658_v58, -inf  ;;  %v929_v7 = vsel %vm892_vm2, %v5682_v5, -inf }
 0x10d   : > { %v923_v4 = vsel %vm882_vm1, %v5666_v62, -inf }
 0x10e   : > { %909 = vmax.xlane.f32.xlu0 %v908_v61 }
 0x110   : > { %912 = vmax.xlane.f32.xlu1 %v911_v0 }
 0x112   : > { %921 = vmax.xlane.f32.xlu0 %v920_v1 }
 0x114   : > { %924 = vmax.xlane.f32.xlu1 %v923_v4 }
 0x116   : > { %927 = vmax.xlane.f32.xlu0 %v926_v6 }
 0x118   : > { %930 = vmax.xlane.f32.xlu1 %v929_v7 }
 0x187   : > { %v891_v8 = vpop.xlane.xlu0 %890 }
 0x188   : > { %v934_v9 = vsub.f32 %v5585_v12, %v891_v8 }
 0x189   : > { %v898_v10 = vpop.xlane.xlu1 %897 }
 0x18a   : > { %v952_v11 = vmul.f32 1.442695, %v934_v9  ;;  %v936_v15 = vsub.f32 %v5592_v19, %v898_v10 }
 0x18b   : > { %v904_v13 = vpop.xlane.xlu0 %903 }
 0x18c   : > { %5195 = vpow2.f32 %v952_v11  ;;  %v938_v14 = vsub.f32 %v5590_v18, %v904_v13  ;;  %v956_v24 = vmul.f32 1.442695, %v936_v15 }
 0x18d   : > { %v895_v16 = vpop.xlane.xlu1 %894 }
 0x18e   : > { %v960_v17 = vmul.f32 1.442695, %v938_v14  ;;  %v935_v20 = vsub.f32 %v5599_v25, %v895_v16 }
 0x18f   : > { %v885_v21 = vpop.xlane.xlu0 %884 }
 0x190   : > { %5197 = vpow2.f32 %v960_v17  ;;  %v954_v22 = vmul.f32 1.442695, %v935_v20  ;;  %v932_v23 = vsub.f32 %v5606_v28, %v885_v21 }
 0x191   : > { %v907_v26 = vpop.xlane.xlu1 %906 }
 0x192   : > { %5199 = vpow2.f32 %v954_v22  ;;  %v948_v12 = vmul.f32 1.442695, %v932_v23  ;;  %v939_v27 = vsub.f32 %v5613_v31, %v907_v26 }
 0x193   : > { %v888_v29 = vpop.xlane.xlu0 %887 }
 0x194   : > { %5201 = vpow2.f32 %v948_v12  ;;  %v962_v18 = vmul.f32 1.442695, %v939_v27  ;;  %v933_v19 = vsub.f32 %v5620_v34, %v888_v29  ;;  %v485_v12 = vld [vmem:[%s5770_s24] sm:$0xff]  ;;  %v486_v27 = vld [vmem:[%s5770_s24 + $0x8] sm:$0xff] }
 0x195   : > { %5203 = vpow2.f32 %v956_v24  ;;  %v901_v30 = vpop.xlane.xlu1 %900 }
 0x196   : > { %v5695_v32 = vpop.eup %5195  ;;  %5205 = vpow2.f32 %v962_v18  ;;  %v950_v25 = vmul.f32 1.442695, %v933_v19  ;;  %v937_v33 = vsub.f32 %v5624_v36, %v901_v30  ;;  %v629_v18 = vpack.c.bf16 %v486_v27, %v485_v12  ;;  %v487_v19 = vld [vmem:[%s5770_s24 + $0x10] sm:$0xff]  ;;  %v488_v30 = vld [vmem:[%s5770_s24 + $0x18] sm:$0x1] }
 0x197   : > { %v916_v28 = vpop.xlane.xlu0 %915  ;;  %v986_v35 = vsel %vm882_vm1, %v5695_v32, 0.0  ;;  %v499_v12 = vld [vmem:[%s5770_s24 + $0x70] sm:$0xff]  ;;  %v500_v27 = vld [vmem:[%s5770_s24 + $0x78] sm:$0x1] }
 0x198   : > { %5207 = vpow2.f32 %v950_v25  ;;  %v958_v37 = vmul.f32 1.442695, %v937_v33  ;;  %v942_v31 = vsub.f32 %v5639_v43, %v916_v28  ;;  %987 = vadd.xlane.f32.xlu0 %v986_v35  ;;  %4770 = vmatprep.subr.bf16.mxu0 %v629_v18  ;;  %v630_v25 = vpack.c.bf16 %v488_v30, %v487_v19 }
 0x199   : > { %v919_v38 = vpop.xlane.xlu1 %918  ;;  %v5459_v33 = vmov 65535   ;;  %4771 = vmatpush3.bf16.msra.mxu0 %v629_v18 }
 0x19a   : > { %v5701_v39 = vpop.eup %5197  ;;  %v968_v34 = vmul.f32 1.442695, %v942_v31  ;;  %v943_v40 = vsub.f32 %v5651_v52, %v919_v38  ;;  %5209 = vpow2.f32 %v958_v37  ;;  %v1076_v28 = vsel %vm1074_vm3, 4294967295, %v5459_v33  ;;  %v489_v31 = vld [vmem:[%s5770_s24 + $0x20] sm:$0xff]  ;;  %v490_v38 = vld [vmem:[%s5770_s24 + $0x28] sm:$0xff] }
 0x19b   : > { %v910_v41 = vpop.xlane.xlu0 %909  ;;  %v998_v36 = vsel %vm882_vm1, %v5701_v39, 0.0  ;;  %v5779_v35 = vsel %vm1075_vm4, %v1076_v28, 0 }
 0x19c   : > { %v5706_v42 = vpop.eup %5199  ;;  %5211 = vpow2.f32 %v968_v34  ;;  %v970_v44 = vmul.f32 1.442695, %v943_v40  ;;  %v940_v45 = vsub.f32 %v5643_v47, %v910_v41  ;;  %999 = vadd.xlane.f32.xlu0 %v998_v36  ;;  %v1079_v37 = vand.u32 %v5779_v35, %v630_v25  ;;  %v491_v40 = vld [vmem:[%s5770_s24 + $0x30] sm:$0xff]  ;;  %v492_v41 = vld [vmem:[%s5770_s24 + $0x38] sm:$0x1]  ;;  %v493_v36 = vld [vmem:[%s5770_s24 + $0x40] sm:$0xff] }
 0x19d   : > { %v989_v43 = vsel %vm892_vm2, %v5706_v42, 0.0  ;;  %v913_v46 = vpop.xlane.xlu1 %912  ;;  %v631_v34 = vpack.c.bf16 %v490_v38, %v489_v31  ;;  %v437_v38 = vld [vmem:[%s5512_s26 + $0x80] sm:$0xff] }
 0x19e   : > { %v5711_v48 = vpop.eup %5201  ;;  %v964_v49 = vmul.f32 1.442695, %v940_v45  ;;  %990 = vadd.xlane.f32.xlu1 %v989_v43  ;;  %v941_v50 = vsub.f32 %v5658_v58, %v913_v46  ;;  %5213 = vpow2.f32 %v970_v44  ;;  %4772 = vmatprep.subr.bf16.mxu0 %v1079_v37  ;;  %v494_v44 = vld [vmem:[%s5770_s24 + $0x48] sm:$0xff]  ;;  %v632_v45 = vpack.c.bf16 %v492_v41, %v491_v40 }
 0x19f   : > { %v5714_v51 = vpop.eup %5203  ;;  %v922_v52 = vpop.xlane.xlu0 %921  ;;  %v980_v53 = vsel %vm882_vm1, %v5711_v48, 0.0  ;;  %4773 = vmatpush3.bf16.msra.mxu0 %v1079_v37  ;;  %4778 = vmatprep.subr.bf16.mxu1 %v631_v34  ;;  %v5788_v43 = vpack.c.bf16 %v494_v44, %v493_v36  ;;  %v309_v44 = vld [vmem:[%s5518_s29 + $0x80] sm:$0xff] }
 0x1a0   : > { %v5718_v54 = vpop.eup %5205  ;;  %5215 = vpow2.f32 %v964_v49  ;;  %v966_v47 = vmul.f32 1.442695, %v941_v50  ;;  %v944_v55 = vsub.f32 %v5662_v60, %v922_v52  ;;  %981 = vadd.xlane.f32.xlu0 %v980_v53  ;;  %v992_v0 = vsel %vm882_vm1, %v5714_v51, 0.0  ;;  %4779 = vmatpush3.bf16.msra.mxu1 %v631_v34  ;;  %v497_v49 = vld [vmem:[%s5770_s24 + $0x60] sm:$0xff]  ;;  %v498_v50 = vld [vmem:[%s5770_s24 + $0x68] sm:$0xff] }
 0x1a1   : > { %v1001_v56 = vsel %vm892_vm2, %v5718_v54, 0.0  ;;  %v925_v57 = vpop.xlane.xlu1 %924  ;;  %v1137_v46 = vand.u32 %v5779_v35, %v632_v45  ;;  %4786 = vmatprep.subr.bf16.mxu0 %v5788_v43  ;;  %v5794_v52 = vpack.c.bf16 %v498_v50, %v497_v49  ;;  %v438_v34 = vld [vmem:[%s5512_s26 + $0x88] sm:$0xff] }
 0x1a2   : > { %v5723_v59 = vpop.eup %5207  ;;  %v972_v58 = vmul.f32 1.442695, %v944_v55  ;;  %1002 = vadd.xlane.f32.xlu1 %v1001_v56  ;;  %v945_v61 = vsub.f32 %v5666_v62, %v925_v57  ;;  %5217 = vpow2.f32 %v966_v47  ;;  %v442_v49 = vld [vmem:[%s5512_s26 + $0xa8] sm:$0xff] }
 0x1a3   : > { %v928_v63 = vpop.xlane.xlu0 %927  ;;  %v983_v1 = vsel %vm882_vm1, %v5723_v59, 0.0  ;;  %4780 = vmatprep.subr.bf16.mxu1 %v1137_v46 }
 0x1a4   : > { %5219 = vpow2.f32 %v972_v58  ;;  %v974_v60 = vmul.f32 1.442695, %v945_v61  ;;  %v946_v2 = vsub.f32 %v5678_v3, %v928_v63  ;;  %993 = vadd.xlane.f32.xlu0 %v992_v0  ;;  %v5731_v4 = vpop.eup %5209  ;;  %4781 = vmatpush3.bf16.msra.mxu1 %v1137_v46 }
 0x1a5   : > { %v931_v6 = vpop.xlane.xlu1 %930  ;;  %v995_v3 = vsel %vm882_vm1, %v5731_v4, 0.0  ;;  %4794 = vmatprep.subr.bf16.mxu1 %v5794_v52 }
 0x1a6   : > { %v5733_v7 = vpop.eup %5211  ;;  %v976_v8 = vmul.f32 1.442695, %v946_v2  ;;  %v947_v62 = vsub.f32 %v5682_v5, %v931_v6  ;;  %984 = vadd.xlane.f32.xlu1 %v983_v1  ;;  %5221 = vpow2.f32 %v974_v60  ;;  %v495_v60 = vld [vmem:[%s5770_s24 + $0x50] sm:$0xff]  ;;  %v496_v2 = vld [vmem:[%s5770_s24 + $0x58] sm:$0x1] }
 0x1a7   : > { %v1010_v9 = vsel %vm882_vm1, %v5733_v7, 0.0 }
 0x1a8   : > { %5223 = vpow2.f32 %v976_v8  ;;  %v978_v10 = vmul.f32 1.442695, %v947_v62  ;;  %1011 = vadd.xlane.f32.xlu0 %v1010_v9  ;;  %v5738_v11 = vpop.eup %5213 }
 0x1a9   : > { %v1013_v15 = vsel %vm892_vm2, %v5738_v11, 0.0 }
 0x1aa   : > { %v5742_v13 = vpop.eup %5215  ;;  %996 = vadd.xlane.f32.xlu1 %v995_v3  ;;  %5225 = vpow2.f32 %v978_v10  ;;  %v634_v3 = vpack.c.bf16 %v496_v2, %v495_v60 }
 0x1ab   : > { %v1004_v14 = vsel %vm882_vm1, %v5742_v13, 0.0 }
 0x1ac   : > { %1005 = vadd.xlane.f32.xlu0 %v1004_v14  ;;  %v5746_v5 = vpop.eup %5217 }
 0x1ad   : > { %v1007_v21 = vsel %vm882_vm1, %v5746_v5, 0.0 }
 0x1ae   : > { %v5750_v16 = vpop.eup %5219  ;;  %1014 = vadd.xlane.f32.xlu1 %v1013_v15 }
 0x1af   : > { %v1016_v17 = vsel %vm882_vm1, %v5750_v16, 0.0 }
 0x1b0   : > { %1017 = vadd.xlane.f32.xlu0 %v1016_v17  ;;  %v5754_v20 = vpop.eup %5221 }
 0x1b1   : > { %v1019_v24 = vsel %vm882_vm1, %v5754_v20, 0.0 }
 0x1b2   : > { %v5758_v22 = vpop.eup %5223  ;;  %1008 = vadd.xlane.f32.xlu1 %v1007_v21 }
 0x1b3   : > { %v1022_v23 = vsel %vm882_vm1, %v5758_v22, 0.0 }
 0x1b4   : > { %1023 = vadd.xlane.f32.xlu0 %v1022_v23  ;;  %v5764_v26 = vpop.eup %5225 }
 0x1b5   : > { %v1025_v29 = vsel %vm892_vm2, %v5764_v26, 0.0 }
 0x1b6   : > { %1020 = vadd.xlane.f32.xlu1 %v1019_v24 }
 0x1ba   : > { %1026 = vadd.xlane.f32.xlu1 %v1025_v29 }
 0x225   : > { %v988_v53 = vpop.xlane.xlu0 %987 }
 0x229   : > { %v1000_v47 = vpop.xlane.xlu0 %999 }
 0x22b   : > { %v991_v55 = vpop.xlane.xlu1 %990 }
 0x22c   : > { %5227 = vrcp.f32 %v991_v55 }
 0x22d   : > { %v982_v56 = vpop.xlane.xlu0 %981 }
 0x22e   : > { %5229 = vrcp.f32 %v982_v56 }
 0x22f   : > { %v1003_v57 = vpop.xlane.xlu1 %1002  ;;  %5231 = vrcp.f32 %v988_v53  ;;  %v373_v53 = vmul.f32 0.35355338, %v309_v44  ;;  %v321_v44 = vld [vmem:[%s5518_s29 + $0xe0] sm:$0xff] }
 0x231   : > { %v994_v58 = vpop.xlane.xlu0 %993 }
 0x233   : > { %v985_v61 = vpop.xlane.xlu1 %984 }
 0x234   : > { %5233 = vrcp.f32 %v985_v61 }
 0x235   : > { %5235 = vrcp.f32 %v1003_v57  ;;  %v1012_v63 = vpop.xlane.xlu0 %1011 }
 0x236   : > { %5237 = vrcp.f32 %v994_v58  ;;  %v5228_v6 = vpop.eup %5227 }
 0x237   : > { %5239 = vrcp.f32 %v1000_v47  ;;  %v997_v0 = vpop.xlane.xlu1 %996  ;;  %v1047_v15 = vmul.f32 %v5228_v6, %v5706_v42  ;;  %v1195_v42 = vand.u32 %v5779_v35, %v634_v3  ;;  %v313_v6 = vld [vmem:[%s5518_s29 + $0xa0] sm:$0xff] }
 0x238   : > { %5241 = vrcp.f32 %v997_v0  ;;  %v5230_v62 = vpop.eup %5229  ;;  %v377_v3 = vmul.f32 0.35355338, %v313_v6  ;;  %v324_v6 = vld [vmem:[%s5518_s29 + $0xf8] sm:$0x1] }
 0x239   : > { %v1006_v1 = vpop.xlane.xlu0 %1005  ;;  %v5232_v9 = vpop.eup %5231  ;;  %v1044_v23 = vmul.f32 %v5230_v62, %v5711_v48  ;;  %v636_v48 = vpack.c.bf16 %v500_v27, %v499_v12  ;;  %v446_v12 = vld [vmem:[%s5512_s26 + $0xc8] sm:$0xff] }
 0x23a   : > { %v1046_v18 = vmul.f32 %v5232_v9, %v5695_v32 }
 0x23b   : > { %v1015_v8 = vpop.xlane.xlu1 %1014  ;;  %v1253_v36 = vand.u32 %v5779_v35, %v636_v48 }
 0x23c   : > { %5243 = vrcp.f32 %v1015_v8  ;;  %v1061_v28 = vpack.c.bf16 %v1047_v15, %v1046_v18  ;;  %v314_v8 = vld [vmem:[%s5518_s29 + $0xa8] sm:$0xff] }
 0x23d   : > { %v1018_v10 = vpop.xlane.xlu0 %1017  ;;  %5245 = vrcp.f32 %v1006_v1  ;;  %v439_v1 = vld [vmem:[%s5512_s26 + $0x90] sm:$0xff] }
 0x23e   : > { %v5234_v14 = vpop.eup %5233  ;;  %5247 = vrcp.f32 %v1012_v63 }
 0x23f   : > { %v5236_v17 = vpop.eup %5235  ;;  %v1009_v21 = vpop.xlane.xlu1 %1008  ;;  %v1045_v24 = vmul.f32 %v5234_v14, %v5723_v59  ;;  %v378_v14 = vmul.f32 0.35355338, %v314_v8 }
 0x240   : > { %v5238_v29 = vpop.eup %5237  ;;  %5249 = vrcp.f32 %v1009_v21  ;;  %v1051_v33 = vmul.f32 %v5236_v17, %v5718_v54  ;;  %v443_v21 = vld [vmem:[%s5512_s26 + $0xb0] sm:$0xff] }
 0x241   : > { %v5240_v19 = vpop.eup %5239  ;;  %v1060_v30 = vpack.c.bf16 %v1045_v24, %v1044_v23  ;;  %5251 = vrcp.f32 %v1018_v10  ;;  %v1024_v37 = vpop.xlane.xlu0 %1023  ;;  %v1048_v32 = vmul.f32 %v5238_v29, %v5714_v51  ;;  %v1322_v51 = vpack.c.bf16 %v438_v34, %v437_v38  ;;  %v444_v23 = vld [vmem:[%s5512_s26 + $0xb8] sm:$0x1]  ;;  %v445_v24 = vld [vmem:[%s5512_s26 + $0xc0] sm:$0xff]  ;;  %v315_v38 = vld [vmem:[%s5518_s29 + $0xb0] sm:$0xff] }
 0x242   : > { %v5242_v25 = vpop.eup %5241  ;;  %v1050_v40 = vmul.f32 %v5240_v19, %v5701_v39  ;;  %v441_v39 = vld [vmem:[%s5512_s26 + $0xa0] sm:$0xff]  ;;  %v1316_v27 = vpack.c.bf16 %v378_v14, %v377_v3  ;;  %v1325_v19 = vpack.c.bf16 %v444_v23, %v443_v21  ;;  %v316_v34 = vld [vmem:[%s5518_s29 + $0xb8] sm:$0x1] }
 0x243   : > { %v1021_v59 = vpop.xlane.xlu1 %1020  ;;  %4774 = vmatprep.mubr.msk.bf16.mxu0 %vm882_vm1, %v1060_v30  ;;  %v1049_v31 = vmul.f32 %v5242_v25, %v5731_v4  ;;  %v310_v4 = vld [vmem:[%s5518_s29 + $0x88] sm:$0xff]  ;;  %v1324_v57 = vpack.c.bf16 %v442_v49, %v441_v39  ;;  %v311_v30 = vld [vmem:[%s5518_s29 + $0x90] sm:$0xff]  ;;  %v317_v25 = vld [vmem:[%s5518_s29 + $0xc0] sm:$0xff]  ;;  %v379_v39 = vmul.f32 0.35355338, %v315_v38 }
 0x244   : > { %5253 = vrcp.f32 %v1021_v59  ;;  %4775 = vmatmul.mubr.msk.bf16.vlgmr.msra.gmra.mrb[8].mxu0 %vm882_vm1, %v1061_v28  ;;  %v1063_v41 = vpack.c.bf16 %v1051_v33, %v1050_v40  ;;  %v374_v47 = vmul.f32 0.35355338, %v310_v4  ;;  %v318_v33 = vld [vmem:[%s5518_s29 + $0xc8] sm:$0xff]  ;;  %v375_v28 = vmul.f32 0.35355338, %v311_v30  ;;  %v447_v40 = vld [vmem:[%s5512_s26 + $0xd0] sm:$0xff] }
 0x245   : > { %4787 = vmatpush3.bf16.msra.mxu0 %v5788_v43  ;;  %v1062_v54 = vpack.c.bf16 %v1049_v31, %v1048_v32  ;;  %5255 = vrcp.f32 %v1024_v37  ;;  %v1406_v18 = vsel %vm637_vm0, %v1324_v57, 0  ;;  %v449_v37 = vld [vmem:[%s5512_s26 + $0xe0] sm:$0xff]  ;;  %v450_v59 = vld [vmem:[%s5512_s26 + $0xe8] sm:$0xff]  ;;  %v381_v32 = vmul.f32 0.35355338, %v317_v25 }
 0x246   : > { %4788 = vmatprep.subr.bf16.mxu0 %v1195_v42  ;;  %v5244_v45 = vpop.eup %5243  ;;  %v1314_v2 = vpack.c.bf16 %v374_v47, %v373_v53  ;;  %v382_v31 = vmul.f32 0.35355338, %v318_v33  ;;  %v322_v4 = vld [vmem:[%s5518_s29 + $0xe8] sm:$0xff]  ;;  %v380_v49 = vmul.f32 0.35355338, %v316_v34  ;;  %v451_v47 = vld [vmem:[%s5512_s26 + $0xf0] sm:$0xff] }
 0x247   : > { %v1027_v46 = vpop.xlane.xlu1 %1026  ;;  %4782 = vmatprep.mubr.msk.bf16.mxu1 %vm882_vm1, %v1062_v54  ;;  %v5246_v50 = vpop.eup %5245  ;;  %v1055_v56 = vmul.f32 %v5244_v45, %v5738_v11  ;;  %v448_v54 = vld [vmem:[%s5512_s26 + $0xd8] sm:$0x1]  ;;  %v386_v53 = vmul.f32 0.35355338, %v322_v4 }
 0x248   : > { %5257 = vrcp.f32 %v1027_v46  ;;  %4783 = vmatmul.mubr.msk.bf16.vlgmr.msra.gmra.mrb[8].mxu1 %vm882_vm1, %v1063_v41  ;;  %v5248_v43 = vpop.eup %5247  ;;  %v1052_v58 = vmul.f32 %v5246_v50, %v5742_v13  ;;  %v1345_v13 = vsel %vm637_vm0, %v1322_v51, 0  ;;  %v1409_v41 = vsel %vm637_vm0, %v1325_v19, 0  ;;  %v572_v4 = vld [vmem:[%s6912_s3 + $0xb8] sm:$0x1] }
 0x249   : > { %4789 = vmatpush3.bf16.msra.mxu0 %v1195_v42  ;;  %4795 = vmatpush3.bf16.msra.mxu1 %v5794_v52  ;;  %v1054_v0 = vmul.f32 %v5248_v43, %v5733_v7  ;;  %v440_v52 = vld [vmem:[%s5512_s26 + $0x98] sm:$0x1]  ;;  %v1318_v45 = vpack.c.bf16 %v382_v31, %v381_v32  ;;  %v1327_v50 = vpack.c.bf16 %v448_v54, %v447_v40  ;;  %v385_v43 = vmul.f32 0.35355338, %v321_v44 }
 0x24a   : > { %v5250_v55 = vpop.eup %5249  ;;  %4796 = vmatprep.subr.bf16.mxu1 %v1253_v36  ;;  %5146 = vmatprep.subr.msk.bf16.mxu0 %vm637_vm0, %v1322_v51  ;;  %v1323_v9 = vpack.c.bf16 %v440_v52, %v439_v1  ;;  %v312_v42 = vld [vmem:[%s5518_s29 + $0x98] sm:$0x1]  ;;  %v1328_v51 = vpack.c.bf16 %v450_v59, %v449_v37 }
 0x24b   : > { %v1053_v61 = vmul.f32 %v5250_v55, %v5746_v5  ;;  %v5252_v63 = vpop.eup %5251  ;;  %v1065_v11 = vpack.c.bf16 %v1055_v56, %v1054_v0  ;;  %v376_v48 = vmul.f32 0.35355338, %v312_v42  ;;  %v452_v55 = vld [vmem:[%s5512_s26 + $0xf8] sm:$0x1]  ;;  %v1317_v56 = vpack.c.bf16 %v380_v49, %v379_v39  ;;  %v566_v39 = vld [vmem:[%s6912_s3 + $0x88] sm:$0xff] }
 0x24c   : > { %v1056_v5 = vmul.f32 %v5252_v63, %v5750_v16  ;;  %v319_v63 = vld [vmem:[%s5518_s29 + $0xd0] sm:$0xff]  ;;  %v320_v0 = vld [vmem:[%s5518_s29 + $0xd8] sm:$0x1]  ;;  %v1470_v1 = vsel %vm637_vm0, %v1327_v50, 0 }
 0x24d   : > { %4797 = vmatpush3.bf16.msra.mxu1 %v1253_v36  ;;  %v1064_v60 = vpack.c.bf16 %v1053_v61, %v1052_v58  ;;  %v1315_v36 = vpack.c.bf16 %v376_v48, %v375_v28  ;;  %v1528_v58 = vsel %vm637_vm0, %v1328_v51, 0  ;;  %v1329_v61 = vpack.c.bf16 %v452_v55, %v451_v47  ;;  %v567_v48 = vld [vmem:[%s6912_s3 + $0x90] sm:$0xff]  ;;  %v568_v59 = vld [vmem:[%s6912_s3 + $0x98] sm:$0x1]  ;;  %v569_v55 = vld [vmem:[%s6912_s3 + $0xa0] sm:$0xff] }
 0x24e   : > { %v5254_v62 = vpop.eup %5253  ;;  %5148 = vmatprep.subr.msk.bf16.mxu1 %vm637_vm0, %v1324_v57  ;;  %v1320_v57 = vpack.c.bf16 %v386_v53, %v385_v43  ;;  %v383_v52 = vmul.f32 0.35355338, %v319_v63 }
 0x24f   : > { %4790 = vmatprep.mubr.msk.bf16.mxu0 %vm882_vm1, %v1064_v60  ;;  %v1057_v7 = vmul.f32 %v5254_v62, %v5754_v20  ;;  %v5256_v10 = vpop.eup %5255  ;;  %v384_v60 = vmul.f32 0.35355338, %v320_v0  ;;  %v1531_v8 = vsel %vm637_vm0, %v1329_v61, 0  ;;  %v575_v0 = vld [vmem:[%s6912_s3 + $0xd0] sm:$0xff] }
 0x250   : > { %4791 = vmatmul.mubr.msk.bf16.vlgmr.msra.gmra.mrb[12].mxu0 %vm882_vm1, %v1065_v11  ;;  %v1058_v16 = vmul.f32 %v5256_v10, %v5758_v22  ;;  %v1348_v22 = vsel %vm637_vm0, %v1323_v9, 0 }
 0x251   : > { %v1066_v15 = vpack.c.bf16 %v1057_v7, %v1056_v5  ;;  %4806 = vmatprep.mubr.msk.bf16.mxu0 %vm637_vm0, %v1314_v2  ;;  %v323_v2 = vld [vmem:[%s5518_s29 + $0xf0] sm:$0xff]  ;;  %v1319_v62 = vpack.c.bf16 %v384_v60, %v383_v52 }
 0x252   : > { %v5258_v17 = vpop.eup %5257  ;;  %4803 = vmatpush3.bf16.xpose.msra.mxu0 %v1345_v13  ;;  %v387_v11 = vmul.f32 0.35355338, %v323_v2  ;;  %v388_v13 = vmul.f32 0.35355338, %v324_v6  ;;  %v576_v2 = vld [vmem:[%s6912_s3 + $0xd8] sm:$0x1] }
 0x253   : > { %v1059_v20 = vmul.f32 %v5258_v17, %v5764_v26  ;;  %4798 = vmatprep.mubr.msk.bf16.mxu1 %vm882_vm1, %v1066_v15  ;;  %5147 = vmatprep.subr.msk.bf16.mxu0 %vm637_vm0, %v1323_v9  ;;  %v1326_v26 = vpack.c.bf16 %v446_v12, %v445_v24 }
 0x254   : > { %v1321_v5 = vpack.c.bf16 %v388_v13, %v387_v11  ;;  %v573_v11 = vld [vmem:[%s6912_s3 + $0xc0] sm:$0xff] }
 0x255   : > { %v1067_v29 = vpack.c.bf16 %v1059_v20, %v1058_v16  ;;  %v1467_v46 = vsel %vm637_vm0, %v1326_v26, 0 }
 0x257   : > { %4799 = vmatmul.mubr.msk.bf16.vlgmr.msra.gmra.mrb[12].mxu1 %vm882_vm1, %v1067_v29 }
 0x258   : > { %4811 = vmatpush3.bf16.xpose.msra.mxu1 %v1406_v18  ;;  %4814 = vmatprep.mubr.msk.bf16.mxu1 %vm637_vm0, %v1316_v27 }
 0x259   : > { %5149 = vmatprep.subr.msk.bf16.mxu1 %vm637_vm0, %v1325_v19 }
 0x25a   : > { %4805 = vmatpush3.bf16.xpose.msra.mxu0 %v1348_v22 }
 0x25b   : > { %5150 = vmatprep.subr.msk.bf16.mxu0 %vm637_vm0, %v1326_v26 }
 0x260   : > { %4813 = vmatpush3.bf16.xpose.msra.mxu1 %v1409_v41  ;;  %v571_v41 = vld [vmem:[%s6912_s3 + $0xb0] sm:$0xff] }
 0x261   : > { %4807 = vmatmul.mubr.msk.bf16.vlgmr.msra.gmra.mrb[16].mxu0 %vm637_vm0, %v1315_v36  ;;  %5152 = vmatprep.subr.msk.bf16.mxu1 %vm637_vm0, %v1328_v51  ;;  %v565_v51 = vld [vmem:[%s6912_s3 + $0x80] sm:$0xff] }
 0x262   : > { %4819 = vmatpush3.bf16.xpose.msra.mxu0 %v1467_v46  ;;  %4822 = vmatprep.mubr.msk.bf16.mxu0 %vm637_vm0, %v1318_v45 }
 0x263   : > { %5151 = vmatprep.subr.msk.bf16.mxu0 %vm637_vm0, %v1327_v50 }
 0x267   : > { %4815 = vmatmul.mubr.msk.bf16.vlgmr.msra.gmra.mrb[16].mxu1 %vm637_vm0, %v1317_v56 }
 0x268   : > { %4827 = vmatpush3.bf16.xpose.msra.mxu1 %v1528_v58  ;;  %4830 = vmatprep.mubr.msk.bf16.mxu1 %vm637_vm0, %v1320_v57  ;;  %v570_v58 = vld [vmem:[%s6912_s3 + $0xa8] sm:$0xff] }
 0x269   : > { %5153 = vmatprep.subr.msk.bf16.mxu1 %vm637_vm0, %v1329_v61 }
 0x26a   : > { %4821 = vmatpush3.bf16.xpose.msra.mxu0 %v1470_v1 }
 0x270   : > { %4829 = vmatpush3.bf16.xpose.msra.mxu1 %v1531_v8 }
 0x271   : > { %4823 = vmatmul.mubr.msk.bf16.vlgmr.msra.gmra.mrb[20].mxu0 %vm637_vm0, %v1319_v62 }
 0x277   : > { %4831 = vmatmul.mubr.msk.bf16.vlgmr.msra.gmra.mrb[20].mxu1 %vm637_vm0, %v1321_v5 }
 0x317   : > { %v5885_v7 = vpop.f32.mrb[8].mxu0 }
 0x318   : > { %v5887_v9 = vpop.f32.mrb[9].mxu0 }
 0x319   : > { %v5889_v10 = vpop.f32.mrb[10].mxu0 }
 0x31a   : > { %v1307_v3 = vpack.c.bf16 %v5889_v10, %v5885_v7  ;;  %v5893_v14 = vpop.f32.mrb[11].mxu0  ;;  %v455_v7 = vld [vmem:[%s5512_s26 + $0x110] sm:$0xff]  ;;  %v456_v10 = vld [vmem:[%s5512_s26 + $0x118] sm:$0x1] }
 0x31b   : > { %v1306_v15 = vpack.c.bf16 %v5893_v14, %v5887_v9  ;;  %v5897_v17 = vpop.f32.mrb[8].mxu1  ;;  %v325_v14 = vld [vmem:[%s5518_s29 + $0x100] sm:$0xff] }
 0x31c   : > { %v5899_v21 = vpop.f32.mrb[9].mxu1 }
 0x31d   : > { %v5901_v23 = vpop.f32.mrb[10].mxu1 }
 0x31e   : > { %v1309_v16 = vpack.c.bf16 %v5901_v23, %v5897_v17  ;;  %v5905_v20 = vpop.f32.mrb[11].mxu1  ;;  %v459_v17 = vld [vmem:[%s5512_s26 + $0x130] sm:$0xff]  ;;  %v460_v23 = vld [vmem:[%s5512_s26 + $0x138] sm:$0x1] }
 0x31f   : > { %v1308_v24 = vpack.c.bf16 %v5905_v20, %v5899_v21  ;;  %v329_v21 = vld [vmem:[%s5518_s29 + $0x120] sm:$0xff]  ;;  %v330_v20 = vld [vmem:[%s5518_s29 + $0x128] sm:$0xff] }
 0x323   : > { %v5909_v12 = vpop.f32.mrb[12].mxu0 }
 0x324   : > { %v5911_v27 = vpop.f32.mrb[13].mxu0 }
 0x325   : > { %v5913_v29 = vpop.f32.mrb[14].mxu0 }
 0x326   : > { %v1311_v18 = vpack.c.bf16 %v5913_v29, %v5909_v12  ;;  %v5917_v19 = vpop.f32.mrb[15].mxu0  ;;  %v462_v12 = vld [vmem:[%s5512_s26 + $0x148] sm:$0xff] }
 0x327   : > { %v1310_v30 = vpack.c.bf16 %v5917_v19, %v5911_v27  ;;  %v2464_v19 = vpack.c.bf16 %v456_v10, %v455_v7  ;;  %v583_v7 = vld [vmem:[%s6912_s3 + $0x110] sm:$0xff] }
 0x32a   : > { %v5921_v42 = vpop.f32.mrb[12].mxu1 }
 0x32b   : > { %v5923_v22 = vpop.f32.mrb[13].mxu1 }
 0x32c   : > { %v5925_v26 = vpop.f32.mrb[14].mxu1 }
 0x32d   : > { %v1313_v25 = vpack.c.bf16 %v5925_v26, %v5921_v42  ;;  %v5929_v33 = vpop.f32.mrb[15].mxu1  ;;  %v465_v42 = vld [vmem:[%s5512_s26 + $0x160] sm:$0xff]  ;;  %v466_v26 = vld [vmem:[%s5512_s26 + $0x168] sm:$0xff] }
 0x32e   : > { %v1312_v28 = vpack.c.bf16 %v5929_v33, %v5923_v22  ;;  %v2466_v22 = vpack.c.bf16 %v460_v23, %v459_v17  ;;  %v327_v33 = vld [vmem:[%s5518_s29 + $0x110] sm:$0xff]  ;;  %v581_v23 = vld [vmem:[%s6912_s3 + $0x100] sm:$0xff] }
 0x32f   : > { %v587_v17 = vld [vmem:[%s6912_s3 + $0x130] sm:$0xff] }
 0x334   : > { %v4808_v37 = vpop.f32.mrb[16].mxu0 }
 0x335   : > { %v5939_v32 = vadd.f32 %v4808_v37, %v567_v48  ;;  %v1384_v31 = vpop.f32.mrb[17].mxu0 }
 0x336   : > { %v4809_v38 = vpop.f32.mrb[18].mxu0  ;;  %v5961_v50 = vadd.f32 %v1384_v31, %v565_v51  ;;  %v574_v31 = vld [vmem:[%s6912_s3 + $0xc8] sm:$0xff] }
 0x337   : > { %v5941_v34 = vadd.f32 %v4809_v38, %v568_v59  ;;  %v1387_v40 = vpop.f32.mrb[19].mxu0  ;;  %v1588_v54 = vsel %vm882_vm1, %v5939_v32, -inf }
 0x338   : > { %1589 = vmax.xlane.f32.xlu0 %v1588_v54  ;;  %v5970_v56 = vadd.f32 %v1387_v40, %v566_v39  ;;  %v1582_v63 = vsel %vm882_vm1, %v5961_v50, -inf  ;;  %v577_v40 = vld [vmem:[%s6912_s3 + $0xe0] sm:$0xff] }
 0x339   : > { %v1591_v36 = vsel %vm892_vm2, %v5941_v34, -inf }
 0x33a   : > { %1592 = vmax.xlane.f32.xlu1 %v1591_v36  ;;  %v4816_v44 = vpop.f32.mrb[16].mxu1  ;;  %v1585_v52 = vsel %vm882_vm1, %v5970_v56, -inf }
 0x33b   : > { %v5956_v45 = vadd.f32 %v4816_v44, %v571_v41  ;;  %v1445_v46 = vpop.f32.mrb[17].mxu1 }
 0x33c   : > { %v4817_v49 = vpop.f32.mrb[18].mxu1  ;;  %v5977_v61 = vadd.f32 %v1445_v46, %v569_v55  ;;  %v578_v46 = vld [vmem:[%s6912_s3 + $0xe8] sm:$0xff] }
 0x33d   : > { %v5963_v43 = vadd.f32 %v4817_v49, %v572_v4  ;;  %v1448_v53 = vpop.f32.mrb[19].mxu1  ;;  %v1600_v47 = vsel %vm882_vm1, %v5956_v45, -inf }
 0x33e   : > { %1601 = vmax.xlane.f32.xlu0 %v1600_v47  ;;  %v5984_v1 = vadd.f32 %v1448_v53, %v570_v58  ;;  %v1594_v62 = vsel %vm882_vm1, %v5977_v61, -inf  ;;  %v579_v53 = vld [vmem:[%s6912_s3 + $0xf0] sm:$0xff]  ;;  %v580_v58 = vld [vmem:[%s6912_s3 + $0xf8] sm:$0x1] }
 0x33f   : > { %v1603_v57 = vsel %vm892_vm2, %v5963_v43, -inf }
 0x340   : > { %1604 = vmax.xlane.f32.xlu1 %v1603_v57  ;;  %v1597_v37 = vsel %vm882_vm1, %v5984_v1, -inf }
 0x342   : > { %1583 = vmax.xlane.f32.xlu0 %v1582_v63 }
 0x344   : > { %v4824_v60 = vpop.f32.mrb[20].mxu0  ;;  %1586 = vmax.xlane.f32.xlu1 %v1585_v52 }
 0x345   : > { %v5991_v6 = vadd.f32 %v4824_v60, %v575_v0  ;;  %v1506_v8 = vpop.f32.mrb[21].mxu0 }
 0x346   : > { %v4825_v13 = vpop.f32.mrb[22].mxu0  ;;  %1595 = vmax.xlane.f32.xlu0 %v1594_v62  ;;  %v6007_v38 = vadd.f32 %v1506_v8, %v573_v11 }
 0x347   : > { %v5998_v5 = vadd.f32 %v4825_v13, %v576_v2  ;;  %v1509_v48 = vpop.f32.mrb[23].mxu0  ;;  %v1612_v59 = vsel %vm882_vm1, %v5991_v6, -inf }
 0x348   : > { %1598 = vmax.xlane.f32.xlu1 %v1597_v37  ;;  %v6012_v41 = vadd.f32 %v1509_v48, %v574_v31  ;;  %v1606_v49 = vsel %vm882_vm1, %v6007_v38, -inf }
 0x349   : > { %v1615_v51 = vsel %vm892_vm2, %v5998_v5, -inf }
 0x34a   : > { %v4832_v54 = vpop.f32.mrb[20].mxu1  ;;  %1613 = vmax.xlane.f32.xlu0 %v1612_v59  ;;  %v1609_v55 = vsel %vm882_vm1, %v6012_v41, -inf }
 0x34b   : > { %v1567_v36 = vpop.f32.mrb[21].mxu1  ;;  %v6035_v63 = vadd.f32 %v4832_v54, %v579_v53 }
 0x34c   : > { %v6016_v44 = vadd.f32 %v1567_v36, %v577_v40  ;;  %v4833_v4 = vpop.f32.mrb[22].mxu1  ;;  %1616 = vmax.xlane.f32.xlu1 %v1615_v51 }
 0x34d   : > { %v1570_v39 = vpop.f32.mrb[23].mxu1  ;;  %v6037_v0 = vadd.f32 %v4833_v4, %v580_v58  ;;  %v1624_v60 = vsel %vm882_vm1, %v6035_v63, -inf }
 0x34e   : > { %1607 = vmax.xlane.f32.xlu0 %v1606_v49  ;;  %v6026_v47 = vadd.f32 %v1570_v39, %v578_v46  ;;  %v1618_v57 = vsel %vm882_vm1, %v6016_v44, -inf }
 0x34f   : > { %v1627_v2 = vsel %vm892_vm2, %v6037_v0, -inf }
 0x350   : > { %1610 = vmax.xlane.f32.xlu1 %v1609_v55  ;;  %v1621_v52 = vsel %vm882_vm1, %v6026_v47, -inf }
 0x352   : > { %1619 = vmax.xlane.f32.xlu0 %v1618_v57 }
 0x354   : > { %1622 = vmax.xlane.f32.xlu1 %v1621_v52 }
 0x356   : > { %1625 = vmax.xlane.f32.xlu0 %v1624_v60 }
 0x358   : > { %1628 = vmax.xlane.f32.xlu1 %v1627_v2 }
 0x3c5   : > { %v1590_v8 = vpop.xlane.xlu0 %1589 }
 0x3c6   : > { %v1632_v62 = vsub.f32 %v5939_v32, %v1590_v8 }
 0x3c7   : > { %v1593_v11 = vpop.xlane.xlu1 %1592 }
 0x3c8   : > { %v1650_v13 = vmul.f32 1.442695, %v1632_v62  ;;  %v1633_v48 = vsub.f32 %v5941_v34, %v1593_v11 }
 0x3ca   : > { %5259 = vpow2.f32 %v1650_v13  ;;  %v1652_v37 = vmul.f32 1.442695, %v1633_v48 }
 0x3cb   : > { %v1602_v59 = vpop.xlane.xlu0 %1601 }
 0x3cc   : > { %5261 = vpow2.f32 %v1652_v37  ;;  %v1636_v31 = vsub.f32 %v5956_v45, %v1602_v59 }
 0x3cd   : > { %v1605_v40 = vpop.xlane.xlu1 %1604 }
 0x3ce   : > { %v1658_v54 = vmul.f32 1.442695, %v1636_v31  ;;  %v1637_v36 = vsub.f32 %v5963_v43, %v1605_v40 }
 0x3cf   : > { %v1584_v51 = vpop.xlane.xlu0 %1583 }
 0x3d0   : > { %5263 = vpow2.f32 %v1658_v54  ;;  %v1660_v4 = vmul.f32 1.442695, %v1637_v36  ;;  %v1630_v46 = vsub.f32 %v5961_v50, %v1584_v51 }
 0x3d1   : > { %v1587_v32 = vpop.xlane.xlu1 %1586 }
 0x3d2   : > { %5265 = vpow2.f32 %v1660_v4  ;;  %v1646_v39 = vmul.f32 1.442695, %v1630_v46  ;;  %v1631_v34 = vsub.f32 %v5970_v56, %v1587_v32 }
 0x3d3   : > { %v1596_v49 = vpop.xlane.xlu0 %1595 }
 0x3d4   : > { %v6051_v53 = vpop.eup %5259  ;;  %5267 = vpow2.f32 %v1646_v39  ;;  %v1648_v55 = vmul.f32 1.442695, %v1631_v34  ;;  %v1634_v45 = vsub.f32 %v5977_v61, %v1596_v49 }
 0x3d5   : > { %v1599_v57 = vpop.xlane.xlu1 %1598  ;;  %v1684_v43 = vsel %vm882_vm1, %v6051_v53, 0.0 }
 0x3d6   : > { %v6056_v58 = vpop.eup %5261  ;;  %5269 = vpow2.f32 %v1648_v55  ;;  %v1654_v50 = vmul.f32 1.442695, %v1634_v45  ;;  %v1635_v52 = vsub.f32 %v5984_v1, %v1599_v57  ;;  %1685 = vadd.xlane.f32.xlu0 %v1684_v43 }
 0x3d7   : > { %v1614_v60 = vpop.xlane.xlu0 %1613  ;;  %v1687_v56 = vsel %vm892_vm2, %v6056_v58, 0.0 }
 0x3d8   : > { %5271 = vpow2.f32 %v1654_v50  ;;  %v1656_v2 = vmul.f32 1.442695, %v1635_v52  ;;  %v1640_v8 = vsub.f32 %v5991_v6, %v1614_v60  ;;  %1688 = vadd.xlane.f32.xlu1 %v1687_v56 }
 0x3d9   : > { %v1617_v61 = vpop.xlane.xlu1 %1616 }
 0x3da   : > { %v6062_v62 = vpop.eup %5263  ;;  %5273 = vpow2.f32 %v1656_v2  ;;  %v1666_v11 = vmul.f32 1.442695, %v1640_v8  ;;  %v1641_v13 = vsub.f32 %v5998_v5, %v1617_v61 }
 0x3db   : > { %v1608_v48 = vpop.xlane.xlu0 %1607  ;;  %v1696_v1 = vsel %vm882_vm1, %v6062_v62, 0.0 }
 0x3dc   : > { %v6067_v37 = vpop.eup %5265  ;;  %5275 = vpow2.f32 %v1666_v11  ;;  %v1668_v59 = vmul.f32 1.442695, %v1641_v13  ;;  %v1638_v31 = vsub.f32 %v6007_v38, %v1608_v48  ;;  %1697 = vadd.xlane.f32.xlu0 %v1696_v1 }
 0x3dd   : > { %v1611_v6 = vpop.xlane.xlu1 %1610  ;;  %v1699_v40 = vsel %vm892_vm2, %v6067_v37, 0.0 }
 0x3de   : > { %v6072_v54 = vpop.eup %5267  ;;  %5277 = vpow2.f32 %v1668_v59  ;;  %v1662_v36 = vmul.f32 1.442695, %v1638_v31  ;;  %v1639_v5 = vsub.f32 %v6012_v41, %v1611_v6  ;;  %1700 = vadd.xlane.f32.xlu1 %v1699_v40 }
 0x3df   : > { %v1620_v51 = vpop.xlane.xlu0 %1619  ;;  %v1678_v4 = vsel %vm882_vm1, %v6072_v54, 0.0 }
 0x3e0   : > { %v6077_v46 = vpop.eup %5269  ;;  %5279 = vpow2.f32 %v1662_v36  ;;  %v1664_v38 = vmul.f32 1.442695, %v1639_v5  ;;  %v1642_v32 = vsub.f32 %v6016_v44, %v1620_v51  ;;  %1679 = vadd.xlane.f32.xlu0 %v1678_v4 }
 0x3e1   : > { %v1623_v39 = vpop.xlane.xlu1 %1622  ;;  %v1681_v34 = vsel %vm882_vm1, %v6077_v46, 0.0 }
 0x3e2   : > { %v6082_v49 = vpop.eup %5271  ;;  %5281 = vpow2.f32 %v1664_v38  ;;  %v1670_v41 = vmul.f32 1.442695, %v1642_v32  ;;  %v1643_v55 = vsub.f32 %v6026_v47, %v1623_v39  ;;  %1682 = vadd.xlane.f32.xlu1 %v1681_v34  ;;  %v501_v38 = vld [vmem:[%s5770_s24 + $0x80] sm:$0xff]  ;;  %v502_v32 = vld [vmem:[%s5770_s24 + $0x88] sm:$0xff]  ;;  %v503_v34 = vld [vmem:[%s5770_s24 + $0x90] sm:$0xff] }
 0x3e3   : > { %v1626_v45 = vpop.xlane.xlu0 %1625  ;;  %v1690_v57 = vsel %vm882_vm1, %v6082_v49, 0.0  ;;  %v1330_v39 = vpack.c.bf16 %v502_v32, %v501_v38 }
 0x3e4   : > { %v6087_v43 = vpop.eup %5273  ;;  %5283 = vpow2.f32 %v1670_v41  ;;  %v1672_v44 = vmul.f32 1.442695, %v1643_v55  ;;  %v1644_v50 = vsub.f32 %v6035_v63, %v1626_v45  ;;  %1691 = vadd.xlane.f32.xlu0 %v1690_v57  ;;  %v504_v41 = vld [vmem:[%s5770_s24 + $0x98] sm:$0x1]  ;;  %v505_v45 = vld [vmem:[%s5770_s24 + $0xa0] sm:$0xff]  ;;  %v506_v57 = vld [vmem:[%s5770_s24 + $0xa8] sm:$0xff] }
 0x3e5   : > { %v1629_v52 = vpop.xlane.xlu1 %1628  ;;  %v1693_v60 = vsel %vm882_vm1, %v6087_v43, 0.0  ;;  %4834 = vmatprep.subr.bf16.mxu0 %v1330_v39  ;;  %v1331_v55 = vpack.c.bf16 %v504_v41, %v503_v34 }
 0x3e6   : > { %v6092_v56 = vpop.eup %5275  ;;  %5285 = vpow2.f32 %v1672_v44  ;;  %v1674_v47 = vmul.f32 1.442695, %v1644_v50  ;;  %v1645_v2 = vsub.f32 %v6037_v0, %v1629_v52  ;;  %1694 = vadd.xlane.f32.xlu1 %v1693_v60  ;;  %4835 = vmatpush3.bf16.msra.mxu0 %v1330_v39  ;;  %v1332_v50 = vpack.c.bf16 %v506_v57, %v505_v45  ;;  %v507_v52 = vld [vmem:[%s5770_s24 + $0xb0] sm:$0xff]  ;;  %v508_v60 = vld [vmem:[%s5770_s24 + $0xb8] sm:$0x1] }
 0x3e7   : > { %v1708_v8 = vsel %vm882_vm1, %v6092_v56, 0.0  ;;  %v1773_v44 = vand.u32 %v1331_v55, %v5779_v35  ;;  %v511_v45 = vld [vmem:[%s5770_s24 + $0xd0] sm:$0xff]  ;;  %v512_v57 = vld [vmem:[%s5770_s24 + $0xd8] sm:$0x1] }
 0x3e8   : > { %v6097_v61 = vpop.eup %5277  ;;  %5287 = vpow2.f32 %v1674_v47  ;;  %v1676_v11 = vmul.f32 1.442695, %v1645_v2  ;;  %1709 = vadd.xlane.f32.xlu0 %v1708_v8  ;;  %4842 = vmatprep.subr.bf16.mxu1 %v1332_v50  ;;  %v1333_v47 = vpack.c.bf16 %v508_v60, %v507_v52  ;;  %v509_v8 = vld [vmem:[%s5770_s24 + $0xc0] sm:$0xff] }
 0x3e9   : > { %v1711_v63 = vsel %vm892_vm2, %v6097_v61, 0.0  ;;  %4836 = vmatprep.subr.bf16.mxu0 %v1773_v44  ;;  %4843 = vmatpush3.bf16.msra.mxu1 %v1332_v50 }
 0x3ea   : > { %v6101_v13 = vpop.eup %5279  ;;  %5289 = vpow2.f32 %v1676_v11  ;;  %1712 = vadd.xlane.f32.xlu1 %v1711_v63  ;;  %4837 = vmatpush3.bf16.msra.mxu0 %v1773_v44  ;;  %v1831_v2 = vand.u32 %v1333_v47, %v5779_v35  ;;  %v510_v11 = vld [vmem:[%s5770_s24 + $0xc8] sm:$0xff] }
 0x3eb   : > { %v1702_v48 = vsel %vm882_vm1, %v6101_v13, 0.0  ;;  %v6137_v63 = vpack.c.bf16 %v510_v11, %v509_v8 }
 0x3ec   : > { %v6105_v0 = vpop.eup %5281  ;;  %1703 = vadd.xlane.f32.xlu0 %v1702_v48  ;;  %4844 = vmatprep.subr.bf16.mxu1 %v1831_v2  ;;  %v513_v48 = vld [vmem:[%s5770_s24 + $0xe0] sm:$0xff] }
 0x3ed   : > { %v1705_v1 = vsel %vm882_vm1, %v6105_v0, 0.0  ;;  %4845 = vmatpush3.bf16.msra.mxu1 %v1831_v2  ;;  %4850 = vmatprep.subr.bf16.mxu0 %v6137_v63  ;;  %v1335_v2 = vpack.c.bf16 %v512_v57, %v511_v45 }
 0x3ee   : > { %v6109_v59 = vpop.eup %5283  ;;  %1706 = vadd.xlane.f32.xlu1 %v1705_v1  ;;  %v514_v1 = vld [vmem:[%s5770_s24 + $0xe8] sm:$0xff] }
 0x3ef   : > { %v1714_v31 = vsel %vm882_vm1, %v6109_v59, 0.0  ;;  %v1889_v57 = vand.u32 %v1335_v2, %v5779_v35 }
 0x3f0   : > { %v6113_v6 = vpop.eup %5285  ;;  %1715 = vadd.xlane.f32.xlu0 %v1714_v31  ;;  %v6142_v31 = vpack.c.bf16 %v514_v1, %v513_v48 }
 0x3f1   : > { %v1717_v40 = vsel %vm882_vm1, %v6113_v6, 0.0 }
 0x3f2   : > { %v6117_v36 = vpop.eup %5287  ;;  %1718 = vadd.xlane.f32.xlu1 %v1717_v40  ;;  %4858 = vmatprep.subr.bf16.mxu1 %v6142_v31 }
 0x3f3   : > { %v1720_v5 = vsel %vm882_vm1, %v6117_v36, 0.0 }
 0x3f4   : > { %v6121_v51 = vpop.eup %5289  ;;  %1721 = vadd.xlane.f32.xlu0 %v1720_v5 }
 0x3f5   : > { %v1723_v4 = vsel %vm892_vm2, %v6121_v51, 0.0 }
 0x3f6   : > { %1724 = vadd.xlane.f32.xlu1 %v1723_v4 }
 0x463   : > { %v1686_v40 = vpop.xlane.xlu0 %1685 }
 0x465   : > { %v1689_v5 = vpop.xlane.xlu1 %1688 }
 0x466   : > { %5291 = vrcp.f32 %v1689_v5 }
 0x469   : > { %v1698_v4 = vpop.xlane.xlu0 %1697 }
 0x46b   : > { %v1701_v38 = vpop.xlane.xlu1 %1700 }
 0x46d   : > { %v1680_v32 = vpop.xlane.xlu0 %1679 }
 0x46e   : > { %5293 = vrcp.f32 %v1680_v32 }
 0x46f   : > { %5295 = vrcp.f32 %v1686_v40  ;;  %v1683_v39 = vpop.xlane.xlu1 %1682 }
 0x470   : > { %5297 = vrcp.f32 %v1683_v39  ;;  %v5292_v44 = vpop.eup %5291 }
 0x471   : > { %5299 = vrcp.f32 %v1701_v38  ;;  %v1692_v34 = vpop.xlane.xlu0 %1691  ;;  %v1745_v11 = vmul.f32 %v5292_v44, %v6056_v58  ;;  %v516_v38 = vld [vmem:[%s5770_s24 + $0xf8] sm:$0x1] }
 0x472   : > { %5301 = vrcp.f32 %v1692_v34 }
 0x473   : > { %5303 = vrcp.f32 %v1698_v4  ;;  %v1695_v41 = vpop.xlane.xlu1 %1694  ;;  %v515_v4 = vld [vmem:[%s5770_s24 + $0xf0] sm:$0xff] }
 0x474   : > { %5305 = vrcp.f32 %v1695_v41 }
 0x475   : > { %v1710_v55 = vpop.xlane.xlu0 %1709 }
 0x477   : > { %v1713_v50 = vpop.xlane.xlu1 %1712 }
 0x478   : > { %v5294_v52 = vpop.eup %5293  ;;  %5307 = vrcp.f32 %v1713_v50  ;;  %v1337_v50 = vpack.c.bf16 %v516_v38, %v515_v4 }
 0x479   : > { %v5296_v60 = vpop.eup %5295  ;;  %v1704_v47 = vpop.xlane.xlu0 %1703  ;;  %v1742_v40 = vmul.f32 %v5294_v52, %v6072_v54 }
 0x47a   : > { %v5298_v8 = vpop.eup %5297  ;;  %5309 = vrcp.f32 %v1704_v47  ;;  %v1744_v39 = vmul.f32 %v5296_v60, %v6051_v53  ;;  %v1947_v2 = vand.u32 %v1337_v50, %v5779_v35 }
 0x47b   : > { %v5300_v48 = vpop.eup %5299  ;;  %5311 = vrcp.f32 %v1710_v55  ;;  %v1707_v1 = vpop.xlane.xlu1 %1706  ;;  %v1743_v5 = vmul.f32 %v5298_v8, %v6077_v46 }
 0x47c   : > { %v5302_v32 = vpop.eup %5301  ;;  %5313 = vrcp.f32 %v1707_v1  ;;  %v1749_v44 = vmul.f32 %v5300_v48, %v6067_v37  ;;  %v1759_v55 = vpack.c.bf16 %v1745_v11, %v1744_v39 }
 0x47d   : > { %v5304_v34 = vpop.eup %5303  ;;  %v1716_v41 = vpop.xlane.xlu0 %1715  ;;  %v1758_v45 = vpack.c.bf16 %v1743_v5, %v1742_v40  ;;  %v1746_v46 = vmul.f32 %v5302_v32, %v6082_v49 }
 0x47e   : > { %v5306_v58 = vpop.eup %5305  ;;  %5315 = vrcp.f32 %v1716_v41  ;;  %v1748_v53 = vmul.f32 %v5304_v34, %v6062_v62 }
 0x47f   : > { %v1719_v54 = vpop.xlane.xlu1 %1718  ;;  %4838 = vmatprep.mubr.msk.bf16.mxu0 %vm882_vm1, %v1758_v45  ;;  %v1747_v52 = vmul.f32 %v5306_v58, %v6087_v43  ;;  %v1304_v58 = vld [vmem:[%s6913_s4] sm:$0xff] }
 0x480   : > { %5317 = vrcp.f32 %v1719_v54  ;;  %4839 = vmatmul.mubr.msk.bf16.vlgmr.msra.gmra.mrb[24].mxu0 %vm882_vm1, %v1759_v55  ;;  %v1761_v37 = vpack.c.bf16 %v1749_v44, %v1748_v53 }
 0x481   : > { %v1722_v60 = vpop.xlane.xlu0 %1721  ;;  %v1760_v47 = vpack.c.bf16 %v1747_v52, %v1746_v46  ;;  %4851 = vmatpush3.bf16.msra.mxu0 %v6137_v63  ;;  %v1305_v52 = vpack.c.bf16 %v1304_v58, %v1304_v58  ;;  %v464_v58 = vld [vmem:[%s5512_s26 + $0x158] sm:$0x1] }
 0x482   : > { %5319 = vrcp.f32 %v1722_v60  ;;  %4852 = vmatprep.subr.bf16.mxu0 %v1889_v57  ;;  %v5308_v8 = vpop.eup %5307 }
 0x483   : > { %v1725_v11 = vpop.xlane.xlu1 %1724  ;;  %4846 = vmatprep.mubr.msk.bf16.mxu1 %vm882_vm1, %v1760_v47  ;;  %v1753_v63 = vmul.f32 %v5308_v8, %v6097_v61 }
 0x484   : > { %v5310_v49 = vpop.eup %5309  ;;  %5321 = vrcp.f32 %v1725_v11  ;;  %4847 = vmatmul.mubr.msk.bf16.vlgmr.msra.gmra.mrb[24].mxu1 %vm882_vm1, %v1761_v37 }
 0x485   : > { %v5312_v62 = vpop.eup %5311  ;;  %4853 = vmatpush3.bf16.msra.mxu0 %v1889_v57  ;;  %4859 = vmatpush3.bf16.msra.mxu1 %v6142_v31  ;;  %v1750_v48 = vmul.f32 %v5310_v49, %v6101_v13 }
 0x486   : > { %v5314_v43 = vpop.eup %5313  ;;  %4860 = vmatprep.subr.bf16.mxu1 %v1947_v2  ;;  %v1752_v5 = vmul.f32 %v5312_v62, %v6092_v56 }
 0x487   : > { %v1751_v1 = vmul.f32 %v5314_v43, %v6105_v0 }
 0x488   : > { %v5316_v40 = vpop.eup %5315  ;;  %v1763_v32 = vpack.c.bf16 %v1753_v63, %v1752_v5  ;;  %v2239_v63 = vsel %vm1074_vm3, %v1305_v52, 0 }
 0x489   : > { %v1762_v4 = vpack.c.bf16 %v1751_v1, %v1750_v48  ;;  %4861 = vmatpush3.bf16.msra.mxu1 %v1947_v2  ;;  %v1754_v39 = vmul.f32 %v5316_v40, %v6109_v59  ;;  %v4488_v59 = vld [vmem:[%s6913_s4 + $0x8] sm:$0xff] }
 0x48a   : > { %v5318_v38 = vpop.eup %5317  ;;  %v2000_v45 = vpack.c.bf16 %v4488_v59, %v4488_v59  ;;  %v333_v59 = vld [vmem:[%s5518_s29 + $0x140] sm:$0xff] }
 0x48b   : > { %4854 = vmatprep.mubr.msk.bf16.mxu0 %vm882_vm1, %v1762_v4  ;;  %v1755_v31 = vmul.f32 %v5318_v38, %v6113_v6 }
 0x48c   : > { %v5320_v34 = vpop.eup %5319  ;;  %4855 = vmatmul.mubr.msk.bf16.vlgmr.msra.gmra.mrb[28].mxu0 %vm882_vm1, %v1763_v32  ;;  %5154 = vmatprep.subr.msk.bf16.mxu0 %vm1074_vm3, %v2000_v45  ;;  %v2016_v6 = vsel %vm1074_vm3, %v2000_v45, 0  ;;  %v453_v32 = vld [vmem:[%s5512_s26 + $0x100] sm:$0xff] }
 0x48d   : > { %v1764_v61 = vpack.c.bf16 %v1755_v31, %v1754_v39  ;;  %v1756_v0 = vmul.f32 %v5320_v34, %v6117_v36  ;;  %5155 = vmatprep.subr.msk.bf16.mxu1 %vm1074_vm3, %v2000_v45  ;;  %4867 = vmatpush3.bf16.msra.mxu0 %v2016_v6  ;;  %v454_v39 = vld [vmem:[%s5512_s26 + $0x108] sm:$0xff]  ;;  %v457_v31 = vld [vmem:[%s5512_s26 + $0x120] sm:$0xff] }
 0x48e   : > { %v5322_v13 = vpop.eup %5321  ;;  %5156 = vmatprep.subr.msk.bf16.mxu0 %vm1074_vm3, %v2000_v45  ;;  %v2463_v9 = vpack.c.bf16 %v454_v39, %v453_v32  ;;  %v458_v34 = vld [vmem:[%s5512_s26 + $0x128] sm:$0xff] }
 0x48f   : > { %v1757_v41 = vmul.f32 %v5322_v13, %v6121_v51  ;;  %4862 = vmatprep.mubr.msk.bf16.mxu1 %vm882_vm1, %v1764_v61  ;;  %v389_v61 = vmul.f32 0.35355338, %v325_v14  ;;  %v339_v14 = vld [vmem:[%s5518_s29 + $0x170] sm:$0xff] }
 0x490   : > { %v2486_v27 = vsel %vm637_vm0, %v2463_v9, 0 }
 0x491   : > { %v1765_v56 = vpack.c.bf16 %v1757_v41, %v1756_v0  ;;  %v394_v0 = vmul.f32 0.35355338, %v330_v20  ;;  %v2489_v41 = vsel %vm637_vm0, %v2464_v19, 0 }
 0x493   : > { %4863 = vmatmul.mubr.msk.bf16.vlgmr.msra.gmra.mrb[28].mxu1 %vm882_vm1, %v1765_v56 }
 0x494   : > { %4873 = vmatpush3.bf16.msra.mxu1 %v2016_v6 }
 0x495   : > { %5157 = vmatprep.subr.msk.bf16.mxu1 %vm1074_vm3, %v2000_v45  ;;  %v334_v45 = vld [vmem:[%s5518_s29 + $0x148] sm:$0xff] }
 0x553   : > { %v4840_v36 = vpop.f32.mrb[24].mxu0 }
 0x554   : > { %v1809_v51 = vpop.f32.mrb[25].mxu0 }
 0x555   : > { %v4841_v57 = vpop.f32.mrb[26].mxu0 }
 0x556   : > { %v2002_v44 = vpack.c.bf16 %v4841_v57, %v4840_v36  ;;  %v1812_v55 = vpop.f32.mrb[27].mxu0  ;;  %v463_v57 = vld [vmem:[%s5512_s26 + $0x150] sm:$0xff] }
 0x557   : > { %v2001_v50 = vpack.c.bf16 %v1812_v55, %v1809_v51  ;;  %v4848_v54 = vpop.f32.mrb[24].mxu1  ;;  %v398_v51 = vmul.f32 0.35355338, %v334_v45  ;;  %v331_v55 = vld [vmem:[%s5518_s29 + $0x130] sm:$0xff]  ;;  %v585_v45 = vld [vmem:[%s6912_s3 + $0x120] sm:$0xff] }
 0x558   : > { %v1867_v46 = vpop.f32.mrb[25].mxu1 }
 0x559   : > { %v4849_v53 = vpop.f32.mrb[26].mxu1  ;;  %4868 = vmatprep.mubr.msk.bf16.mxu0 %vm637_vm0, %v2001_v50  ;;  %v332_v50 = vld [vmem:[%s5518_s29 + $0x138] sm:$0x1] }
 0x55a   : > { %v2004_v60 = vpack.c.bf16 %v4849_v53, %v4848_v54  ;;  %v1870_v47 = vpop.f32.mrb[27].mxu1  ;;  %4869 = vmatmul.mubr.msk.bf16.vlgmr.msra.gmra.mrb[32].mxu0 %vm637_vm0, %v2002_v44  ;;  %v2550_v54 = vsel %vm637_vm0, %v2466_v22, 0  ;;  %v338_v53 = vld [vmem:[%s5518_s29 + $0x168] sm:$0xff] }
 0x55b   : > { %v2003_v37 = vpack.c.bf16 %v1870_v47, %v1867_v46  ;;  %4879 = vmatpush3.bf16.msra.mxu0 %v2016_v6  ;;  %v2469_v46 = vpack.c.bf16 %v466_v26, %v465_v42  ;;  %v2468_v47 = vpack.c.bf16 %v464_v58, %v463_v57  ;;  %v586_v42 = vld [vmem:[%s6912_s3 + $0x128] sm:$0xff] }
 0x55c   : > { %5158 = vmatprep.subr.msk.bf16.mxu0 %vm1074_vm3, %v1305_v52 }
 0x55d   : > { %4874 = vmatprep.mubr.msk.bf16.mxu1 %vm637_vm0, %v2003_v37 }
 0x55e   : > { %4875 = vmatmul.mubr.msk.bf16.vlgmr.msra.gmra.mrb[32].mxu1 %vm637_vm0, %v2004_v60 }
 0x55f   : > { %v4856_v2 = vpop.f32.mrb[28].mxu0  ;;  %4885 = vmatpush3.bf16.msra.mxu1 %v2016_v6  ;;  %v391_v6 = vmul.f32 0.35355338, %v327_v33 }
 0x560   : > { %v1925_v8 = vpop.f32.mrb[29].mxu0  ;;  %5159 = vmatprep.subr.msk.bf16.mxu1 %vm1074_vm3, %v1305_v52 }
 0x561   : > { %v4857_v11 = vpop.f32.mrb[30].mxu0 }
 0x562   : > { %v2006_v49 = vpack.c.bf16 %v4857_v11, %v4856_v2  ;;  %v1928_v62 = vpop.f32.mrb[31].mxu0  ;;  %v395_v2 = vmul.f32 0.35355338, %v331_v55 }
 0x563   : > { %v2005_v43 = vpack.c.bf16 %v1928_v62, %v1925_v8  ;;  %v396_v8 = vmul.f32 0.35355338, %v332_v50  ;;  %v467_v62 = vld [vmem:[%s5512_s26 + $0x170] sm:$0xff] }
 0x565   : > { %4880 = vmatprep.mubr.msk.bf16.mxu0 %vm637_vm0, %v2005_v43  ;;  %v468_v43 = vld [vmem:[%s5512_s26 + $0x178] sm:$0x1] }
 0x566   : > { %v4864_v48 = vpop.f32.mrb[28].mxu1  ;;  %4881 = vmatmul.mubr.msk.bf16.vlgmr.msra.gmra.mrb[36].mxu0 %vm637_vm0, %v2006_v49  ;;  %v402_v49 = vmul.f32 0.35355338, %v338_v53  ;;  %v589_v53 = vld [vmem:[%s6912_s3 + $0x140] sm:$0xff] }
 0x567   : > { %v1983_v1 = vpop.f32.mrb[29].mxu1  ;;  %4892 = vmatprep.mubr.msk.bf16.mxu0 %vm637_vm0, %v1306_v15  ;;  %4891 = vmatpush3.bf16.msra.mxu0 %v2239_v63  ;;  %v326_v15 = vld [vmem:[%s5518_s29 + $0x108] sm:$0xff] }
 0x568   : > { %v4865_v40 = vpop.f32.mrb[30].mxu1  ;;  %5160 = vmatprep.subr.msk.bf16.mxu0 %vm1074_vm3, %v1305_v52  ;;  %v390_v13 = vmul.f32 0.35355338, %v326_v15  ;;  %v340_v15 = vld [vmem:[%s5518_s29 + $0x178] sm:$0x1] }
 0x569   : > { %v2008_v5 = vpack.c.bf16 %v4865_v40, %v4864_v48  ;;  %v1986_v4 = vpop.f32.mrb[31].mxu1  ;;  %v2470_v40 = vpack.c.bf16 %v468_v43, %v467_v62 }
 0x56a   : > { %v2007_v38 = vpack.c.bf16 %v1986_v4, %v1983_v1  ;;  %v2669_v1 = vsel %vm637_vm0, %v2469_v46, 0  ;;  %v336_v4 = vld [vmem:[%s5518_s29 + $0x158] sm:$0x1] }
 0x56b   : > { %v400_v39 = vmul.f32 0.35355338, %v336_v4 }
 0x56c   : > { %4886 = vmatprep.mubr.msk.bf16.mxu1 %vm637_vm0, %v2007_v38  ;;  %v2611_v38 = vsel %vm637_vm0, %v2468_v47, 0 }
 0x56d   : > { %4887 = vmatmul.mubr.msk.bf16.vlgmr.msra.gmra.mrb[36].mxu1 %vm637_vm0, %v2008_v5  ;;  %v335_v5 = vld [vmem:[%s5518_s29 + $0x150] sm:$0xff] }
 0x56e   : > { %4897 = vmatpush3.bf16.msra.mxu1 %v2239_v63  ;;  %4893 = vmatmul.mubr.msk.bf16.vlgmr.msra.gmra.mrb[32].mxu0 %vm637_vm0, %v1307_v3  ;;  %v2465_v3 = vpack.c.bf16 %v458_v34, %v457_v31  ;;  %v399_v32 = vmul.f32 0.35355338, %v335_v5  ;;  %v2672_v31 = vsel %vm637_vm0, %v2470_v40, 0  ;;  %v403_v34 = vmul.f32 0.35355338, %v339_v14  ;;  %v594_v5 = vld [vmem:[%s6912_s3 + $0x168] sm:$0xff] }
 0x56f   : > { %4898 = vmatprep.mubr.msk.bf16.mxu1 %vm637_vm0, %v1308_v24  ;;  %4903 = vmatpush3.bf16.msra.mxu0 %v2239_v63  ;;  %v2455_v24 = vpack.c.bf16 %v390_v13, %v389_v61  ;;  %v404_v61 = vmul.f32 0.35355338, %v340_v15  ;;  %v596_v15 = vld [vmem:[%s6912_s3 + $0x178] sm:$0x1] }
 0x570   : > { %4904 = vmatprep.mubr.msk.bf16.mxu0 %vm637_vm0, %v1310_v30  ;;  %5161 = vmatprep.subr.msk.bf16.mxu1 %vm1074_vm3, %v1305_v52  ;;  %v393_v30 = vmul.f32 0.35355338, %v329_v21  ;;  %v337_v52 = vld [vmem:[%s5518_s29 + $0x160] sm:$0xff] }
 0x571   : > { %5162 = vmatprep.subr.msk.bf16.mxu0 %vm637_vm0, %v2463_v9  ;;  %v401_v11 = vmul.f32 0.35355338, %v337_v52  ;;  %v2460_v9 = vpack.c.bf16 %v400_v39, %v399_v32  ;;  %v2462_v13 = vpack.c.bf16 %v404_v61, %v403_v34  ;;  %v595_v32 = vld [vmem:[%s6912_s3 + $0x170] sm:$0xff] }
 0x572   : > { %v2457_v29 = vpack.c.bf16 %v394_v0, %v393_v30 }
 0x573   : > { %v2461_v48 = vpack.c.bf16 %v402_v49, %v401_v11  ;;  %v593_v49 = vld [vmem:[%s6912_s3 + $0x160] sm:$0xff] }
 0x575   : > { %4899 = vmatmul.mubr.msk.bf16.vlgmr.msra.gmra.mrb[32].mxu1 %vm637_vm0, %v1309_v16  ;;  %v461_v16 = vld [vmem:[%s5512_s26 + $0x140] sm:$0xff] }
 0x576   : > { %4909 = vmatpush3.bf16.msra.mxu1 %v2239_v63  ;;  %4905 = vmatmul.mubr.msk.bf16.vlgmr.msra.gmra.mrb[36].mxu0 %vm637_vm0, %v1311_v18  ;;  %v2547_v18 = vsel %vm637_vm0, %v2465_v3, 0  ;;  %v2467_v56 = vpack.c.bf16 %v462_v12, %v461_v16  ;;  %v2458_v63 = vpack.c.bf16 %v396_v8, %v395_v2  ;;  %v588_v12 = vld [vmem:[%s6912_s3 + $0x138] sm:$0x1]  ;;  %v590_v8 = vld [vmem:[%s6912_s3 + $0x148] sm:$0xff] }
 0x577   : > { %4910 = vmatprep.mubr.msk.bf16.mxu1 %vm637_vm0, %v1312_v28  ;;  %5164 = vmatprep.subr.msk.bf16.mxu1 %vm637_vm0, %v2465_v3  ;;  %v328_v28 = vld [vmem:[%s5518_s29 + $0x118] sm:$0x1] }
 0x578   : > { %4915 = vmatpush3.bf16.xpose.msra.mxu0 %v2486_v27  ;;  %4918 = vmatprep.mubr.msk.bf16.mxu0 %vm637_vm0, %v2455_v24  ;;  %v392_v36 = vmul.f32 0.35355338, %v328_v28  ;;  %v2608_v60 = vsel %vm637_vm0, %v2467_v56, 0  ;;  %v584_v3 = vld [vmem:[%s6912_s3 + $0x118] sm:$0x1] }
 0x579   : > { %5163 = vmatprep.subr.msk.bf16.mxu0 %vm637_vm0, %v2464_v19 }
 0x57a   : > { %v2456_v44 = vpack.c.bf16 %v392_v36, %v391_v6 }
 0x57d   : > { %4911 = vmatmul.mubr.msk.bf16.vlgmr.msra.gmra.mrb[36].mxu1 %vm637_vm0, %v1313_v25  ;;  %v397_v25 = vmul.f32 0.35355338, %v333_v59 }
 0x57e   : > { %4926 = vmatprep.mubr.msk.bf16.mxu1 %vm637_vm0, %v2457_v29 }
 0x57f   : > { %4923 = vmatpush3.bf16.xpose.msra.mxu1 %v2547_v18  ;;  %v2459_v37 = vpack.c.bf16 %v398_v51, %v397_v25  ;;  %v591_v51 = vld [vmem:[%s6912_s3 + $0x150] sm:$0xff] }
 0x580   : > { %4917 = vmatpush3.bf16.xpose.msra.mxu0 %v2489_v41  ;;  %5165 = vmatprep.subr.msk.bf16.mxu1 %vm637_vm0, %v2466_v22  ;;  %v582_v22 = vld [vmem:[%s6912_s3 + $0x108] sm:$0xff] }
 0x581   : > { %5166 = vmatprep.subr.msk.bf16.mxu0 %vm637_vm0, %v2467_v56 }
 0x587   : > { %4919 = vmatmul.mubr.msk.bf16.vlgmr.msra.gmra.mrb[40].mxu0 %vm637_vm0, %v2456_v44  ;;  %4925 = vmatpush3.bf16.xpose.msra.mxu1 %v2550_v54  ;;  %v592_v54 = vld [vmem:[%s6912_s3 + $0x158] sm:$0x1] }
 0x588   : > { %4931 = vmatpush3.bf16.xpose.msra.mxu0 %v2608_v60  ;;  %5168 = vmatprep.subr.msk.bf16.mxu1 %vm637_vm0, %v2469_v46 }
 0x589   : > { %5167 = vmatprep.subr.msk.bf16.mxu0 %vm637_vm0, %v2468_v47  ;;  %4934 = vmatprep.mubr.msk.bf16.mxu0 %vm637_vm0, %v2459_v37 }
 0x58e   : > { %4927 = vmatmul.mubr.msk.bf16.vlgmr.msra.gmra.mrb[40].mxu1 %vm637_vm0, %v2458_v63 }
 0x58f   : > { %4939 = vmatpush3.bf16.xpose.msra.mxu1 %v2669_v1  ;;  %4942 = vmatprep.mubr.msk.bf16.mxu1 %vm637_vm0, %v2461_v48 }
 0x590   : > { %4933 = vmatpush3.bf16.xpose.msra.mxu0 %v2611_v38  ;;  %5169 = vmatprep.subr.msk.bf16.mxu1 %vm637_vm0, %v2470_v40 }
 0x597   : > { %4935 = vmatmul.mubr.msk.bf16.vlgmr.msra.gmra.mrb[44].mxu0 %vm637_vm0, %v2460_v9  ;;  %4941 = vmatpush3.bf16.xpose.msra.mxu1 %v2672_v31 }
 0x59e   : > { %4943 = vmatmul.mubr.msk.bf16.vlgmr.msra.gmra.mrb[44].mxu1 %vm637_vm0, %v2462_v13 }
 0x65a   : > { %v4920_v10 = vpop.f32.mrb[40].mxu0 }
 0x65b   : > { %v6295_v21 = vadd.f32 %v4920_v10, %v583_v7  ;;  %v2525_v20 = vpop.f32.mrb[41].mxu0 }
 0x65c   : > { %v4921_v24 = vpop.f32.mrb[42].mxu0  ;;  %v6317_v28 = vadd.f32 %v2525_v20, %v581_v23 }
 0x65d   : > { %v6297_v27 = vadd.f32 %v4921_v24, %v584_v3  ;;  %v2528_v19 = vpop.f32.mrb[43].mxu0  ;;  %v2729_v30 = vsel %vm882_vm1, %v6295_v21, -inf }
 0x65e   : > { %2730 = vmax.xlane.f32.xlu0 %v2729_v30  ;;  %v6326_v6 = vadd.f32 %v2528_v19, %v582_v22  ;;  %v2723_v25 = vsel %vm882_vm1, %v6317_v28, -inf }
 0x65f   : > { %v2732_v0 = vsel %vm892_vm2, %v6297_v27, -inf }
 0x660   : > { %2733 = vmax.xlane.f32.xlu1 %v2732_v0  ;;  %v2726_v44 = vsel %vm882_vm1, %v6326_v6, -inf }
 0x661   : > { %v4928_v16 = vpop.f32.mrb[40].mxu1 }
 0x662   : > { %v6312_v29 = vadd.f32 %v4928_v16, %v587_v17  ;;  %v2586_v18 = vpop.f32.mrb[41].mxu1 }
 0x663   : > { %v4929_v33 = vpop.f32.mrb[42].mxu1  ;;  %v6333_v26 = vadd.f32 %v2586_v18, %v585_v45 }
 0x664   : > { %v6319_v41 = vadd.f32 %v4929_v33, %v588_v12  ;;  %v2589_v56 = vpop.f32.mrb[43].mxu1  ;;  %v2741_v59 = vsel %vm882_vm1, %v6312_v29, -inf }
 0x665   : > { %2742 = vmax.xlane.f32.xlu0 %v2741_v59  ;;  %v6340_v57 = vadd.f32 %v2589_v56, %v586_v42  ;;  %v2735_v52 = vsel %vm882_vm1, %v6333_v26, -inf }
 0x666   : > { %v2744_v36 = vsel %vm892_vm2, %v6319_v41, -inf }
 0x667   : > { %2745 = vmax.xlane.f32.xlu1 %v2744_v36  ;;  %v2738_v37 = vsel %vm882_vm1, %v6340_v57, -inf }
 0x669   : > { %2724 = vmax.xlane.f32.xlu0 %v2723_v25 }
 0x66a   : > { %v4936_v58 = vpop.f32.mrb[44].mxu0 }
 0x66b   : > { %v6344_v55 = vadd.f32 %v4936_v58, %v591_v51  ;;  %v2647_v50 = vpop.f32.mrb[45].mxu0  ;;  %2727 = vmax.xlane.f32.xlu1 %v2726_v44 }
 0x66c   : > { %v4937_v46 = vpop.f32.mrb[46].mxu0  ;;  %v6363_v11 = vadd.f32 %v2647_v50, %v589_v53 }
 0x66d   : > { %v2650_v60 = vpop.f32.mrb[47].mxu0  ;;  %2736 = vmax.xlane.f32.xlu0 %v2735_v52  ;;  %v6354_v47 = vadd.f32 %v4937_v46, %v592_v54  ;;  %v2753_v2 = vsel %vm882_vm1, %v6344_v55, -inf }
 0x66e   : > { %v6368_v43 = vadd.f32 %v2650_v60, %v590_v8  ;;  %v2747_v38 = vsel %vm882_vm1, %v6363_v11, -inf }
 0x66f   : > { %2739 = vmax.xlane.f32.xlu1 %v2738_v37  ;;  %v2756_v48 = vsel %vm892_vm2, %v6354_v47, -inf }
 0x670   : > { %v2750_v9 = vsel %vm882_vm1, %v6368_v43, -inf }
 0x671   : > { %v4944_v62 = vpop.f32.mrb[44].mxu1  ;;  %2754 = vmax.xlane.f32.xlu0 %v2753_v2 }
 0x672   : > { %v2708_v63 = vpop.f32.mrb[45].mxu1  ;;  %v6391_v31 = vadd.f32 %v4944_v62, %v595_v32 }
 0x673   : > { %v6372_v1 = vadd.f32 %v2708_v63, %v593_v49  ;;  %v4945_v40 = vpop.f32.mrb[46].mxu1  ;;  %2757 = vmax.xlane.f32.xlu1 %v2756_v48 }
 0x674   : > { %v2711_v4 = vpop.f32.mrb[47].mxu1  ;;  %v6393_v34 = vadd.f32 %v4945_v40, %v596_v15  ;;  %v2765_v13 = vsel %vm882_vm1, %v6391_v31, -inf }
 0x675   : > { %2748 = vmax.xlane.f32.xlu0 %v2747_v38  ;;  %v6382_v39 = vadd.f32 %v2711_v4, %v594_v5  ;;  %v2759_v14 = vsel %vm882_vm1, %v6372_v1, -inf }
 0x676   : > { %v2768_v7 = vsel %vm892_vm2, %v6393_v34, -inf }
 0x677   : > { %2751 = vmax.xlane.f32.xlu1 %v2750_v9  ;;  %v2762_v61 = vsel %vm882_vm1, %v6382_v39, -inf }
 0x679   : > { %2760 = vmax.xlane.f32.xlu0 %v2759_v14 }
 0x67b   : > { %2763 = vmax.xlane.f32.xlu1 %v2762_v61 }
 0x67d   : > { %2766 = vmax.xlane.f32.xlu0 %v2765_v13 }
 0x67f   : > { %2769 = vmax.xlane.f32.xlu1 %v2768_v7 }
 0x6eb   : > { %v2731_v10 = vpop.xlane.xlu0 %2730 }
 0x6ec   : > { %v2773_v3 = vsub.f32 %v6295_v21, %v2731_v10 }
 0x6ed   : > { %v2734_v20 = vpop.xlane.xlu1 %2733 }
 0x6ee   : > { %v2791_v24 = vmul.f32 1.442695, %v2773_v3  ;;  %v2774_v19 = vsub.f32 %v6297_v27, %v2734_v20 }
 0x6f0   : > { %5323 = vpow2.f32 %v2791_v24  ;;  %v2793_v30 = vmul.f32 1.442695, %v2774_v19 }
 0x6f2   : > { %5325 = vpow2.f32 %v2793_v30  ;;  %v2743_v0 = vpop.xlane.xlu0 %2742 }
 0x6f3   : > { %v2777_v17 = vsub.f32 %v6312_v29, %v2743_v0 }
 0x6f4   : > { %v2746_v23 = vpop.xlane.xlu1 %2745 }
 0x6f5   : > { %v2799_v16 = vmul.f32 1.442695, %v2777_v17  ;;  %v2778_v12 = vsub.f32 %v6319_v41, %v2746_v23 }
 0x6f6   : > { %v2725_v18 = vpop.xlane.xlu0 %2724 }
 0x6f7   : > { %5327 = vpow2.f32 %v2799_v16  ;;  %v2801_v22 = vmul.f32 1.442695, %v2778_v12  ;;  %v2771_v33 = vsub.f32 %v6317_v28, %v2725_v18 }
 0x6f8   : > { %v2728_v21 = vpop.xlane.xlu1 %2727 }
 0x6f9   : > { %5329 = vpow2.f32 %v2801_v22  ;;  %v2787_v56 = vmul.f32 1.442695, %v2771_v33  ;;  %v2772_v27 = vsub.f32 %v6326_v6, %v2728_v21 }
 0x6fa   : > { %v6407_v59 = vpop.eup %5323  ;;  %v2737_v45 = vpop.xlane.xlu0 %2736 }
 0x6fb   : > { %5331 = vpow2.f32 %v2787_v56  ;;  %v2789_v36 = vmul.f32 1.442695, %v2772_v27  ;;  %v2775_v29 = vsub.f32 %v6333_v26, %v2737_v45  ;;  %v2825_v41 = vsel %vm882_vm1, %v6407_v59, 0.0  ;;  %v517_v45 = vld [vmem:[%s5770_s24 + $0x100] sm:$0xff] }
 0x6fc   : > { %v6412_v42 = vpop.eup %5325  ;;  %v2740_v25 = vpop.xlane.xlu1 %2739  ;;  %2826 = vadd.xlane.f32.xlu0 %v2825_v41  ;;  %v519_v41 = vld [vmem:[%s5770_s24 + $0x110] sm:$0xff] }
 0x6fd   : > { %5333 = vpow2.f32 %v2789_v36  ;;  %v2795_v28 = vmul.f32 1.442695, %v2775_v29  ;;  %v2776_v51 = vsub.f32 %v6340_v57, %v2740_v25  ;;  %v2828_v6 = vsel %vm892_vm2, %v6412_v42, 0.0  ;;  %v518_v36 = vld [vmem:[%s5770_s24 + $0x108] sm:$0xff]  ;;  %v520_v25 = vld [vmem:[%s5770_s24 + $0x118] sm:$0x1] }
 0x6fe   : > { %2829 = vadd.xlane.f32.xlu1 %v2828_v6  ;;  %v2755_v58 = vpop.xlane.xlu0 %2754  ;;  %v2471_v29 = vpack.c.bf16 %v518_v36, %v517_v45  ;;  %v522_v6 = vld [vmem:[%s5770_s24 + $0x128] sm:$0xff] }
 0x6ff   : > { %5335 = vpow2.f32 %v2795_v28  ;;  %v2797_v44 = vmul.f32 1.442695, %v2776_v51  ;;  %v2781_v26 = vsub.f32 %v6344_v55, %v2755_v58  ;;  %v2472_v28 = vpack.c.bf16 %v520_v25, %v519_v41  ;;  %v521_v51 = vld [vmem:[%s5770_s24 + $0x120] sm:$0xff] }
 0x700   : > { %v2758_v50 = vpop.xlane.xlu1 %2757  ;;  %4946 = vmatprep.subr.bf16.mxu0 %v2471_v29 }
 0x701   : > { %v6418_v54 = vpop.eup %5327  ;;  %5337 = vpow2.f32 %v2797_v44  ;;  %v2807_v46 = vmul.f32 1.442695, %v2781_v26  ;;  %v2782_v52 = vsub.f32 %v6354_v47, %v2758_v50  ;;  %4947 = vmatpush3.bf16.msra.mxu0 %v2471_v29  ;;  %v2914_v58 = vand.u32 %v2472_v28, %v5779_v35  ;;  %v523_v26 = vld [vmem:[%s5770_s24 + $0x130] sm:$0xff]  ;;  %v524_v50 = vld [vmem:[%s5770_s24 + $0x138] sm:$0x1] }
 0x702   : > { %v2749_v53 = vpop.xlane.xlu0 %2748  ;;  %v2837_v57 = vsel %vm882_vm1, %v6418_v54, 0.0  ;;  %v2473_v44 = vpack.c.bf16 %v522_v6, %v521_v51 }
 0x703   : > { %v6423_v60 = vpop.eup %5329  ;;  %5339 = vpow2.f32 %v2807_v46  ;;  %v2809_v37 = vmul.f32 1.442695, %v2782_v52  ;;  %v2779_v2 = vsub.f32 %v6363_v11, %v2749_v53  ;;  %2838 = vadd.xlane.f32.xlu0 %v2837_v57  ;;  %4948 = vmatprep.subr.bf16.mxu0 %v2914_v58  ;;  %v2474_v46 = vpack.c.bf16 %v524_v50, %v523_v26  ;;  %v525_v53 = vld [vmem:[%s5770_s24 + $0x140] sm:$0xff]  ;;  %v526_v57 = vld [vmem:[%s5770_s24 + $0x148] sm:$0xff] }
 0x704   : > { %v2752_v8 = vpop.xlane.xlu1 %2751  ;;  %v2840_v55 = vsel %vm892_vm2, %v6423_v60, 0.0  ;;  %4954 = vmatprep.subr.bf16.mxu1 %v2473_v44 }
 0x705   : > { %v6428_v49 = vpop.eup %5331  ;;  %5341 = vpow2.f32 %v2809_v37  ;;  %v2803_v62 = vmul.f32 1.442695, %v2779_v2  ;;  %v2780_v47 = vsub.f32 %v6368_v43, %v2752_v8  ;;  %2841 = vadd.xlane.f32.xlu1 %v2840_v55  ;;  %4949 = vmatpush3.bf16.msra.mxu0 %v2914_v58  ;;  %v2972_v52 = vand.u32 %v2474_v46, %v5779_v35  ;;  %v529_v2 = vld [vmem:[%s5770_s24 + $0x160] sm:$0xff]  ;;  %v530_v8 = vld [vmem:[%s5770_s24 + $0x168] sm:$0xff] }
 0x706   : > { %v2761_v63 = vpop.xlane.xlu0 %2760  ;;  %v2819_v48 = vsel %vm882_vm1, %v6428_v49, 0.0  ;;  %4955 = vmatpush3.bf16.msra.mxu1 %v2473_v44  ;;  %v6493_v37 = vpack.c.bf16 %v526_v57, %v525_v53  ;;  %v6498_v55 = vpack.c.bf16 %v530_v8, %v529_v2 }
 0x707   : > { %v6433_v40 = vpop.eup %5333  ;;  %5343 = vpow2.f32 %v2803_v62  ;;  %v2805_v11 = vmul.f32 1.442695, %v2780_v47  ;;  %v2783_v5 = vsub.f32 %v6372_v1, %v2761_v63  ;;  %2820 = vadd.xlane.f32.xlu0 %v2819_v48  ;;  %4956 = vmatprep.subr.bf16.mxu1 %v2972_v52 }
 0x708   : > { %v2764_v4 = vpop.xlane.xlu1 %2763  ;;  %v2822_v38 = vsel %vm882_vm1, %v6433_v40, 0.0  ;;  %4962 = vmatprep.subr.bf16.mxu0 %v6493_v37 }
 0x709   : > { %v6438_v32 = vpop.eup %5335  ;;  %5345 = vpow2.f32 %v2805_v11  ;;  %v2811_v43 = vmul.f32 1.442695, %v2783_v5  ;;  %v2784_v9 = vsub.f32 %v6382_v39, %v2764_v4  ;;  %2823 = vadd.xlane.f32.xlu1 %v2822_v38 }
 0x70a   : > { %v2767_v14 = vpop.xlane.xlu0 %2766  ;;  %v2831_v15 = vsel %vm882_vm1, %v6438_v32, 0.0  ;;  %4957 = vmatpush3.bf16.msra.mxu1 %v2972_v52 }
 0x70b   : > { %v6443_v61 = vpop.eup %5337  ;;  %5347 = vpow2.f32 %v2811_v43  ;;  %v2813_v1 = vmul.f32 1.442695, %v2784_v9  ;;  %v2785_v13 = vsub.f32 %v6391_v31, %v2767_v14  ;;  %2832 = vadd.xlane.f32.xlu0 %v2831_v15  ;;  %4970 = vmatprep.subr.bf16.mxu1 %v6498_v55  ;;  %v527_v9 = vld [vmem:[%s5770_s24 + $0x150] sm:$0xff]  ;;  %v528_v14 = vld [vmem:[%s5770_s24 + $0x158] sm:$0x1] }
 0x70c   : > { %v2770_v7 = vpop.xlane.xlu1 %2769  ;;  %v2834_v10 = vsel %vm882_vm1, %v6443_v61, 0.0 }
 0x70d   : > { %v6448_v3 = vpop.eup %5339  ;;  %5349 = vpow2.f32 %v2813_v1  ;;  %v2815_v39 = vmul.f32 1.442695, %v2785_v13  ;;  %v2786_v20 = vsub.f32 %v6393_v34, %v2770_v7  ;;  %2835 = vadd.xlane.f32.xlu1 %v2834_v10 }
 0x70e   : > { %v2849_v24 = vsel %vm882_vm1, %v6448_v3, 0.0 }
 0x70f   : > { %v6453_v19 = vpop.eup %5341  ;;  %5351 = vpow2.f32 %v2815_v39  ;;  %v2817_v30 = vmul.f32 1.442695, %v2786_v20  ;;  %2850 = vadd.xlane.f32.xlu0 %v2849_v24  ;;  %v2476_v39 = vpack.c.bf16 %v528_v14, %v527_v9 }
 0x710   : > { %v2852_v31 = vsel %vm892_vm2, %v6453_v19, 0.0 }
 0x711   : > { %v6457_v0 = vpop.eup %5343  ;;  %5353 = vpow2.f32 %v2817_v30  ;;  %2853 = vadd.xlane.f32.xlu1 %v2852_v31  ;;  %v3030_v41 = vand.u32 %v2476_v39, %v5779_v35  ;;  %v473_v39 = vld [vmem:[%s5512_s26 + $0x1a0] sm:$0xff] }
 0x712   : > { %v2843_v17 = vsel %vm882_vm1, %v6457_v0, 0.0 }
 0x713   : > { %v6461_v34 = vpop.eup %5345  ;;  %2844 = vadd.xlane.f32.xlu0 %v2843_v17 }
 0x714   : > { %v2846_v23 = vsel %vm882_vm1, %v6461_v34, 0.0 }
 0x715   : > { %v6465_v16 = vpop.eup %5347  ;;  %2847 = vadd.xlane.f32.xlu1 %v2846_v23 }
 0x716   : > { %v2855_v12 = vsel %vm882_vm1, %v6465_v16, 0.0 }
 0x717   : > { %v6469_v18 = vpop.eup %5349  ;;  %2856 = vadd.xlane.f32.xlu0 %v2855_v12  ;;  %v531_v12 = vld [vmem:[%s5770_s24 + $0x170] sm:$0xff] }
 0x718   : > { %v2858_v22 = vsel %vm882_vm1, %v6469_v18, 0.0 }
 0x719   : > { %v6473_v33 = vpop.eup %5351  ;;  %2859 = vadd.xlane.f32.xlu1 %v2858_v22  ;;  %v532_v22 = vld [vmem:[%s5770_s24 + $0x178] sm:$0x1] }
 0x71a   : > { %v2861_v21 = vsel %vm882_vm1, %v6473_v33, 0.0  ;;  %v2478_v51 = vpack.c.bf16 %v532_v22, %v531_v12  ;;  %v342_v12 = vld [vmem:[%s5518_s29 + $0x188] sm:$0xff] }
 0x71b   : > { %v6477_v56 = vpop.eup %5353  ;;  %2862 = vadd.xlane.f32.xlu0 %v2861_v21 }
 0x71c   : > { %v2864_v27 = vsel %vm892_vm2, %v6477_v56, 0.0  ;;  %v3088_v26 = vand.u32 %v2478_v51, %v5779_v35 }
 0x71d   : > { %2865 = vadd.xlane.f32.xlu1 %v2864_v27 }
 0x789   : > { %v2827_v62 = vpop.xlane.xlu0 %2826 }
 0x78b   : > { %v2830_v47 = vpop.xlane.xlu1 %2829 }
 0x78c   : > { %5355 = vrcp.f32 %v2830_v47 }
 0x790   : > { %v2839_v63 = vpop.xlane.xlu0 %2838 }
 0x792   : > { %v2842_v48 = vpop.xlane.xlu1 %2841 }
 0x794   : > { %v2821_v11 = vpop.xlane.xlu0 %2820 }
 0x795   : > { %5357 = vrcp.f32 %v2821_v11 }
 0x796   : > { %5359 = vrcp.f32 %v2827_v62  ;;  %v2824_v5 = vpop.xlane.xlu1 %2823  ;;  %v5356_v15 = vpop.eup %5355 }
 0x797   : > { %5361 = vrcp.f32 %v2824_v5  ;;  %v2886_v24 = vmul.f32 %v5356_v15, %v6412_v42 }
 0x798   : > { %5363 = vrcp.f32 %v2842_v48  ;;  %v2833_v4 = vpop.xlane.xlu0 %2832 }
 0x799   : > { %5365 = vrcp.f32 %v2833_v4 }
 0x79a   : > { %5367 = vrcp.f32 %v2839_v63  ;;  %v2836_v38 = vpop.xlane.xlu1 %2835 }
 0x79b   : > { %5369 = vrcp.f32 %v2836_v38  ;;  %v469_v38 = vld [vmem:[%s5512_s26 + $0x180] sm:$0xff] }
 0x79c   : > { %v2851_v43 = vpop.xlane.xlu0 %2850 }
 0x79e   : > { %v2854_v1 = vpop.xlane.xlu1 %2853 }
 0x79f   : > { %v5358_v13 = vpop.eup %5357  ;;  %5371 = vrcp.f32 %v2854_v1 }
 0x7a0   : > { %v5360_v7 = vpop.eup %5359  ;;  %v2845_v10 = vpop.xlane.xlu0 %2844  ;;  %v2883_v17 = vmul.f32 %v5358_v13, %v6428_v49 }
 0x7a1   : > { %v5362_v20 = vpop.eup %5361  ;;  %5373 = vrcp.f32 %v2845_v10  ;;  %v2885_v27 = vmul.f32 %v5360_v7, %v6407_v59 }
 0x7a2   : > { %v5364_v30 = vpop.eup %5363  ;;  %5375 = vrcp.f32 %v2851_v43  ;;  %v2848_v31 = vpop.xlane.xlu1 %2847  ;;  %v2884_v23 = vmul.f32 %v5362_v20, %v6433_v40  ;;  %v470_v43 = vld [vmem:[%s5512_s26 + $0x188] sm:$0xff] }
 0x7a3   : > { %v5366_v21 = vpop.eup %5365  ;;  %5377 = vrcp.f32 %v2848_v31  ;;  %v2890_v25 = vmul.f32 %v5364_v30, %v6423_v60  ;;  %v2900_v28 = vpack.c.bf16 %v2886_v24, %v2885_v27  ;;  %v3397_v7 = vpack.c.bf16 %v470_v43, %v469_v38  ;;  %v474_v20 = vld [vmem:[%s5512_s26 + $0x1a8] sm:$0xff]  ;;  %v348_v38 = vld [vmem:[%s5518_s29 + $0x1b8] sm:$0x1] }
 0x7a4   : > { %v5368_v45 = vpop.eup %5367  ;;  %v2857_v36 = vpop.xlane.xlu0 %2856  ;;  %v2899_v29 = vpack.c.bf16 %v2884_v23, %v2883_v17  ;;  %v2887_v40 = vmul.f32 %v5366_v21, %v6438_v32  ;;  %v3399_v17 = vpack.c.bf16 %v474_v20, %v473_v39  ;;  %v341_v23 = vld [vmem:[%s5518_s29 + $0x180] sm:$0xff]  ;;  %v406_v27 = vmul.f32 0.35355338, %v342_v12 }
 0x7a5   : > { %v5370_v42 = vpop.eup %5369  ;;  %5379 = vrcp.f32 %v2857_v36  ;;  %v2889_v59 = vmul.f32 %v5368_v45, %v6418_v54  ;;  %v405_v21 = vmul.f32 0.35355338, %v341_v23  ;;  %v412_v39 = vmul.f32 0.35355338, %v348_v38 }
 0x7a6   : > { %v2860_v49 = vpop.xlane.xlu1 %2859  ;;  %4950 = vmatprep.mubr.msk.bf16.mxu0 %vm882_vm1, %v2899_v29  ;;  %v2888_v6 = vmul.f32 %v5370_v42, %v6443_v61  ;;  %v471_v29 = vld [vmem:[%s5512_s26 + $0x190] sm:$0xff] }
 0x7a7   : > { %5381 = vrcp.f32 %v2860_v49  ;;  %4951 = vmatmul.mubr.msk.bf16.vlgmr.msra.gmra.mrb[48].mxu0 %vm882_vm1, %v2900_v28  ;;  %v2902_v60 = vpack.c.bf16 %v2890_v25, %v2889_v59  ;;  %v3389_v51 = vpack.c.bf16 %v406_v27, %v405_v21  ;;  %v345_v49 = vld [vmem:[%s5518_s29 + $0x1a0] sm:$0xff]  ;;  %v351_v21 = vld [vmem:[%s5518_s29 + $0x1d0] sm:$0xff]  ;;  %v352_v27 = vld [vmem:[%s5518_s29 + $0x1d8] sm:$0x1] }
 0x7a8   : > { %v2863_v58 = vpop.xlane.xlu0 %2862  ;;  %v2901_v44 = vpack.c.bf16 %v2888_v6, %v2887_v40  ;;  %4963 = vmatpush3.bf16.msra.mxu0 %v6493_v37  ;;  %v346_v40 = vld [vmem:[%s5518_s29 + $0x1a8] sm:$0xff]  ;;  %v3420_v6 = vsel %vm637_vm0, %v3397_v7, 0 }
 0x7a9   : > { %5383 = vrcp.f32 %v2863_v58  ;;  %4964 = vmatprep.subr.bf16.mxu0 %v3030_v41  ;;  %v5372_v50 = vpop.eup %5371 }
 0x7aa   : > { %v2866_v46 = vpop.xlane.xlu1 %2865  ;;  %4958 = vmatprep.mubr.msk.bf16.mxu1 %vm882_vm1, %v2901_v44  ;;  %v2894_v52 = vmul.f32 %v5372_v50, %v6453_v19  ;;  %v409_v44 = vmul.f32 0.35355338, %v345_v49 }
 0x7ab   : > { %v5374_v32 = vpop.eup %5373  ;;  %5385 = vrcp.f32 %v2866_v46  ;;  %4959 = vmatmul.mubr.msk.bf16.vlgmr.msra.gmra.mrb[48].mxu1 %vm882_vm1, %v2902_v60  ;;  %v410_v60 = vmul.f32 0.35355338, %v346_v40  ;;  %v475_v46 = vld [vmem:[%s5512_s26 + $0x1b0] sm:$0xff] }
 0x7ac   : > { %v5376_v54 = vpop.eup %5375  ;;  %4965 = vmatpush3.bf16.msra.mxu0 %v3030_v41  ;;  %4971 = vmatpush3.bf16.msra.mxu1 %v6498_v55  ;;  %v2891_v53 = vmul.f32 %v5374_v32, %v6457_v0  ;;  %v472_v41 = vld [vmem:[%s5512_s26 + $0x198] sm:$0x1] }
 0x7ad   : > { %v5378_v61 = vpop.eup %5377  ;;  %4972 = vmatprep.subr.bf16.mxu1 %v3088_v26  ;;  %v2893_v2 = vmul.f32 %v5376_v54, %v6448_v3  ;;  %v3398_v59 = vpack.c.bf16 %v472_v41, %v471_v29  ;;  %v476_v32 = vld [vmem:[%s5512_s26 + $0x1b8] sm:$0x1]  ;;  %v416_v29 = vmul.f32 0.35355338, %v352_v27 }
 0x7ae   : > { %v2892_v57 = vmul.f32 %v5378_v61, %v6461_v34 }
 0x7af   : > { %v5380_v37 = vpop.eup %5379  ;;  %v2904_v47 = vpack.c.bf16 %v2894_v52, %v2893_v2  ;;  %v477_v52 = vld [vmem:[%s5512_s26 + $0x1c0] sm:$0xff]  ;;  %v3481_v2 = vsel %vm637_vm0, %v3399_v17, 0 }
 0x7b0   : > { %v2903_v8 = vpack.c.bf16 %v2892_v57, %v2891_v53  ;;  %4973 = vmatpush3.bf16.msra.mxu1 %v3088_v26  ;;  %v2895_v63 = vmul.f32 %v5380_v37, %v6465_v16  ;;  %v4521_v16 = vld [vmem:[%s6913_s4 + $0x10] sm:$0xff]  ;;  %v478_v53 = vld [vmem:[%s5512_s26 + $0x1c8] sm:$0xff]  ;;  %v3391_v37 = vpack.c.bf16 %v410_v60, %v409_v44 }
 0x7b1   : > { %v5382_v62 = vpop.eup %5381 }
 0x7b2   : > { %4966 = vmatprep.mubr.msk.bf16.mxu0 %vm882_vm1, %v2903_v8  ;;  %v2896_v55 = vmul.f32 %v5382_v62, %v6469_v18  ;;  %v3141_v18 = vpack.c.bf16 %v4521_v16, %v4521_v16  ;;  %v3400_v8 = vpack.c.bf16 %v476_v32, %v475_v46  ;;  %v343_v62 = vld [vmem:[%s5518_s29 + $0x190] sm:$0xff] }
 0x7b3   : > { %v5384_v48 = vpop.eup %5383  ;;  %4967 = vmatmul.mubr.msk.bf16.vlgmr.msra.gmra.mrb[52].mxu0 %vm882_vm1, %v2904_v47  ;;  %v344_v47 = vld [vmem:[%s5518_s29 + $0x198] sm:$0x1] }
 0x7b4   : > { %v2905_v19 = vpack.c.bf16 %v2896_v55, %v2895_v63  ;;  %v2897_v34 = vmul.f32 %v5384_v48, %v6473_v33  ;;  %5170 = vmatprep.subr.msk.bf16.mxu0 %vm1074_vm3, %v3141_v18  ;;  %v3157_v5 = vsel %vm1074_vm3, %v3141_v18, 0  ;;  %5171 = vmatprep.subr.msk.bf16.mxu1 %vm1074_vm3, %v3141_v18  ;;  %v3423_v63 = vsel %vm637_vm0, %v3398_v59, 0  ;;  %v349_v48 = vld [vmem:[%s5518_s29 + $0x1c0] sm:$0xff] }
 0x7b5   : > { %v5386_v0 = vpop.eup %5385  ;;  %4979 = vmatpush3.bf16.msra.mxu0 %v3157_v5  ;;  %v3401_v55 = vpack.c.bf16 %v478_v53, %v477_v52  ;;  %v413_v16 = vmul.f32 0.35355338, %v349_v48  ;;  %v3484_v43 = vsel %vm637_vm0, %v3400_v8, 0  ;;  %v597_v52 = vld [vmem:[%s6912_s3 + $0x180] sm:$0xff] }
 0x7b6   : > { %v2898_v11 = vmul.f32 %v5386_v0, %v6477_v56  ;;  %4974 = vmatprep.mubr.msk.bf16.mxu1 %vm882_vm1, %v2905_v19  ;;  %5172 = vmatprep.subr.msk.bf16.mxu0 %vm1074_vm3, %v3141_v18  ;;  %v350_v19 = vld [vmem:[%s5518_s29 + $0x1c8] sm:$0xff]  ;;  %v407_v0 = vmul.f32 0.35355338, %v343_v62 }
 0x7b8   : > { %v2906_v3 = vpack.c.bf16 %v2898_v11, %v2897_v34  ;;  %v408_v34 = vmul.f32 0.35355338, %v344_v47  ;;  %v481_v11 = vld [vmem:[%s5512_s26 + $0x1e0] sm:$0xff] }
 0x7ba   : > { %4975 = vmatmul.mubr.msk.bf16.vlgmr.msra.gmra.mrb[52].mxu1 %vm882_vm1, %v2906_v3  ;;  %v482_v3 = vld [vmem:[%s5512_s26 + $0x1e8] sm:$0xff] }
 0x7bb   : > { %4985 = vmatpush3.bf16.msra.mxu1 %v3157_v5 }
 0x7bc   : > { %5173 = vmatprep.subr.msk.bf16.mxu1 %vm1074_vm3, %v3141_v18  ;;  %v414_v18 = vmul.f32 0.35355338, %v350_v19  ;;  %v601_v19 = vld [vmem:[%s6912_s3 + $0x1a0] sm:$0xff] }
 0x87a   : > { %v4952_v33 = vpop.f32.mrb[48].mxu0 }
 0x87b   : > { %v2950_v56 = vpop.f32.mrb[49].mxu0 }
 0x87c   : > { %v4953_v4 = vpop.f32.mrb[50].mxu0 }
 0x87d   : > { %v3143_v9 = vpack.c.bf16 %v4953_v4, %v4952_v33  ;;  %v2953_v14 = vpop.f32.mrb[51].mxu0  ;;  %v480_v33 = vld [vmem:[%s5512_s26 + $0x1d8] sm:$0x1]  ;;  %v347_v4 = vld [vmem:[%s5518_s29 + $0x1b0] sm:$0xff] }
 0x87e   : > { %v3142_v15 = vpack.c.bf16 %v2953_v14, %v2950_v56  ;;  %v4960_v1 = vpop.f32.mrb[48].mxu1  ;;  %v3390_v56 = vpack.c.bf16 %v408_v34, %v407_v0  ;;  %v353_v14 = vld [vmem:[%s5518_s29 + $0x1e0] sm:$0xff] }
 0x87f   : > { %v3008_v13 = vpop.f32.mrb[49].mxu1  ;;  %v417_v20 = vmul.f32 0.35355338, %v353_v14 }
 0x880   : > { %v4961_v10 = vpop.f32.mrb[50].mxu1  ;;  %4980 = vmatprep.mubr.msk.bf16.mxu0 %vm637_vm0, %v3142_v15  ;;  %v354_v15 = vld [vmem:[%s5518_s29 + $0x1e8] sm:$0xff] }
 0x881   : > { %v3145_v24 = vpack.c.bf16 %v4961_v10, %v4960_v1  ;;  %v3011_v30 = vpop.f32.mrb[51].mxu1  ;;  %4981 = vmatmul.mubr.msk.bf16.vlgmr.msra.gmra.mrb[32].mxu0 %vm637_vm0, %v3143_v9  ;;  %v3403_v9 = vpack.c.bf16 %v482_v3, %v481_v11  ;;  %v3542_v1 = vsel %vm637_vm0, %v3401_v55, 0  ;;  %v411_v10 = vmul.f32 0.35355338, %v347_v4  ;;  %v602_v11 = vld [vmem:[%s6912_s3 + $0x1a8] sm:$0xff] }
 0x882   : > { %v3144_v31 = vpack.c.bf16 %v3011_v30, %v3008_v13  ;;  %4991 = vmatpush3.bf16.msra.mxu0 %v3157_v5  ;;  %v483_v30 = vld [vmem:[%s5512_s26 + $0x1f0] sm:$0xff] }
 0x883   : > { %5174 = vmatprep.subr.msk.bf16.mxu0 %vm637_vm0, %v3397_v7  ;;  %v3393_v7 = vpack.c.bf16 %v414_v18, %v413_v16  ;;  %v3603_v12 = vsel %vm637_vm0, %v3403_v9, 0  ;;  %v607_v18 = vld [vmem:[%s6912_s3 + $0x1d0] sm:$0xff] }
 0x884   : > { %4986 = vmatprep.mubr.msk.bf16.mxu1 %vm637_vm0, %v3144_v31  ;;  %v484_v31 = vld [vmem:[%s5512_s26 + $0x1f8] sm:$0x1] }
 0x885   : > { %4987 = vmatmul.mubr.msk.bf16.vlgmr.msra.gmra.mrb[32].mxu1 %vm637_vm0, %v3145_v24  ;;  %v418_v24 = vmul.f32 0.35355338, %v354_v15  ;;  %v605_v15 = vld [vmem:[%s6912_s3 + $0x1c0] sm:$0xff] }
 0x886   : > { %v4968_v22 = vpop.f32.mrb[52].mxu0  ;;  %4997 = vmatpush3.bf16.msra.mxu1 %v3157_v5  ;;  %v479_v5 = vld [vmem:[%s5512_s26 + $0x1d0] sm:$0xff] }
 0x887   : > { %v3066_v45 = vpop.f32.mrb[53].mxu0  ;;  %5176 = vmatprep.subr.msk.bf16.mxu1 %vm637_vm0, %v3399_v17  ;;  %v3402_v13 = vpack.c.bf16 %v480_v33, %v479_v5  ;;  %v3392_v17 = vpack.c.bf16 %v412_v39, %v411_v10  ;;  %v3395_v23 = vpack.c.bf16 %v418_v24, %v417_v20  ;;  %v606_v39 = vld [vmem:[%s6912_s3 + $0x1c8] sm:$0xff]  ;;  %v609_v24 = vld [vmem:[%s6912_s3 + $0x1e0] sm:$0xff] }
 0x888   : > { %v4969_v36 = vpop.f32.mrb[54].mxu0 }
 0x889   : > { %v3147_v42 = vpack.c.bf16 %v4969_v36, %v4968_v22  ;;  %v3069_v25 = vpop.f32.mrb[55].mxu0  ;;  %v3404_v22 = vpack.c.bf16 %v484_v31, %v483_v30  ;;  %v415_v36 = vmul.f32 0.35355338, %v351_v21  ;;  %v610_v21 = vld [vmem:[%s6912_s3 + $0x1e8] sm:$0xff] }
 0x88a   : > { %v3146_v28 = vpack.c.bf16 %v3069_v25, %v3066_v45  ;;  %v3545_v45 = vsel %vm637_vm0, %v3402_v13, 0  ;;  %v356_v25 = vld [vmem:[%s5518_s29 + $0x1f8] sm:$0x1] }
 0x88b   : > { %v3394_v41 = vpack.c.bf16 %v416_v29, %v415_v36  ;;  %v420_v49 = vmul.f32 0.35355338, %v356_v25  ;;  %v611_v36 = vld [vmem:[%s6912_s3 + $0x1f0] sm:$0xff]  ;;  %v612_v25 = vld [vmem:[%s6912_s3 + $0x1f8] sm:$0x1] }
 0x88c   : > { %4992 = vmatprep.mubr.msk.bf16.mxu0 %vm637_vm0, %v3146_v28  ;;  %v3606_v28 = vsel %vm637_vm0, %v3404_v22, 0 }
 0x88d   : > { %v4976_v58 = vpop.f32.mrb[52].mxu1  ;;  %4993 = vmatmul.mubr.msk.bf16.vlgmr.msra.gmra.mrb[36].mxu0 %vm637_vm0, %v3147_v42  ;;  %v355_v42 = vld [vmem:[%s5518_s29 + $0x1f0] sm:$0xff] }
 0x88e   : > { %5003 = vmatpush3.bf16.xpose.msra.mxu0 %v3420_v6  ;;  %v3124_v26 = vpop.f32.mrb[53].mxu1  ;;  %5006 = vmatprep.mubr.msk.bf16.mxu0 %vm637_vm0, %v3389_v51  ;;  %v419_v51 = vmul.f32 0.35355338, %v355_v42  ;;  %v599_v6 = vld [vmem:[%s6912_s3 + $0x190] sm:$0xff] }
 0x88f   : > { %v4977_v50 = vpop.f32.mrb[54].mxu1  ;;  %5175 = vmatprep.subr.msk.bf16.mxu0 %vm637_vm0, %v3398_v59 }
 0x890   : > { %v3149_v54 = vpack.c.bf16 %v4977_v50, %v4976_v58  ;;  %v3127_v61 = vpop.f32.mrb[55].mxu1  ;;  %v3396_v40 = vpack.c.bf16 %v420_v49, %v419_v51  ;;  %v600_v58 = vld [vmem:[%s6912_s3 + $0x198] sm:$0x1] }
 0x891   : > { %v3148_v57 = vpack.c.bf16 %v3127_v61, %v3124_v26  ;;  %v603_v61 = vld [vmem:[%s6912_s3 + $0x1b0] sm:$0xff] }
 0x893   : > { %4998 = vmatprep.mubr.msk.bf16.mxu1 %vm637_vm0, %v3148_v57  ;;  %v604_v57 = vld [vmem:[%s6912_s3 + $0x1b8] sm:$0x1] }
 0x894   : > { %4999 = vmatmul.mubr.msk.bf16.vlgmr.msra.gmra.mrb[36].mxu1 %vm637_vm0, %v3149_v54 }
 0x895   : > { %5011 = vmatpush3.bf16.xpose.msra.mxu1 %v3481_v2  ;;  %5014 = vmatprep.mubr.msk.bf16.mxu1 %vm637_vm0, %v3391_v37 }
 0x896   : > { %5005 = vmatpush3.bf16.xpose.msra.mxu0 %v3423_v63  ;;  %5177 = vmatprep.subr.msk.bf16.mxu1 %vm637_vm0, %v3400_v8  ;;  %v598_v8 = vld [vmem:[%s6912_s3 + $0x188] sm:$0xff] }
 0x897   : > { %5178 = vmatprep.subr.msk.bf16.mxu0 %vm637_vm0, %v3401_v55 }
 0x89d   : > { %5007 = vmatmul.mubr.msk.bf16.vlgmr.msra.gmra.mrb[56].mxu0 %vm637_vm0, %v3390_v56  ;;  %5013 = vmatpush3.bf16.xpose.msra.mxu1 %v3484_v43  ;;  %v608_v43 = vld [vmem:[%s6912_s3 + $0x1d8] sm:$0x1] }
 0x89e   : > { %5019 = vmatpush3.bf16.xpose.msra.mxu0 %v3542_v1  ;;  %5180 = vmatprep.subr.msk.bf16.mxu1 %vm637_vm0, %v3403_v9 }
 0x89f   : > { %5179 = vmatprep.subr.msk.bf16.mxu0 %vm637_vm0, %v3402_v13  ;;  %5022 = vmatprep.mubr.msk.bf16.mxu0 %vm637_vm0, %v3393_v7 }
 0x8a4   : > { %5015 = vmatmul.mubr.msk.bf16.vlgmr.msra.gmra.mrb[56].mxu1 %vm637_vm0, %v3392_v17 }
 0x8a5   : > { %5027 = vmatpush3.bf16.xpose.msra.mxu1 %v3603_v12  ;;  %5030 = vmatprep.mubr.msk.bf16.mxu1 %vm637_vm0, %v3395_v23 }
 0x8a6   : > { %5021 = vmatpush3.bf16.xpose.msra.mxu0 %v3545_v45  ;;  %5181 = vmatprep.subr.msk.bf16.mxu1 %vm637_vm0, %v3404_v22 }
 0x8ad   : > { %5023 = vmatmul.mubr.msk.bf16.vlgmr.msra.gmra.mrb[60].mxu0 %vm637_vm0, %v3394_v41  ;;  %5029 = vmatpush3.bf16.xpose.msra.mxu1 %v3606_v28 }
 0x8b4   : > { %5031 = vmatmul.mubr.msk.bf16.vlgmr.msra.gmra.mrb[60].mxu1 %vm637_vm0, %v3396_v40 }
 0x970   : > { %v5008_v59 = vpop.f32.mrb[56].mxu0 }
 0x971   : > { %v6611_v44 = vadd.f32 %v5008_v59, %v599_v6  ;;  %v3459_v60 = vpop.f32.mrb[57].mxu0 }
 0x972   : > { %v5009_v26 = vpop.f32.mrb[58].mxu0  ;;  %v6633_v47 = vadd.f32 %v3459_v60, %v597_v52 }
 0x973   : > { %v6613_v50 = vadd.f32 %v5009_v26, %v600_v58  ;;  %v3462_v46 = vpop.f32.mrb[59].mxu0  ;;  %v3663_v32 = vsel %vm882_vm1, %v6611_v44, -inf }
 0x974   : > { %3664 = vmax.xlane.f32.xlu0 %v3663_v32  ;;  %v6642_v0 = vadd.f32 %v3462_v46, %v598_v8  ;;  %v3657_v16 = vsel %vm882_vm1, %v6633_v47, -inf }
 0x975   : > { %v3666_v54 = vsel %vm892_vm2, %v6613_v50, -inf }
 0x976   : > { %3667 = vmax.xlane.f32.xlu1 %v3666_v54  ;;  %v3660_v56 = vsel %vm882_vm1, %v6642_v0, -inf }
 0x977   : > { %v5016_v53 = vpop.f32.mrb[56].mxu1 }
 0x978   : > { %v6628_v37 = vadd.f32 %v5016_v53, %v603_v61  ;;  %v3520_v2 = vpop.f32.mrb[57].mxu1 }
 0x979   : > { %v5017_v62 = vpop.f32.mrb[58].mxu1  ;;  %v6649_v3 = vadd.f32 %v3520_v2, %v601_v19 }
 0x97a   : > { %v6635_v63 = vadd.f32 %v5017_v62, %v604_v57  ;;  %v3523_v55 = vpop.f32.mrb[59].mxu1  ;;  %v3675_v48 = vsel %vm882_vm1, %v6628_v37, -inf }
 0x97b   : > { %3676 = vmax.xlane.f32.xlu0 %v3675_v48  ;;  %v6656_v5 = vadd.f32 %v3523_v55, %v602_v11  ;;  %v3669_v14 = vsel %vm882_vm1, %v6649_v3, -inf }
 0x97c   : > { %v3678_v34 = vsel %vm892_vm2, %v6635_v63, -inf }
 0x97d   : > { %3679 = vmax.xlane.f32.xlu1 %v3678_v34  ;;  %v3672_v7 = vsel %vm882_vm1, %v6656_v5, -inf }
 0x97f   : > { %3658 = vmax.xlane.f32.xlu0 %v3657_v16 }
 0x980   : > { %v5024_v33 = vpop.f32.mrb[60].mxu0 }
 0x981   : > { %v6660_v4 = vadd.f32 %v5024_v33, %v607_v18  ;;  %v3581_v38 = vpop.f32.mrb[61].mxu0  ;;  %3661 = vmax.xlane.f32.xlu1 %v3660_v56 }
 0x982   : > { %v5025_v9 = vpop.f32.mrb[62].mxu0  ;;  %v6679_v20 = vadd.f32 %v3581_v38, %v605_v15 }
 0x983   : > { %v3584_v1 = vpop.f32.mrb[63].mxu0  ;;  %3670 = vmax.xlane.f32.xlu0 %v3669_v14  ;;  %v6670_v13 = vadd.f32 %v5025_v9, %v608_v43  ;;  %v3687_v10 = vsel %vm882_vm1, %v6660_v4, -inf }
 0x984   : > { %v6684_v31 = vadd.f32 %v3584_v1, %v606_v39  ;;  %v3681_v45 = vsel %vm882_vm1, %v6679_v20, -inf }
 0x985   : > { %3673 = vmax.xlane.f32.xlu1 %v3672_v7  ;;  %v3690_v23 = vsel %vm892_vm2, %v6670_v13, -inf }
 0x986   : > { %v3684_v41 = vsel %vm882_vm1, %v6684_v31, -inf }
 0x987   : > { %v5032_v30 = vpop.f32.mrb[60].mxu1  ;;  %3688 = vmax.xlane.f32.xlu0 %v3687_v10 }
 0x988   : > { %v3642_v17 = vpop.f32.mrb[61].mxu1  ;;  %v6707_v28 = vadd.f32 %v5032_v30, %v611_v36 }
 0x989   : > { %v6688_v12 = vadd.f32 %v3642_v17, %v609_v24  ;;  %v5033_v22 = vpop.f32.mrb[62].mxu1  ;;  %3691 = vmax.xlane.f32.xlu1 %v3690_v23 }
 0x98a   : > { %v3645_v27 = vpop.f32.mrb[63].mxu1  ;;  %v6709_v51 = vadd.f32 %v5033_v22, %v612_v25  ;;  %v3699_v40 = vsel %vm882_vm1, %v6707_v28, -inf }
 0x98b   : > { %3682 = vmax.xlane.f32.xlu0 %v3681_v45  ;;  %v6698_v29 = vadd.f32 %v3645_v27, %v610_v21  ;;  %v3693_v42 = vsel %vm882_vm1, %v6688_v12, -inf }
 0x98c   : > { %v3702_v6 = vsel %vm892_vm2, %v6709_v51, -inf }
 0x98d   : > { %3685 = vmax.xlane.f32.xlu1 %v3684_v41  ;;  %v3696_v49 = vsel %vm882_vm1, %v6698_v29, -inf }
 0x98f   : > { %3694 = vmax.xlane.f32.xlu0 %v3693_v42 }
 0x991   : > { %3697 = vmax.xlane.f32.xlu1 %v3696_v49 }
 0x993   : > { %3700 = vmax.xlane.f32.xlu0 %v3699_v40 }
 0x995   : > { %3703 = vmax.xlane.f32.xlu1 %v3702_v6 }
 0xa01   : > { %v3665_v59 = vpop.xlane.xlu0 %3664 }
 0xa02   : > { %v3707_v58 = vsub.f32 %v6611_v44, %v3665_v59 }
 0xa03   : > { %v3668_v60 = vpop.xlane.xlu1 %3667 }
 0xa04   : > { %v3725_v26 = vmul.f32 1.442695, %v3707_v58  ;;  %v3708_v46 = vsub.f32 %v6613_v50, %v3668_v60 }
 0xa06   : > { %5387 = vpow2.f32 %v3725_v26  ;;  %v3727_v32 = vmul.f32 1.442695, %v3708_v46 }
 0xa08   : > { %5389 = vpow2.f32 %v3727_v32  ;;  %v3677_v54 = vpop.xlane.xlu0 %3676 }
 0xa09   : > { %v3711_v61 = vsub.f32 %v6628_v37, %v3677_v54 }
 0xa0a   : > { %v3680_v52 = vpop.xlane.xlu1 %3679 }
 0xa0b   : > { %v3733_v53 = vmul.f32 1.442695, %v3711_v61  ;;  %v3712_v57 = vsub.f32 %v6635_v63, %v3680_v52 }
 0xa0c   : > { %v3659_v2 = vpop.xlane.xlu0 %3658 }
 0xa0d   : > { %5391 = vpow2.f32 %v3733_v53  ;;  %v3735_v8 = vmul.f32 1.442695, %v3712_v57  ;;  %v3705_v62 = vsub.f32 %v6633_v47, %v3659_v2 }
 0xa0e   : > { %v3662_v44 = vpop.xlane.xlu1 %3661 }
 0xa0f   : > { %5393 = vpow2.f32 %v3735_v8  ;;  %v3721_v55 = vmul.f32 1.442695, %v3705_v62  ;;  %v3706_v50 = vsub.f32 %v6642_v0, %v3662_v44 }
 0xa10   : > { %v6723_v48 = vpop.eup %5387  ;;  %v3671_v19 = vpop.xlane.xlu0 %3670 }
 0xa11   : > { %5395 = vpow2.f32 %v3721_v55  ;;  %v3723_v34 = vmul.f32 1.442695, %v3706_v50  ;;  %v3709_v37 = vsub.f32 %v6649_v3, %v3671_v19  ;;  %v3759_v63 = vsel %vm882_vm1, %v6723_v48, 0.0  ;;  %v533_v19 = vld [vmem:[%s5770_s24 + $0x180] sm:$0xff] }
 0xa12   : > { %v6728_v11 = vpop.eup %5389  ;;  %v3674_v16 = vpop.xlane.xlu1 %3673  ;;  %3760 = vadd.xlane.f32.xlu0 %v3759_v63  ;;  %v535_v63 = vld [vmem:[%s5770_s24 + $0x190] sm:$0xff] }
 0xa13   : > { %5397 = vpow2.f32 %v3723_v34  ;;  %v3729_v47 = vmul.f32 1.442695, %v3709_v37  ;;  %v3710_v18 = vsub.f32 %v6656_v5, %v3674_v16  ;;  %v3762_v0 = vsel %vm892_vm2, %v6728_v11, 0.0  ;;  %v534_v34 = vld [vmem:[%s5770_s24 + $0x188] sm:$0xff]  ;;  %v536_v16 = vld [vmem:[%s5770_s24 + $0x198] sm:$0x1] }
 0xa14   : > { %3763 = vadd.xlane.f32.xlu1 %v3762_v0  ;;  %v3689_v33 = vpop.xlane.xlu0 %3688  ;;  %v3405_v37 = vpack.c.bf16 %v534_v34, %v533_v19  ;;  %v538_v0 = vld [vmem:[%s5770_s24 + $0x1a8] sm:$0xff] }
 0xa15   : > { %5399 = vpow2.f32 %v3729_v47  ;;  %v3731_v56 = vmul.f32 1.442695, %v3710_v18  ;;  %v3715_v3 = vsub.f32 %v6660_v4, %v3689_v33  ;;  %v3406_v47 = vpack.c.bf16 %v536_v16, %v535_v63  ;;  %v537_v18 = vld [vmem:[%s5770_s24 + $0x1a0] sm:$0xff] }
 0xa16   : > { %v3692_v38 = vpop.xlane.xlu1 %3691  ;;  %5034 = vmatprep.subr.bf16.mxu0 %v3405_v37 }
 0xa17   : > { %v6734_v43 = vpop.eup %5391  ;;  %5401 = vpow2.f32 %v3731_v56  ;;  %v3741_v9 = vmul.f32 1.442695, %v3715_v3  ;;  %v3716_v14 = vsub.f32 %v6670_v13, %v3692_v38  ;;  %5035 = vmatpush3.bf16.msra.mxu0 %v3405_v37  ;;  %v3848_v33 = vand.u32 %v3406_v47, %v5779_v35  ;;  %v539_v3 = vld [vmem:[%s5770_s24 + $0x1b0] sm:$0xff]  ;;  %v540_v38 = vld [vmem:[%s5770_s24 + $0x1b8] sm:$0x1] }
 0xa18   : > { %v3683_v15 = vpop.xlane.xlu0 %3682  ;;  %v3771_v5 = vsel %vm882_vm1, %v6734_v43, 0.0  ;;  %v3407_v56 = vpack.c.bf16 %v538_v0, %v537_v18 }
 0xa19   : > { %v6739_v1 = vpop.eup %5393  ;;  %5403 = vpow2.f32 %v3741_v9  ;;  %v3743_v7 = vmul.f32 1.442695, %v3716_v14  ;;  %v3713_v10 = vsub.f32 %v6679_v20, %v3683_v15  ;;  %3772 = vadd.xlane.f32.xlu0 %v3771_v5  ;;  %5036 = vmatprep.subr.bf16.mxu0 %v3848_v33  ;;  %v3408_v9 = vpack.c.bf16 %v540_v38, %v539_v3  ;;  %v541_v15 = vld [vmem:[%s5770_s24 + $0x1c0] sm:$0xff]  ;;  %v542_v5 = vld [vmem:[%s5770_s24 + $0x1c8] sm:$0xff] }
 0xa1a   : > { %v3686_v39 = vpop.xlane.xlu1 %3685  ;;  %v3774_v4 = vsel %vm892_vm2, %v6739_v1, 0.0  ;;  %5042 = vmatprep.subr.bf16.mxu1 %v3407_v56 }
 0xa1b   : > { %v6744_v24 = vpop.eup %5395  ;;  %5405 = vpow2.f32 %v3743_v7  ;;  %v3737_v30 = vmul.f32 1.442695, %v3713_v10  ;;  %v3714_v13 = vsub.f32 %v6684_v31, %v3686_v39  ;;  %3775 = vadd.xlane.f32.xlu1 %v3774_v4  ;;  %5037 = vmatpush3.bf16.msra.mxu0 %v3848_v33  ;;  %v3906_v14 = vand.u32 %v3408_v9, %v5779_v35  ;;  %v545_v10 = vld [vmem:[%s5770_s24 + $0x1e0] sm:$0xff]  ;;  %v546_v39 = vld [vmem:[%s5770_s24 + $0x1e8] sm:$0xff] }
 0xa1c   : > { %v3695_v17 = vpop.xlane.xlu0 %3694  ;;  %v3753_v23 = vsel %vm882_vm1, %v6744_v24, 0.0  ;;  %5043 = vmatpush3.bf16.msra.mxu1 %v3407_v56  ;;  %v6809_v7 = vpack.c.bf16 %v542_v5, %v541_v15  ;;  %v6814_v4 = vpack.c.bf16 %v546_v39, %v545_v10 }
 0xa1d   : > { %v6749_v22 = vpop.eup %5397  ;;  %5407 = vpow2.f32 %v3737_v30  ;;  %v3739_v20 = vmul.f32 1.442695, %v3714_v13  ;;  %v3717_v21 = vsub.f32 %v6688_v12, %v3695_v17  ;;  %3754 = vadd.xlane.f32.xlu0 %v3753_v23  ;;  %5044 = vmatprep.subr.bf16.mxu1 %v3906_v14 }
 0xa1e   : > { %v3698_v27 = vpop.xlane.xlu1 %3697  ;;  %v3756_v45 = vsel %vm882_vm1, %v6749_v22, 0.0  ;;  %5050 = vmatprep.subr.bf16.mxu0 %v6809_v7 }
 0xa1f   : > { %v6754_v36 = vpop.eup %5399  ;;  %5409 = vpow2.f32 %v3739_v20  ;;  %v3745_v31 = vmul.f32 1.442695, %v3717_v21  ;;  %v3718_v41 = vsub.f32 %v6698_v29, %v3698_v27  ;;  %3757 = vadd.xlane.f32.xlu1 %v3756_v45 }
 0xa20   : > { %v3701_v42 = vpop.xlane.xlu0 %3700  ;;  %v3765_v25 = vsel %vm882_vm1, %v6754_v36, 0.0  ;;  %5045 = vmatpush3.bf16.msra.mxu1 %v3906_v14 }
 0xa21   : > { %v6759_v49 = vpop.eup %5401  ;;  %5411 = vpow2.f32 %v3745_v31  ;;  %v3747_v12 = vmul.f32 1.442695, %v3718_v41  ;;  %v3719_v40 = vsub.f32 %v6707_v28, %v3701_v42  ;;  %3766 = vadd.xlane.f32.xlu0 %v3765_v25  ;;  %5058 = vmatprep.subr.bf16.mxu1 %v6814_v4  ;;  %v543_v41 = vld [vmem:[%s5770_s24 + $0x1d0] sm:$0xff]  ;;  %v544_v42 = vld [vmem:[%s5770_s24 + $0x1d8] sm:$0x1] }
 0xa22   : > { %v3704_v6 = vpop.xlane.xlu1 %3703  ;;  %v3768_v59 = vsel %vm882_vm1, %v6759_v49, 0.0 }
 0xa23   : > { %v6764_v58 = vpop.eup %5403  ;;  %5413 = vpow2.f32 %v3747_v12  ;;  %v3749_v29 = vmul.f32 1.442695, %v3719_v40  ;;  %v3720_v60 = vsub.f32 %v6709_v51, %v3704_v6  ;;  %3769 = vadd.xlane.f32.xlu1 %v3768_v59 }
 0xa24   : > { %v3783_v26 = vsel %vm882_vm1, %v6764_v58, 0.0 }
 0xa25   : > { %v6769_v46 = vpop.eup %5405  ;;  %5415 = vpow2.f32 %v3749_v29  ;;  %v3751_v32 = vmul.f32 1.442695, %v3720_v60  ;;  %3784 = vadd.xlane.f32.xlu0 %v3783_v26  ;;  %v3410_v29 = vpack.c.bf16 %v544_v42, %v543_v41 }
 0xa26   : > { %v3786_v28 = vsel %vm892_vm2, %v6769_v46, 0.0 }
 0xa27   : > { %v6773_v54 = vpop.eup %5407  ;;  %5417 = vpow2.f32 %v3751_v32  ;;  %3787 = vadd.xlane.f32.xlu1 %v3786_v28  ;;  %v3964_v63 = vand.u32 %v3410_v29, %v5779_v35 }
 0xa28   : > { %v3777_v61 = vsel %vm882_vm1, %v6773_v54, 0.0 }
 0xa29   : > { %v6777_v51 = vpop.eup %5409  ;;  %3778 = vadd.xlane.f32.xlu0 %v3777_v61 }
 0xa2a   : > { %v3780_v52 = vsel %vm882_vm1, %v6777_v51, 0.0 }
 0xa2b   : > { %v6781_v53 = vpop.eup %5411  ;;  %3781 = vadd.xlane.f32.xlu1 %v3780_v52 }
 0xa2c   : > { %v3789_v57 = vsel %vm882_vm1, %v6781_v53, 0.0 }
 0xa2d   : > { %v6785_v2 = vpop.eup %5413  ;;  %3790 = vadd.xlane.f32.xlu0 %v3789_v57  ;;  %v547_v57 = vld [vmem:[%s5770_s24 + $0x1f0] sm:$0xff] }
 0xa2e   : > { %v3792_v8 = vsel %vm882_vm1, %v6785_v2, 0.0 }
 0xa2f   : > { %v6789_v62 = vpop.eup %5415  ;;  %3793 = vadd.xlane.f32.xlu1 %v3792_v8  ;;  %v548_v8 = vld [vmem:[%s5770_s24 + $0x1f8] sm:$0x1] }
 0xa30   : > { %v3795_v44 = vsel %vm882_vm1, %v6789_v62, 0.0  ;;  %v3412_v18 = vpack.c.bf16 %v548_v8, %v547_v57 }
 0xa31   : > { %v6793_v55 = vpop.eup %5417  ;;  %3796 = vadd.xlane.f32.xlu0 %v3795_v44 }
 0xa32   : > { %v3798_v50 = vsel %vm892_vm2, %v6793_v55, 0.0  ;;  %v4022_v3 = vand.u32 %v3412_v18, %v5779_v35 }
 0xa33   : > { %3799 = vadd.xlane.f32.xlu1 %v3798_v50 }
 0xa9f   : > { %v3761_v30 = vpop.xlane.xlu0 %3760 }
 0xaa1   : > { %v3764_v13 = vpop.xlane.xlu1 %3763 }
 0xaa2   : > { %5419 = vrcp.f32 %v3764_v13 }
 0xaa6   : > { %v3773_v17 = vpop.xlane.xlu0 %3772 }
 0xaa8   : > { %v3776_v23 = vpop.xlane.xlu1 %3775 }
 0xaaa   : > { %v3755_v20 = vpop.xlane.xlu0 %3754 }
 0xaab   : > { %5421 = vrcp.f32 %v3755_v20 }
 0xaac   : > { %5423 = vrcp.f32 %v3761_v30  ;;  %v3758_v21 = vpop.xlane.xlu1 %3757  ;;  %v5420_v25 = vpop.eup %5419 }
 0xaad   : > { %5425 = vrcp.f32 %v3758_v21  ;;  %v3820_v26 = vmul.f32 %v5420_v25, %v6728_v11 }
 0xaae   : > { %5427 = vrcp.f32 %v3776_v23  ;;  %v3767_v27 = vpop.xlane.xlu0 %3766 }
 0xaaf   : > { %5429 = vrcp.f32 %v3767_v27 }
 0xab0   : > { %5431 = vrcp.f32 %v3773_v17  ;;  %v3770_v45 = vpop.xlane.xlu1 %3769 }
 0xab1   : > { %5433 = vrcp.f32 %v3770_v45 }
 0xab2   : > { %v3785_v31 = vpop.xlane.xlu0 %3784 }
 0xab4   : > { %v3788_v12 = vpop.xlane.xlu1 %3787 }
 0xab5   : > { %v5422_v40 = vpop.eup %5421  ;;  %5435 = vrcp.f32 %v3788_v12 }
 0xab6   : > { %v5424_v6 = vpop.eup %5423  ;;  %v3779_v59 = vpop.xlane.xlu0 %3778  ;;  %v3817_v61 = vmul.f32 %v5422_v40, %v6744_v24 }
 0xab7   : > { %v5426_v60 = vpop.eup %5425  ;;  %5437 = vrcp.f32 %v3779_v59  ;;  %v3819_v50 = vmul.f32 %v5424_v6, %v6723_v48 }
 0xab8   : > { %v5428_v32 = vpop.eup %5427  ;;  %5439 = vrcp.f32 %v3785_v31  ;;  %v3782_v28 = vpop.xlane.xlu1 %3781  ;;  %v3818_v52 = vmul.f32 %v5426_v60, %v6749_v22 }
 0xab9   : > { %v5430_v44 = vpop.eup %5429  ;;  %5441 = vrcp.f32 %v3782_v28  ;;  %v3824_v16 = vmul.f32 %v5428_v32, %v6739_v1  ;;  %v3834_v47 = vpack.c.bf16 %v3820_v26, %v3819_v50 }
 0xaba   : > { %v5432_v19 = vpop.eup %5431  ;;  %v3791_v34 = vpop.xlane.xlu0 %3790  ;;  %v3833_v37 = vpack.c.bf16 %v3818_v52, %v3817_v61  ;;  %v3821_v22 = vmul.f32 %v5430_v44, %v6754_v36 }
 0xabb   : > { %v5434_v11 = vpop.eup %5433  ;;  %5443 = vrcp.f32 %v3791_v34  ;;  %v3823_v48 = vmul.f32 %v5432_v19, %v6734_v43  ;;  %v4555_v19 = vld [vmem:[%s6914_s5] ss:$0 sm:$0xff] }
 0xabc   : > { %v3794_v24 = vpop.xlane.xlu1 %3793  ;;  %5038 = vmatprep.mubr.msk.bf16.mxu0 %vm882_vm1, %v3833_v37  ;;  %v3822_v0 = vmul.f32 %v5434_v11, %v6759_v49 }
 0xabd   : > { %5445 = vrcp.f32 %v3794_v24  ;;  %5039 = vmatmul.mubr.msk.bf16.vlgmr.msra.gmra.mrb[64].mxu0 %vm882_vm1, %v3834_v47  ;;  %v3836_v1 = vpack.c.bf16 %v3824_v16, %v3823_v48 }
 0xabe   : > { %v3797_v33 = vpop.xlane.xlu0 %3796  ;;  %v3835_v56 = vpack.c.bf16 %v3822_v0, %v3821_v22  ;;  %5051 = vmatpush3.bf16.msra.mxu0 %v6809_v7 }
 0xabf   : > { %5447 = vrcp.f32 %v3797_v33  ;;  %5052 = vmatprep.subr.bf16.mxu0 %v3964_v63  ;;  %v5436_v38 = vpop.eup %5435 }
 0xac0   : > { %v3800_v9 = vpop.xlane.xlu1 %3799  ;;  %5046 = vmatprep.mubr.msk.bf16.mxu1 %vm882_vm1, %v3835_v56  ;;  %v3828_v14 = vmul.f32 %v5436_v38, %v6769_v46 }
 0xac1   : > { %v5438_v36 = vpop.eup %5437  ;;  %5449 = vrcp.f32 %v3800_v9  ;;  %5047 = vmatmul.mubr.msk.bf16.vlgmr.msra.gmra.mrb[64].mxu1 %vm882_vm1, %v3836_v1 }
 0xac2   : > { %v5440_v43 = vpop.eup %5439  ;;  %5053 = vmatpush3.bf16.msra.mxu0 %v3964_v63  ;;  %5059 = vmatpush3.bf16.msra.mxu1 %v6814_v4  ;;  %v3825_v15 = vmul.f32 %v5438_v36, %v6773_v54 }
 0xac3   : > { %v5442_v49 = vpop.eup %5441  ;;  %5060 = vmatprep.subr.bf16.mxu1 %v4022_v3  ;;  %v3827_v7 = vmul.f32 %v5440_v43, %v6764_v58 }
 0xac4   : > { %v3826_v35 = vmul.f32 %v5442_v49, %v6777_v51 }
 0xac5   : > { %v5444_v5 = vpop.eup %5443  ;;  %v3838_v30 = vpack.c.bf16 %v3828_v14, %v3827_v7 }
 0xac6   : > { %v3837_v10 = vpack.c.bf16 %v3826_v35, %v3825_v15  ;;  %5061 = vmatpush3.bf16.msra.mxu1 %v4022_v3  ;;  %v3829_v13 = vmul.f32 %v5444_v5, %v6781_v53  ;;  %v4546_v53 = vld [vmem:[%s6913_s4 + $0x18] sm:$0xff] }
 0xac7   : > { %v5446_v39 = vpop.eup %5445  ;;  %v4075_v20 = vpack.c.bf16 %v4546_v53, %v4546_v53 }
 0xac8   : > { %5054 = vmatprep.mubr.msk.bf16.mxu0 %vm882_vm1, %v3837_v10  ;;  %v3830_v4 = vmul.f32 %v5446_v39, %v6785_v2 }
 0xac9   : > { %v5448_v17 = vpop.eup %5447  ;;  %5055 = vmatmul.mubr.msk.bf16.vlgmr.msra.gmra.mrb[68].mxu0 %vm882_vm1, %v3838_v30  ;;  %5182 = vmatprep.subr.msk.bf16.mxu0 %vm1074_vm3, %v4075_v20  ;;  %v4091_v2 = vsel %vm1074_vm3, %v4075_v20, 0 }
 0xaca   : > { %v3839_v46 = vpack.c.bf16 %v3830_v4, %v3829_v13  ;;  %v3831_v51 = vmul.f32 %v5448_v17, %v6789_v62  ;;  %5183 = vmatprep.subr.msk.bf16.mxu1 %vm1074_vm3, %v4075_v20  ;;  %5067 = vmatpush3.bf16.msra.mxu0 %v4091_v2 }
 0xacb   : > { %v5450_v54 = vpop.eup %5449  ;;  %5184 = vmatprep.subr.msk.bf16.mxu0 %vm1074_vm3, %v4075_v20 }
 0xacc   : > { %v3832_v23 = vmul.f32 %v5450_v54, %v6793_v55  ;;  %5062 = vmatprep.mubr.msk.bf16.mxu1 %vm882_vm1, %v3839_v46 }
 0xace   : > { %v3840_v58 = vpack.c.bf16 %v3832_v23, %v3831_v51 }
 0xad0   : > { %5063 = vmatmul.mubr.msk.bf16.vlgmr.msra.gmra.mrb[68].mxu1 %vm882_vm1, %v3840_v58 }
 0xad1   : > { %5073 = vmatpush3.bf16.msra.mxu1 %v4091_v2 }
 0xad2   : > { %5185 = vmatprep.subr.msk.bf16.mxu1 %vm1074_vm3, %v4075_v20 }
 0xb90   : > { %v5040_v62 = vpop.f32.mrb[64].mxu0 }
 0xb91   : > { %v3884_v55 = vpop.f32.mrb[65].mxu0 }
 0xb92   : > { %v5041_v21 = vpop.f32.mrb[66].mxu0 }
 0xb93   : > { %v4077_v27 = vpack.c.bf16 %v5041_v21, %v5040_v62  ;;  %v3887_v45 = vpop.f32.mrb[67].mxu0 }
 0xb94   : > { %v4076_v31 = vpack.c.bf16 %v3887_v45, %v3884_v55  ;;  %v5048_v41 = vpop.f32.mrb[64].mxu1 }
 0xb95   : > { %v3942_v42 = vpop.f32.mrb[65].mxu1 }
 0xb96   : > { %v5049_v25 = vpop.f32.mrb[66].mxu1  ;;  %5068 = vmatprep.mubr.msk.bf16.mxu0 %vm637_vm0, %v4076_v31 }
 0xb97   : > { %v4079_v12 = vpack.c.bf16 %v5049_v25, %v5048_v41  ;;  %v3945_v40 = vpop.f32.mrb[67].mxu1  ;;  %5069 = vmatmul.mubr.msk.bf16.vlgmr.msra.gmra.mrb[32].mxu0 %vm637_vm0, %v4077_v27 }
 0xb98   : > { %v4078_v6 = vpack.c.bf16 %v3945_v40, %v3942_v42  ;;  %5079 = vmatpush3.bf16.msra.mxu0 %v4091_v2 }
 0xb9a   : > { %5074 = vmatprep.mubr.msk.bf16.mxu1 %vm637_vm0, %v4078_v6 }
 0xb9b   : > { %5075 = vmatmul.mubr.msk.bf16.vlgmr.msra.gmra.mrb[32].mxu1 %vm637_vm0, %v4079_v12 }
 0xb9c   : > { %v5056_v59 = vpop.f32.mrb[68].mxu0  ;;  %5085 = vmatpush3.bf16.msra.mxu1 %v4091_v2 }
 0xb9d   : > { %v4000_v29 = vpop.f32.mrb[69].mxu0 }
 0xb9e   : > { %v5057_v60 = vpop.f32.mrb[70].mxu0 }
 0xb9f   : > { %v4081_v26 = vpack.c.bf16 %v5057_v60, %v5056_v59  ;;  %v4003_v32 = vpop.f32.mrb[71].mxu0 }
 0xba0   : > { %v4080_v28 = vpack.c.bf16 %v4003_v32, %v4000_v29 }
 0xba2   : > { %5080 = vmatprep.mubr.msk.bf16.mxu0 %vm637_vm0, %v4080_v28 }
 0xba3   : > { %v5064_v61 = vpop.f32.mrb[68].mxu1  ;;  %5081 = vmatmul.mubr.msk.bf16.vlgmr.msra.gmra.mrb[36].mxu0 %vm637_vm0, %v4081_v26 }
 0xba4   : > { %v4058_v52 = vpop.f32.mrb[69].mxu1 }
 0xba5   : > { %v5065_v57 = vpop.f32.mrb[70].mxu1 }
 0xba6   : > { %v4083_v8 = vpack.c.bf16 %v5065_v57, %v5064_v61  ;;  %v4061_v44 = vpop.f32.mrb[71].mxu1 }
 0xba7   : > { %v4082_v50 = vpack.c.bf16 %v4061_v44, %v4058_v52 }
 0xba9   : > { %5086 = vmatprep.mubr.msk.bf16.mxu1 %vm637_vm0, %v4082_v50 }
 0xbaa   : > { %5087 = vmatmul.mubr.msk.bf16.vlgmr.msra.gmra.mrb[36].mxu1 %vm637_vm0, %v4083_v8 }
 0xc6a   : > { %v5070_v34 = vpop.f32.mrb[32].mxu0 }
 0xc6b   : > { %v4332_v37 = vadd.f32 %v5070_v34, %v4555_v19  ;;  %v4127_v63 = vpop.f32.mrb[33].mxu0 }
 0xc6c   : > { %v4330_v11 = vadd.f32 %v4555_v19, %v4127_v63  ;;  %v5071_v16 = vpop.f32.mrb[34].mxu0 }
 0xc6d   : > { %4349 = vst.msk [vmem:[%s6872_s11 + $0x10] sm:$0xff] %vm4346_vm5, %v4332_v37  ;;  %v4333_v47 = vadd.f32 %v5071_v16, %v4555_v19  ;;  %v4130_v18 = vpop.f32.mrb[35].mxu0 }
 0xc6e   : > { %4347 = vst.msk [vmem:[%s6872_s11] sm:$0xff] %vm4346_vm5, %v4330_v11  ;;  %v4331_v24 = vadd.f32 %v4555_v19, %v4130_v18  ;;  %v5076_v22 = vpop.f32.mrb[32].mxu1 }
 0xc6f   : > { %4351 = vst.msk [vmem:[%s6872_s11 + $0x18] sm:$0x1] %vm4350_vm6, %v4333_v47  ;;  %v4336_v0 = vadd.f32 %v5076_v22, %v4555_v19  ;;  %v4182_v48 = vpop.f32.mrb[33].mxu1 }
 0xc70   : > { %4348 = vst.msk [vmem:[%s6872_s11 + $0x8] sm:$0xff] %vm4346_vm5, %v4331_v24  ;;  %v4334_v33 = vadd.f32 %v4555_v19, %v4182_v48  ;;  %v5077_v56 = vpop.f32.mrb[34].mxu1 }
 0xc71   : > { %4354 = vst.msk [vmem:[%s6872_s11 + $0x30] sm:$0xff] %vm4346_vm5, %v4336_v0  ;;  %v4337_v1 = vadd.f32 %v5077_v56, %v4555_v19  ;;  %v4185_v3 = vpop.f32.mrb[35].mxu1 }
 0xc72   : > { %4352 = vst.msk [vmem:[%s6872_s11 + $0x20] sm:$0xff] %vm4346_vm5, %v4334_v33  ;;  %v4335_v38 = vadd.f32 %v4555_v19, %v4185_v3 }
 0xc73   : > { %4355 = vst.msk [vmem:[%s6872_s11 + $0x38] sm:$0x1] %vm4350_vm6, %v4337_v1 }
 0xc74   : > { %4353 = vst.msk [vmem:[%s6872_s11 + $0x28] sm:$0xff] %vm4346_vm5, %v4335_v38 }
 0xc76   : > { %v5082_v9 = vpop.f32.mrb[36].mxu0 }
 0xc77   : > { %v4340_v36 = vadd.f32 %v5082_v9, %v4555_v19  ;;  %v4237_v43 = vpop.f32.mrb[37].mxu0 }
 0xc78   : > { %v4338_v49 = vadd.f32 %v4555_v19, %v4237_v43  ;;  %v5083_v14 = vpop.f32.mrb[38].mxu0 }
 0xc79   : > { %4358 = vst.msk [vmem:[%s6872_s11 + $0x50] sm:$0xff] %vm4346_vm5, %v4340_v36  ;;  %v4341_v15 = vadd.f32 %v5083_v14, %v4555_v19  ;;  %v4240_v35 = vpop.f32.mrb[39].mxu0 }
 0xc7a   : > { %4356 = vst.msk [vmem:[%s6872_s11 + $0x40] sm:$0xff] %vm4346_vm5, %v4338_v49  ;;  %v4339_v5 = vadd.f32 %v4555_v19, %v4240_v35 }
 0xc7b   : > { %4359 = vst.msk [vmem:[%s6872_s11 + $0x58] sm:$0x1] %vm4350_vm6, %v4341_v15 }
 0xc7c   : > { %4357 = vst.msk [vmem:[%s6872_s11 + $0x48] sm:$0xff] %vm4346_vm5, %v4339_v5 }
 0xc7d   : > { %v5088_v7 = vpop.f32.mrb[36].mxu1 }
 0xc7e   : > { %v4344_v10 = vadd.f32 %v5088_v7, %v4555_v19  ;;  %v4292_v39 = vpop.f32.mrb[37].mxu1 }
 0xc7f   : > { %v4342_v30 = vadd.f32 %v4555_v19, %v4292_v39  ;;  %v5089_v13 = vpop.f32.mrb[38].mxu1 }
 0xc80   : > { %4362 = vst.msk [vmem:[%s6872_s11 + $0x70] sm:$0xff] %vm4346_vm5, %v4344_v10  ;;  %v4345_v4 = vadd.f32 %v5089_v13, %v4555_v19  ;;  %v4295_v17 = vpop.f32.mrb[39].mxu1 }
 0xc81   : > { %4360 = vst.msk [vmem:[%s6872_s11 + $0x60] sm:$0xff] %vm4346_vm5, %v4342_v30  ;;  %v4343_v46 = vadd.f32 %v4555_v19, %v4295_v17 }
 0xc82   : > { %4363 = vst.msk [vmem:[%s6872_s11 + $0x78] sm:$0x1] %vm4350_vm6, %v4345_v4 }
 0xc83   : > { %4361 = vst.msk [vmem:[%s6872_s11 + $0x68] sm:$0xff] %vm4346_vm5, %v4343_v46 }
 0xc84 PF: > { %s16_s21 = sadd.s32 1, %s5457_s21  }
 0xc85   : > { %p13_p4 = scmp.ge.s32.totalorder %s16_s21, 4  }
 0xc87   :  { %15 = sbr.rel (!%p13_p4) target bundleno = 1 (0x1), region = 83 }

// kernel: lrt_forward.13
= control target key start
LH: loop header
LB: loop body
LE: loop exit
PB: predicated region body
PF: predicated region fallthrough
CT: control target
= control target key end

     0   :  { %s792_s18 = smov 0   ;;  %s1046_s0 = inlined_call_operand.vmem [shape: f32[208,32], index: 0, kind: input, shape index: {}]   ;;  %s1047_s1 = inlined_call_operand.vmem [shape: f32[1,32], index: 1, kind: input, shape index: {}]   ;;  %s1048_s2 = inlined_call_operand.vmem [shape: f32[1,32], index: 2, kind: input, shape index: {}]   ;;  %s1049_s3 = inlined_call_operand.vmem [shape: f32[32,96], index: 3, kind: input, shape index: {}]   ;;  %s1050_s4 = inlined_call_operand.vmem [shape: f32[1,96], index: 4, kind: input, shape index: {}]   ;;  %s1051_s5 = inlined_call_operand.vmem [shape: f32[208,96], index: 5, kind: output, shape index: {}]  }
   0x1 LB: > { %s652_s19 = sadd.s32 4294967295, %s758_s18   ;;  %p656_p0 = scmp.ge.s32.totalorder %s758_s18, 1  ;;  %s758_s18 = sphi %s792_s18, %s15_s18  }
   0x2   : > { %p188_p1 = scmp.lt.s32.totalorder %s758_s18, 3 }
   0x4   : > { %p189_p2 = pnand %p656_p0, %p188_p1 }
   0x5   : > { %s216_s20 = smul.u32 (!%p189_p2), 13, %s652_s19  ;;  %vm242_vm0 = vcmask (!%p189_p2), 261120   ;;  %vm761_vm1 = vmmov (!%p189_p2), 0   ;;  %vm582_vm2 = vcmask (!%p189_p2), 785408  }
   0x6   : > { %192 = sbr.rel (%p189_p2) target bundleno = 577 (0x241), region = 40 }
   0x7   : > { %p217_p3 = scmp.lt.s32.totalorder (!%p189_p2), %s216_s20, 25 }
   0xd   : > { %s1053_s20 = smov (!%p217_p3, %s216_s20), 25 }
   0xe   : > { %s657_s21 = sshll.u32 %s1053_s20, 3 }
   0xf   : > { %s808_s24 = scalar_lea.vmem %s1046_s0, %s657_s21  ;;  %s1015_s16 = scalar_lea.vmem %s1051_s5, %s657_s21 }
  0x10   : > { %v229_v0 = vld [vmem:[%s808_s24] sm:$0xff]  ;;  %v231_v1 = vld [vmem:[%s808_s24 + $0x10] sm:$0xff]  ;;  %v230_v2 = vld [vmem:[%s808_s24 + $0x8] sm:$0xff] }
  0x11   : > { %v243_v3 = vsel %vm242_vm0, %v229_v0, 0.0  ;;  %v249_v4 = vsel %vm242_vm0, %v231_v1, 0.0  ;;  %v232_v5 = vld [vmem:[%s808_s24 + $0x18] sm:$0xff]  ;;  %v246_v6 = vsel %vm242_vm0, %v230_v2, 0.0  ;;  %v237_v8 = vld [vmem:[%s808_s24 + $0x40] sm:$0xff]  ;;  %v238_v9 = vld [vmem:[%s808_s24 + $0x48] sm:$0xff] }
  0x12   : > { %244 = vadd.xlane.f32.xlu0 %v243_v3  ;;  %250 = vadd.xlane.f32.xlu1 %v249_v4  ;;  %v252_v7 = vsel %vm242_vm0, %v232_v5, 0.0  ;;  %v267_v10 = vsel %vm242_vm0, %v237_v8, 0.0  ;;  %v270_v11 = vsel %vm242_vm0, %v238_v9, 0.0  ;;  %v233_v12 = vld [vmem:[%s808_s24 + $0x20] sm:$0xff]  ;;  %v234_v13 = vld [vmem:[%s808_s24 + $0x28] sm:$0xff]  ;;  %v827_v16 = vld [vmem:[%s808_s24 + $0x50] sm:$0xff] }
  0x13   : > { %v255_v14 = vsel %vm242_vm0, %v233_v12, 0.0  ;;  %v258_v15 = vsel %vm242_vm0, %v234_v13, 0.0  ;;  %v830_v17 = vld [vmem:[%s808_s24 + $0x58] sm:$0xff]  ;;  %v273_v18 = vsel %vm242_vm0, %v827_v16, 0.0  ;;  %v837_v20 = vld [vmem:[%s808_s24 + $0x30] sm:$0xff]  ;;  %v847_v24 = vld [vmem:[%s808_s24 + $0x60] sm:$0xff] }
  0x14   : > { %v276_v19 = vsel %vm242_vm0, %v830_v17, 0.0  ;;  %v840_v21 = vld [vmem:[%s808_s24 + $0x38] sm:$0xff]  ;;  %v261_v22 = vsel %vm242_vm0, %v837_v20, 0.0  ;;  %v279_v25 = vsel %vm242_vm0, %v847_v24, 0.0 }
  0x15   : > { %v264_v23 = vsel %vm242_vm0, %v840_v21, 0.0 }
  0x16   : > { %247 = vadd.xlane.f32.xlu0 %v246_v6  ;;  %253 = vadd.xlane.f32.xlu1 %v252_v7 }
  0x1a   : > { %268 = vadd.xlane.f32.xlu0 %v267_v10  ;;  %271 = vadd.xlane.f32.xlu1 %v270_v11 }
  0x1e   : > { %256 = vadd.xlane.f32.xlu0 %v255_v14  ;;  %259 = vadd.xlane.f32.xlu1 %v258_v15 }
  0x22   : > { %274 = vadd.xlane.f32.xlu0 %v273_v18  ;;  %277 = vadd.xlane.f32.xlu1 %v276_v19 }
  0x26   : > { %262 = vadd.xlane.f32.xlu0 %v261_v22  ;;  %265 = vadd.xlane.f32.xlu1 %v264_v23 }
  0x2a   : > { %280 = vadd.xlane.f32.xlu0 %v279_v25 }
  0x9f   : > { %v245_v26 = vpop.xlane.xlu0 %244  ;;  %v251_v27 = vpop.xlane.xlu1 %250 }
  0xa0   : > { %v283_v28 = vmul.f32 0.03125, %v245_v26  ;;  %v285_v29 = vmul.f32 0.03125, %v251_v27 }
  0xa2   : > { %v851_v30 = vsub.f32 %v229_v0, %v283_v28  ;;  %v853_v31 = vsub.f32 %v231_v1, %v285_v29  ;;  %v460_v28 = vld [vmem:[%s1049_s3] sm:$0xff] }
  0xa3   : > { %v248_v32 = vpop.xlane.xlu0 %247  ;;  %v254_v33 = vpop.xlane.xlu1 %253 }
  0xa4   : > { %v284_v34 = vmul.f32 0.03125, %v248_v32  ;;  %v286_v35 = vmul.f32 0.03125, %v254_v33  ;;  %v309_v36 = vmul.f32 %v851_v30, %v851_v30  ;;  %v311_v37 = vmul.f32 %v853_v31, %v853_v31  ;;  %v462_v33 = vld [vmem:[%s1049_s3 + $0x10] sm:$0xff] }
  0xa5   : > { %v760_v32 = vmov 0.0  }
  0xa6   : > { %v859_v38 = vsub.f32 %v230_v2, %v284_v34  ;;  %v861_v39 = vsub.f32 %v232_v5, %v286_v35  ;;  %v322_v40 = vsel %vm242_vm0, %v309_v36, 0.0  ;;  %v328_v43 = vsel %vm242_vm0, %v311_v37, 0.0  ;;  %680 = vmatprep.subr.bf16.mxu0 %v760_v32  ;;  %712 = vmatprep.subr.bf16.mxu1 %v760_v32  ;;  %v463_v34 = vld [vmem:[%s1049_s3 + $0x18] sm:$0xff] }
  0xa7   : > { %323 = vadd.xlane.f32.xlu1 %v322_v40  ;;  %v269_v41 = vpop.xlane.xlu0 %268  ;;  %v272_v42 = vpop.xlane.xlu1 %271  ;;  %v465_v35 = vpack.c.bf16 %v463_v34, %v462_v33  ;;  %684 = vmatprep.mubr.msk.bf16.mxu0 %vm761_vm1, %v760_v32 }
  0xa8   : > { %v291_v44 = vmul.f32 0.03125, %v269_v41  ;;  %v292_v45 = vmul.f32 0.03125, %v272_v42  ;;  %v310_v46 = vmul.f32 %v859_v38, %v859_v38  ;;  %v312_v47 = vmul.f32 %v861_v39, %v861_v39  ;;  %700 = vmatprep.mubr.msk.bf16.mxu1 %vm761_vm1, %v760_v32 }
  0xaa   : > { %v869_v48 = vsub.f32 %v237_v8, %v291_v44  ;;  %v871_v49 = vsub.f32 %v238_v9, %v292_v45  ;;  %v325_v50 = vsel %vm242_vm0, %v310_v46, 0.0  ;;  %v331_v53 = vsel %vm242_vm0, %v312_v47, 0.0 }
  0xab   : > { %329 = vadd.xlane.f32.xlu1 %v328_v43  ;;  %326 = vadd.xlane.f32.xlu0 %v325_v50  ;;  %v257_v51 = vpop.xlane.xlu0 %256  ;;  %v260_v52 = vpop.xlane.xlu1 %259 }
  0xac   : > { %v287_v54 = vmul.f32 0.03125, %v257_v51  ;;  %v288_v55 = vmul.f32 0.03125, %v260_v52  ;;  %v317_v56 = vmul.f32 %v869_v48, %v869_v48  ;;  %v318_v57 = vmul.f32 %v871_v49, %v871_v49 }
  0xae   : > { %v879_v58 = vsub.f32 %v233_v12, %v287_v54  ;;  %v881_v59 = vsub.f32 %v234_v13, %v288_v55  ;;  %v346_v60 = vsel %vm242_vm0, %v317_v56, 0.0  ;;  %v349_v63 = vsel %vm242_vm0, %v318_v57, 0.0 }
  0xaf   : > { %332 = vadd.xlane.f32.xlu0 %v331_v53  ;;  %347 = vadd.xlane.f32.xlu1 %v346_v60  ;;  %v275_v61 = vpop.xlane.xlu0 %274  ;;  %v278_v62 = vpop.xlane.xlu1 %277 }
  0xb0   : > { %v293_v0 = vmul.f32 0.03125, %v275_v61  ;;  %v294_v1 = vmul.f32 0.03125, %v278_v62  ;;  %v313_v2 = vmul.f32 %v879_v58, %v879_v58  ;;  %v314_v3 = vmul.f32 %v881_v59, %v881_v59 }
  0xb2   : > { %v890_v4 = vsub.f32 %v827_v16, %v293_v0  ;;  %v893_v5 = vsub.f32 %v830_v17, %v294_v1  ;;  %v334_v6 = vsel %vm242_vm0, %v313_v2, 0.0  ;;  %v337_v9 = vsel %vm242_vm0, %v314_v3, 0.0 }
  0xb3   : > { %350 = vadd.xlane.f32.xlu0 %v349_v63  ;;  %335 = vadd.xlane.f32.xlu1 %v334_v6  ;;  %v263_v7 = vpop.xlane.xlu0 %262  ;;  %v266_v8 = vpop.xlane.xlu1 %265 }
  0xb4   : > { %v289_v10 = vmul.f32 0.03125, %v263_v7  ;;  %v290_v11 = vmul.f32 0.03125, %v266_v8  ;;  %v319_v12 = vmul.f32 %v890_v4, %v890_v4  ;;  %v320_v13 = vmul.f32 %v893_v5, %v893_v5 }
  0xb6   : > { %v902_v14 = vsub.f32 %v837_v20, %v289_v10  ;;  %v905_v15 = vsub.f32 %v840_v21, %v290_v11  ;;  %v352_v16 = vsel %vm242_vm0, %v319_v12, 0.0  ;;  %v355_v19 = vsel %vm242_vm0, %v320_v13, 0.0 }
  0xb7   : > { %338 = vadd.xlane.f32.xlu0 %v337_v9  ;;  %353 = vadd.xlane.f32.xlu1 %v352_v16  ;;  %v281_v17 = vpop.xlane.xlu0 %280  ;;  %v945_v9 = vld [vmem:[%s1047_s1] ss:$0 sm:$0xff] }
  0xb8   : > { %v295_v18 = vmul.f32 0.03125, %v281_v17  ;;  %v315_v22 = vmul.f32 %v902_v14, %v902_v14  ;;  %v316_v23 = vmul.f32 %v905_v15, %v905_v15 }
  0xba   : > { %v914_v20 = vsub.f32 %v847_v24, %v295_v18  ;;  %v340_v21 = vsel %vm242_vm0, %v315_v22, 0.0  ;;  %v343_v25 = vsel %vm242_vm0, %v316_v23, 0.0  ;;  %v461_v24 = vld [vmem:[%s1049_s3 + $0x8] sm:$0xff] }
  0xbb   : > { %356 = vadd.xlane.f32.xlu0 %v355_v19  ;;  %341 = vadd.xlane.f32.xlu1 %v340_v21  ;;  %v464_v29 = vpack.c.bf16 %v461_v24, %v460_v28  ;;  %v953_v21 = vld [vmem:[%s1048_s2] ss:$0 sm:$0xff] }
  0xbc   : > { %v321_v26 = vmul.f32 %v914_v20, %v914_v20 }
  0xbd   : > { %681 = vmatpush3.bf16.msra.mxu0 %v464_v29  ;;  %714 = vmatpush3.bf16.msra.mxu1 %v464_v29 }
  0xbe   : > { %v358_v27 = vsel %vm242_vm0, %v321_v26, 0.0  ;;  %682 = vmatprep.subr.bf16.mxu0 %v760_v32  ;;  %713 = vmatprep.subr.bf16.mxu1 %v760_v32 }
  0xbf   : > { %344 = vadd.xlane.f32.xlu0 %v343_v25  ;;  %359 = vadd.xlane.f32.xlu1 %v358_v27 }
  0xc1   : > { %683 = vmatpush3.bf16.msra.mxu0 %v465_v35  ;;  %715 = vmatpush3.bf16.msra.mxu1 %v465_v35 }
 0x134   : > { %v324_v36 = vpop.xlane.xlu1 %323 }
 0x135   : > { %v361_v37 = vmul.f32 0.03125, %v324_v36 }
 0x137   : > { %v374_v40 = vadd.f32 1e-05, %v361_v37 }
 0x138   : > { %v330_v41 = vpop.xlane.xlu1 %329  ;;  %v327_v42 = vpop.xlane.xlu0 %326 }
 0x139   : > { %726 = vrsqrt.f32 %v374_v40  ;;  %v363_v43 = vmul.f32 0.03125, %v330_v41  ;;  %v362_v44 = vmul.f32 0.03125, %v327_v42 }
 0x13b   : > { %v375_v45 = vadd.f32 1e-05, %v362_v44  ;;  %v376_v46 = vadd.f32 1e-05, %v363_v43 }
 0x13c   : > { %v348_v47 = vpop.xlane.xlu1 %347  ;;  %v333_v50 = vpop.xlane.xlu0 %332 }
 0x13d   : > { %v369_v51 = vmul.f32 0.03125, %v348_v47  ;;  %v364_v52 = vmul.f32 0.03125, %v333_v50  ;;  %728 = vrsqrt.f32 %v375_v45 }
 0x13e   : > { %730 = vrsqrt.f32 %v376_v46 }
 0x13f   : > { %v382_v53 = vadd.f32 1e-05, %v369_v51  ;;  %v377_v54 = vadd.f32 1e-05, %v364_v52 }
 0x140   : > { %v336_v55 = vpop.xlane.xlu1 %335  ;;  %v351_v56 = vpop.xlane.xlu0 %350 }
 0x141   : > { %732 = vrsqrt.f32 %v382_v53  ;;  %v365_v57 = vmul.f32 0.03125, %v336_v55  ;;  %v370_v60 = vmul.f32 0.03125, %v351_v56 }
 0x142   : > { %734 = vrsqrt.f32 %v377_v54 }
 0x143   : > { %v727_v61 = vpop.eup %726  ;;  %v383_v62 = vadd.f32 1e-05, %v370_v60  ;;  %v378_v63 = vadd.f32 1e-05, %v365_v57 }
 0x144   : > { %v354_v0 = vpop.xlane.xlu1 %353  ;;  %v339_v1 = vpop.xlane.xlu0 %338  ;;  %v400_v6 = vmul.f32 %v727_v61, %v851_v30 }
 0x145   : > { %v371_v2 = vmul.f32 0.03125, %v354_v0  ;;  %v366_v3 = vmul.f32 0.03125, %v339_v1  ;;  %736 = vrsqrt.f32 %v383_v62 }
 0x146   : > { %738 = vrsqrt.f32 %v378_v63  ;;  %v420_v30 = vmul.f32 %v945_v9, %v400_v6 }
 0x147   : > { %v384_v7 = vadd.f32 1e-05, %v371_v2  ;;  %v379_v8 = vadd.f32 1e-05, %v366_v3  ;;  %v729_v10 = vpop.eup %728 }
 0x148   : > { %v342_v11 = vpop.xlane.xlu1 %341  ;;  %v357_v12 = vpop.xlane.xlu0 %356  ;;  %v401_v13 = vmul.f32 %v729_v10, %v859_v38  ;;  %v440_v35 = vadd.f32 %v953_v21, %v420_v30 }
 0x149   : > { %740 = vrsqrt.f32 %v384_v7  ;;  %v367_v16 = vmul.f32 0.03125, %v342_v11  ;;  %v372_v17 = vmul.f32 0.03125, %v357_v12  ;;  %v731_v18 = vpop.eup %730 }
 0x14a   : > { %742 = vrsqrt.f32 %v379_v8  ;;  %v421_v23 = vmul.f32 %v945_v9, %v401_v13  ;;  %v402_v34 = vmul.f32 %v731_v18, %v853_v31 }
 0x14b   : > { %v733_v19 = vpop.eup %732  ;;  %v385_v22 = vadd.f32 1e-05, %v372_v17  ;;  %v380_v26 = vadd.f32 1e-05, %v367_v16 }
 0x14c   : > { %v735_v25 = vpop.eup %734  ;;  %v360_v27 = vpop.xlane.xlu1 %359  ;;  %v408_v28 = vmul.f32 %v733_v19, %v869_v48  ;;  %v441_v36 = vadd.f32 %v953_v21, %v421_v23  ;;  %v422_v31 = vmul.f32 %v945_v9, %v402_v34  ;;  %v661_v19 = vld [vmem:[%s1050_s4] ss:$0 sm:$0xff] }
 0x14d   : > { %v345_v38 = vpop.xlane.xlu0 %344  ;;  %v403_v24 = vmul.f32 %v735_v25, %v861_v39  ;;  %v373_v29 = vmul.f32 0.03125, %v360_v27  ;;  %744 = vrsqrt.f32 %v385_v22 }
 0x14e   : > { %v368_v33 = vmul.f32 0.03125, %v345_v38  ;;  %746 = vrsqrt.f32 %v380_v26  ;;  %v453_v42 = vpack.c.bf16 %v441_v36, %v440_v35  ;;  %v428_v39 = vmul.f32 %v945_v9, %v408_v28 }
 0x14f   : > { %v386_v37 = vadd.f32 1e-05, %v373_v29  ;;  %v737_v41 = vpop.eup %736  ;;  %v423_v43 = vmul.f32 %v945_v9, %v403_v24  ;;  %v442_v55 = vadd.f32 %v953_v21, %v422_v31 }
 0x150   : > { %v381_v40 = vadd.f32 1e-05, %v368_v33  ;;  %v409_v48 = vmul.f32 %v737_v41, %v871_v49  ;;  %v739_v44 = vpop.eup %738  ;;  %685 = vmatmul.mubr.msk.bf16.vlgmr.msra.gmra.mrb[0].mxu0 %vm242_vm0, %v453_v42  ;;  %v448_v52 = vadd.f32 %v953_v21, %v428_v39 }
 0x151   : > { %748 = vrsqrt.f32 %v386_v37  ;;  %688 = vmatprep.mubr.msk.bf16.mxu0 %vm761_vm1, %v760_v32  ;;  %v443_v50 = vadd.f32 %v953_v21, %v423_v43  ;;  %v404_v54 = vmul.f32 %v739_v44, %v879_v58 }
 0x152   : > { %750 = vrsqrt.f32 %v381_v40  ;;  %v429_v46 = vmul.f32 %v945_v9, %v409_v48 }
 0x153   : > { %v741_v45 = vpop.eup %740  ;;  %v454_v60 = vpack.c.bf16 %v443_v50, %v442_v55  ;;  %v424_v58 = vmul.f32 %v945_v9, %v404_v54 }
 0x154   : > { %v743_v47 = vpop.eup %742  ;;  %v410_v49 = vmul.f32 %v741_v45, %v890_v4  ;;  %v449_v53 = vadd.f32 %v953_v21, %v429_v46 }
 0x155   : > { %v405_v51 = vmul.f32 %v743_v47, %v881_v59  ;;  %v444_v10 = vadd.f32 %v953_v21, %v424_v58 }
 0x156   : > { %v457_v56 = vpack.c.bf16 %v449_v53, %v448_v52  ;;  %v430_v4 = vmul.f32 %v945_v9, %v410_v49 }
 0x157   : > { %v745_v57 = vpop.eup %744  ;;  %v425_v61 = vmul.f32 %v945_v9, %v405_v51 }
 0x158   : > { %v411_v62 = vmul.f32 %v745_v57, %v893_v5  ;;  %701 = vmatmul.mubr.msk.bf16.vlgmr.msra.gmra.mrb[0].mxu1 %vm242_vm0, %v457_v56  ;;  %v747_v59 = vpop.eup %746  ;;  %689 = vmatmul.mubr.msk.bf16.gmra.mrb[4].mxu0 %vm242_vm0, %v454_v60  ;;  %v450_v6 = vadd.f32 %v953_v21, %v430_v4 }
 0x159   : > { %704 = vmatprep.mubr.msk.bf16.mxu1 %vm761_vm1, %v760_v32  ;;  %692 = vmatprep.mubr.msk.bf16.mxu0 %vm761_vm1, %v760_v32  ;;  %v445_v2 = vadd.f32 %v953_v21, %v425_v61  ;;  %v406_v8 = vmul.f32 %v747_v59, %v902_v14 }
 0x15a   : > { %v431_v0 = vmul.f32 %v945_v9, %v411_v62 }
 0x15b   : > { %v749_v63 = vpop.eup %748  ;;  %v455_v13 = vpack.c.bf16 %v445_v2, %v444_v10 }
 0x15c   : > { %v751_v1 = vpop.eup %750  ;;  %v412_v5 = vmul.f32 %v749_v63, %v914_v20  ;;  %v451_v7 = vadd.f32 %v953_v21, %v431_v0 }
 0x15d   : > { %v407_v3 = vmul.f32 %v751_v1, %v905_v15  ;;  %v426_v15 = vmul.f32 %v945_v9, %v406_v8 }
 0x15e   : > { %v458_v11 = vpack.c.bf16 %v451_v7, %v450_v6  ;;  %v432_v12 = vmul.f32 %v945_v9, %v412_v5 }
 0x15f   : > { %v427_v16 = vmul.f32 %v945_v9, %v407_v3  ;;  %v446_v17 = vadd.f32 %v953_v21, %v426_v15 }
 0x160   : > { %705 = vmatmul.mubr.msk.bf16.gmra.mrb[4].mxu1 %vm242_vm0, %v458_v11  ;;  %693 = vmatmul.mubr.msk.bf16.gmra.mrb[8].mxu0 %vm242_vm0, %v455_v13  ;;  %v452_v14 = vadd.f32 %v953_v21, %v432_v12 }
 0x161   : > { %708 = vmatprep.mubr.msk.bf16.mxu1 %vm761_vm1, %v760_v32  ;;  %696 = vmatprep.mubr.msk.bf16.mxu0 %vm761_vm1, %v760_v32  ;;  %v447_v20 = vadd.f32 %v953_v21, %v427_v16 }
 0x162   : > { %v459_v18 = vpack.c.bf16 %v452_v14, %v452_v14 }
 0x163   : > { %v456_v30 = vpack.c.bf16 %v447_v20, %v446_v17 }
 0x168   : > { %709 = vmatmul.mubr.msk.bf16.gmra.mrb[8].mxu1 %vm242_vm0, %v459_v18  ;;  %697 = vmatmul.mubr.msk.bf16.gmra.mrb[12].mxu0 %vm242_vm0, %v456_v30 }
 0x223   : > { %v528_v32 = vpop.f32.mrb[0].mxu0 }
 0x224   : > { %v529_v9 = vadd.f32 %v661_v19, %v528_v32  ;;  %v686_v22 = vpop.f32.mrb[1].mxu0 }
 0x225   : > { %v531_v23 = vpop.f32.mrb[2].mxu0 }
 0x226   : > { %583 = vst.msk [vmem:[%s1015_s16] sm:$0xff] %vm582_vm2, %v529_v9  ;;  %v532_v21 = vadd.f32 %v661_v19, %v531_v23  ;;  %v687_v25 = vpop.f32.mrb[3].mxu0 }
 0x228   : > { %584 = vst.msk [vmem:[%s1015_s16 + $0x8] sm:$0xff] %vm582_vm2, %v532_v21 }
 0x22b   : > { %v560_v26 = vpop.f32.mrb[0].mxu1  ;;  %v536_v27 = vpop.f32.mrb[4].mxu0 }
 0x22c   : > { %v561_v38 = vadd.f32 %v661_v19, %v560_v26  ;;  %v702_v28 = vpop.f32.mrb[1].mxu1  ;;  %v537_v24 = vadd.f32 %v661_v19, %v536_v27  ;;  %v690_v29 = vpop.f32.mrb[5].mxu0 }
 0x22d   : > { %v563_v33 = vpop.f32.mrb[2].mxu1  ;;  %v539_v34 = vpop.f32.mrb[6].mxu0 }
 0x22e   : > { %591 = vst.msk [vmem:[%s1015_s16 + $0x40] sm:$0xff] %vm582_vm2, %v561_v38  ;;  %v564_v35 = vadd.f32 %v661_v19, %v563_v33  ;;  %v703_v36 = vpop.f32.mrb[3].mxu1  ;;  %585 = vst.msk [vmem:[%s1015_s16 + $0x10] sm:$0xff] %vm582_vm2, %v537_v24  ;;  %v540_v37 = vadd.f32 %v661_v19, %v539_v34  ;;  %v691_v40 = vpop.f32.mrb[7].mxu0 }
 0x230   : > { %592 = vst.msk [vmem:[%s1015_s16 + $0x48] sm:$0xff] %vm582_vm2, %v564_v35  ;;  %586 = vst.msk [vmem:[%s1015_s16 + $0x18] sm:$0xff] %vm582_vm2, %v540_v37 }
 0x233   : > { %v568_v41 = vpop.f32.mrb[4].mxu1  ;;  %v544_v42 = vpop.f32.mrb[8].mxu0 }
 0x234   : > { %v569_v43 = vadd.f32 %v661_v19, %v568_v41  ;;  %v706_v48 = vpop.f32.mrb[5].mxu1  ;;  %v545_v39 = vadd.f32 %v661_v19, %v544_v42  ;;  %v694_v44 = vpop.f32.mrb[9].mxu0 }
 0x235   : > { %v571_v31 = vpop.f32.mrb[6].mxu1  ;;  %v547_v45 = vpop.f32.mrb[10].mxu0 }
 0x236   : > { %593 = vst.msk [vmem:[%s1015_s16 + $0x50] sm:$0xff] %vm582_vm2, %v569_v43  ;;  %v572_v46 = vadd.f32 %v661_v19, %v571_v31  ;;  %v707_v47 = vpop.f32.mrb[7].mxu1  ;;  %587 = vst.msk [vmem:[%s1015_s16 + $0x20] sm:$0xff] %vm582_vm2, %v545_v39  ;;  %v548_v50 = vadd.f32 %v661_v19, %v547_v45  ;;  %v695_v49 = vpop.f32.mrb[11].mxu0 }
 0x238   : > { %594 = vst.msk [vmem:[%s1015_s16 + $0x58] sm:$0xff] %vm582_vm2, %v572_v46  ;;  %588 = vst.msk [vmem:[%s1015_s16 + $0x28] sm:$0xff] %vm582_vm2, %v548_v50 }
 0x23b   : > { %v576_v51 = vpop.f32.mrb[8].mxu1  ;;  %v552_v52 = vpop.f32.mrb[12].mxu0 }
 0x23c   : > { %v577_v53 = vadd.f32 %v661_v19, %v576_v51  ;;  %v710_v54 = vpop.f32.mrb[9].mxu1  ;;  %v553_v55 = vadd.f32 %v661_v19, %v552_v52  ;;  %v698_v56 = vpop.f32.mrb[13].mxu0 }
 0x23d   : > { %v579_v57 = vpop.f32.mrb[10].mxu1  ;;  %v555_v60 = vpop.f32.mrb[14].mxu0 }
 0x23e   : > { %595 = vst.msk [vmem:[%s1015_s16 + $0x60] sm:$0xff] %vm582_vm2, %v577_v53  ;;  %v711_v61 = vpop.f32.mrb[11].mxu1  ;;  %589 = vst.msk [vmem:[%s1015_s16 + $0x30] sm:$0xff] %vm582_vm2, %v553_v55  ;;  %v556_v62 = vadd.f32 %v661_v19, %v555_v60  ;;  %v699_v4 = vpop.f32.mrb[15].mxu0 }
 0x240   : > { %590 = vst.msk [vmem:[%s1015_s16 + $0x38] sm:$0xff] %vm582_vm2, %v556_v62 }
 0x241 PF: > { %s15_s18 = sadd.s32 1, %s758_s18  }
 0x242   : > { %p12_p4 = scmp.ge.s32.totalorder %s15_s18, 4  }
 0x244   :  { %14 = sbr.rel (!%p12_p4) target bundleno = 1 (0x1), region = 70 }

// kernel: lrt_forward.8
= control target key start
LH: loop header
LB: loop body
LE: loop exit
PB: predicated region body
PF: predicated region fallthrough
CT: control target
= control target key end

     0   :  { %s5214_s17 = smov 0   ;;  %s7254_s0 = inlined_call_operand.vmem [shape: f32[2,100,32], index: 0, kind: input, shape index: {}]   ;;  %s7255_s1 = inlined_call_operand.vmem [shape: f32[9,32,32], index: 1, kind: input, shape index: {}]   ;;  %s7256_s2 = inlined_call_operand.vmem [shape: f32[1,32], index: 2, kind: input, shape index: {}]   ;;  %s7257_s3 = inlined_call_operand.vmem [shape: f32[1,32], index: 3, kind: input, shape index: {}]   ;;  %s7258_s4 = inlined_call_operand.vmem [shape: f32[1,32], index: 4, kind: input, shape index: {}]   ;;  %s7259_s5 = inlined_call_operand.vmem [shape: f32[9,32,32], index: 5, kind: input, shape index: {}]   ;;  %s7260_s6 = inlined_call_operand.vmem [shape: f32[1,32], index: 6, kind: input, shape index: {}]   ;;  %s7261_s7 = inlined_call_operand.vmem [shape: f32[1,32], index: 7, kind: input, shape index: {}]   ;;  %s7262_s8 = inlined_call_operand.vmem [shape: f32[1,32], index: 8, kind: input, shape index: {}]   ;;  %s7263_s9 = inlined_call_operand.vmem [shape: f32[32,32], index: 9, kind: input, shape index: {}]   ;;  %s7264_s10 = inlined_call_operand.vmem [shape: f32[1,32], index: 10, kind: input, shape index: {}]   ;;  %s7265_s11 = inlined_call_operand.vmem [shape: f32[2,100,32], index: 11, kind: output, shape index: {}]  }
   0x1 LB: > { %s4099_s18 = sadd.s32 4294967295, %s5150_s17   ;;  %p4103_p0 = scmp.ge.s32.totalorder %s5150_s17, 1  ;;  %s5150_s17 = sphi %s5214_s17, %s21_s17  }
   0x2   : > { %p337_p1 = scmp.lt.s32.totalorder %s5150_s17, 3 }
   0x4   : > { %p338_p2 = pnand %p4103_p0, %p337_p1 }
   0x5   : > { %v4106_v0 = vld [vmem:[%s7255_s1 + $0x20] sm:$0xff] (!%p338_p2)  ;;  %v4107_v1 = vld [vmem:[%s7255_s1 + $0x28] sm:$0xff] (!%p338_p2)  ;;  %v4108_v2 = vld [vmem:[%s7255_s1 + $0x30] sm:$0xff] (!%p338_p2)  ;;  %p377_p3 = scmp.lt.s32.totalorder (!%p338_p2), %s4099_s18, 1  ;;  %v388_v3 = vlaneseq (!%p338_p2)  ;;  %v5152_v4 = vmov (!%p338_p2), 0.0   ;;  %vm636_vm0 = vcmask (!%p338_p2), 261120  }
   0x6   : > { %341 = sbr.rel (%p338_p2) target bundleno = 2191 (0x88f), region = 64  ;;  %4483 = vmatprep.subr.bf16.mxu0 (!%p338_p2), %v5152_v4  ;;  %5091 = vmatprep.subr.bf16.mxu1 (!%p338_p2), %v5152_v4  ;;  %v770_v5 = vpack.c.bf16 (!%p338_p2), %v4107_v1, %v4106_v0  ;;  %v4109_v6 = vld [vmem:[%s7255_s1 + $0x38] sm:$0xff] (!%p338_p2)  ;;  %vm5153_vm1 = vmmov (!%p338_p2), 0   ;;  %637 = vst.msk [vmem:[#allocation2] sm:$0xff] (!%p338_p2), %vm636_vm0, %v5152_v4  ;;  %638 = vst.msk [vmem:[#allocation2 + $0x8] sm:$0xff] (!%p338_p2), %vm636_vm0, %v5152_v4  ;;  %v4124_v34 = vld [vmem:[%s7255_s1 + $0x40] sm:$0xff] (!%p338_p2) }
   0x7   : > { %4487 = vmatprep.mubr.msk.bf16.mxu0 (!%p338_p2), %vm5153_vm1, %v5152_v4  ;;  %4503 = vmatprep.mubr.msk.bf16.mxu1 (!%p338_p2), %vm5153_vm1, %v5152_v4  ;;  %639 = vst.msk [vmem:[#allocation2 + $0x10] sm:$0xff] (!%p338_p2), %vm636_vm0, %v5152_v4  ;;  %640 = vst.msk [vmem:[#allocation2 + $0x18] sm:$0xff] (!%p338_p2), %vm636_vm0, %v5152_v4  ;;  %v5274_v7 = vshrl.u32 (!%p338_p2), %v388_v3, 7  ;;  %v771_v8 = vpack.c.bf16 (!%p338_p2), %v4109_v6, %v4108_v2  ;;  %v4125_v35 = vld [vmem:[%s7255_s1 + $0x48] sm:$0xff] (!%p338_p2)  ;;  %v739_v37 = vld [vmem:[%s7255_s1] sm:$0xff] (!%p338_p2) }
   0x8   : > { %641 = vst.msk [vmem:[#allocation2 + $0x20] sm:$0xff] (!%p338_p2), %vm636_vm0, %v5152_v4  ;;  %642 = vst.msk [vmem:[#allocation2 + $0x28] sm:$0xff] (!%p338_p2), %vm636_vm0, %v5152_v4  ;;  %4484 = vmatpush3.bf16.msra.mxu0 (!%p338_p2), %v770_v5  ;;  %5093 = vmatpush3.bf16.msra.mxu1 (!%p338_p2), %v770_v5  ;;  %v740_v38 = vld [vmem:[%s7255_s1 + $0x8] sm:$0xff] (!%p338_p2)  ;;  %v1054_v44 = vpack.c.bf16 (!%p338_p2), %v4125_v35, %v4124_v34  ;;  %v4126_v49 = vld [vmem:[%s7255_s1 + $0x50] sm:$0xff] (!%p338_p2) }
   0x9   : > { %643 = vst.msk [vmem:[#allocation2 + $0x30] sm:$0xff] (!%p338_p2), %vm636_vm0, %v5152_v4  ;;  %644 = vst.msk [vmem:[#allocation2 + $0x38] sm:$0xff] (!%p338_p2), %vm636_vm0, %v5152_v4  ;;  %4485 = vmatprep.subr.bf16.mxu0 (!%p338_p2), %v5152_v4  ;;  %5092 = vmatprep.subr.bf16.mxu1 (!%p338_p2), %v5152_v4  ;;  %v5280_v9 = vadd.s32 (!%p338_p2), 8, %v5274_v7  ;;  %v5283_v10 = vadd.s32 (!%p338_p2), 16, %v5274_v7  ;;  %v5286_v11 = vmul.u32.u64.low (!%p338_p2), 3435973837, %v5274_v7  ;;  %v5287_v12 = vmul.u32.u64.high 3435973837, %v5274_v7, %v5286_v11 }
   0xa   : > { %645 = vst.msk [vmem:[#allocation2 + $0x40] sm:$0xff] (!%p338_p2), %vm636_vm0, %v5152_v4  ;;  %646 = vst.msk [vmem:[#allocation2 + $0x48] sm:$0xff] (!%p338_p2), %vm636_vm0, %v5152_v4  ;;  %v5290_v13 = vadd.s32 (!%p338_p2), 24, %v5274_v7  ;;  %v5352_v41 = vadd.s32 (!%p338_p2), 32, %v5274_v7  ;;  %v5355_v45 = vadd.s32 (!%p338_p2), 40, %v5274_v7  ;;  %v743_v48 = vpack.c.bf16 (!%p338_p2), %v740_v38, %v739_v37  ;;  %v4127_v50 = vld [vmem:[%s7255_s1 + $0x58] sm:$0xff] (!%p338_p2) }
   0xb   : > { %647 = vst.msk [vmem:[#allocation2 + $0x50] sm:$0xff] (!%p338_p2), %vm636_vm0, %v5152_v4  ;;  %648 = vst.msk [vmem:[#allocation2 + $0x58] sm:$0xff] (!%p338_p2), %vm636_vm0, %v5152_v4  ;;  %v5300_v14 = vmul.u32.u64.low (!%p338_p2), 3435973837, %v5280_v9  ;;  %v5301_v15 = vmul.u32.u64.high 3435973837, %v5280_v9, %v5300_v14  ;;  %v5315_v22 = vmul.u32.u64.low (!%p338_p2), 3435973837, %v5283_v10  ;;  %v5316_v23 = vmul.u32.u64.high 3435973837, %v5283_v10, %v5315_v22 }
   0xc   : > { %649 = vst.msk [vmem:[#allocation2 + $0x60] sm:$0xff] (!%p338_p2), %vm636_vm0, %v5152_v4  ;;  %650 = vst.msk [vmem:[#allocation2 + $0x68] sm:$0xff] (!%p338_p2), %vm636_vm0, %v5152_v4  ;;  %4486 = vmatpush3.bf16.msra.mxu0 (!%p338_p2), %v771_v8  ;;  %5094 = vmatpush3.bf16.msra.mxu1 (!%p338_p2), %v771_v8  ;;  %v408_v26 = vshrl.u32 (!%p338_p2), %v5287_v12, 3  ;;  %v5325_v27 = vmul.u32.u64.low (!%p338_p2), 3435973837, %v5290_v13  ;;  %v5326_v28 = vmul.u32.u64.high 3435973837, %v5290_v13, %v5325_v27  ;;  %v741_v53 = vld [vmem:[%s7255_s1 + $0x10] sm:$0xff] (!%p338_p2)  ;;  %v1055_v62 = vpack.c.bf16 (!%p338_p2), %v4127_v50, %v4126_v49 }
   0xd   : > { %s7374_s18 = smov (!%p377_p3, %s4099_s18), 1  ;;  %651 = vst.msk [vmem:[#allocation2 + $0x70] sm:$0xff] %vm636_vm0, %v5152_v4  ;;  %652 = vst.msk [vmem:[#allocation2 + $0x78] sm:$0xff] %vm636_vm0, %v5152_v4  ;;  %4547 = vmatprep.subr.bf16.mxu0 %v5152_v4  ;;  %4515 = vmatprep.subr.bf16.mxu1 %v5152_v4  ;;  %v419_v32 = vshrl.u32 %v5301_v15, 3  ;;  %v745_v36 = vld [vmem:[#allocation2 + $0x6] sm:$0xff]  ;;  %v430_v51 = vshrl.u32 %v5316_v23, 3 }
   0xe   : > { %s5095_s27 = smul.u32 104, %s7374_s18  ;;  %v409_v39 = vmul.u32 10, %v408_v26  ;;  %v742_v54 = vld [vmem:[%s7255_s1 + $0x18] sm:$0xff]  ;;  %v441_v56 = vshrl.u32 %v5326_v28, 3  ;;  %v5375_v58 = vmul.u32.u64.low 3435973837, %v5352_v41  ;;  %v5376_v59 = vmul.u32.u64.high 3435973837, %v5352_v41, %v5375_v58 }
   0xf   : > { %v420_v40 = vmul.u32 10, %v419_v32  ;;  %v5380_v63 = vmul.u32.u64.low 3435973837, %v5355_v45  ;;  %v5381_v0 = vmul.u32.u64.high 3435973837, %v5355_v45, %v5380_v63  ;;  %v744_v3 = vpack.c.bf16 %v742_v54, %v741_v53  ;;  %v4136_v54 = vld [vmem:[%s7255_s1 + $0x68] sm:$0xff] }
  0x10   : > { %s5297_s30 = scalar_lea.vmem %s7254_s0, %s5095_s27  ;;  %v410_v55 = vsub.s32 %v5274_v7, %v409_v39  ;;  %v431_v5 = vmul.u32 10, %v430_v51  ;;  %v442_v6 = vmul.u32 10, %v441_v56  ;;  %v5390_v11 = vadd.s32 48, %v5274_v7  ;;  %s7223_s19 = scalar_lea.vmem %s7265_s11, %s5095_s27 }
  0x11   : > { %v653_v16 = vld [vmem:[%s5297_s30] sm:$0xff]  ;;  %v659_v17 = vld [vmem:[%s5297_s30 + $0x30] sm:$0xff]  ;;  %v660_v18 = vld [vmem:[%s5297_s30 + $0x38] sm:$0xff]  ;;  %v421_v57 = vsub.s32 %v5280_v9, %v420_v40  ;;  %v5426_v28 = vadd.s32 64, %v5274_v7  ;;  %v5431_v37 = vadd.s32 72, %v5274_v7  ;;  %v5474_v56 = vadd.s32 80, %v5274_v7 }
  0x12   : > { %666 = vst.msk [vmem:[#allocation2 + $0x10] sm:$0xff] %vm636_vm0, %v653_v16  ;;  %v661_v19 = vld [vmem:[%s5297_s30 + $0x40] sm:$0xff]  ;;  %672 = vst.msk [vmem:[#allocation2 + $0x40] sm:$0xff] %vm636_vm0, %v659_v17  ;;  %v654_v20 = vld [vmem:[%s5297_s30 + $0x8] sm:$0xff]  ;;  %vm545_vm2 = vcmp.ne.s32.totalorder %v410_v55, 0  ;;  %vm558_vm3 = vcmp.lt.s32.totalorder %v410_v55, 0  ;;  %v432_v16 = vsub.s32 %v5283_v10, %v431_v5  ;;  %v443_v17 = vsub.s32 %v5290_v13, %v442_v6 }
  0x13   : > { %673 = vst.msk [vmem:[#allocation2 + $0x48] sm:$0xff] %vm636_vm0, %v660_v18  ;;  %v655_v21 = vld [vmem:[%s5297_s30 + $0x10] sm:$0xff]  ;;  %674 = vst.msk [vmem:[#allocation2 + $0x50] sm:$0xff] %vm636_vm0, %v661_v19  ;;  %v662_v24 = vld [vmem:[%s5297_s30 + $0x48] sm:$0xff]  ;;  %vm546_vm4 = vcmp.ne.s32.totalorder %v421_v57, 0  ;;  %vm559_vm5 = vcmp.lt.s32.totalorder %v421_v57, 0 }
  0x14   : > { %667 = vst.msk [vmem:[#allocation2 + $0x18] sm:$0xff] %vm636_vm0, %v654_v20  ;;  %668 = vst.msk [vmem:[#allocation2 + $0x20] sm:$0xff] %vm636_vm0, %v655_v21  ;;  %v663_v25 = vld [vmem:[%s5297_s30 + $0x50] sm:$0xff]  ;;  %v656_v29 = vld [vmem:[%s5297_s30 + $0x18] sm:$0xff]  ;;  %v584_v14 = vadd.s32 10, %v410_v55  ;;  %v585_v15 = vadd.s32 10, %v421_v57 }
  0x15   : > { %675 = vst.msk [vmem:[#allocation2 + $0x58] sm:$0xff] %vm636_vm0, %v662_v24  ;;  %676 = vst.msk [vmem:[#allocation2 + $0x60] sm:$0xff] %vm636_vm0, %v663_v25  ;;  %v657_v30 = vld [vmem:[%s5297_s30 + $0x20] sm:$0xff]  ;;  %v664_v31 = vld [vmem:[%s5297_s30 + $0x58] sm:$0xff]  ;;  %v5401_v18 = vadd.s32 56, %v5274_v7  ;;  %v452_v19 = vshrl.u32 %v5376_v59, 3 }
  0x16   : > { %669 = vst.msk [vmem:[#allocation2 + $0x28] sm:$0xff] %vm636_vm0, %v656_v29  ;;  %670 = vst.msk [vmem:[#allocation2 + $0x30] sm:$0xff] %vm636_vm0, %v657_v30  ;;  %v658_v33 = vld [vmem:[%s5297_s30 + $0x28] sm:$0xff]  ;;  %v463_v10 = vshrl.u32 %v5381_v0, 3  ;;  %v5410_v22 = vmul.u32.u64.low 3435973837, %v5390_v11  ;;  %v5411_v23 = vmul.u32.u64.high 3435973837, %v5390_v11, %v5410_v22 }
  0x17   : > { %677 = vst.msk [vmem:[#allocation2 + $0x68] sm:$0xff] %vm636_vm0, %v664_v31  ;;  %671 = vst.msk [vmem:[#allocation2 + $0x38] sm:$0xff] %vm636_vm0, %v658_v33  ;;  %vm547_vm8 = vcmp.ne.s32.totalorder %v432_v16, 0  ;;  %vm560_vm9 = vcmp.lt.s32.totalorder %v432_v16, 0  ;;  %vm548_vm10 = vcmp.ne.s32.totalorder %v443_v17, 0  ;;  %vm561_vm11 = vcmp.lt.s32.totalorder %v443_v17, 0 }
  0x18   : > { %vm5392_vm6 = vmand %vm558_vm3, %vm545_vm2  ;;  %v5422_v26 = vmul.u32.u64.low 3435973837, %v5401_v18  ;;  %v5423_v27 = vmul.u32.u64.high 3435973837, %v5401_v18, %v5422_v26  ;;  %v586_v30 = vadd.s32 10, %v432_v16  ;;  %v453_v31 = vmul.u32 10, %v452_v19  ;;  %v680_v33 = vld [vmem:[#allocation2 + $0x5] sm:$0xff] }
  0x19   : > { %v746_v42 = vld [vmem:[#allocation2 + $0xe] sm:$0xff]  ;;  %vm572_vm7 = vmand %vm559_vm5, %vm546_vm4  ;;  %v5417_v24 = vsel %vm5392_vm6, %v584_v14, %v410_v55  ;;  %v464_v35 = vmul.u32 10, %v463_v10  ;;  %v5471_v55 = vld [vmem:[%s7255_s1 + $0x80] sm:$0xff]  ;;  %v5498_v12 = vadd.s32 88, %v5274_v7 }
  0x1a   : > { %v753_v43 = vld [vmem:[#allocation2 + $0x46] sm:$0xff]  ;;  %v758_v46 = vpack.c.bf16 %v746_v42, %v745_v36  ;;  %v754_v47 = vld [vmem:[#allocation2 + $0x4e] sm:$0xff]  ;;  %v5419_v25 = vsel %vm572_vm7, %v585_v15, %v421_v57  ;;  %vm610_vm12 = vcmp.ne.s32.totalorder %v5417_v24, 0  ;;  %vm573_vm14 = vmand %vm560_vm9, %vm547_vm8  ;;  %v587_v36 = vadd.s32 10, %v443_v17 }
  0x1b   : > { %v762_v52 = vpack.c.bf16 %v754_v47, %v753_v43  ;;  %v747_v60 = vld [vmem:[#allocation2 + $0x16] sm:$0xff]  ;;  %v748_v61 = vld [vmem:[#allocation2 + $0x1e] sm:$0xff]  ;;  %vm611_vm13 = vcmp.ne.s32.totalorder %v5419_v25, 0  ;;  %v681_v34 = vld [vmem:[#allocation2 + $0xd] sm:$0xff]  ;;  %v719_v40 = vsel %vm610_vm12, %v680_v33, 0.0  ;;  %v5439_v43 = vsel %vm573_vm14, %v586_v30, %v432_v16 }
  0x1c   : > { %4488 = vmatmul.mubr.msk.bf16.vlgmr.msra.gmra.mrb[0].mxu0 %vm636_vm0, %v758_v46  ;;  %v755_v1 = vld [vmem:[#allocation2 + $0x56] sm:$0xff]  ;;  %v756_v2 = vld [vmem:[#allocation2 + $0x5e] sm:$0xff]  ;;  %v759_v8 = vpack.c.bf16 %v748_v61, %v747_v60  ;;  %vm574_vm15 = vmand %vm561_vm11, %vm548_vm10  ;;  %v720_v42 = vsel %vm611_vm13, %v681_v34, 0.0  ;;  %v465_v46 = vsub.s32 %v5355_v45, %v464_v35  ;;  %v474_v47 = vshrl.u32 %v5411_v23, 3 }
  0x1d   : > { %4504 = vmatmul.mubr.msk.bf16.vlgmr.msra.gmra.mrb[0].mxu1 %vm636_vm0, %v762_v52  ;;  %4548 = vmatpush3.bf16.msra.mxu0 %v1054_v44  ;;  %v763_v9 = vpack.c.bf16 %v756_v2, %v755_v1  ;;  %v749_v20 = vld [vmem:[#allocation2 + $0x26] sm:$0xff]  ;;  %v750_v21 = vld [vmem:[#allocation2 + $0x2e] sm:$0xff]  ;;  %v454_v44 = vsub.s32 %v5352_v41, %v453_v31  ;;  %v5453_v50 = vsel %vm574_vm15, %v587_v36, %v443_v17  ;;  %v485_v41 = vshrl.u32 %v5423_v27, 3  ;;  %v683_v61 = vld [vmem:[#allocation2 + $0x1d] sm:$0xff] }
  0x1e   : > { %4516 = vmatpush3.bf16.msra.mxu1 %v743_v48  ;;  %4491 = vmatprep.mubr.msk.bf16.mxu0 %vm5153_vm1, %v5152_v4  ;;  %v757_v13 = vld [vmem:[#allocation2 + $0x66] sm:$0xf]  ;;  %v760_v29 = vpack.c.bf16 %v750_v21, %v749_v20  ;;  %v751_v38 = vld [vmem:[#allocation2 + $0x36] sm:$0xff]  ;;  %v752_v39 = vld [vmem:[#allocation2 + $0x3e] sm:$0xff]  ;;  %v5448_v48 = vmul.u32.u64.low 3435973837, %v5426_v28  ;;  %v5449_v49 = vmul.u32.u64.high 3435973837, %v5426_v28, %v5448_v48  ;;  %v732_v57 = vpack.c.bf16 %v720_v42, %v719_v40 }
  0x1f   : > { %4507 = vmatprep.mubr.msk.bf16.mxu1 %vm5153_vm1, %v5152_v4  ;;  %4549 = vmatprep.subr.bf16.mxu0 %v5152_v4  ;;  %v764_v32 = vpack.c.bf16 %v757_v13, %v757_v13  ;;  %v5457_v51 = vmul.u32.u64.low 3435973837, %v5431_v37  ;;  %v5458_v52 = vmul.u32.u64.high 3435973837, %v5431_v37, %v5457_v51  ;;  %v761_v53 = vpack.c.bf16 %v752_v39, %v751_v38  ;;  %v4135_v45 = vld [vmem:[%s7255_s1 + $0x60] sm:$0xff]  ;;  %v682_v58 = vld [vmem:[#allocation2 + $0x15] sm:$0xff]  ;;  %v5480_v60 = vld [vmem:[%s7255_s1 + $0x88] sm:$0xff] }
  0x20   : > { %4517 = vmatprep.subr.bf16.mxu1 %v5152_v4  ;;  %vm7269_vm2 = vcmp.ne.s32.totalorder %v5417_v24, 9  ;;  %vm7266_vm3 = vcmp.ne.s32.totalorder %v5419_v25, 9  ;;  %vm7282_vm4 = vcmp.ne.s32.totalorder %v5439_v43, 0  ;;  %v990_v59 = vld [vmem:[#allocation2 + $0x7] sm:$0xff]  ;;  %vm549_vm5 = vcmp.ne.s32.totalorder %v454_v44, 0  ;;  %v4149_v33 = vld [vmem:[%s7255_s1 + $0x98] sm:$0xff] }
  0x21   : > { %4550 = vmatpush3.bf16.msra.mxu0 %v1055_v62  ;;  %vm562_vm6 = vcmp.lt.s32.totalorder %v454_v44, 0  ;;  %vm7281_vm7 = vcmp.ne.s32.totalorder %v5453_v50, 0  ;;  %v5483_v62 = vld [vmem:[#allocation2 + $0xf] sm:$0xff]  ;;  %vm550_vm8 = vcmp.ne.s32.totalorder %v465_v46, 0  ;;  %vm563_vm9 = vcmp.lt.s32.totalorder %v465_v46, 0  ;;  %v5548_v34 = vld [vmem:[#allocation2 + $0x17] sm:$0xff] }
  0x22   : > { %4518 = vmatpush3.bf16.msra.mxu1 %v744_v3  ;;  %4611 = vmatprep.subr.bf16.mxu0 %v5152_v4  ;;  %v475_v63 = vmul.u32 10, %v474_v47  ;;  %v1216_v0 = vpack.c.bf16 %v4136_v54, %v4135_v45  ;;  %v588_v1 = vadd.s32 10, %v454_v44  ;;  %v486_v2 = vmul.u32 10, %v485_v41  ;;  %vm5487_vm10 = vmand %vm562_vm6, %vm549_vm5  ;;  %v684_v36 = vld [vmem:[#allocation2 + $0x25] sm:$0xff]  ;;  %v685_v38 = vld [vmem:[#allocation2 + $0x2d] sm:$0xff] }
  0x23   : > { %4579 = vmatprep.subr.bf16.mxu1 %v5152_v4  ;;  %v1365_v3 = vpack.c.bf16 %v5480_v60, %v5471_v55  ;;  %v589_v6 = vadd.s32 10, %v465_v46  ;;  %v721_v14 = vsel %vm7282_vm4, %v682_v58, 0.0  ;;  %v722_v15 = vsel %vm7281_vm7, %v683_v61, 0.0  ;;  %vm576_vm11 = vmand %vm563_vm9, %vm550_vm8  ;;  %v5595_v60 = vld [vmem:[#allocation2 + $0x27] sm:$0xff]  ;;  %v5597_v61 = vld [vmem:[#allocation2 + $0x2f] sm:$0xff] }
  0x24   : > { %4492 = vmatmul.mubr.msk.bf16.gmra.mrb[4].mxu0 %vm636_vm0, %v759_v8  ;;  %v4137_v8 = vld [vmem:[%s7255_s1 + $0x70] sm:$0xff]  ;;  %v1029_v16 = vsel %vm7269_vm2, %v990_v59, 0.0  ;;  %v1030_v17 = vsel %vm7266_vm3, %v5483_v62, 0.0  ;;  %v476_v19 = vsub.s32 %v5390_v11, %v475_v63  ;;  %v496_v20 = vshrl.u32 %v5449_v49, 3 }
  0x25   : > { %4508 = vmatmul.mubr.msk.bf16.gmra.mrb[4].mxu1 %vm636_vm0, %v763_v9  ;;  %4495 = vmatprep.mubr.msk.bf16.mxu0 %vm5153_vm1, %v5152_v4  ;;  %v4138_v9 = vld [vmem:[%s7255_s1 + $0x78] sm:$0xff]  ;;  %v5518_v21 = vmul.u32.u64.low 3435973837, %v5474_v56  ;;  %v5519_v10 = vmul.u32.u64.high 3435973837, %v5474_v56, %v5518_v21  ;;  %v5525_v22 = vsel %vm5487_vm10, %v588_v1, %v454_v44  ;;  %v487_v23 = vsub.s32 %v5401_v18, %v486_v2  ;;  %v4148_v18 = vld [vmem:[%s7255_s1 + $0x90] sm:$0xff] }
  0x26   : > { %4511 = vmatprep.mubr.msk.bf16.mxu1 %vm5153_vm1, %v5152_v4  ;;  %v507_v13 = vshrl.u32 %v5458_v52, 3  ;;  %v1217_v26 = vpack.c.bf16 %v4138_v9, %v4137_v8  ;;  %v5529_v11 = vsel %vm576_vm11, %v589_v6, %v465_v46  ;;  %v5537_v30 = vadd.s32 96, %v5274_v7  ;;  %v5550_v7 = vld [vmem:[#allocation2 + $0x1f] sm:$0xff]  ;;  %v5673_v46 = vld [vmem:[#allocation2 + $0x4f] sm:$0xff] }
  0x27   : > { %v733_v31 = vpack.c.bf16 %v722_v15, %v721_v14  ;;  %vm7268_vm14 = vcmp.ne.s32.totalorder %v5439_v43, 9  ;;  %vm7267_vm15 = vcmp.ne.s32.totalorder %v5453_v50, 9  ;;  %vm7275_vm5 = vcmp.ne.s32.totalorder %v5525_v22, 0  ;;  %v687_v1 = vld [vmem:[#allocation2 + $0x3d] sm:$0xff] }
  0x28   : > { %vm551_vm6 = vcmp.ne.s32.totalorder %v476_v19, 0  ;;  %vm564_vm8 = vcmp.lt.s32.totalorder %v476_v19, 0  ;;  %v497_v35 = vmul.u32 10, %v496_v20  ;;  %vm7270_vm9 = vcmp.ne.s32.totalorder %v5529_v11, 0 }
  0x29   : > { %vm552_vm10 = vcmp.ne.s32.totalorder %v487_v23, 0  ;;  %vm565_vm11 = vcmp.lt.s32.totalorder %v487_v23, 0  ;;  %v508_v39 = vmul.u32 10, %v507_v13  ;;  %v1366_v40 = vpack.c.bf16 %v4149_v33, %v4148_v18  ;;  %vm5563_vm3 = vmand %vm564_vm8, %vm551_vm6 }
  0x2a   : > { %v1031_v42 = vsel %vm7268_vm14, %v5548_v34, 0.0  ;;  %v1032_v44 = vsel %vm7267_vm15, %v5550_v7, 0.0  ;;  %v590_v47 = vadd.s32 10, %v476_v19  ;;  %v591_v48 = vadd.s32 10, %v487_v23  ;;  %vm578_vm15 = vmand %vm565_vm11, %vm552_vm10 }
  0x2b   : > { %v723_v49 = vsel %vm7275_vm5, %v684_v36, 0.0  ;;  %v724_v41 = vsel %vm7270_vm9, %v685_v38, 0.0  ;;  %v498_v51 = vsub.s32 %v5426_v28, %v497_v35  ;;  %v518_v52 = vshrl.u32 %v5519_v10, 3 }
  0x2c   : > { %4496 = vmatmul.mubr.msk.bf16.gmra.mrb[8].mxu0 %vm636_vm0, %v760_v29  ;;  %v5533_v27 = vmul.u32.u64.low 3435973837, %v5498_v12  ;;  %v5534_v29 = vmul.u32.u64.high 3435973837, %v5498_v12, %v5533_v27  ;;  %v5583_v54 = vmul.u32.u64.low 3435973837, %v5537_v30  ;;  %v5584_v55 = vmul.u32.u64.high 3435973837, %v5537_v30, %v5583_v54 }
  0x2d   : > { %4512 = vmatmul.mubr.msk.bf16.gmra.mrb[8].mxu1 %vm636_vm0, %v764_v32  ;;  %4499 = vmatprep.mubr.msk.bf16.mxu0 %vm5153_vm1, %v5152_v4  ;;  %v1042_v32 = vpack.c.bf16 %v1030_v17, %v1029_v16  ;;  %v5589_v28 = vsel %vm5563_vm3, %v590_v47, %v476_v19  ;;  %v5591_v58 = vsel %vm578_vm15, %v591_v48, %v487_v23  ;;  %vm7272_vm6 = vcmp.ne.s32.totalorder %v5525_v22, 9  ;;  %v665_v19 = vld [vmem:[%s5297_s30 + $0x60] sm:$0xf]  ;;  %v5638_v23 = vld [vmem:[#allocation2 + $0x37] sm:$0xff]  ;;  %v689_v27 = vld [vmem:[#allocation2 + $0x4d] sm:$0xff] }
  0x2e   : > { %4519 = vmatprep.mubr.msk.bf16.mxu1 %vm5153_vm1, %v5152_v4  ;;  %v529_v45 = vshrl.u32 %v5534_v29, 3  ;;  %v734_v59 = vpack.c.bf16 %v724_v41, %v723_v49  ;;  %vm553_vm8 = vcmp.ne.s32.totalorder %v498_v51, 0  ;;  %vm566_vm10 = vcmp.lt.s32.totalorder %v498_v51, 0  ;;  %v691_v47 = vld [vmem:[#allocation2 + $0x5d] sm:$0xff] }
  0x2f   : > { %vm7271_vm11 = vcmp.ne.s32.totalorder %v5529_v11, 9  ;;  %vm7274_vm3 = vcmp.ne.s32.totalorder %v5589_v28, 0  ;;  %vm7273_vm15 = vcmp.ne.s32.totalorder %v5591_v58, 0  ;;  %vm5605_vm9 = vmand %vm566_vm10, %vm553_vm8  ;;  %v1033_v6 = vsel %vm7272_vm6, %v5595_v60, 0.0 }
  0x30   : > { %v530_v63 = vmul.u32 10, %v529_v45  ;;  %v1034_v8 = vsel %vm7271_vm11, %v5597_v61, 0.0  ;;  %v726_v15 = vsel %vm7273_vm15, %v687_v1, 0.0  ;;  %v540_v17 = vshrl.u32 %v5584_v55, 3  ;;  %v5697_v55 = vld [vmem:[#allocation2 + $0x57] sm:$0xff] }
  0x31   : > { %v1044_v20 = vpack.c.bf16 %v1034_v8, %v1033_v6  ;;  %vm7276_vm11 = vcmask 257024   ;;  %vm7277_vm6 = vcmp.ne.s32.totalorder %v5591_v58, 9  ;;  %v1191_v6 = vsel %vm610_vm12, %v5483_v62, 0.0  ;;  %v4160_v62 = vld [vmem:[%s7255_s1 + $0xb8] sm:$0xff] }
  0x32   : > { %v531_v16 = vsub.s32 %v5498_v12, %v530_v63  ;;  %v5640_v12 = vld [vmem:[#allocation2 + $0x3f] sm:$0xff]  ;;  %v541_v13 = vmul.u32 10, %v540_v17  ;;  %679 = vst.msk [vmem:[#allocation2 + $0x70] sm:$0xf] %vm7276_vm11, %v665_v19  ;;  %v1192_v8 = vsel %vm611_vm13, %v5548_v34, 0.0  ;;  %v4159_v19 = vld [vmem:[%s7255_s1 + $0xb0] sm:$0xff] }
  0x33   : > { %v1036_v18 = vsel %vm7277_vm6, %v5640_v12, 0.0  ;;  %v1340_v34 = vld [vmem:[#allocation2 + $0x10] sm:$0xff] }
  0x34   : > { %4500 = vmatmul.mubr.msk.bf16.gmra.mrb[12].mxu0 %vm636_vm0, %v761_v53  ;;  %v509_v53 = vsub.s32 %v5431_v37, %v508_v39  ;;  %v519_v37 = vmul.u32 10, %v518_v52  ;;  %vm556_vm15 = vcmp.ne.s32.totalorder %v531_v16, 0  ;;  %v542_v36 = vsub.s32 %v5537_v30, %v541_v13  ;;  %v690_v30 = vld [vmem:[#allocation2 + $0x55] sm:$0xff] }
  0x35   : > { %4520 = vmatmul.mubr.msk.bf16.vlgmr.msra.gmra.mrb[12].mxu1 %vm636_vm0, %v732_v57  ;;  %4551 = vmatprep.mubr.msk.bf16.mxu0 %vm5153_vm1, %v5152_v4  ;;  %v1043_v57 = vpack.c.bf16 %v1032_v44, %v1031_v42  ;;  %v5671_v44 = vld [vmem:[#allocation2 + $0x47] sm:$0xff]  ;;  %v1194_v13 = vsel %vm7281_vm7, %v5595_v60, 0.0  ;;  %v4171_v60 = vld [vmem:[%s7255_s1 + $0xd8] sm:$0xff] }
  0x36   : > { %4580 = vmatpush3.bf16.msra.mxu1 %v1216_v0  ;;  %4523 = vmatprep.mubr.msk.bf16.mxu1 %vm5153_vm1, %v5152_v4  ;;  %vm554_vm14 = vcmp.ne.s32.totalorder %v509_v53, 0  ;;  %vm567_vm2 = vcmp.lt.s32.totalorder %v509_v53, 0  ;;  %v686_v0 = vld [vmem:[#allocation2 + $0x35] sm:$0xff]  ;;  %v593_v5 = vadd.s32 10, %v509_v53  ;;  %v520_v9 = vsub.s32 %v5474_v56, %v519_v37 }
  0x37   : > { %4581 = vmatprep.subr.bf16.mxu1 %v5152_v4  ;;  %vm580_vm8 = vmand %vm567_vm2, %vm554_vm14  ;;  %v725_v14 = vsel %vm7274_vm3, %v686_v0, 0.0  ;;  %vm7278_vm2 = vcmp.ne.s32.totalorder %v5589_v28, 9  ;;  %vm569_vm3 = vcmp.lt.s32.totalorder %v531_v16, 0  ;;  %v596_v48 = vadd.s32 10, %v542_v36 }
  0x38   : > { %v5634_v56 = vsel %vm580_vm8, %v593_v5, %v509_v53  ;;  %v735_v10 = vpack.c.bf16 %v726_v15, %v725_v14  ;;  %vm555_vm14 = vcmp.ne.s32.totalorder %v520_v9, 0  ;;  %vm568_vm10 = vcmp.lt.s32.totalorder %v520_v9, 0  ;;  %vm582_vm11 = vmand %vm569_vm3, %vm556_vm15  ;;  %v4158_v14 = vld [vmem:[%s7255_s1 + $0xa8] sm:$0xff] }
  0x39   : > { %vm619_vm8 = vcmp.ne.s32.totalorder %v5634_v56, 0  ;;  %vm581_vm5 = vmand %vm568_vm10, %vm555_vm14  ;;  %v594_v29 = vadd.s32 10, %v520_v9  ;;  %vm632_vm3 = vcmp.ne.s32.totalorder %v5634_v56, 9  ;;  %vm557_vm15 = vcmp.ne.s32.totalorder %v542_v36, 0 }
  0x3a   : > { %4582 = vmatpush3.bf16.msra.mxu1 %v1217_v26  ;;  %v688_v26 = vld [vmem:[#allocation2 + $0x45] sm:$0xff]  ;;  %v728_v35 = vsel %vm619_vm8, %v689_v27, 0.0  ;;  %vm570_vm10 = vcmp.lt.s32.totalorder %v542_v36, 0  ;;  %v1038_v41 = vsel %vm632_vm3, %v5673_v46, 0.0 }
  0x3b   : > { %4643 = vmatprep.subr.bf16.mxu1 %v5152_v4  ;;  %v5665_v39 = vsel %vm581_vm5, %v594_v29, %v520_v9  ;;  %vm583_vm5 = vmand %vm570_vm10, %vm557_vm15  ;;  %v4157_v9 = vld [vmem:[%s7255_s1 + $0xa0] sm:$0xff]  ;;  %v4169_v27 = vld [vmem:[%s7255_s1 + $0xc8] sm:$0xff]  ;;  %v1528_v29 = vpack.c.bf16 %v4160_v62, %v4159_v19 }
  0x3c   : > { %4552 = vmatmul.mubr.msk.bf16.vlgmr.msra.gmra.mrb[16].mxu0 %vm636_vm0, %v1042_v32  ;;  %v1035_v32 = vsel %vm7278_vm2, %v5638_v23, 0.0  ;;  %vm620_vm6 = vcmp.ne.s32.totalorder %v5665_v39, 0  ;;  %v5693_v45 = vsel %vm583_vm5, %v596_v48, %v542_v36  ;;  %v1527_v17 = vpack.c.bf16 %v4158_v14, %v4157_v9  ;;  %v1344_v48 = vld [vmem:[#allocation2 + $0x30] sm:$0xff]  ;;  %v4179_v62 = vld [vmem:[%s7255_s1 + $0xe0] sm:$0xff] }
  0x3d   : > { %4524 = vmatmul.mubr.msk.bf16.gmra.mrb[16].mxu1 %vm636_vm0, %v733_v31  ;;  %4612 = vmatpush3.bf16.msra.mxu0 %v1365_v3  ;;  %v592_v3 = vadd.s32 10, %v498_v51  ;;  %v595_v31 = vadd.s32 10, %v531_v16  ;;  %v1045_v38 = vpack.c.bf16 %v1036_v18, %v1035_v32  ;;  %vm622_vm15 = vcmp.ne.s32.totalorder %v5693_v45, 0  ;;  %v1489_v14 = vld [vmem:[#allocation2 + $0x11] sm:$0xff] }
  0x3e   : > { %4527 = vmatprep.mubr.msk.bf16.mxu1 %vm5153_vm1, %v5152_v4  ;;  %4555 = vmatprep.mubr.msk.bf16.mxu0 %vm5153_vm1, %v5152_v4  ;;  %vm7280_vm10 = vcmp.ne.s32.totalorder %v5693_v45, 9  ;;  %vm7291_vm5 = vcmp.ne.s32.totalorder %v5525_v22, 0 }
  0x3f   : > { %4613 = vmatprep.subr.bf16.mxu0 %v5152_v4  ;;  %v5632_v21 = vsel %vm5605_vm9, %v592_v3, %v498_v51  ;;  %v729_v51 = vsel %vm620_vm6, %v690_v30, 0.0  ;;  %v1002_v3 = vld [vmem:[#allocation2 + $0x67] sm:$0xf] }
  0x40   : > { %vm618_vm9 = vcmp.ne.s32.totalorder %v5632_v21, 0  ;;  %vm7279_vm14 = vcmp.ne.s32.totalorder %v5632_v21, 9  ;;  %v1041_v5 = vsel %vm7280_vm10, %v1002_v3, 0.0  ;;  %vm7292_vm10 = vcmp.ne.s32.totalorder %v5529_v11, 0  ;;  %v1190_v3 = vld [vmem:[#allocation2 + $0x6f] sm:$0xf] }
  0x41   : > { %4614 = vmatpush3.bf16.msra.mxu0 %v1366_v40  ;;  %v727_v33 = vsel %vm618_vm9, %v688_v26, 0.0  ;;  %v5667_v40 = vsel %vm582_vm11, %v595_v31, %v531_v16  ;;  %v1037_v49 = vsel %vm7279_vm14, %v5671_v44, 0.0  ;;  %vm633_vm11 = vcmp.ne.s32.totalorder %v5665_v39, 9  ;;  %v4168_v26 = vld [vmem:[%s7255_s1 + $0xc0] sm:$0xff] }
  0x42   : > { %4675 = vmatprep.subr.bf16.mxu0 %v5152_v4  ;;  %v736_v42 = vpack.c.bf16 %v728_v35, %v727_v33  ;;  %vm621_vm2 = vcmp.ne.s32.totalorder %v5667_v40, 0  ;;  %v1046_v53 = vpack.c.bf16 %v1038_v41, %v1037_v49  ;;  %vm634_vm14 = vcmp.ne.s32.totalorder %v5667_v40, 9  ;;  %v1342_v33 = vld [vmem:[#allocation2 + $0x20] sm:$0xff]  ;;  %v1343_v35 = vld [vmem:[#allocation2 + $0x28] sm:$0xff] }
  0x43   : > { %v730_v52 = vsel %vm621_vm2, %v691_v47, 0.0  ;;  %v1039_v37 = vsel %vm633_vm11, %v5697_v55, 0.0  ;;  %v1048_v15 = vpack.c.bf16 %v1041_v5, %v1041_v5  ;;  %v1204_v16 = vpack.c.bf16 %v1192_v8, %v1191_v6  ;;  %v1350_v5 = vld [vmem:[#allocation2 + $0x60] sm:$0xff]  ;;  %v1351_v6 = vld [vmem:[#allocation2 + $0x68] sm:$0xff] }
  0x44   : > { %4556 = vmatmul.mubr.msk.bf16.gmra.mrb[20].mxu0 %vm636_vm0, %v1043_v57  ;;  %v737_v54 = vpack.c.bf16 %v730_v52, %v729_v51  ;;  %v5699_v57 = vld [vmem:[#allocation2 + $0x5f] sm:$0xff]  ;;  %v1689_v18 = vpack.c.bf16 %v4169_v27, %v4168_v26  ;;  %v1354_v30 = vpack.c.bf16 %v1343_v35, %v1342_v33  ;;  %v1358_v8 = vpack.c.bf16 %v1351_v6, %v1350_v5  ;;  %v1492_v27 = vld [vmem:[#allocation2 + $0x29] sm:$0xff] }
  0x45   : > { %4528 = vmatmul.mubr.msk.bf16.gmra.mrb[20].mxu1 %vm636_vm0, %v734_v59  ;;  %4559 = vmatprep.mubr.msk.bf16.mxu0 %vm5153_vm1, %v5152_v4  ;;  %v692_v59 = vld [vmem:[#allocation2 + $0x65] sm:$0xf]  ;;  %v1040_v63 = vsel %vm634_vm14, %v5699_v57, 0.0 }
  0x46   : > { %4531 = vmatprep.mubr.msk.bf16.mxu1 %vm5153_vm1, %v5152_v4  ;;  %v731_v0 = vsel %vm622_vm15, %v692_v59, 0.0  ;;  %v1047_v1 = vpack.c.bf16 %v1040_v63, %v1039_v37  ;;  %v1346_v52 = vld [vmem:[#allocation2 + $0x40] sm:$0xff]  ;;  %v1348_v63 = vld [vmem:[#allocation2 + $0x50] sm:$0xff]  ;;  %v4191_v35 = vld [vmem:[%s7255_s1 + $0x108] sm:$0xff] }
  0x47   : > { %v738_v2 = vpack.c.bf16 %v731_v0, %v731_v0  ;;  %v1189_v37 = vld [vmem:[#allocation2 + $0x67] sm:$0xff]  ;;  %v1349_v0 = vld [vmem:[#allocation2 + $0x58] sm:$0xff] }
  0x48   : > { %v1491_v26 = vld [vmem:[#allocation2 + $0x21] sm:$0xff] }
  0x49   : > { %v4190_v33 = vld [vmem:[%s7255_s1 + $0x100] sm:$0xff] }
  0x4c   : > { %4560 = vmatmul.mubr.msk.bf16.gmra.mrb[24].mxu0 %vm636_vm0, %v1044_v20  ;;  %v1341_v20 = vld [vmem:[#allocation2 + $0x18] sm:$0xff] }
  0x4d   : > { %4532 = vmatmul.mubr.msk.bf16.gmra.mrb[24].mxu1 %vm636_vm0, %v735_v10  ;;  %4563 = vmatprep.mubr.msk.bf16.mxu0 %vm5153_vm1, %v5152_v4  ;;  %v1193_v10 = vsel %vm7282_vm4, %v5550_v7, 0.0  ;;  %v1353_v31 = vpack.c.bf16 %v1341_v20, %v1340_v34  ;;  %v4170_v7 = vld [vmem:[%s7255_s1 + $0xd0] sm:$0xff]  ;;  %v4180_v34 = vld [vmem:[%s7255_s1 + $0xe8] sm:$0xff] }
  0x4e   : > { %4535 = vmatprep.mubr.msk.bf16.mxu1 %vm5153_vm1, %v5152_v4  ;;  %v1205_v32 = vpack.c.bf16 %v1194_v13, %v1193_v10  ;;  %v1690_v36 = vpack.c.bf16 %v4171_v60, %v4170_v7  ;;  %v1838_v13 = vpack.c.bf16 %v4180_v34, %v4179_v62 }
  0x54   : > { %4564 = vmatmul.mubr.msk.bf16.gmra.mrb[28].mxu0 %vm636_vm0, %v1045_v38  ;;  %v1195_v38 = vsel %vm7291_vm5, %v5597_v61, 0.0  ;;  %v1345_v61 = vld [vmem:[#allocation2 + $0x38] sm:$0xff]  ;;  %vm7294_vm5 = vcmp.ne.s32.totalorder %v5591_v58, 0 }
  0x55   : > { %4536 = vmatmul.mubr.msk.bf16.gmra.mrb[28].mxu1 %vm636_vm0, %v736_v42  ;;  %4567 = vmatprep.mubr.msk.bf16.mxu0 %vm5153_vm1, %v5152_v4  ;;  %v1196_v42 = vsel %vm7292_vm10, %v5638_v23, 0.0  ;;  %vm7293_vm10 = vcmp.ne.s32.totalorder %v5589_v28, 0  ;;  %v1198_v49 = vsel %vm7294_vm5, %v5671_v44, 0.0  ;;  %v1355_v41 = vpack.c.bf16 %v1345_v61, %v1344_v48  ;;  %v4192_v48 = vld [vmem:[%s7255_s1 + $0x110] sm:$0xff]  ;;  %v4193_v61 = vld [vmem:[%s7255_s1 + $0x118] sm:$0xff] }
  0x56   : > { %4539 = vmatprep.mubr.msk.bf16.mxu1 %vm5153_vm1, %v5152_v4  ;;  %v1206_v47 = vpack.c.bf16 %v1196_v42, %v1195_v38  ;;  %v1197_v23 = vsel %vm7293_vm10, %v5640_v12, 0.0  ;;  %v1199_v12 = vsel %vm618_vm9, %v5673_v46, 0.0  ;;  %v1200_v44 = vsel %vm619_vm8, %v5697_v55, 0.0 }
  0x57   : > { %v1207_v51 = vpack.c.bf16 %v1198_v49, %v1197_v23  ;;  %v1208_v59 = vpack.c.bf16 %v1200_v44, %v1199_v12  ;;  %v1201_v46 = vsel %vm620_vm6, %v5699_v57, 0.0  ;;  %v1202_v55 = vsel %vm621_vm2, %v1189_v37, 0.0  ;;  %v1494_v23 = vld [vmem:[#allocation2 + $0x39] sm:$0xff] }
  0x58   : > { %v1203_v57 = vsel %vm622_vm15, %v1190_v3, 0.0  ;;  %vm7295_vm10 = vcmp.ne.s32.totalorder %v5417_v24, 9  ;;  %vm7296_vm5 = vcmp.ne.s32.totalorder %v5419_v25, 9  ;;  %v1666_v49 = vsel %vm7282_vm4, %v1492_v27, 0.0  ;;  %v1498_v3 = vld [vmem:[#allocation2 + $0x59] sm:$0xff] }
  0x59   : > { %v1210_v9 = vpack.c.bf16 %v1203_v57, %v1203_v57  ;;  %vm7304_vm4 = vcmp.ne.s32.totalorder %v5591_v58, 9 }
  0x5c   : > { %4568 = vmatmul.mubr.msk.bf16.gmra.mrb[32].mxu0 %vm636_vm0, %v1046_v53  ;;  %v1347_v53 = vld [vmem:[#allocation2 + $0x48] sm:$0xff] }
  0x5d   : > { %4540 = vmatmul.mubr.msk.bf16.gmra.mrb[32].mxu1 %vm636_vm0, %v737_v54  ;;  %4571 = vmatprep.mubr.msk.bf16.mxu0 %vm5153_vm1, %v5152_v4  ;;  %v1356_v54 = vpack.c.bf16 %v1347_v53, %v1346_v52 }
  0x5e   : > { %4543 = vmatprep.mubr.msk.bf16.mxu1 %vm5153_vm1, %v5152_v4 }
  0x64   : > { %4572 = vmatmul.mubr.msk.bf16.gmra.mrb[36].mxu0 %vm636_vm0, %v1047_v1  ;;  %v1357_v1 = vpack.c.bf16 %v1349_v0, %v1348_v63 }
  0x65   : > { %4544 = vmatmul.mubr.msk.bf16.gmra.mrb[36].mxu1 %vm636_vm0, %v738_v2  ;;  %4575 = vmatprep.mubr.msk.bf16.mxu0 %vm5153_vm1, %v5152_v4  ;;  %v1209_v2 = vpack.c.bf16 %v1202_v55, %v1201_v46 }
  0x66   : > { %4583 = vmatprep.mubr.msk.bf16.mxu1 %vm5153_vm1, %v5152_v4 }
  0x6c   : > { %4576 = vmatmul.mubr.msk.bf16.gmra.mrb[40].mxu0 %vm636_vm0, %v1048_v15  ;;  %v1490_v15 = vld [vmem:[#allocation2 + $0x19] sm:$0xff] }
  0x6d   : > { %4584 = vmatmul.mubr.msk.bf16.vlgmr.msra.gmra.mrb[40].mxu1 %vm636_vm0, %v1204_v16  ;;  %4615 = vmatprep.mubr.msk.bf16.mxu0 %vm5153_vm1, %v5152_v4  ;;  %v1352_v16 = vld [vmem:[#allocation2 + $0x70] sm:$0xf]  ;;  %v1503_v19 = vsel %vm7296_vm5, %v1490_v15, 0.0  ;;  %vm7298_vm5 = vcmp.ne.s32.totalorder %v5453_v50, 9 }
  0x6e   : > { %4644 = vmatpush3.bf16.msra.mxu1 %v1527_v17  ;;  %4587 = vmatprep.mubr.msk.bf16.mxu1 %vm5153_vm1, %v5152_v4  ;;  %v1502_v17 = vsel %vm7295_vm10, %v1489_v14, 0.0  ;;  %v1359_v20 = vpack.c.bf16 %v1352_v16, %v1352_v16  ;;  %vm7297_vm10 = vcmp.ne.s32.totalorder %v5439_v43, 9  ;;  %v1505_v60 = vsel %vm7298_vm5, %v1492_v27, 0.0  ;;  %v1500_v16 = vld [vmem:[#allocation2 + $0x69] sm:$0xff] }
  0x6f   : > { %4645 = vmatprep.subr.bf16.mxu1 %v5152_v4  ;;  %v1515_v10 = vpack.c.bf16 %v1503_v19, %v1502_v17  ;;  %v1504_v7 = vsel %vm7297_vm10, %v1491_v26, 0.0  ;;  %vm7299_vm10 = vcmp.ne.s32.totalorder %v5525_v22, 9  ;;  %vm7300_vm5 = vcmp.ne.s32.totalorder %v5529_v11, 9 }
  0x70   : > { %v1516_v42 = vpack.c.bf16 %v1505_v60, %v1504_v7  ;;  %v1507_v53 = vsel %vm7300_vm5, %v1494_v23, 0.0  ;;  %vm7302_vm5 = vcmp.ne.s32.totalorder %v5529_v11, 0  ;;  %v1672_v17 = vsel %vm618_vm9, %v1498_v3, 0.0  ;;  %v1663_v7 = vld [vmem:[#allocation2 + $0x79] sm:$0xf] }
  0x71   : > { %v1513_v34 = vsel %vm634_vm14, %v1500_v16, 0.0  ;;  %v1674_v27 = vsel %vm620_vm6, %v1500_v16, 0.0  ;;  %v1676_v60 = vsel %vm622_vm15, %v1663_v7, 0.0 }
  0x72   : > { %4646 = vmatpush3.bf16.msra.mxu1 %v1528_v29  ;;  %v4181_v29 = vld [vmem:[%s7255_s1 + $0xf0] sm:$0xff] }
  0x73   : > { %4707 = vmatprep.subr.bf16.mxu1 %v5152_v4 }
  0x74   : > { %4616 = vmatmul.mubr.msk.bf16.vlgmr.msra.gmra.mrb[44].mxu0 %vm636_vm0, %v1353_v31  ;;  %v4182_v31 = vld [vmem:[%s7255_s1 + $0xf8] sm:$0xff] }
  0x75   : > { %4588 = vmatmul.mubr.msk.bf16.gmra.mrb[44].mxu1 %vm636_vm0, %v1205_v32  ;;  %4676 = vmatpush3.bf16.msra.mxu0 %v1689_v18  ;;  %v1664_v32 = vsel %vm610_vm12, %v1490_v15, 0.0  ;;  %v1665_v18 = vsel %vm611_vm13, %v1491_v26, 0.0  ;;  %v1499_v15 = vld [vmem:[#allocation2 + $0x61] sm:$0xff]  ;;  %v1501_v26 = vld [vmem:[#allocation2 + $0x71] sm:$0xf] }
  0x76   : > { %4591 = vmatprep.mubr.msk.bf16.mxu1 %vm5153_vm1, %v5152_v4  ;;  %4619 = vmatprep.mubr.msk.bf16.mxu0 %vm5153_vm1, %v5152_v4  ;;  %v1677_v38 = vpack.c.bf16 %v1665_v18, %v1664_v32  ;;  %v1673_v19 = vsel %vm619_vm8, %v1499_v15, 0.0  ;;  %v1512_v62 = vsel %vm633_vm11, %v1499_v15, 0.0 }
  0x77   : > { %4677 = vmatprep.subr.bf16.mxu0 %v5152_v4 }
  0x79   : > { %4678 = vmatpush3.bf16.msra.mxu0 %v1690_v36  ;;  %v1839_v36 = vpack.c.bf16 %v4182_v31, %v4181_v29 }
  0x7a   : > { %4739 = vmatprep.subr.bf16.mxu0 %v5152_v4 }
  0x7c   : > { %4620 = vmatmul.mubr.msk.bf16.gmra.mrb[48].mxu0 %vm636_vm0, %v1354_v30  ;;  %v2000_v30 = vpack.c.bf16 %v4191_v35, %v4190_v33  ;;  %v1813_v33 = vld [vmem:[#allocation2 + $0x1a] sm:$0xff]  ;;  %v1814_v35 = vld [vmem:[#allocation2 + $0x22] sm:$0xff] }
  0x7d   : > { %4592 = vmatmul.mubr.msk.bf16.gmra.mrb[48].mxu1 %vm636_vm0, %v1206_v47  ;;  %4623 = vmatprep.mubr.msk.bf16.mxu0 %vm5153_vm1, %v5152_v4  ;;  %v1493_v47 = vld [vmem:[#allocation2 + $0x31] sm:$0xff] }
  0x7e   : > { %4595 = vmatprep.mubr.msk.bf16.mxu1 %vm5153_vm1, %v5152_v4  ;;  %v1506_v52 = vsel %vm7299_vm10, %v1493_v47, 0.0  ;;  %vm7301_vm10 = vcmp.ne.s32.totalorder %v5525_v22, 0 }
  0x7f   : > { %v1517_v44 = vpack.c.bf16 %v1507_v53, %v1506_v52  ;;  %v1668_v37 = vsel %vm7301_vm10, %v1494_v23, 0.0  ;;  %vm7305_vm10 = vcmp.ne.s32.totalorder %v5589_v28, 0  ;;  %v1816_v23 = vld [vmem:[#allocation2 + $0x32] sm:$0xff] }
  0x80   : > { %v1965_v52 = vld [vmem:[#allocation2 + $0x33] sm:$0xff] }
  0x84   : > { %4624 = vmatmul.mubr.msk.bf16.gmra.mrb[52].mxu0 %vm636_vm0, %v1355_v41  ;;  %v1667_v41 = vsel %vm7281_vm7, %v1493_v47, 0.0  ;;  %vm7303_vm7 = vcmp.ne.s32.totalorder %v5589_v28, 9 }
  0x85   : > { %4596 = vmatmul.mubr.msk.bf16.gmra.mrb[52].mxu1 %vm636_vm0, %v1207_v51  ;;  %4627 = vmatprep.mubr.msk.bf16.mxu0 %vm5153_vm1, %v5152_v4  ;;  %v2001_v51 = vpack.c.bf16 %v4193_v61, %v4192_v48  ;;  %v1678_v12 = vpack.c.bf16 %v1667_v41, %v1666_v49  ;;  %v1815_v61 = vld [vmem:[#allocation2 + $0x2a] sm:$0xff] }
  0x86   : > { %4599 = vmatprep.mubr.msk.bf16.mxu1 %vm5153_vm1, %v5152_v4  ;;  %v1827_v41 = vpack.c.bf16 %v1816_v23, %v1815_v61 }
  0x8c   : > { %4628 = vmatmul.mubr.msk.bf16.gmra.mrb[56].mxu0 %vm636_vm0, %v1356_v54  ;;  %v1495_v54 = vld [vmem:[#allocation2 + $0x41] sm:$0xff] }
  0x8d   : > { %4600 = vmatmul.mubr.msk.bf16.gmra.mrb[56].mxu1 %vm636_vm0, %v1208_v59  ;;  %4631 = vmatprep.mubr.msk.bf16.mxu0 %vm5153_vm1, %v5152_v4  ;;  %v1496_v59 = vld [vmem:[#allocation2 + $0x49] sm:$0xff]  ;;  %v1669_v63 = vsel %vm7302_vm5, %v1495_v54, 0.0  ;;  %v1508_v0 = vsel %vm7303_vm7, %v1495_v54, 0.0  ;;  %vm7306_vm5 = vcmp.ne.s32.totalorder %v5591_v58, 0  ;;  %vm7308_vm7 = vcmp.ne.s32.totalorder %v5693_v45, 9 }
  0x8e   : > { %4603 = vmatprep.mubr.msk.bf16.mxu1 %vm5153_vm1, %v5152_v4  ;;  %v1509_v46 = vsel %vm7304_vm4, %v1496_v59, 0.0  ;;  %v1679_v55 = vpack.c.bf16 %v1669_v63, %v1668_v37  ;;  %v1670_v5 = vsel %vm7305_vm10, %v1496_v59, 0.0  ;;  %vm7307_vm4 = vcmp.ne.s32.totalorder %v5632_v21, 9  ;;  %v1818_v54 = vld [vmem:[#allocation2 + $0x42] sm:$0xff] }
  0x8f   : > { %v1514_v31 = vsel %vm7308_vm7, %v1501_v26, 0.0  ;;  %vm7309_vm10 = vcmp.ne.s32.totalorder %v5417_v24, 9  ;;  %vm7312_vm7 = vcmp.ne.s32.totalorder %v5453_v50, 9  ;;  %v1966_v63 = vld [vmem:[#allocation2 + $0x3b] sm:$0xff] }
  0x90   : > { %v1521_v18 = vpack.c.bf16 %v1514_v31, %v1514_v31 }
  0x94   : > { %4632 = vmatmul.mubr.msk.bf16.gmra.mrb[60].mxu0 %vm636_vm0, %v1357_v1  ;;  %v1518_v1 = vpack.c.bf16 %v1509_v46, %v1508_v0  ;;  %v1967_v0 = vld [vmem:[#allocation2 + $0x43] sm:$0xff] }
  0x95   : > { %4604 = vmatmul.mubr.msk.bf16.gmra.mrb[60].mxu1 %vm636_vm0, %v1209_v2  ;;  %4635 = vmatprep.mubr.msk.bf16.mxu0 %vm5153_vm1, %v5152_v4  ;;  %v1497_v2 = vld [vmem:[#allocation2 + $0x51] sm:$0xff] }
  0x96   : > { %4607 = vmatprep.mubr.msk.bf16.mxu1 %vm5153_vm1, %v5152_v4  ;;  %v1671_v6 = vsel %vm7306_vm5, %v1497_v2, 0.0  ;;  %v1510_v57 = vsel %vm7307_vm4, %v1497_v2, 0.0  ;;  %vm7310_vm5 = vcmp.ne.s32.totalorder %v5419_v25, 9  ;;  %vm7311_vm4 = vcmp.ne.s32.totalorder %v5439_v43, 9  ;;  %v1820_v2 = vld [vmem:[#allocation2 + $0x52] sm:$0xff] }
  0x9c   : > { %4636 = vmatmul.mubr.msk.bf16.gmra.mrb[64].mxu0 %vm636_vm0, %v1358_v8  ;;  %v1511_v8 = vsel %vm632_vm3, %v1498_v3, 0.0 }
  0x9d   : > { %4608 = vmatmul.mubr.msk.bf16.gmra.mrb[64].mxu1 %vm636_vm0, %v1210_v9  ;;  %4639 = vmatprep.mubr.msk.bf16.mxu0 %vm5153_vm1, %v5152_v4  ;;  %v1680_v9 = vpack.c.bf16 %v1671_v6, %v1670_v5  ;;  %v1519_v14 = vpack.c.bf16 %v1511_v8, %v1510_v57 }
  0x9e   : > { %4647 = vmatprep.mubr.msk.bf16.mxu1 %vm5153_vm1, %v5152_v4 }
  0xa4   : > { %4640 = vmatmul.mubr.msk.bf16.gmra.mrb[68].mxu0 %vm636_vm0, %v1359_v20  ;;  %v1681_v20 = vpack.c.bf16 %v1673_v19, %v1672_v17  ;;  %v1968_v17 = vld [vmem:[#allocation2 + $0x4b] sm:$0xff]  ;;  %v1969_v19 = vld [vmem:[#allocation2 + $0x53] sm:$0xff] }
  0xa5   : > { %4648 = vmatmul.mubr.msk.bf16.vlgmr.msra.gmra.mrb[68].mxu1 %vm636_vm0, %v1515_v10  ;;  %4679 = vmatprep.mubr.msk.bf16.mxu0 %vm5153_vm1, %v5152_v4  ;;  %v1520_v10 = vpack.c.bf16 %v1513_v34, %v1512_v62 }
  0xa6   : > { %4708 = vmatpush3.bf16.msra.mxu1 %v1838_v13  ;;  %4651 = vmatprep.mubr.msk.bf16.mxu1 %vm5153_vm1, %v5152_v4  ;;  %v1662_v13 = vld [vmem:[#allocation2 + $0x71] sm:$0xff] }
  0xa7   : > { %4709 = vmatprep.subr.bf16.mxu1 %v5152_v4  ;;  %v1675_v29 = vsel %vm621_vm2, %v1662_v13, 0.0  ;;  %v1822_v13 = vld [vmem:[#allocation2 + $0x62] sm:$0xff] }
  0xa8   : > { %v1682_v32 = vpack.c.bf16 %v1675_v29, %v1674_v27 }
  0xaa   : > { %4710 = vmatpush3.bf16.msra.mxu1 %v1839_v36  ;;  %v1683_v36 = vpack.c.bf16 %v1676_v60, %v1676_v60 }
  0xab   : > { %4771 = vmatprep.subr.bf16.mxu1 %v5152_v4 }
  0xac   : > { %4680 = vmatmul.mubr.msk.bf16.vlgmr.msra.gmra.mrb[72].mxu0 %vm636_vm0, %v1677_v38  ;;  %v1826_v38 = vpack.c.bf16 %v1814_v35, %v1813_v33  ;;  %v1970_v35 = vld [vmem:[#allocation2 + $0x5b] sm:$0xff] }
  0xad   : > { %4652 = vmatmul.mubr.msk.bf16.gmra.mrb[72].mxu1 %vm636_vm0, %v1516_v42  ;;  %4740 = vmatpush3.bf16.msra.mxu0 %v2000_v30  ;;  %v1962_v42 = vld [vmem:[#allocation2 + $0x1b] sm:$0xff]  ;;  %v1963_v30 = vld [vmem:[#allocation2 + $0x23] sm:$0xff] }
  0xae   : > { %4655 = vmatprep.mubr.msk.bf16.mxu1 %vm5153_vm1, %v5152_v4  ;;  %4683 = vmatprep.mubr.msk.bf16.mxu0 %vm5153_vm1, %v5152_v4  ;;  %v1975_v47 = vsel %vm7309_vm10, %v1962_v42, 0.0  ;;  %v1976_v48 = vsel %vm7310_vm5, %v1963_v30, 0.0  ;;  %vm7313_vm10 = vcmp.ne.s32.totalorder %v5525_v22, 9  ;;  %vm7314_vm5 = vcmp.ne.s32.totalorder %v5529_v11, 9 }
  0xaf   : > { %4741 = vmatprep.subr.bf16.mxu0 %v5152_v4  ;;  %v1988_v49 = vpack.c.bf16 %v1976_v48, %v1975_v47  ;;  %v1979_v46 = vsel %vm7313_vm10, %v1966_v63, 0.0  ;;  %vm7317_vm10 = vcmp.ne.s32.totalorder %v5632_v21, 9  ;;  %v1823_v47 = vld [vmem:[#allocation2 + $0x6a] sm:$0xff]  ;;  %v1824_v48 = vld [vmem:[#allocation2 + $0x72] sm:$0xff] }
  0xb0   : > { %v1983_v42 = vsel %vm7317_vm10, %v1970_v35, 0.0 }
  0xb1   : > { %4742 = vmatpush3.bf16.msra.mxu0 %v2001_v51  ;;  %v1964_v51 = vld [vmem:[#allocation2 + $0x2b] sm:$0xff] }
  0xb2   : > { %4803 = vmatprep.subr.bf16.mxu0 %v5152_v4  ;;  %v1977_v53 = vsel %vm7311_vm4, %v1964_v51, 0.0  ;;  %vm7315_vm4 = vcmp.ne.s32.totalorder %v5589_v28, 9 }
  0xb3   : > { %v1981_v34 = vsel %vm7315_vm4, %v1968_v17, 0.0  ;;  %vm7319_vm4 = vcmask 257024  }
  0xb4   : > { %4684 = vmatmul.mubr.msk.bf16.gmra.mrb[76].mxu0 %vm636_vm0, %v1678_v12  ;;  %v1978_v12 = vsel %vm7312_vm7, %v1965_v52, 0.0  ;;  %vm7316_vm7 = vcmp.ne.s32.totalorder %v5591_v58, 9  ;;  %vm7321_vm10 = vmmov %vm7319_vm4 }
  0xb5   : > { %4656 = vmatmul.mubr.msk.bf16.gmra.mrb[76].mxu1 %vm636_vm0, %v1517_v44  ;;  %4687 = vmatprep.mubr.msk.bf16.mxu0 %vm5153_vm1, %v5152_v4  ;;  %v1817_v44 = vld [vmem:[#allocation2 + $0x3a] sm:$0xff]  ;;  %v1989_v59 = vpack.c.bf16 %v1978_v12, %v1977_v53  ;;  %v1831_v53 = vpack.c.bf16 %v1824_v48, %v1823_v47 }
  0xb6   : > { %4659 = vmatprep.mubr.msk.bf16.mxu1 %vm5153_vm1, %v5152_v4  ;;  %v1828_v37 = vpack.c.bf16 %v1818_v54, %v1817_v44  ;;  %v1972_v54 = vld [vmem:[#allocation2 + $0x6b] sm:$0xff] }
  0xb7   : > { %v1985_v63 = vsel %vm633_vm11, %v1972_v54, 0.0 }
  0xbc   : > { %4688 = vmatmul.mubr.msk.bf16.gmra.mrb[80].mxu0 %vm636_vm0, %v1679_v55  ;;  %v1980_v55 = vsel %vm7314_vm5, %v1967_v0, 0.0  ;;  %vm7318_vm5 = vcmp.ne.s32.totalorder %v5693_v45, 9 }
  0xbd   : > { %4660 = vmatmul.mubr.msk.bf16.gmra.mrb[80].mxu1 %vm636_vm0, %v1518_v1  ;;  %4691 = vmatprep.mubr.msk.bf16.mxu0 %vm5153_vm1, %v5152_v4  ;;  %v1819_v1 = vld [vmem:[#allocation2 + $0x4a] sm:$0xff]  ;;  %v1990_v57 = vpack.c.bf16 %v1980_v55, %v1979_v46  ;;  %v1825_v46 = vld [vmem:[#allocation2 + $0x7a] sm:$0xf] }
  0xbe   : > { %4663 = vmatprep.mubr.msk.bf16.mxu1 %vm5153_vm1, %v5152_v4 }
  0xc4   : > { %4692 = vmatmul.mubr.msk.bf16.gmra.mrb[84].mxu0 %vm636_vm0, %v1680_v9 }
  0xc5   : > { %4664 = vmatmul.mubr.msk.bf16.gmra.mrb[84].mxu1 %vm636_vm0, %v1519_v14  ;;  %4695 = vmatprep.mubr.msk.bf16.mxu0 %vm5153_vm1, %v5152_v4  ;;  %v1829_v14 = vpack.c.bf16 %v1820_v2, %v1819_v1 }
  0xc6   : > { %4667 = vmatprep.mubr.msk.bf16.mxu1 %vm5153_vm1, %v5152_v4 }
  0xcc   : > { %4696 = vmatmul.mubr.msk.bf16.gmra.mrb[88].mxu0 %vm636_vm0, %v1681_v20  ;;  %v1982_v20 = vsel %vm7316_vm7, %v1969_v19, 0.0  ;;  %vm7320_vm7 = vmmov %vm7319_vm4 }
  0xcd   : > { %4668 = vmatmul.mubr.msk.bf16.gmra.mrb[88].mxu1 %vm636_vm0, %v1520_v10  ;;  %4699 = vmatprep.mubr.msk.bf16.mxu0 %vm5153_vm1, %v5152_v4  ;;  %v1821_v10 = vld [vmem:[#allocation2 + $0x5a] sm:$0xff]  ;;  %v1991_v31 = vpack.c.bf16 %v1982_v20, %v1981_v34 }
  0xce   : > { %4671 = vmatprep.mubr.msk.bf16.mxu1 %vm5153_vm1, %v5152_v4  ;;  %v1830_v7 = vpack.c.bf16 %v1822_v13, %v1821_v10 }
  0xd4   : > { %4700 = vmatmul.mubr.msk.bf16.gmra.mrb[92].mxu0 %vm636_vm0, %v1682_v32 }
  0xd5   : > { %4672 = vmatmul.mubr.msk.bf16.gmra.mrb[92].mxu1 %vm636_vm0, %v1521_v18  ;;  %4703 = vmatprep.mubr.msk.bf16.mxu0 %vm5153_vm1, %v5152_v4 }
  0xd6   : > { %4711 = vmatprep.mubr.msk.bf16.mxu1 %vm5153_vm1, %v5152_v4 }
  0xdc   : > { %4704 = vmatmul.mubr.msk.bf16.gmra.mrb[96].mxu0 %vm636_vm0, %v1683_v36  ;;  %v1971_v36 = vld [vmem:[#allocation2 + $0x63] sm:$0xff] }
  0xdd   : > { %4712 = vmatmul.mubr.msk.bf16.vlgmr.msra.gmra.mrb[96].mxu1 %vm636_vm0, %v1826_v38  ;;  %4743 = vmatprep.mubr.msk.bf16.mxu0 %vm5153_vm1, %v5152_v4  ;;  %v1984_v30 = vsel %vm632_vm3, %v1971_v36, 0.0 }
  0xde   : > { %4715 = vmatprep.mubr.msk.bf16.mxu1 %vm5153_vm1, %v5152_v4 }
  0xe4   : > { %4744 = vmatmul.mubr.msk.bf16.vlgmr.msra.gmra.mrb[100].mxu0 %vm636_vm0, %v1988_v49 }
  0xe5   : > { %4716 = vmatmul.mubr.msk.bf16.gmra.mrb[100].mxu1 %vm636_vm0, %v1827_v41  ;;  %4747 = vmatprep.mubr.msk.bf16.mxu0 %vm5153_vm1, %v5152_v4  ;;  %v1992_v41 = vpack.c.bf16 %v1984_v30, %v1983_v42 }
  0xe6   : > { %4719 = vmatprep.mubr.msk.bf16.mxu1 %vm5153_vm1, %v5152_v4 }
  0xec   : > { %4748 = vmatmul.mubr.msk.bf16.gmra.mrb[104].mxu0 %vm636_vm0, %v1989_v59  ;;  %v1973_v59 = vld [vmem:[#allocation2 + $0x73] sm:$0xff] }
  0xed   : > { %4720 = vmatmul.mubr.msk.bf16.gmra.mrb[104].mxu1 %vm636_vm0, %v1828_v37  ;;  %4751 = vmatprep.mubr.msk.bf16.mxu0 %vm5153_vm1, %v5152_v4  ;;  %v1986_v0 = vsel %vm634_vm14, %v1973_v59, 0.0 }
  0xee   : > { %4723 = vmatprep.mubr.msk.bf16.mxu1 %vm5153_vm1, %v5152_v4 }
  0xef   : > { %v5984_v3 = vpop.f32.mrb[0].mxu0 }
  0xf0   : > { %v4489_v5 = vpop.f32.mrb[1].mxu0  ;;  %v5986_v6 = vpop.f32.mrb[0].mxu1 }
  0xf1   : > { %v5988_v8 = vpop.f32.mrb[2].mxu0  ;;  %v4505_v9 = vpop.f32.mrb[1].mxu1  ;;  %v1993_v5 = vpack.c.bf16 %v1986_v0, %v1985_v63 }
  0xf2   : > { %v4490_v15 = vpop.f32.mrb[3].mxu0  ;;  %v5990_v16 = vpop.f32.mrb[2].mxu1 }
  0xf3   : > { %v4506_v62 = vpop.f32.mrb[3].mxu1  ;;  %v1832_v15 = vpack.c.bf16 %v1825_v46, %v1825_v46 }
  0xf4   : > { %4752 = vmatmul.mubr.msk.bf16.gmra.mrb[108].mxu0 %vm636_vm0, %v1990_v57  ;;  %v1974_v62 = vld [vmem:[#allocation2 + $0x7b] sm:$0xf] }
  0xf5   : > { %4724 = vmatmul.mubr.msk.bf16.gmra.mrb[108].mxu1 %vm636_vm0, %v1829_v14  ;;  %4755 = vmatprep.mubr.msk.bf16.mxu0 %vm5153_vm1, %v5152_v4  ;;  %v1987_v10 = vsel %vm7318_vm5, %v1974_v62, 0.0  ;;  %vm7322_vm5 = vcmp.ne.s32.totalorder %v5439_v43, 0 }
  0xf6   : > { %4727 = vmatprep.mubr.msk.bf16.mxu1 %vm5153_vm1, %v5152_v4 }
  0xf7   : > { %v835_v26 = vpop.f32.mrb[4].mxu0 }
  0xf8   : > { %v4493_v27 = vpop.f32.mrb[5].mxu0  ;;  %v6002_v29 = vpop.f32.mrb[4].mxu1 }
  0xf9   : > { %v6004_v32 = vpop.f32.mrb[6].mxu0  ;;  %v4509_v18 = vpop.f32.mrb[5].mxu1 }
  0xfa   : > { %v4494_v60 = vpop.f32.mrb[7].mxu0  ;;  %v6006_v33 = vpop.f32.mrb[6].mxu1 }
  0xfb   : > { %v4510_v38 = vpop.f32.mrb[7].mxu1 }
  0xfc   : > { %4756 = vmatmul.mubr.msk.bf16.gmra.mrb[112].mxu0 %vm636_vm0, %v1991_v31 }
  0xfd   : > { %4728 = vmatmul.mubr.msk.bf16.gmra.mrb[112].mxu1 %vm636_vm0, %v1830_v7  ;;  %4759 = vmatprep.mubr.msk.bf16.mxu0 %vm5153_vm1, %v5152_v4 }
  0xfe   : > { %4731 = vmatprep.mubr.msk.bf16.mxu1 %vm5153_vm1, %v5152_v4 }
  0xff   : > { %v843_v61 = vpop.f32.mrb[8].mxu0 }
 0x100   : > { %v4497_v23 = vpop.f32.mrb[9].mxu0  ;;  %v6018_v49 = vpop.f32.mrb[8].mxu1 }
 0x101   : > { %v846_v51 = vpop.f32.mrb[10].mxu0  ;;  %v4513_v52 = vpop.f32.mrb[9].mxu1 }
 0x102   : > { %v4498_v12 = vpop.f32.mrb[11].mxu0  ;;  %v878_v44 = vpop.f32.mrb[10].mxu1 }
 0x103   : > { %v4514_v37 = vpop.f32.mrb[11].mxu1 }
 0x104   : > { %4760 = vmatmul.mubr.msk.bf16.gmra.mrb[116].mxu0 %vm636_vm0, %v1992_v41 }
 0x105   : > { %4732 = vmatmul.mubr.msk.bf16.gmra.mrb[116].mxu1 %vm636_vm0, %v1831_v53  ;;  %4763 = vmatprep.mubr.msk.bf16.mxu0 %vm5153_vm1, %v5152_v4 }
 0x106   : > { %4735 = vmatprep.mubr.msk.bf16.mxu1 %vm5153_vm1, %v5152_v4 }
 0x107   : > { %v851_v55 = vpop.f32.mrb[12].mxu0 }
 0x108   : > { %v936_v1 = vpop.f32.mrb[12].mxu1  ;;  %v4501_v2 = vpop.f32.mrb[13].mxu0 }
 0x109   : > { %v937_v57 = vadd.f32 %v936_v1, %v5984_v3  ;;  %v4521_v9 = vpop.f32.mrb[13].mxu1  ;;  %v854_v14 = vpop.f32.mrb[14].mxu0 }
 0x10a   : > { %v939_v17 = vpop.f32.mrb[14].mxu1  ;;  %v4502_v19 = vpop.f32.mrb[15].mxu0 }
 0x10b   : > { %v940_v34 = vadd.f32 %v939_v17, %v5988_v8  ;;  %v4522_v20 = vpop.f32.mrb[15].mxu1  ;;  %v1994_v8 = vpack.c.bf16 %v1987_v10, %v1987_v10 }
 0x10c   : > { %4764 = vmatmul.mubr.msk.bf16.gmra.mrb[120].mxu0 %vm636_vm0, %v1993_v5 }
 0x10d   : > { %4736 = vmatmul.mubr.msk.bf16.gmra.mrb[120].mxu1 %vm636_vm0, %v1832_v15  ;;  %4767 = vmatprep.mubr.msk.bf16.mxu0 %vm5153_vm1, %v5152_v4 }
 0x10e   : > { %4775 = vmatprep.mubr.msk.bf16.mxu1 %vm5153_vm1, %v5152_v4 }
 0x10f   : > { %v1111_v3 = vpop.f32.mrb[16].mxu0 }
 0x110   : > { %v944_v13 = vpop.f32.mrb[16].mxu1  ;;  %v6040_v27 = vadd.f32 %v1111_v3, %v937_v57  ;;  %v4553_v31 = vpop.f32.mrb[17].mxu0 }
 0x111   : > { %v945_v18 = vadd.f32 %v944_v13, %v835_v26  ;;  %v4525_v7 = vpop.f32.mrb[17].mxu1  ;;  %v1114_v60 = vpop.f32.mrb[18].mxu0 }
 0x112   : > { %v947_v35 = vpop.f32.mrb[18].mxu1  ;;  %v6042_v36 = vadd.f32 %v1114_v60, %v940_v34  ;;  %v4554_v38 = vpop.f32.mrb[19].mxu0 }
 0x113   : > { %v948_v42 = vadd.f32 %v947_v35, %v6004_v32  ;;  %v4526_v30 = vpop.f32.mrb[19].mxu1 }
 0x114   : > { %4768 = vmatmul.mubr.msk.bf16.gmra.mrb[124].mxu0 %vm636_vm0, %v1994_v8 }
 0x115   : > { %4807 = vmatprep.mubr.msk.bf16.mxu0 %vm5153_vm1, %v5152_v4 }
 0x117   : > { %v1119_v47 = vpop.f32.mrb[20].mxu0 }
 0x118   : > { %v952_v48 = vpop.f32.mrb[20].mxu1  ;;  %v6048_v23 = vadd.f32 %v1119_v47, %v945_v18  ;;  %v4557_v41 = vpop.f32.mrb[21].mxu0 }
 0x119   : > { %v953_v26 = vadd.f32 %v952_v48, %v843_v61  ;;  %v4529_v52 = vpop.f32.mrb[21].mxu1  ;;  %v1122_v53 = vpop.f32.mrb[22].mxu0 }
 0x11a   : > { %v955_v12 = vpop.f32.mrb[22].mxu1  ;;  %v6050_v44 = vadd.f32 %v1122_v53, %v948_v42  ;;  %v4558_v54 = vpop.f32.mrb[23].mxu0 }
 0x11b   : > { %v956_v59 = vadd.f32 %v955_v12, %v846_v51  ;;  %v4530_v32 = vpop.f32.mrb[23].mxu1 }
 0x11f   : > { %v1127_v37 = vpop.f32.mrb[24].mxu0 }
 0x120   : > { %v960_v63 = vpop.f32.mrb[24].mxu1  ;;  %v6052_v0 = vadd.f32 %v1127_v37, %v953_v26  ;;  %v4561_v46 = vpop.f32.mrb[25].mxu0 }
 0x121   : > { %v961_v1 = vadd.f32 %v960_v63, %v851_v55  ;;  %v4533_v2 = vpop.f32.mrb[25].mxu1  ;;  %v1130_v5 = vpop.f32.mrb[26].mxu0 }
 0x122   : > { %v963_v57 = vpop.f32.mrb[26].mxu1  ;;  %v6054_v9 = vadd.f32 %v1130_v5, %v956_v59  ;;  %v4562_v61 = vpop.f32.mrb[27].mxu0 }
 0x123   : > { %v964_v15 = vadd.f32 %v963_v57, %v854_v14  ;;  %v4534_v17 = vpop.f32.mrb[27].mxu1 }
 0x127   : > { %v1135_v19 = vpop.f32.mrb[28].mxu0 }
 0x128   : > { %v968_v62 = vpop.f32.mrb[28].mxu1  ;;  %v6056_v34 = vadd.f32 %v1135_v19, %v961_v1  ;;  %v4565_v51 = vpop.f32.mrb[29].mxu0 }
 0x129   : > { %v969_v20 = vadd.f32 %v968_v62, %v5986_v6  ;;  %v4537_v10 = vpop.f32.mrb[29].mxu1  ;;  %v1138_v3 = vpop.f32.mrb[30].mxu0 }
 0x12a   : > { %v971_v13 = vpop.f32.mrb[30].mxu1  ;;  %v6059_v31 = vadd.f32 %v1138_v3, %v964_v15  ;;  %v4566_v55 = vpop.f32.mrb[31].mxu0 }
 0x12b   : > { %v972_v8 = vadd.f32 %v971_v13, %v5990_v16  ;;  %v4538_v18 = vpop.f32.mrb[31].mxu1 }
 0x12f   : > { %v1143_v7 = vpop.f32.mrb[32].mxu0 }
 0x130   : > { %v976_v60 = vpop.f32.mrb[32].mxu1  ;;  %v6062_v14 = vadd.f32 %v1143_v7, %v969_v20  ;;  %v4569_v35 = vpop.f32.mrb[33].mxu0 }
 0x131   : > { %v977_v38 = vadd.f32 %v976_v60, %v6002_v29  ;;  %v4541_v42 = vpop.f32.mrb[33].mxu1  ;;  %v1146_v30 = vpop.f32.mrb[34].mxu0 }
 0x132   : > { %v979_v47 = vpop.f32.mrb[34].mxu1  ;;  %v6065_v6 = vadd.f32 %v1146_v30, %v972_v8  ;;  %v4570_v48 = vpop.f32.mrb[35].mxu0 }
 0x133   : > { %v980_v41 = vadd.f32 %v979_v47, %v6006_v33  ;;  %v4542_v26 = vpop.f32.mrb[35].mxu1 }
 0x137   : > { %v1151_v52 = vpop.f32.mrb[36].mxu0 }
 0x138   : > { %v984_v53 = vpop.f32.mrb[36].mxu1  ;;  %v6068_v16 = vadd.f32 %v1151_v52, %v977_v38  ;;  %v4573_v12 = vpop.f32.mrb[37].mxu0 }
 0x139   : > { %v985_v54 = vadd.f32 %v984_v53, %v6018_v49  ;;  %v1154_v59 = vpop.f32.mrb[38].mxu0  ;;  %v4545_v32 = vpop.f32.mrb[37].mxu1 }
 0x13a   : > { %v6071_v37 = vadd.f32 %v1154_v59, %v980_v41  ;;  %v4574_v29 = vpop.f32.mrb[39].mxu0  ;;  %v987_v63 = vpop.f32.mrb[38].mxu1 }
 0x13b   : > { %v4546_v46 = vpop.f32.mrb[39].mxu1 }
 0x13f   : > { %v1159_v1 = vpop.f32.mrb[40].mxu0 }
 0x140   : > { %v6073_v2 = vadd.f32 %v1159_v1, %v985_v54  ;;  %v1273_v5 = vpop.f32.mrb[40].mxu1  ;;  %v4577_v33 = vpop.f32.mrb[41].mxu0 }
 0x141   : > { %v1327_v57 = vadd.f32 %v1273_v5, %v6040_v27  ;;  %v4585_v61 = vpop.f32.mrb[41].mxu1  ;;  %v1162_v15 = vpop.f32.mrb[42].mxu0 }
 0x142   : > { %v1276_v17 = vpop.f32.mrb[42].mxu1  ;;  %v4578_v19 = vpop.f32.mrb[43].mxu0 }
 0x143   : > { %v1328_v49 = vadd.f32 %v1276_v17, %v6042_v36  ;;  %v4586_v62 = vpop.f32.mrb[43].mxu1 }
 0x147   : > { %v1422_v51 = vpop.f32.mrb[44].mxu0 }
 0x148   : > { %v1281_v20 = vpop.f32.mrb[44].mxu1  ;;  %v6077_v10 = vadd.f32 %v1422_v51, %v1327_v57  ;;  %v4617_v3 = vpop.f32.mrb[45].mxu0 }
 0x149   : > { %v1329_v13 = vadd.f32 %v1281_v20, %v6048_v23  ;;  %v4589_v55 = vpop.f32.mrb[45].mxu1  ;;  %v1425_v8 = vpop.f32.mrb[46].mxu0 }
 0x14a   : > { %v1284_v18 = vpop.f32.mrb[46].mxu1  ;;  %v6080_v7 = vadd.f32 %v1425_v8, %v1328_v49  ;;  %v4618_v27 = vpop.f32.mrb[47].mxu0 }
 0x14b   : > { %v1330_v60 = vadd.f32 %v1284_v18, %v6050_v44  ;;  %v4590_v35 = vpop.f32.mrb[47].mxu1 }
 0x14f   : > { %v1430_v38 = vpop.f32.mrb[48].mxu0 }
 0x150   : > { %v1289_v42 = vpop.f32.mrb[48].mxu1  ;;  %v6083_v36 = vadd.f32 %v1430_v38, %v1329_v13  ;;  %v4621_v30 = vpop.f32.mrb[49].mxu0 }
 0x151   : > { %v1331_v47 = vadd.f32 %v1289_v42, %v6052_v0  ;;  %v4593_v48 = vpop.f32.mrb[49].mxu1  ;;  %v1433_v41 = vpop.f32.mrb[50].mxu0 }
 0x152   : > { %v1292_v26 = vpop.f32.mrb[50].mxu1  ;;  %v6086_v23 = vadd.f32 %v1433_v41, %v1330_v60  ;;  %v4622_v52 = vpop.f32.mrb[51].mxu0 }
 0x153   : > { %v1332_v53 = vadd.f32 %v1292_v26, %v6054_v9  ;;  %v4594_v12 = vpop.f32.mrb[51].mxu1 }
 0x157   : > { %v1438_v54 = vpop.f32.mrb[52].mxu0 }
 0x158   : > { %v1297_v59 = vpop.f32.mrb[52].mxu1  ;;  %v6089_v44 = vadd.f32 %v1438_v54, %v1331_v47  ;;  %v4625_v32 = vpop.f32.mrb[53].mxu0 }
 0x159   : > { %v1333_v29 = vadd.f32 %v1297_v59, %v6056_v34  ;;  %v4597_v63 = vpop.f32.mrb[53].mxu1  ;;  %v1441_v46 = vpop.f32.mrb[54].mxu0 }
 0x15a   : > { %v1300_v1 = vpop.f32.mrb[54].mxu1  ;;  %v6092_v0 = vadd.f32 %v1441_v46, %v1332_v53  ;;  %v4626_v5 = vpop.f32.mrb[55].mxu0 }
 0x15b   : > { %v1334_v33 = vadd.f32 %v1300_v1, %v6059_v31  ;;  %v4598_v57 = vpop.f32.mrb[55].mxu1 }
 0x15f   : > { %v1446_v61 = vpop.f32.mrb[56].mxu0 }
 0x160   : > { %v1305_v15 = vpop.f32.mrb[56].mxu1  ;;  %v6095_v9 = vadd.f32 %v1446_v61, %v1333_v29  ;;  %v4629_v17 = vpop.f32.mrb[57].mxu0 }
 0x161   : > { %v1335_v19 = vadd.f32 %v1305_v15, %v6062_v14  ;;  %v4601_v49 = vpop.f32.mrb[57].mxu1  ;;  %v1449_v62 = vpop.f32.mrb[58].mxu0 }
 0x162   : > { %v1308_v51 = vpop.f32.mrb[58].mxu1  ;;  %v6098_v34 = vadd.f32 %v1449_v62, %v1334_v33  ;;  %v4630_v20 = vpop.f32.mrb[59].mxu0 }
 0x163   : > { %v1336_v3 = vadd.f32 %v1308_v51, %v6065_v6  ;;  %v4602_v13 = vpop.f32.mrb[59].mxu1 }
 0x167   : > { %v1454_v55 = vpop.f32.mrb[60].mxu0 }
 0x168   : > { %v1313_v8 = vpop.f32.mrb[60].mxu1  ;;  %v6101_v31 = vadd.f32 %v1454_v55, %v1335_v19  ;;  %v4633_v18 = vpop.f32.mrb[61].mxu0 }
 0x169   : > { %v1337_v27 = vadd.f32 %v1313_v8, %v6068_v16  ;;  %v4605_v60 = vpop.f32.mrb[61].mxu1  ;;  %v1457_v35 = vpop.f32.mrb[62].mxu0 }
 0x16a   : > { %v1316_v38 = vpop.f32.mrb[62].mxu1  ;;  %v6104_v14 = vadd.f32 %v1457_v35, %v1336_v3  ;;  %v4634_v42 = vpop.f32.mrb[63].mxu0 }
 0x16b   : > { %v1338_v30 = vadd.f32 %v1316_v38, %v6071_v37  ;;  %v4606_v47 = vpop.f32.mrb[63].mxu1 }
 0x16f   : > { %v1462_v48 = vpop.f32.mrb[64].mxu0 }
 0x170   : > { %v1321_v41 = vpop.f32.mrb[64].mxu1  ;;  %v6107_v6 = vadd.f32 %v1462_v48, %v1337_v27  ;;  %v4637_v26 = vpop.f32.mrb[65].mxu0 }
 0x171   : > { %v1339_v52 = vadd.f32 %v1321_v41, %v6073_v2  ;;  %v1465_v53 = vpop.f32.mrb[66].mxu0  ;;  %v4609_v12 = vpop.f32.mrb[65].mxu1 }
 0x172   : > { %v6110_v54 = vadd.f32 %v1465_v53, %v1338_v30  ;;  %v4638_v16 = vpop.f32.mrb[67].mxu0  ;;  %v1324_v59 = vpop.f32.mrb[66].mxu1 }
 0x173   : > { %v4610_v32 = vpop.f32.mrb[67].mxu1 }
 0x177   : > { %v1470_v29 = vpop.f32.mrb[68].mxu0 }
 0x178   : > { %v6112_v63 = vadd.f32 %v1470_v29, %v1339_v52  ;;  %v1584_v46 = vpop.f32.mrb[68].mxu1  ;;  %v4641_v37 = vpop.f32.mrb[69].mxu0 }
 0x179   : > { %v1638_v1 = vadd.f32 %v1584_v46, %v6077_v10  ;;  %v4649_v5 = vpop.f32.mrb[69].mxu1  ;;  %v1473_v33 = vpop.f32.mrb[70].mxu0 }
 0x17a   : > { %v1587_v57 = vpop.f32.mrb[70].mxu1  ;;  %v4642_v61 = vpop.f32.mrb[71].mxu0 }
 0x17b   : > { %v1639_v2 = vadd.f32 %v1587_v57, %v6080_v7  ;;  %v4650_v15 = vpop.f32.mrb[71].mxu1 }
 0x17f   : > { %v1746_v17 = vpop.f32.mrb[72].mxu0 }
 0x180   : > { %v1592_v19 = vpop.f32.mrb[72].mxu1  ;;  %v6116_v49 = vadd.f32 %v1746_v17, %v1638_v1  ;;  %v4681_v62 = vpop.f32.mrb[73].mxu0 }
 0x181   : > { %v1640_v51 = vadd.f32 %v1592_v19, %v6083_v36  ;;  %v4653_v20 = vpop.f32.mrb[73].mxu1  ;;  %v1749_v3 = vpop.f32.mrb[74].mxu0 }
 0x182   : > { %v1595_v13 = vpop.f32.mrb[74].mxu1  ;;  %v6119_v55 = vadd.f32 %v1749_v3, %v1639_v2  ;;  %v4682_v10 = vpop.f32.mrb[75].mxu0 }
 0x183   : > { %v1641_v8 = vadd.f32 %v1595_v13, %v6086_v23  ;;  %v4654_v18 = vpop.f32.mrb[75].mxu1 }
 0x187   : > { %v1754_v27 = vpop.f32.mrb[76].mxu0 }
 0x188   : > { %v1600_v60 = vpop.f32.mrb[76].mxu1  ;;  %v6122_v7 = vadd.f32 %v1754_v27, %v1640_v51  ;;  %v4685_v35 = vpop.f32.mrb[77].mxu0 }
 0x189   : > { %v1642_v38 = vadd.f32 %v1600_v60, %v6089_v44  ;;  %v4657_v42 = vpop.f32.mrb[77].mxu1  ;;  %v1757_v30 = vpop.f32.mrb[78].mxu0 }
 0x18a   : > { %v1603_v47 = vpop.f32.mrb[78].mxu1  ;;  %v6125_v36 = vadd.f32 %v1757_v30, %v1641_v8  ;;  %v4686_v48 = vpop.f32.mrb[79].mxu0 }
 0x18b   : > { %v1643_v41 = vadd.f32 %v1603_v47, %v6092_v0  ;;  %v4658_v26 = vpop.f32.mrb[79].mxu1 }
 0x18f   : > { %v1762_v52 = vpop.f32.mrb[80].mxu0 }
 0x190   : > { %v1608_v53 = vpop.f32.mrb[80].mxu1  ;;  %v6128_v23 = vadd.f32 %v1762_v52, %v1642_v38  ;;  %v4689_v12 = vpop.f32.mrb[81].mxu0 }
 0x191   : > { %v1644_v16 = vadd.f32 %v1608_v53, %v6095_v9  ;;  %v4661_v59 = vpop.f32.mrb[81].mxu1  ;;  %v1765_v32 = vpop.f32.mrb[82].mxu0 }
 0x192   : > { %v1611_v29 = vpop.f32.mrb[82].mxu1  ;;  %v6131_v44 = vadd.f32 %v1765_v32, %v1643_v41  ;;  %v4690_v46 = vpop.f32.mrb[83].mxu0 }
 0x193   : > { %v1645_v37 = vadd.f32 %v1611_v29, %v6098_v34  ;;  %v4662_v1 = vpop.f32.mrb[83].mxu1 }
 0x197   : > { %v1770_v5 = vpop.f32.mrb[84].mxu0 }
 0x198   : > { %v1616_v33 = vpop.f32.mrb[84].mxu1  ;;  %v6134_v0 = vadd.f32 %v1770_v5, %v1644_v16  ;;  %v4693_v57 = vpop.f32.mrb[85].mxu0 }
 0x199   : > { %v1646_v61 = vadd.f32 %v1616_v33, %v6101_v31  ;;  %v4665_v2 = vpop.f32.mrb[85].mxu1  ;;  %v1773_v15 = vpop.f32.mrb[86].mxu0 }
 0x19a   : > { %v1619_v17 = vpop.f32.mrb[86].mxu1  ;;  %v6137_v9 = vadd.f32 %v1773_v15, %v1645_v37  ;;  %v4694_v19 = vpop.f32.mrb[87].mxu0 }
 0x19b   : > { %v1647_v62 = vadd.f32 %v1619_v17, %v6104_v14  ;;  %v4666_v51 = vpop.f32.mrb[87].mxu1 }
 0x19f   : > { %v1778_v20 = vpop.f32.mrb[88].mxu0 }
 0x1a0   : > { %v1624_v3 = vpop.f32.mrb[88].mxu1  ;;  %v6140_v34 = vadd.f32 %v1778_v20, %v1646_v61  ;;  %v4697_v13 = vpop.f32.mrb[89].mxu0 }
 0x1a1   : > { %v1648_v10 = vadd.f32 %v1624_v3, %v6107_v6  ;;  %v4669_v8 = vpop.f32.mrb[89].mxu1  ;;  %v1781_v18 = vpop.f32.mrb[90].mxu0 }
 0x1a2   : > { %v1627_v27 = vpop.f32.mrb[90].mxu1  ;;  %v6143_v31 = vadd.f32 %v1781_v18, %v1647_v62  ;;  %v4698_v60 = vpop.f32.mrb[91].mxu0 }
 0x1a3   : > { %v1649_v35 = vadd.f32 %v1627_v27, %v6110_v54  ;;  %v4670_v38 = vpop.f32.mrb[91].mxu1 }
 0x1a7   : > { %v1786_v42 = vpop.f32.mrb[92].mxu0 }
 0x1a8   : > { %v1632_v30 = vpop.f32.mrb[92].mxu1  ;;  %v6146_v14 = vadd.f32 %v1786_v42, %v1648_v10  ;;  %v4701_v47 = vpop.f32.mrb[93].mxu0 }
 0x1a9   : > { %v1650_v48 = vadd.f32 %v1632_v30, %v6112_v63  ;;  %v1789_v41 = vpop.f32.mrb[94].mxu0  ;;  %v4673_v26 = vpop.f32.mrb[93].mxu1 }
 0x1aa   : > { %v6149_v52 = vadd.f32 %v1789_v41, %v1649_v35  ;;  %v4702_v6 = vpop.f32.mrb[95].mxu0  ;;  %v1635_v53 = vpop.f32.mrb[94].mxu1 }
 0x1ab   : > { %v4674_v12 = vpop.f32.mrb[95].mxu1 }
 0x1af   : > { %v1794_v16 = vpop.f32.mrb[96].mxu0 }
 0x1b0   : > { %v6151_v59 = vadd.f32 %v1794_v16, %v1650_v48  ;;  %v1895_v32 = vpop.f32.mrb[96].mxu1  ;;  %v4705_v54 = vpop.f32.mrb[97].mxu0  ;;  %v6162_v48 = vld [vmem:[%s7256_s2] ss:$0 sm:$0xff] }
 0x1b1   : > { %v1949_v29 = vadd.f32 %v1895_v32, %v6116_v49  ;;  %v4713_v46 = vpop.f32.mrb[97].mxu1  ;;  %v1797_v37 = vpop.f32.mrb[98].mxu0 }
 0x1b2   : > { %v1898_v1 = vpop.f32.mrb[98].mxu1  ;;  %v4706_v5 = vpop.f32.mrb[99].mxu0 }
 0x1b3   : > { %v1950_v63 = vadd.f32 %v1898_v1, %v6119_v55  ;;  %v4714_v33 = vpop.f32.mrb[99].mxu1 }
 0x1b7   : > { %v2057_v57 = vpop.f32.mrb[100].mxu0 }
 0x1b8   : > { %v1903_v61 = vpop.f32.mrb[100].mxu1  ;;  %v2111_v2 = vadd.f32 %v2057_v57, %v1949_v29  ;;  %v4745_v15 = vpop.f32.mrb[101].mxu0 }
 0x1b9   : > { %v1951_v17 = vadd.f32 %v1903_v61, %v6122_v7  ;;  %v4717_v19 = vpop.f32.mrb[101].mxu1  ;;  %v2060_v62 = vpop.f32.mrb[102].mxu0 }
 0x1ba   : > { %v1906_v51 = vpop.f32.mrb[102].mxu1  ;;  %v2112_v20 = vadd.f32 %v2060_v62, %v1950_v63  ;;  %v4746_v3 = vpop.f32.mrb[103].mxu0  ;;  %v6168_v26 = vadd.f32 %v6162_v48, %v2111_v2 }
 0x1bb   : > { %v1952_v49 = vadd.f32 %v1906_v51, %v6125_v36  ;;  %v4718_v13 = vpop.f32.mrb[103].mxu1 }
 0x1bc   : > { %v6165_v36 = vadd.f32 %v6162_v48, %v2112_v20  ;;  %v2144_v63 = vsel %vm636_vm0, %v6168_v26, 0.0 }
 0x1be   : > { %v2145_v54 = vsel %vm636_vm0, %v6165_v36, 0.0 }
 0x1bf   : > { %v2065_v10 = vpop.f32.mrb[104].mxu0 }
 0x1c0   : > { %v1911_v8 = vpop.f32.mrb[104].mxu1  ;;  %v2113_v18 = vadd.f32 %v2065_v10, %v1951_v17  ;;  %v4749_v27 = vpop.f32.mrb[105].mxu0 }
 0x1c1   : > { %v1953_v55 = vadd.f32 %v1911_v8, %v6128_v23  ;;  %v4721_v60 = vpop.f32.mrb[105].mxu1  ;;  %v2068_v35 = vpop.f32.mrb[106].mxu0 }
 0x1c2   : > { %v1914_v38 = vpop.f32.mrb[106].mxu1  ;;  %v2114_v42 = vadd.f32 %v2068_v35, %v1952_v49  ;;  %v4750_v30 = vpop.f32.mrb[107].mxu0  ;;  %v6171_v23 = vadd.f32 %v6162_v48, %v2113_v18 }
 0x1c3   : > { %v1954_v7 = vadd.f32 %v1914_v38, %v6131_v44  ;;  %v4722_v47 = vpop.f32.mrb[107].mxu1 }
 0x1c4   : > { %v2147_v33 = vsel %vm636_vm0, %v6171_v23, 0.0  ;;  %v6182_v57 = vadd.f32 %v6162_v48, %v2114_v42 }
 0x1c6   : > { %v2149_v17 = vsel %vm636_vm0, %v6182_v57, 0.0 }
 0x1c7   : > { %v2073_v41 = vpop.f32.mrb[108].mxu0 }
 0x1c8   : > { %v1919_v6 = vpop.f32.mrb[108].mxu1  ;;  %v2115_v53 = vadd.f32 %v2073_v41, %v1953_v55  ;;  %v4753_v12 = vpop.f32.mrb[109].mxu0 }
 0x1c9   : > { %v1955_v44 = vadd.f32 %v1919_v6, %v6134_v0  ;;  %v4725_v16 = vpop.f32.mrb[109].mxu1  ;;  %v2076_v32 = vpop.f32.mrb[110].mxu0  ;;  %v2146_v0 = vadd.f32 %v2145_v54, %v2144_v63 }
 0x1ca   : > { %v1922_v29 = vpop.f32.mrb[110].mxu1  ;;  %v2116_v46 = vadd.f32 %v2076_v32, %v1954_v7  ;;  %v4754_v37 = vpop.f32.mrb[111].mxu0  ;;  %v6185_v61 = vadd.f32 %v6162_v48, %v2115_v53 }
 0x1cb   : > { %v1956_v1 = vadd.f32 %v1922_v29, %v6137_v9  ;;  %v4726_v5 = vpop.f32.mrb[111].mxu1  ;;  %v2148_v2 = vadd.f32 %v2147_v33, %v2146_v0 }
 0x1cc   : > { %v2151_v49 = vsel %vm636_vm0, %v6185_v61, 0.0  ;;  %v6193_v13 = vadd.f32 %v6162_v48, %v2116_v46 }
 0x1cd   : > { %v2150_v27 = vadd.f32 %v2149_v17, %v2148_v2 }
 0x1cf   : > { %v2081_v15 = vpop.f32.mrb[112].mxu0  ;;  %v2152_v38 = vadd.f32 %v2151_v49, %v2150_v27 }
 0x1d0   : > { %v1927_v9 = vpop.f32.mrb[112].mxu1  ;;  %v2117_v19 = vadd.f32 %v2081_v15, %v1955_v44  ;;  %v4757_v62 = vpop.f32.mrb[113].mxu0 }
 0x1d1   : > { %v1957_v51 = vadd.f32 %v1927_v9, %v6140_v34  ;;  %v4729_v20 = vpop.f32.mrb[113].mxu1  ;;  %v2084_v3 = vpop.f32.mrb[114].mxu0  ;;  %v2153_v34 = vsel %vm636_vm0, %v6193_v13, 0.0 }
 0x1d2   : > { %v1930_v10 = vpop.f32.mrb[114].mxu1  ;;  %v2118_v8 = vadd.f32 %v2084_v3, %v1956_v1  ;;  %v4758_v18 = vpop.f32.mrb[115].mxu0  ;;  %v6197_v35 = vadd.f32 %v6162_v48, %v2117_v19  ;;  %v2154_v53 = vadd.f32 %v2153_v34, %v2152_v38 }
 0x1d3   : > { %v1958_v55 = vadd.f32 %v1930_v10, %v6143_v31  ;;  %v4730_v60 = vpop.f32.mrb[115].mxu1 }
 0x1d4   : > { %v2155_v30 = vsel %vm636_vm0, %v6197_v35, 0.0  ;;  %v6204_v7 = vadd.f32 %v6162_v48, %v2118_v8 }
 0x1d5   : > { %v2156_v46 = vadd.f32 %v2155_v30, %v2154_v53 }
 0x1d6   : > { %v2157_v5 = vsel %vm636_vm0, %v6204_v7, 0.0 }
 0x1d7   : > { %v2089_v42 = vpop.f32.mrb[116].mxu0  ;;  %v2158_v33 = vadd.f32 %v2157_v5, %v2156_v46 }
 0x1d8   : > { %v1935_v47 = vpop.f32.mrb[116].mxu1  ;;  %v2119_v41 = vadd.f32 %v2089_v42, %v1957_v51  ;;  %v4761_v6 = vpop.f32.mrb[117].mxu0 }
 0x1d9   : > { %v1959_v31 = vadd.f32 %v1935_v47, %v6146_v14  ;;  %v4733_v12 = vpop.f32.mrb[117].mxu1  ;;  %v2092_v44 = vpop.f32.mrb[118].mxu0 }
 0x1da   : > { %v6208_v16 = vadd.f32 %v6162_v48, %v2119_v41  ;;  %v1938_v32 = vpop.f32.mrb[118].mxu1  ;;  %v2120_v54 = vadd.f32 %v2092_v44, %v1958_v55  ;;  %v4762_v29 = vpop.f32.mrb[119].mxu0 }
 0x1db   : > { %v1960_v37 = vadd.f32 %v1938_v32, %v6149_v52  ;;  %v4734_v1 = vpop.f32.mrb[119].mxu1 }
 0x1dc   : > { %v2159_v63 = vsel %vm636_vm0, %v6208_v16, 0.0  ;;  %v6216_v14 = vadd.f32 %v6162_v48, %v2120_v54 }
 0x1dd   : > { %v2160_v9 = vadd.f32 %v2159_v63, %v2158_v33 }
 0x1de   : > { %v2161_v51 = vsel %vm636_vm0, %v6216_v14, 0.0 }
 0x1df   : > { %v2097_v0 = vpop.f32.mrb[120].mxu0  ;;  %v2162_v55 = vadd.f32 %v2161_v51, %v2160_v9 }
 0x1e0   : > { %v1943_v2 = vpop.f32.mrb[120].mxu1  ;;  %v2121_v15 = vadd.f32 %v2097_v0, %v1959_v31  ;;  %v4765_v17 = vpop.f32.mrb[121].mxu0 }
 0x1e1   : > { %v1961_v19 = vadd.f32 %v1943_v2, %v6151_v59  ;;  %v2100_v62 = vpop.f32.mrb[122].mxu0  ;;  %v4737_v52 = vpop.f32.mrb[121].mxu1 }
 0x1e2   : > { %v2141_v20 = vadd.f32 %v6162_v48, %v2121_v15  ;;  %v2122_v3 = vadd.f32 %v2100_v62, %v1960_v37  ;;  %v4766_v49 = vpop.f32.mrb[123].mxu0  ;;  %v1946_v10 = vpop.f32.mrb[122].mxu1 }
 0x1e3   : > { %v4738_v8 = vpop.f32.mrb[123].mxu1 }
 0x1e4   : > { %v2163_v18 = vsel %vm636_vm0, %v2141_v20, 0.0  ;;  %v2142_v27 = vadd.f32 %v6162_v48, %v2122_v3 }
 0x1e5   : > { %v2164_v38 = vadd.f32 %v2163_v18, %v2162_v55 }
 0x1e6   : > { %v2165_v42 = vsel %vm636_vm0, %v2142_v27, 0.0 }
 0x1e7   : > { %v2105_v60 = vpop.f32.mrb[124].mxu0  ;;  %v2166_v6 = vadd.f32 %v2165_v42, %v2164_v38 }
 0x1e8   : > { %v2123_v34 = vadd.f32 %v2105_v60, %v1961_v19  ;;  %v4769_v59 = vpop.f32.mrb[125].mxu0 }
 0x1e9   : > { %v2108_v30 = vpop.f32.mrb[126].mxu0 }
 0x1ea   : > { %v2143_v47 = vadd.f32 %v6162_v48, %v2123_v34  ;;  %v4770_v41 = vpop.f32.mrb[127].mxu0 }
 0x1ec   : > { %v2167_v53 = vsel %vm7319_vm4, %v2143_v47, 0.0  ;;  %vm7323_vm4 = vcmp.ne.s32.totalorder %v5453_v50, 0 }
 0x1ed   : > { %v2168_v31 = vadd.f32 %v2167_v53, %v2166_v6 }
 0x1ef   : > { %2169 = vadd.xlane.f32.xlu0 %v2168_v31 }
 0x27c   : > { %v2170_v12 = vpop.xlane.xlu0 %2169 }
 0x27d   : > { %v2171_v44 = vrot.slane %v2170_v12, 4 }
 0x27f   : > { %v2172_v32 = vadd.f32 %v2171_v44, %v2170_v12 }
 0x281   : > { %v2173_v54 = vrot.slane %v2172_v32, 2 }
 0x283   : > { %v2174_v29 = vadd.f32 %v2173_v54, %v2172_v32 }
 0x285   : > { %v2175_v46 = vrot.slane %v2174_v29, 1 }
 0x287   : > { %v2176_v37 = vadd.f32 %v2175_v46, %v2174_v29 }
 0x289   : > { %5122 = vpush %v2176_v37 }
 0x2ba   : > { %s5123_s15 = spop %5122 }
 0x2bb   : > { %v2178_v1 = vstv %s5123_s15 }
 0x2bc   : > { %v2180_v5 = vmul.f32 0.0003125, %v2178_v1 }
 0x2be   : > { %v6228_v63 = vsub.f32 %v6168_v26, %v2180_v5  ;;  %v6231_v48 = vsub.f32 %v6165_v36, %v2180_v5  ;;  %v6234_v33 = vsub.f32 %v6171_v23, %v2180_v5  ;;  %v6237_v0 = vsub.f32 %v6182_v57, %v2180_v5 }
 0x2bf   : > { %v6244_v17 = vsub.f32 %v6185_v61, %v2180_v5  ;;  %v6249_v36 = vsub.f32 %v6193_v13, %v2180_v5  ;;  %v6256_v62 = vsub.f32 %v6197_v35, %v2180_v5  ;;  %v6262_v13 = vsub.f32 %v6204_v7, %v2180_v5 }
 0x2c0   : > { %v2194_v2 = vmul.f32 %v6228_v63, %v6228_v63  ;;  %v2195_v15 = vmul.f32 %v6231_v48, %v6231_v48  ;;  %v2196_v26 = vmul.f32 %v6234_v33, %v6234_v33  ;;  %v2197_v23 = vmul.f32 %v6237_v0, %v6237_v0 }
 0x2c1   : > { %v2198_v61 = vmul.f32 %v6244_v17, %v6244_v17  ;;  %v2199_v3 = vmul.f32 %v6249_v36, %v6249_v36  ;;  %v6268_v8 = vsub.f32 %v6208_v16, %v2180_v5  ;;  %v2200_v35 = vmul.f32 %v6256_v62, %v6256_v62 }
 0x2c2   : > { %v2207_v57 = vsel %vm636_vm0, %v2194_v2, 0.0  ;;  %v2208_v9 = vsel %vm636_vm0, %v2195_v15, 0.0  ;;  %v2210_v52 = vsel %vm636_vm0, %v2196_v26, 0.0  ;;  %v2212_v49 = vsel %vm636_vm0, %v2197_v23, 0.0  ;;  %v4204_v15 = vld [vmem:[%s7259_s5 + $0x20] sm:$0xff]  ;;  %v4205_v26 = vld [vmem:[%s7259_s5 + $0x28] sm:$0xff] }
 0x2c3   : > { %v2209_v19 = vadd.f32 %v2208_v9, %v2207_v57  ;;  %v2214_v18 = vsel %vm636_vm0, %v2198_v61, 0.0  ;;  %v6274_v60 = vsub.f32 %v6216_v14, %v2180_v5  ;;  %v2201_v7 = vmul.f32 %v6262_v13, %v6262_v13  ;;  %v4206_v57 = vld [vmem:[%s7259_s5 + $0x30] sm:$0xff]  ;;  %v4207_v9 = vld [vmem:[%s7259_s5 + $0x38] sm:$0xff] }
 0x2c4   : > { %v2216_v38 = vsel %vm636_vm0, %v2199_v3, 0.0  ;;  %v6279_v59 = vsub.f32 %v2141_v20, %v2180_v5  ;;  %v2202_v16 = vmul.f32 %v6268_v8, %v6268_v8  ;;  %v2218_v42 = vsel %vm636_vm0, %v2200_v35, 0.0  ;;  %v2360_v3 = vld [vmem:[%s7259_s5 + $0x18] sm:$0xff] }
 0x2c5   : > { %v2211_v51 = vadd.f32 %v2210_v52, %v2209_v19  ;;  %v6284_v41 = vsub.f32 %v2142_v27, %v2180_v5  ;;  %v2203_v14 = vmul.f32 %v6274_v60, %v6274_v60  ;;  %v2220_v6 = vsel %vm636_vm0, %v2201_v7, 0.0  ;;  %v2357_v19 = vld [vmem:[%s7259_s5] sm:$0xff]  ;;  %v2358_v52 = vld [vmem:[%s7259_s5 + $0x8] sm:$0xff] }
 0x2c6   : > { %v6289_v31 = vsub.f32 %v2143_v47, %v2180_v5  ;;  %v2204_v20 = vmul.f32 %v6279_v59, %v6279_v59  ;;  %v2222_v12 = vsel %vm636_vm0, %v2202_v16, 0.0  ;;  %v2388_v23 = vpack.c.bf16 %v4205_v26, %v4204_v15 }
 0x2c7   : > { %v2213_v10 = vadd.f32 %v2212_v49, %v2211_v51  ;;  %v2205_v32 = vmul.f32 %v6284_v41, %v6284_v41  ;;  %v2224_v27 = vsel %vm636_vm0, %v2203_v14, 0.0  ;;  %v2389_v61 = vpack.c.bf16 %v4207_v9, %v4206_v57  ;;  %v2359_v51 = vld [vmem:[%s7259_s5 + $0x10] sm:$0xff] }
 0x2c8   : > { %v2206_v29 = vmul.f32 %v6289_v31, %v6289_v31  ;;  %v2226_v46 = vsel %vm636_vm0, %v2204_v20, 0.0  ;;  %4772 = vmatpush3.bf16.msra.mxu1 %v2388_v23  ;;  %v2361_v49 = vpack.c.bf16 %v2358_v52, %v2357_v19 }
 0x2c9   : > { %v2215_v55 = vadd.f32 %v2214_v18, %v2213_v10  ;;  %v2228_v47 = vsel %vm636_vm0, %v2205_v32, 0.0  ;;  %4773 = vmatprep.subr.bf16.mxu1 %v5152_v4  ;;  %v2362_v10 = vpack.c.bf16 %v2360_v3, %v2359_v51 }
 0x2ca   : > { %v2230_v5 = vsel %vm7320_vm7, %v2206_v29, 0.0  ;;  %4804 = vmatpush3.bf16.msra.mxu0 %v2361_v49  ;;  %vm7324_vm7 = vcmp.ne.s32.totalorder %v5525_v22, 0 }
 0x2cb   : > { %v2217_v34 = vadd.f32 %v2216_v38, %v2215_v55  ;;  %4805 = vmatprep.subr.bf16.mxu0 %v5152_v4 }
 0x2cc   : > { %4774 = vmatpush3.bf16.msra.mxu1 %v2389_v61 }
 0x2cd   : > { %v2219_v30 = vadd.f32 %v2218_v42, %v2217_v34  ;;  %4835 = vmatprep.subr.bf16.mxu1 %v5152_v4 }
 0x2ce   : > { %4806 = vmatpush3.bf16.msra.mxu0 %v2362_v10 }
 0x2cf   : > { %v2221_v53 = vadd.f32 %v2220_v6, %v2219_v30  ;;  %4867 = vmatprep.subr.bf16.mxu0 %v5152_v4 }
 0x2d1   : > { %v2223_v44 = vadd.f32 %v2222_v12, %v2221_v53  ;;  %v4202_v53 = vld [vmem:[%s7257_s3] ss:$0 sm:$0xff] }
 0x2d3   : > { %v2225_v54 = vadd.f32 %v2224_v27, %v2223_v44 }
 0x2d5   : > { %v2227_v37 = vadd.f32 %v2226_v46, %v2225_v54 }
 0x2d7   : > { %v2229_v1 = vadd.f32 %v2228_v47, %v2227_v37 }
 0x2d9   : > { %v2231_v2 = vadd.f32 %v2230_v5, %v2229_v1 }
 0x2db   : > { %2232 = vadd.xlane.f32.xlu0 %v2231_v2 }
 0x368   : > { %v2233_v35 = vpop.xlane.xlu0 %2232 }
 0x369   : > { %v2234_v18 = vrot.slane %v2233_v35, 4 }
 0x36b   : > { %v2235_v55 = vadd.f32 %v2234_v18, %v2233_v35 }
 0x36d   : > { %v2236_v7 = vrot.slane %v2235_v55, 2 }
 0x36f   : > { %v2237_v38 = vadd.f32 %v2236_v7, %v2235_v55 }
 0x371   : > { %v2238_v34 = vrot.slane %v2237_v38, 1 }
 0x373   : > { %v2239_v16 = vadd.f32 %v2238_v34, %v2237_v38 }
 0x375   : > { %5124 = vpush %v2239_v16 }
 0x3a6   : > { %s5125_s16 = spop %5124 }
 0x3a7   : > { %v2241_v42 = vstv %s5125_s16 }
 0x3a8   : > { %v2242_v30 = vmul.f32 0.0003125, %v2241_v42 }
 0x3aa   : > { %v2243_v14 = vadd.f32 1e-05, %v2242_v30 }
 0x3ac   : > { %5140 = vrsqrt.f32 %v2243_v14  ;;  %v2324_v14 = vld [vmem:[#allocation2 + $0x5] sm:$0xff] }
 0x3b6   : > { %v5141_v6 = vpop.eup %5140 }
 0x3b7   : > { %v2245_v20 = vmul.f32 %v5141_v6, %v6228_v63  ;;  %v2247_v12 = vmul.f32 %v5141_v6, %v6234_v33  ;;  %v2248_v44 = vmul.f32 %v5141_v6, %v6237_v0  ;;  %v2249_v32 = vmul.f32 %v5141_v6, %v6244_v17  ;;  %v4203_v33 = vld [vmem:[%s7258_s4] ss:$0 sm:$0xff] }
 0x3b8   : > { %v2250_v27 = vmul.f32 %v5141_v6, %v6249_v36  ;;  %v2251_v54 = vmul.f32 %v5141_v6, %v6256_v62  ;;  %v2252_v29 = vmul.f32 %v5141_v6, %v6262_v13  ;;  %v2253_v46 = vmul.f32 %v5141_v6, %v6268_v8 }
 0x3b9   : > { %v2254_v37 = vmul.f32 %v5141_v6, %v6274_v60  ;;  %v2255_v47 = vmul.f32 %v5141_v6, %v6279_v59  ;;  %v2265_v1 = vmul.f32 %v4202_v53, %v2245_v20  ;;  %v2267_v63 = vmul.f32 %v4202_v53, %v2247_v12 }
 0x3ba   : > { %v2268_v0 = vmul.f32 %v4202_v53, %v2248_v44  ;;  %v2269_v17 = vmul.f32 %v4202_v53, %v2249_v32  ;;  %v2270_v5 = vmul.f32 %v4202_v53, %v2250_v27  ;;  %v2271_v36 = vmul.f32 %v4202_v53, %v2251_v54 }
 0x3bb   : > { %v2272_v2 = vmul.f32 %v4202_v53, %v2252_v29  ;;  %v2273_v62 = vmul.f32 %v4202_v53, %v2253_v46  ;;  %v2274_v15 = vmul.f32 %v4202_v53, %v2254_v37  ;;  %v2275_v13 = vmul.f32 %v4202_v53, %v2255_v47  ;;  %v4233_v29 = vld [vmem:[%s7259_s5 + $0x60] sm:$0xff] }
 0x3bc   : > { %v2285_v26 = vadd.f32 %v4203_v33, %v2265_v1  ;;  %v2287_v8 = vadd.f32 %v4203_v33, %v2267_v63  ;;  %v2288_v23 = vadd.f32 %v4203_v33, %v2268_v0  ;;  %v2289_v60 = vadd.f32 %v4203_v33, %v2269_v17 }
 0x3bd   : > { %v2290_v57 = vadd.f32 %v4203_v33, %v2270_v5  ;;  %v2291_v59 = vadd.f32 %v4203_v33, %v2271_v36  ;;  %v2292_v9 = vadd.f32 %v4203_v33, %v2272_v2  ;;  %v2293_v19 = vadd.f32 %v4203_v33, %v2273_v62  ;;  %v4224_v5 = vld [vmem:[%s7259_s5 + $0x50] sm:$0xff]  ;;  %v4225_v36 = vld [vmem:[%s7259_s5 + $0x58] sm:$0xff] }
 0x3be   : > { %v2294_v61 = vadd.f32 %v4203_v33, %v2274_v15  ;;  %v2295_v52 = vadd.f32 %v4203_v33, %v2275_v13  ;;  %v2298_v51 = vmax.f32 %v2285_v26, 0.0  ;;  %v2300_v3 = vmax.f32 %v2287_v8, 0.0  ;;  %v4235_v15 = vld [vmem:[%s7259_s5 + $0x70] sm:$0xff]  ;;  %v4236_v13 = vld [vmem:[%s7259_s5 + $0x78] sm:$0xff] }
 0x3bf   : > { %v2301_v49 = vmax.f32 %v2288_v23, 0.0  ;;  %v2302_v10 = vmax.f32 %v2289_v60, 0.0  ;;  %v2303_v35 = vmax.f32 %v2290_v57, 0.0  ;;  %v2304_v18 = vmax.f32 %v2291_v59, 0.0 }
 0x3c0   : > { %v2305_v55 = vmax.f32 %v2292_v9, 0.0  ;;  %v2306_v7 = vmax.f32 %v2293_v19, 0.0  ;;  %v2307_v38 = vmax.f32 %v2294_v61, 0.0  ;;  %v2308_v34 = vmax.f32 %v2295_v52, 0.0  ;;  %2311 = vst.msk [vmem:[#allocation2 + $0x10] sm:$0xff] %vm636_vm0, %v2298_v51  ;;  %2313 = vst.msk [vmem:[#allocation2 + $0x20] sm:$0xff] %vm636_vm0, %v2300_v3 }
 0x3c1   : > { %2314 = vst.msk [vmem:[#allocation2 + $0x28] sm:$0xff] %vm636_vm0, %v2301_v49  ;;  %2315 = vst.msk [vmem:[#allocation2 + $0x30] sm:$0xff] %vm636_vm0, %v2302_v10  ;;  %v2246_v16 = vmul.f32 %v5141_v6, %v6231_v48  ;;  %v2256_v42 = vmul.f32 %v5141_v6, %v6284_v41  ;;  %v2257_v30 = vmul.f32 %v5141_v6, %v6289_v31  ;;  %v4222_v48 = vld [vmem:[%s7259_s5 + $0x40] sm:$0xff]  ;;  %v4223_v41 = vld [vmem:[%s7259_s5 + $0x48] sm:$0xff]  ;;  %v2337_v54 = vsel %vm610_vm12, %v2324_v14, 0.0 }
 0x3c2   : > { %2316 = vst.msk [vmem:[#allocation2 + $0x38] sm:$0xff] %vm636_vm0, %v2303_v35  ;;  %2317 = vst.msk [vmem:[#allocation2 + $0x40] sm:$0xff] %vm636_vm0, %v2304_v18  ;;  %v2363_v31 = vld [vmem:[#allocation2 + $0x6] sm:$0xff]  ;;  %v2646_v37 = vpack.c.bf16 %v4223_v41, %v4222_v48  ;;  %v2647_v26 = vpack.c.bf16 %v4225_v36, %v4224_v5  ;;  %v2809_v8 = vpack.c.bf16 %v4236_v13, %v4235_v15 }
 0x3c3   : > { %2318 = vst.msk [vmem:[#allocation2 + $0x48] sm:$0xff] %vm636_vm0, %v2305_v55  ;;  %2319 = vst.msk [vmem:[#allocation2 + $0x50] sm:$0xff] %vm636_vm0, %v2306_v7  ;;  %v2266_v20 = vmul.f32 %v4202_v53, %v2246_v16  ;;  %v2276_v12 = vmul.f32 %v4202_v53, %v2256_v42  ;;  %v2277_v44 = vmul.f32 %v4202_v53, %v2257_v30  ;;  %v4234_v53 = vld [vmem:[%s7259_s5 + $0x68] sm:$0xff]  ;;  %v4244_v13 = vld [vmem:[%s7259_s5 + $0x80] sm:$0xff] }
 0x3c4   : > { %2320 = vst.msk [vmem:[#allocation2 + $0x58] sm:$0xff] %vm636_vm0, %v2307_v38  ;;  %2321 = vst.msk [vmem:[#allocation2 + $0x60] sm:$0xff] %vm636_vm0, %v2308_v34  ;;  %v2808_v62 = vpack.c.bf16 %v4234_v53, %v4233_v29 }
 0x3c5   : > { %v2286_v6 = vadd.f32 %v4203_v33, %v2266_v20  ;;  %v2296_v32 = vadd.f32 %v4203_v33, %v2276_v12  ;;  %v2297_v27 = vadd.f32 %v4203_v33, %v2277_v44 }
 0x3c7   : > { %v2364_v46 = vld [vmem:[#allocation2 + $0xe] sm:$0xff]  ;;  %v2299_v1 = vmax.f32 %v2286_v6, 0.0  ;;  %v2309_v63 = vmax.f32 %v2296_v32, 0.0  ;;  %v2310_v0 = vmax.f32 %v2297_v27, 0.0 }
 0x3c8   : > { %v2325_v47 = vld [vmem:[#allocation2 + $0xd] sm:$0xff]  ;;  %v2376_v17 = vpack.c.bf16 %v2364_v46, %v2363_v31  ;;  %v2328_v51 = vld [vmem:[#allocation2 + $0x25] sm:$0xff] }
 0x3c9   : > { %v2338_v33 = vsel %vm611_vm13, %v2325_v47, 0.0  ;;  %2312 = vst.msk [vmem:[#allocation2 + $0x18] sm:$0xff] %vm636_vm0, %v2299_v1  ;;  %2322 = vst.msk [vmem:[#allocation2 + $0x68] sm:$0xff] %vm636_vm0, %v2309_v63  ;;  %v2329_v3 = vld [vmem:[#allocation2 + $0x2d] sm:$0xff]  ;;  %v2341_v35 = vsel %vm7324_vm7, %v2328_v51, 0.0  ;;  %v2330_v38 = vld [vmem:[#allocation2 + $0x35] sm:$0xff] }
 0x3ca   : > { %v2350_v2 = vpack.c.bf16 %v2338_v33, %v2337_v54  ;;  %2323 = vst.msk [vmem:[#allocation2 + $0x70] sm:$0xf] %vm7321_vm10, %v2310_v0  ;;  %4776 = vmatmul.mubr.msk.bf16.vlgmr.msra.gmra.mrb[124].mxu1 %vm636_vm0, %v2376_v17  ;;  %v2367_v49 = vld [vmem:[#allocation2 + $0x26] sm:$0xff]  ;;  %v2368_v10 = vld [vmem:[#allocation2 + $0x2e] sm:$0xff]  ;;  %vm7325_vm10 = vcmp.ne.s32.totalorder %v5529_v11, 0  ;;  %v2331_v34 = vld [vmem:[#allocation2 + $0x3d] sm:$0xff] }
 0x3cb   : > { %4836 = vmatpush3.bf16.msra.mxu1 %v2646_v37  ;;  %4779 = vmatprep.mubr.msk.bf16.mxu1 %vm5153_vm1, %v5152_v4  ;;  %v2342_v18 = vsel %vm7325_vm10, %v2329_v3, 0.0  ;;  %v2378_v55 = vpack.c.bf16 %v2368_v10, %v2367_v49  ;;  %v2369_v16 = vld [vmem:[#allocation2 + $0x36] sm:$0xff]  ;;  %v2370_v42 = vld [vmem:[#allocation2 + $0x3e] sm:$0xff]  ;;  %v2333_v48 = vld [vmem:[#allocation2 + $0x4d] sm:$0xff]  ;;  %vm7328_vm7 = vcmp.ne.s32.totalorder %v5417_v24, 9  ;;  %vm7329_vm10 = vcmp.ne.s32.totalorder %v5419_v25, 9 }
 0x3cc   : > { %4808 = vmatmul.mubr.msk.bf16.vlgmr.msra.gmra.mrb[128].mxu0 %vm636_vm0, %v2350_v2  ;;  %4837 = vmatprep.subr.bf16.mxu1 %v5152_v4  ;;  %v2352_v7 = vpack.c.bf16 %v2342_v18, %v2341_v35  ;;  %v2379_v20 = vpack.c.bf16 %v2370_v42, %v2369_v16  ;;  %v2332_v44 = vld [vmem:[#allocation2 + $0x45] sm:$0xff]  ;;  %v2372_v31 = vld [vmem:[#allocation2 + $0x4e] sm:$0xff]  ;;  %v2346_v32 = vsel %vm619_vm8, %v2333_v48, 0.0  ;;  %v2335_v53 = vld [vmem:[#allocation2 + $0x5d] sm:$0xff] }
 0x3cd   : > { %4811 = vmatprep.mubr.msk.bf16.mxu0 %vm5153_vm1, %v5152_v4  ;;  %4868 = vmatpush3.bf16.msra.mxu0 %v2808_v62  ;;  %v2371_v41 = vld [vmem:[#allocation2 + $0x46] sm:$0xff]  ;;  %v2345_v6 = vsel %vm618_vm9, %v2332_v44, 0.0  ;;  %v2334_v29 = vld [vmem:[#allocation2 + $0x55] sm:$0xff]  ;;  %v2374_v37 = vld [vmem:[#allocation2 + $0x5e] sm:$0xff]  ;;  %v2348_v1 = vsel %vm621_vm2, %v2335_v53, 0.0 }
 0x3ce   : > { %4869 = vmatprep.subr.bf16.mxu0 %v5152_v4  ;;  %v2380_v27 = vpack.c.bf16 %v2372_v31, %v2371_v41  ;;  %v2354_v54 = vpack.c.bf16 %v2346_v32, %v2345_v6  ;;  %v2373_v46 = vld [vmem:[#allocation2 + $0x56] sm:$0xff]  ;;  %v2347_v47 = vsel %vm620_vm6, %v2334_v29, 0.0  ;;  %v2608_v62 = vld [vmem:[#allocation2 + $0x7] sm:$0xff]  ;;  %v2615_v29 = vld [vmem:[#allocation2 + $0x3f] sm:$0xff] }
 0x3cf   : > { %4838 = vmatpush3.bf16.msra.mxu1 %v2647_v26  ;;  %v2381_v63 = vpack.c.bf16 %v2374_v37, %v2373_v46  ;;  %v2355_v0 = vpack.c.bf16 %v2348_v1, %v2347_v47  ;;  %v2609_v15 = vld [vmem:[#allocation2 + $0xf] sm:$0xff]  ;;  %v4247_v3 = vld [vmem:[%s7259_s5 + $0x98] sm:$0xff]  ;;  %v2777_v53 = vld [vmem:[#allocation2 + $0x47] sm:$0xff] }
 0x3d0   : > { %v2365_v23 = vld [vmem:[#allocation2 + $0x16] sm:$0xff]  ;;  %v2366_v60 = vld [vmem:[#allocation2 + $0x1e] sm:$0xff]  ;;  %4899 = vmatprep.subr.bf16.mxu1 %v5152_v4  ;;  %v2375_v33 = vld [vmem:[#allocation2 + $0x66] sm:$0xf] }
 0x3d1   : > { %v2326_v57 = vld [vmem:[#allocation2 + $0x15] sm:$0xff]  ;;  %v2377_v59 = vpack.c.bf16 %v2366_v60, %v2365_v23  ;;  %v2327_v9 = vld [vmem:[#allocation2 + $0x1d] sm:$0xff]  ;;  %4870 = vmatpush3.bf16.msra.mxu0 %v2809_v8  ;;  %v2336_v17 = vld [vmem:[#allocation2 + $0x65] sm:$0xf]  ;;  %v2382_v36 = vpack.c.bf16 %v2375_v33, %v2375_v33  ;;  %v2621_v23 = vsel %vm7328_vm7, %v2608_v62, 0.0  ;;  %v2622_v60 = vsel %vm7329_vm10, %v2609_v15, 0.0 }
 0x3d2   : > { %v2339_v19 = vsel %vm7322_vm5, %v2326_v57, 0.0  ;;  %v2340_v61 = vsel %vm7323_vm4, %v2327_v9, 0.0  ;;  %4931 = vmatprep.subr.bf16.mxu0 %v5152_v4  ;;  %vm7326_vm5 = vcmp.ne.s32.totalorder %v5589_v28, 0  ;;  %vm7327_vm4 = vcmp.ne.s32.totalorder %v5591_v58, 0  ;;  %v4245_v26 = vld [vmem:[%s7259_s5 + $0x88] sm:$0xff]  ;;  %v2771_v8 = vld [vmem:[#allocation2 + $0x17] sm:$0xff] }
 0x3d3   : > { %4780 = vmatmul.mubr.msk.bf16.gmra.mrb[128].mxu1 %vm636_vm0, %v2377_v59  ;;  %v2351_v52 = vpack.c.bf16 %v2340_v61, %v2339_v19  ;;  %v2343_v30 = vsel %vm7326_vm5, %v2330_v38, 0.0  ;;  %v2344_v14 = vsel %vm7327_vm4, %v2331_v34, 0.0  ;;  %v2349_v5 = vsel %vm622_vm15, %v2336_v17, 0.0  ;;  %v4255_v57 = vld [vmem:[%s7259_s5 + $0xa0] sm:$0xff]  ;;  %v4256_v59 = vld [vmem:[%s7259_s5 + $0xa8] sm:$0xff]  ;;  %v4246_v51 = vld [vmem:[%s7259_s5 + $0x90] sm:$0xff] }
 0x3d4   : > { %4783 = vmatprep.mubr.msk.bf16.mxu1 %vm5153_vm1, %v5152_v4  ;;  %v2353_v12 = vpack.c.bf16 %v2344_v14, %v2343_v30  ;;  %v2356_v2 = vpack.c.bf16 %v2349_v5, %v2349_v5  ;;  %v2957_v9 = vpack.c.bf16 %v4245_v26, %v4244_v13  ;;  %v2783_v19 = vsel %vm610_vm12, %v2609_v15, 0.0  ;;  %v2611_v35 = vld [vmem:[#allocation2 + $0x1f] sm:$0xff]  ;;  %v4257_v18 = vld [vmem:[%s7259_s5 + $0xb0] sm:$0xff]  ;;  %v2773_v38 = vld [vmem:[#allocation2 + $0x27] sm:$0xff] }
 0x3d5   : > { %4812 = vmatmul.mubr.msk.bf16.gmra.mrb[132].mxu0 %vm636_vm0, %v2351_v52  ;;  %v2784_v61 = vsel %vm611_vm13, %v2771_v8, 0.0  ;;  %v2634_v52 = vpack.c.bf16 %v2622_v60, %v2621_v23  ;;  %v3119_v49 = vpack.c.bf16 %v4256_v59, %v4255_v57  ;;  %vm7330_vm5 = vcmp.ne.s32.totalorder %v5439_v43, 9  ;;  %v2613_v44 = vld [vmem:[#allocation2 + $0x2f] sm:$0xff]  ;;  %v2775_v48 = vld [vmem:[#allocation2 + $0x37] sm:$0xff]  ;;  %v2619_v26 = vld [vmem:[#allocation2 + $0x5f] sm:$0xff] }
 0x3d6   : > { %4815 = vmatprep.mubr.msk.bf16.mxu0 %vm5153_vm1, %v5152_v4  ;;  %v2796_v10 = vpack.c.bf16 %v2784_v61, %v2783_v19  ;;  %v2623_v34 = vsel %vm7330_vm5, %v2771_v8, 0.0  ;;  %vm7331_vm4 = vcmp.ne.s32.totalorder %v5453_v50, 9  ;;  %vm7332_vm7 = vcmp.ne.s32.totalorder %v5439_v43, 0  ;;  %v2617_v17 = vld [vmem:[#allocation2 + $0x4f] sm:$0xff]  ;;  %v2779_v33 = vld [vmem:[#allocation2 + $0x57] sm:$0xff]  ;;  %v2781_v8 = vld [vmem:[#allocation2 + $0x67] sm:$0xff] }
 0x3d7   : > { %v2624_v16 = vsel %vm7331_vm4, %v2611_v35, 0.0  ;;  %v2785_v30 = vsel %vm7332_vm7, %v2611_v35, 0.0  ;;  %vm7333_vm10 = vcmp.ne.s32.totalorder %v5453_v50, 0  ;;  %vm7334_vm5 = vcmp.ne.s32.totalorder %v5525_v22, 9  ;;  %v2620_v61 = vld [vmem:[#allocation2 + $0x67] sm:$0xf] }
 0x3d8   : > { %v2786_v14 = vsel %vm7333_vm10, %v2773_v38, 0.0  ;;  %v2625_v41 = vsel %vm7334_vm5, %v2773_v38, 0.0  ;;  %vm7335_vm4 = vcmp.ne.s32.totalorder %v5529_v11, 9  ;;  %vm7336_vm7 = vcmp.ne.s32.totalorder %v5525_v22, 0  ;;  %v4266_v35 = vld [vmem:[%s7259_s5 + $0xc0] sm:$0xff]  ;;  %v2932_v38 = vld [vmem:[#allocation2 + $0x10] sm:$0xff] }
 0x3d9   : > { %v2626_v31 = vsel %vm7335_vm4, %v2613_v44, 0.0  ;;  %v2787_v6 = vsel %vm7336_vm7, %v2613_v44, 0.0  ;;  %vm7337_vm10 = vcmp.ne.s32.totalorder %v5529_v11, 0  ;;  %vm7338_vm5 = vcmp.ne.s32.totalorder %v5589_v28, 9  ;;  %v4268_v44 = vld [vmem:[%s7259_s5 + $0xd0] sm:$0xff] }
 0x3da   : > { %v2788_v32 = vsel %vm7337_vm10, %v2775_v48, 0.0  ;;  %v2627_v46 = vsel %vm7338_vm5, %v2775_v48, 0.0  ;;  %vm7339_vm4 = vcmp.ne.s32.totalorder %v5591_v58, 9  ;;  %vm7340_vm7 = vcmp.ne.s32.totalorder %v5589_v28, 0  ;;  %v4269_v48 = vld [vmem:[%s7259_s5 + $0xd8] sm:$0xff] }
 0x3db   : > { %4784 = vmatmul.mubr.msk.bf16.gmra.mrb[132].mxu1 %vm636_vm0, %v2378_v55  ;;  %v4258_v55 = vld [vmem:[%s7259_s5 + $0xb8] sm:$0xff]  ;;  %v2628_v37 = vsel %vm7339_vm4, %v2615_v29, 0.0  ;;  %v2789_v47 = vsel %vm7340_vm7, %v2615_v29, 0.0  ;;  %vm7341_vm10 = vcmp.ne.s32.totalorder %v5591_v58, 0  ;;  %vm7342_vm5 = vcmp.ne.s32.totalorder %v5632_v21, 9  ;;  %v6617_v29 = vld [vmem:[#allocation2 + $0x29] sm:$0xff] }
 0x3dc   : > { %4787 = vmatprep.mubr.msk.bf16.mxu1 %vm5153_vm1, %v5152_v4  ;;  %v3120_v42 = vpack.c.bf16 %v4258_v55, %v4257_v18  ;;  %v2790_v1 = vsel %vm7341_vm10, %v2777_v53, 0.0  ;;  %v2629_v5 = vsel %vm7342_vm5, %v2777_v53, 0.0  ;;  %v2792_v62 = vsel %vm619_vm8, %v2779_v33, 0.0  ;;  %v4267_v18 = vld [vmem:[%s7259_s5 + $0xc8] sm:$0xff]  ;;  %v3081_v55 = vld [vmem:[#allocation2 + $0x11] sm:$0xff]  ;;  %v2934_v53 = vld [vmem:[#allocation2 + $0x20] sm:$0xff] }
 0x3dd   : > { %4816 = vmatmul.mubr.msk.bf16.gmra.mrb[136].mxu0 %vm636_vm0, %v2352_v7  ;;  %v2958_v7 = vpack.c.bf16 %v4247_v3, %v4246_v51  ;;  %v2631_v23 = vsel %vm633_vm11, %v2779_v33, 0.0  ;;  %v2632_v60 = vsel %vm634_vm14, %v2619_v26, 0.0  ;;  %v2793_v57 = vsel %vm620_vm6, %v2619_v26, 0.0  ;;  %v6637_v33 = vld [vmem:[#allocation2 + $0x39] sm:$0xff]  ;;  %v6651_v26 = vld [vmem:[#allocation2 + $0x41] sm:$0xff] }
 0x3de   : > { %4819 = vmatprep.mubr.msk.bf16.mxu0 %vm5153_vm1, %v5152_v4  ;;  %v2794_v59 = vsel %vm621_vm2, %v2781_v8, 0.0  ;;  %vm7343_vm4 = vcmp.ne.s32.totalorder %v5693_v45, 9  ;;  %vm7344_vm7 = vcmp.ne.s32.totalorder %v5417_v24, 9  ;;  %vm7345_vm10 = vcmp.ne.s32.totalorder %v5419_v25, 9  ;;  %v6653_v8 = vld [vmem:[#allocation2 + $0x49] sm:$0xff] }
 0x3df   : > { %v2801_v19 = vpack.c.bf16 %v2794_v59, %v2793_v57  ;;  %v2633_v51 = vsel %vm7343_vm4, %v2620_v61, 0.0  ;;  %vm7346_vm5 = vcmp.ne.s32.totalorder %v5439_v43, 9  ;;  %vm7347_vm4 = vcmp.ne.s32.totalorder %v5453_v50, 9  ;;  %v6667_v61 = vld [vmem:[#allocation2 + $0x51] sm:$0xff] }
 0x3e3   : > { %4788 = vmatmul.mubr.msk.bf16.gmra.mrb[136].mxu1 %vm636_vm0, %v2379_v20  ;;  %v2635_v20 = vpack.c.bf16 %v2624_v16, %v2623_v34  ;;  %v2933_v34 = vld [vmem:[#allocation2 + $0x18] sm:$0xff]  ;;  %v4277_v16 = vld [vmem:[%s7259_s5 + $0xe0] sm:$0xff] }
 0x3e4   : > { %4791 = vmatprep.mubr.msk.bf16.mxu1 %vm5153_vm1, %v5152_v4 }
 0x3e5   : > { %4820 = vmatmul.mubr.msk.bf16.gmra.mrb[140].mxu0 %vm636_vm0, %v2353_v12  ;;  %v2797_v12 = vpack.c.bf16 %v2786_v14, %v2785_v30  ;;  %v3281_v30 = vpack.c.bf16 %v4267_v18, %v4266_v35  ;;  %v3094_v14 = vsel %vm7344_vm7, %v3081_v55, 0.0  ;;  %vm7348_vm7 = vcmp.ne.s32.totalorder %v5525_v22, 9  ;;  %v6683_v55 = vld [vmem:[#allocation2 + $0x61] sm:$0xff] }
 0x3e6   : > { %4823 = vmatprep.mubr.msk.bf16.mxu0 %vm5153_vm1, %v5152_v4 }
 0x3eb   : > { %4792 = vmatmul.mubr.msk.bf16.gmra.mrb[140].mxu1 %vm636_vm0, %v2380_v27  ;;  %v2636_v27 = vpack.c.bf16 %v2626_v31, %v2625_v41 }
 0x3ec   : > { %4795 = vmatprep.mubr.msk.bf16.mxu1 %vm5153_vm1, %v5152_v4 }
 0x3ed   : > { %4824 = vmatmul.mubr.msk.bf16.gmra.mrb[144].mxu0 %vm636_vm0, %v2354_v54  ;;  %v2798_v54 = vpack.c.bf16 %v2788_v32, %v2787_v6  ;;  %v4279_v6 = vld [vmem:[%s7259_s5 + $0xf0] sm:$0xff]  ;;  %v4280_v32 = vld [vmem:[%s7259_s5 + $0xf8] sm:$0xff] }
 0x3ee   : > { %4827 = vmatprep.mubr.msk.bf16.mxu0 %vm5153_vm1, %v5152_v4 }
 0x3f3   : > { %4796 = vmatmul.mubr.msk.bf16.gmra.mrb[144].mxu1 %vm636_vm0, %v2381_v63  ;;  %v2637_v63 = vpack.c.bf16 %v2628_v37, %v2627_v46  ;;  %v2935_v46 = vld [vmem:[#allocation2 + $0x28] sm:$0xff]  ;;  %v3431_v37 = vpack.c.bf16 %v4280_v32, %v4279_v6  ;;  %v4288_v6 = vld [vmem:[%s7259_s5 + $0x100] sm:$0xff] }
 0x3f4   : > { %4799 = vmatprep.mubr.msk.bf16.mxu1 %vm5153_vm1, %v5152_v4  ;;  %v4289_v32 = vld [vmem:[%s7259_s5 + $0x108] sm:$0xff] }
 0x3f5   : > { %4828 = vmatmul.mubr.msk.bf16.gmra.mrb[148].mxu0 %vm636_vm0, %v2355_v0  ;;  %v2799_v0 = vpack.c.bf16 %v2790_v1, %v2789_v47  ;;  %v3097_v1 = vsel %vm7347_vm4, %v6617_v29, 0.0  ;;  %vm7351_vm4 = vcmp.ne.s32.totalorder %v5591_v58, 9 }
 0x3f6   : > { %4831 = vmatprep.mubr.msk.bf16.mxu0 %vm5153_vm1, %v5152_v4  ;;  %v3101_v59 = vsel %vm7351_vm4, %v6653_v8, 0.0  ;;  %vm7357_vm4 = vcmp.ne.s32.totalorder %v5529_v11, 0 }
 0x3fb   : > { %4800 = vmatmul.mubr.msk.bf16.gmra.mrb[148].mxu1 %vm636_vm0, %v2382_v36  ;;  %v2630_v36 = vsel %vm632_vm3, %v2617_v17, 0.0 }
 0x3fc   : > { %4839 = vmatprep.mubr.msk.bf16.mxu1 %vm5153_vm1, %v5152_v4  ;;  %v2638_v15 = vpack.c.bf16 %v2630_v36, %v2629_v5  ;;  %v2936_v5 = vld [vmem:[#allocation2 + $0x30] sm:$0xff]  ;;  %v2937_v36 = vld [vmem:[#allocation2 + $0x38] sm:$0xff] }
 0x3fd   : > { %4832 = vmatmul.mubr.msk.bf16.gmra.mrb[152].mxu0 %vm636_vm0, %v2356_v2  ;;  %v2791_v2 = vsel %vm618_vm9, %v2617_v17, 0.0  ;;  %v6635_v17 = vld [vmem:[#allocation2 + $0x31] sm:$0xff] }
 0x3fe   : > { %4871 = vmatprep.mubr.msk.bf16.mxu0 %vm5153_vm1, %v5152_v4  ;;  %v2800_v13 = vpack.c.bf16 %v2792_v62, %v2791_v2  ;;  %v3098_v2 = vsel %vm7348_vm7, %v6635_v17, 0.0  ;;  %vm7352_vm7 = vcmp.ne.s32.totalorder %v5632_v21, 9 }
 0x403   : > { %4840 = vmatmul.mubr.msk.bf16.vlgmr.msra.gmra.mrb[152].mxu1 %vm636_vm0, %v2634_v52  ;;  %v2782_v52 = vld [vmem:[#allocation2 + $0x6f] sm:$0xf] }
 0x404   : > { %4900 = vmatpush3.bf16.msra.mxu1 %v2957_v9  ;;  %4843 = vmatprep.mubr.msk.bf16.mxu1 %vm5153_vm1, %v5152_v4  ;;  %v2639_v9 = vpack.c.bf16 %v2632_v60, %v2631_v23  ;;  %v2795_v3 = vsel %vm622_vm15, %v2782_v52, 0.0  ;;  %v2938_v23 = vld [vmem:[#allocation2 + $0x40] sm:$0xff]  ;;  %v2939_v60 = vld [vmem:[#allocation2 + $0x48] sm:$0xff] }
 0x405   : > { %4872 = vmatmul.mubr.msk.bf16.vlgmr.msra.gmra.mrb[156].mxu0 %vm636_vm0, %v2796_v10  ;;  %4901 = vmatprep.subr.bf16.mxu1 %v5152_v4  ;;  %v2802_v10 = vpack.c.bf16 %v2795_v3, %v2795_v3  ;;  %v6669_v52 = vld [vmem:[#allocation2 + $0x59] sm:$0xff] }
 0x406   : > { %4875 = vmatprep.mubr.msk.bf16.mxu0 %vm5153_vm1, %v5152_v4  ;;  %4932 = vmatpush3.bf16.msra.mxu0 %v3119_v49  ;;  %v2640_v49 = vpack.c.bf16 %v2633_v51, %v2633_v51  ;;  %v2940_v51 = vld [vmem:[#allocation2 + $0x50] sm:$0xff]  ;;  %v2941_v3 = vld [vmem:[#allocation2 + $0x58] sm:$0xff] }
 0x407   : > { %4933 = vmatprep.subr.bf16.mxu0 %v5152_v4  ;;  %v2949_v35 = vpack.c.bf16 %v2941_v3, %v2940_v51 }
 0x408   : > { %4902 = vmatpush3.bf16.msra.mxu1 %v2958_v7  ;;  %v6584_v7 = vld [vmem:[#allocation2 + $0x19] sm:$0xff] }
 0x409   : > { %4963 = vmatprep.subr.bf16.mxu1 %v5152_v4 }
 0x40a   : > { %4934 = vmatpush3.bf16.msra.mxu0 %v3120_v42  ;;  %v4278_v42 = vld [vmem:[%s7259_s5 + $0xe8] sm:$0xff] }
 0x40b   : > { %4844 = vmatmul.mubr.msk.bf16.gmra.mrb[156].mxu1 %vm636_vm0, %v2635_v20  ;;  %4995 = vmatprep.subr.bf16.mxu0 %v5152_v4  ;;  %v3095_v20 = vsel %vm7345_vm10, %v6584_v7, 0.0  ;;  %v3430_v41 = vpack.c.bf16 %v4278_v42, %v4277_v16  ;;  %vm7349_vm10 = vcmp.ne.s32.totalorder %v5529_v11, 9  ;;  %v2943_v16 = vld [vmem:[#allocation2 + $0x68] sm:$0xff]  ;;  %v3104_v42 = vsel %vm633_vm11, %v6683_v55, 0.0 }
 0x40c   : > { %4847 = vmatprep.mubr.msk.bf16.mxu1 %vm5153_vm1, %v5152_v4  ;;  %v3107_v31 = vpack.c.bf16 %v3095_v20, %v3094_v14  ;;  %v3099_v62 = vsel %vm7349_vm10, %v6637_v33, 0.0  ;;  %vm7353_vm10 = vcmp.ne.s32.totalorder %v5693_v45, 9 }
 0x40d   : > { %4876 = vmatmul.mubr.msk.bf16.gmra.mrb[160].mxu0 %vm636_vm0, %v2797_v12  ;;  %v2945_v12 = vpack.c.bf16 %v2933_v34, %v2932_v38  ;;  %v6685_v38 = vld [vmem:[#allocation2 + $0x69] sm:$0xff]  ;;  %v2942_v34 = vld [vmem:[#allocation2 + $0x60] sm:$0xff] }
 0x40e   : > { %4879 = vmatprep.mubr.msk.bf16.mxu0 %vm5153_vm1, %v5152_v4  ;;  %v2950_v14 = vpack.c.bf16 %v2943_v16, %v2942_v34  ;;  %v3254_v34 = vld [vmem:[#allocation2 + $0x71] sm:$0xff] }
 0x40f   : > { %v3415_v16 = vld [vmem:[#allocation2 + $0x6a] sm:$0xff] }
 0x413   : > { %4848 = vmatmul.mubr.msk.bf16.gmra.mrb[160].mxu1 %vm636_vm0, %v2636_v27  ;;  %v3282_v27 = vpack.c.bf16 %v4269_v48, %v4268_v44  ;;  %v2944_v44 = vld [vmem:[#allocation2 + $0x70] sm:$0xf] }
 0x414   : > { %4851 = vmatprep.mubr.msk.bf16.mxu1 %vm5153_vm1, %v5152_v4 }
 0x415   : > { %4880 = vmatmul.mubr.msk.bf16.gmra.mrb[164].mxu0 %vm636_vm0, %v2798_v54  ;;  %v6615_v54 = vld [vmem:[#allocation2 + $0x21] sm:$0xff] }
 0x416   : > { %4883 = vmatprep.mubr.msk.bf16.mxu0 %vm5153_vm1, %v5152_v4  ;;  %v3096_v47 = vsel %vm7346_vm5, %v6615_v54, 0.0  ;;  %vm7350_vm5 = vcmp.ne.s32.totalorder %v5589_v28, 9 }
 0x417   : > { %v3100_v57 = vsel %vm7350_vm5, %v6651_v26, 0.0  ;;  %vm7356_vm5 = vcmp.ne.s32.totalorder %v5525_v22, 0 }
 0x41b   : > { %4852 = vmatmul.mubr.msk.bf16.gmra.mrb[164].mxu1 %vm636_vm0, %v2637_v63  ;;  %v2946_v63 = vpack.c.bf16 %v2935_v46, %v2934_v53  ;;  %v3257_v53 = vsel %vm611_vm13, %v6615_v54, 0.0  ;;  %v3592_v46 = vpack.c.bf16 %v4289_v32, %v4288_v6  ;;  %vm7355_vm13 = vcmp.ne.s32.totalorder %v5453_v50, 0 }
 0x41c   : > { %4855 = vmatprep.mubr.msk.bf16.mxu1 %vm5153_vm1, %v5152_v4 }
 0x41d   : > { %4884 = vmatmul.mubr.msk.bf16.gmra.mrb[168].mxu0 %vm636_vm0, %v2799_v0  ;;  %v3108_v0 = vpack.c.bf16 %v3097_v1, %v3096_v47  ;;  %v3406_v47 = vld [vmem:[#allocation2 + $0x22] sm:$0xff] }
 0x41e   : > { %4887 = vmatprep.mubr.msk.bf16.mxu0 %vm5153_vm1, %v5152_v4 }
 0x423   : > { %4856 = vmatmul.mubr.msk.bf16.gmra.mrb[168].mxu1 %vm636_vm0, %v2638_v15  ;;  %v2947_v15 = vpack.c.bf16 %v2937_v36, %v2936_v5  ;;  %v3259_v36 = vsel %vm7355_vm13, %v6635_v17, 0.0  ;;  %v3261_v17 = vsel %vm7357_vm4, %v6651_v26, 0.0  ;;  %vm7366_vm13 = vcmp.ne.s32.totalorder %v5589_v28, 9 }
 0x424   : > { %4859 = vmatprep.mubr.msk.bf16.mxu1 %vm5153_vm1, %v5152_v4  ;;  %vm7368_vm4 = vcmp.ne.s32.totalorder %v5632_v21, 9  ;;  %v3565_v21 = vld [vmem:[#allocation2 + $0x73] sm:$0xff] }
 0x425   : > { %4888 = vmatmul.mubr.msk.bf16.gmra.mrb[172].mxu0 %vm636_vm0, %v2800_v13  ;;  %v3109_v13 = vpack.c.bf16 %v3099_v62, %v3098_v2  ;;  %v3407_v2 = vld [vmem:[#allocation2 + $0x2a] sm:$0xff]  ;;  %v3408_v62 = vld [vmem:[#allocation2 + $0x32] sm:$0xff] }
 0x426   : > { %4891 = vmatprep.mubr.msk.bf16.mxu0 %vm5153_vm1, %v5152_v4 }
 0x42b   : > { %4860 = vmatmul.mubr.msk.bf16.gmra.mrb[172].mxu1 %vm636_vm0, %v2639_v9  ;;  %v2948_v9 = vpack.c.bf16 %v2939_v60, %v2938_v23  ;;  %v3409_v23 = vld [vmem:[#allocation2 + $0x3a] sm:$0xff]  ;;  %v3410_v60 = vld [vmem:[#allocation2 + $0x42] sm:$0xff] }
 0x42c   : > { %4863 = vmatprep.mubr.msk.bf16.mxu1 %vm5153_vm1, %v5152_v4 }
 0x42d   : > { %4892 = vmatmul.mubr.msk.bf16.gmra.mrb[176].mxu0 %vm636_vm0, %v2801_v19  ;;  %v3110_v19 = vpack.c.bf16 %v3101_v59, %v3100_v57  ;;  %v3420_v59 = vpack.c.bf16 %v3410_v60, %v3409_v23 }
 0x42e   : > { %4895 = vmatprep.mubr.msk.bf16.mxu0 %vm5153_vm1, %v5152_v4 }
 0x433   : > { %4864 = vmatmul.mubr.msk.bf16.gmra.mrb[176].mxu1 %vm636_vm0, %v2640_v49  ;;  %v3102_v49 = vsel %vm7352_vm7, %v6667_v61, 0.0  ;;  %vm7358_vm7 = vcmp.ne.s32.totalorder %v5589_v28, 0  ;;  %v3563_v28 = vld [vmem:[#allocation2 + $0x63] sm:$0xff] }
 0x434   : > { %4903 = vmatprep.mubr.msk.bf16.mxu1 %vm5153_vm1, %v5152_v4 }
 0x435   : > { %4896 = vmatmul.mubr.msk.bf16.gmra.mrb[180].mxu0 %vm636_vm0, %v2802_v10  ;;  %v3103_v10 = vsel %vm632_vm3, %v6669_v52, 0.0 }
 0x436   : > { %4935 = vmatprep.mubr.msk.bf16.mxu0 %vm5153_vm1, %v5152_v4  ;;  %v3111_v18 = vpack.c.bf16 %v3103_v10, %v3102_v49  ;;  %v3413_v49 = vld [vmem:[#allocation2 + $0x5a] sm:$0xff]  ;;  %v3414_v10 = vld [vmem:[#allocation2 + $0x62] sm:$0xff] }
 0x43b   : > { %4904 = vmatmul.mubr.msk.bf16.vlgmr.msra.gmra.mrb[180].mxu1 %vm636_vm0, %v2945_v12  ;;  %v3093_v12 = vld [vmem:[#allocation2 + $0x71] sm:$0xf] }
 0x43c   : > { %4964 = vmatpush3.bf16.msra.mxu1 %v3281_v30  ;;  %4907 = vmatprep.mubr.msk.bf16.mxu1 %vm5153_vm1, %v5152_v4  ;;  %v3105_v30 = vsel %vm634_vm14, %v6685_v38, 0.0  ;;  %v3106_v48 = vsel %vm7353_vm10, %v3093_v12, 0.0  ;;  %vm7359_vm10 = vcmp.ne.s32.totalorder %v5591_v58, 0 }
 0x43d   : > { %4936 = vmatmul.mubr.msk.bf16.vlgmr.msra.gmra.mrb[184].mxu0 %vm636_vm0, %v3107_v31  ;;  %4965 = vmatprep.subr.bf16.mxu1 %v5152_v4  ;;  %v3112_v20 = vpack.c.bf16 %v3105_v30, %v3104_v42  ;;  %v3113_v31 = vpack.c.bf16 %v3106_v48, %v3106_v48  ;;  %v3263_v26 = vsel %vm7359_vm10, %v6667_v61, 0.0  ;;  %v3265_v61 = vsel %vm619_vm8, %v6683_v55, 0.0  ;;  %v3416_v42 = vld [vmem:[#allocation2 + $0x72] sm:$0xff] }
 0x43e   : > { %4939 = vmatprep.mubr.msk.bf16.mxu0 %vm5153_vm1, %v5152_v4  ;;  %4996 = vmatpush3.bf16.msra.mxu0 %v3430_v41  ;;  %v2951_v41 = vpack.c.bf16 %v2944_v44, %v2944_v44  ;;  %v3267_v55 = vsel %vm621_vm2, %v3254_v34, 0.0  ;;  %vm7361_vm2 = vcmp.ne.s32.totalorder %v5419_v25, 9  ;;  %v3557_v25 = vld [vmem:[#allocation2 + $0x33] sm:$0xff]  ;;  %vm7363_vm8 = vcmp.ne.s32.totalorder %v5453_v50, 9  ;;  %v3558_v34 = vld [vmem:[#allocation2 + $0x3b] sm:$0xff] }
 0x43f   : > { %4997 = vmatprep.subr.bf16.mxu0 %v5152_v4 }
 0x440   : > { %4966 = vmatpush3.bf16.msra.mxu1 %v3282_v27  ;;  %v3256_v27 = vsel %vm610_vm12, %v6584_v7, 0.0  ;;  %vm7354_vm12 = vcmp.ne.s32.totalorder %v5439_v43, 0 }
 0x441   : > { %5027 = vmatprep.subr.bf16.mxu1 %v5152_v4  ;;  %v3269_v1 = vpack.c.bf16 %v3257_v53, %v3256_v27  ;;  %v3258_v5 = vsel %vm7354_vm12, %v6617_v29, 0.0  ;;  %v3260_v29 = vsel %vm7356_vm5, %v6637_v33, 0.0  ;;  %v3262_v33 = vsel %vm7358_vm7, %v6653_v8, 0.0 }
 0x442   : > { %4998 = vmatpush3.bf16.msra.mxu0 %v3431_v37  ;;  %v3405_v37 = vld [vmem:[#allocation2 + $0x1a] sm:$0xff]  ;;  %v3271_v57 = vpack.c.bf16 %v3261_v17, %v3260_v29  ;;  %v3272_v51 = vpack.c.bf16 %v3263_v26, %v3262_v33  ;;  %v3264_v8 = vsel %vm618_vm9, %v6669_v52, 0.0  ;;  %v3266_v52 = vsel %vm620_vm6, %v6685_v38, 0.0 }
 0x443   : > { %4908 = vmatmul.mubr.msk.bf16.gmra.mrb[184].mxu1 %vm636_vm0, %v2946_v63  ;;  %5059 = vmatprep.subr.bf16.mxu0 %v5152_v4  ;;  %v4290_v63 = vld [vmem:[%s7259_s5 + $0x110] sm:$0xff]  ;;  %v3418_v7 = vpack.c.bf16 %v3406_v47, %v3405_v37  ;;  %v3274_v30 = vpack.c.bf16 %v3267_v55, %v3266_v52  ;;  %vm7360_vm6 = vcmp.ne.s32.totalorder %v5417_v24, 9  ;;  %vm7362_vm9 = vcmp.ne.s32.totalorder %v5439_v43, 9  ;;  %v3559_v43 = vld [vmem:[#allocation2 + $0x43] sm:$0xff] }
 0x444   : > { %4911 = vmatprep.mubr.msk.bf16.mxu1 %vm5153_vm1, %v5152_v4  ;;  %v3556_v24 = vld [vmem:[#allocation2 + $0x2b] sm:$0xff]  ;;  %v3570_v26 = vsel %vm7363_vm8, %v3557_v25, 0.0  ;;  %vm7365_vm12 = vcmp.ne.s32.totalorder %v5529_v11, 9  ;;  %vm7367_vm5 = vcmp.ne.s32.totalorder %v5591_v58, 9 }
 0x445   : > { %4940 = vmatmul.mubr.msk.bf16.gmra.mrb[188].mxu0 %vm636_vm0, %v3108_v0  ;;  %v4291_v0 = vld [vmem:[%s7259_s5 + $0x118] sm:$0xff]  ;;  %v3569_v33 = vsel %vm7362_vm9, %v3556_v24, 0.0  ;;  %v3572_v55 = vsel %vm7365_vm12, %v3559_v43, 0.0 }
 0x446   : > { %4943 = vmatprep.mubr.msk.bf16.mxu0 %vm5153_vm1, %v5152_v4  ;;  %v3593_v54 = vpack.c.bf16 %v4291_v0, %v4290_v63  ;;  %v3554_v63 = vld [vmem:[#allocation2 + $0x1b] sm:$0xff]  ;;  %v3555_v0 = vld [vmem:[#allocation2 + $0x23] sm:$0xff] }
 0x44b   : > { %4912 = vmatmul.mubr.msk.bf16.gmra.mrb[188].mxu1 %vm636_vm0, %v2947_v15  ;;  %v3270_v15 = vpack.c.bf16 %v3259_v36, %v3258_v5  ;;  %v3568_v5 = vsel %vm7361_vm2, %v3555_v0, 0.0 }
 0x44c   : > { %4915 = vmatprep.mubr.msk.bf16.mxu1 %vm5153_vm1, %v5152_v4 }
 0x44d   : > { %4944 = vmatmul.mubr.msk.bf16.gmra.mrb[192].mxu0 %vm636_vm0, %v3109_v13  ;;  %v3419_v13 = vpack.c.bf16 %v3408_v62, %v3407_v2 }
 0x44e   : > { %4947 = vmatprep.mubr.msk.bf16.mxu0 %vm5153_vm1, %v5152_v4 }
 0x453   : > { %4916 = vmatmul.mubr.msk.bf16.gmra.mrb[192].mxu1 %vm636_vm0, %v2948_v9  ;;  %v3411_v9 = vld [vmem:[#allocation2 + $0x4a] sm:$0xff] }
 0x454   : > { %4919 = vmatprep.mubr.msk.bf16.mxu1 %vm5153_vm1, %v5152_v4 }
 0x455   : > { %4948 = vmatmul.mubr.msk.bf16.gmra.mrb[196].mxu0 %vm636_vm0, %v3110_v19  ;;  %v3412_v19 = vld [vmem:[#allocation2 + $0x52] sm:$0xff] }
 0x456   : > { %4951 = vmatprep.mubr.msk.bf16.mxu0 %vm5153_vm1, %v5152_v4  ;;  %v3421_v3 = vpack.c.bf16 %v3412_v19, %v3411_v9 }
 0x45b   : > { %4920 = vmatmul.mubr.msk.bf16.gmra.mrb[196].mxu1 %vm636_vm0, %v2949_v35  ;;  %v3273_v35 = vpack.c.bf16 %v3265_v61, %v3264_v8 }
 0x45c   : > { %4923 = vmatprep.mubr.msk.bf16.mxu1 %vm5153_vm1, %v5152_v4 }
 0x45d   : > { %4952 = vmatmul.mubr.msk.bf16.gmra.mrb[200].mxu0 %vm636_vm0, %v3111_v18  ;;  %v3422_v18 = vpack.c.bf16 %v3414_v10, %v3413_v49  ;;  %v3581_v49 = vpack.c.bf16 %v3570_v26, %v3569_v33 }
 0x45e   : > { %4955 = vmatprep.mubr.msk.bf16.mxu0 %vm5153_vm1, %v5152_v4 }
 0x463   : > { %4924 = vmatmul.mubr.msk.bf16.gmra.mrb[200].mxu1 %vm636_vm0, %v2950_v14  ;;  %v3255_v14 = vld [vmem:[#allocation2 + $0x79] sm:$0xf] }
 0x464   : > { %4927 = vmatprep.mubr.msk.bf16.mxu1 %vm5153_vm1, %v5152_v4  ;;  %v3268_v12 = vsel %vm622_vm15, %v3255_v14, 0.0  ;;  %vm7364_vm15 = vcmp.ne.s32.totalorder %v5525_v22, 9  ;;  %v3561_v22 = vld [vmem:[#allocation2 + $0x53] sm:$0xff] }
 0x465   : > { %4956 = vmatmul.mubr.msk.bf16.gmra.mrb[204].mxu0 %vm636_vm0, %v3112_v20  ;;  %v3423_v20 = vpack.c.bf16 %v3416_v42, %v3415_v16  ;;  %v3275_v27 = vpack.c.bf16 %v3268_v12, %v3268_v12  ;;  %v3571_v52 = vsel %vm7364_vm15, %v3558_v34, 0.0 }
 0x466   : > { %4959 = vmatprep.mubr.msk.bf16.mxu0 %vm5153_vm1, %v5152_v4 }
 0x46b   : > { %4928 = vmatmul.mubr.msk.bf16.gmra.mrb[204].mxu1 %vm636_vm0, %v2951_v41  ;;  %v3417_v41 = vld [vmem:[#allocation2 + $0x7a] sm:$0xf] }
 0x46c   : > { %4967 = vmatprep.mubr.msk.bf16.mxu1 %vm5153_vm1, %v5152_v4 }
 0x46d   : > { %4960 = vmatmul.mubr.msk.bf16.gmra.mrb[208].mxu0 %vm636_vm0, %v3113_v31 }
 0x46e   : > { %4999 = vmatprep.mubr.msk.bf16.mxu0 %vm5153_vm1, %v5152_v4 }
 0x473   : > { %4968 = vmatmul.mubr.msk.bf16.vlgmr.msra.gmra.mrb[208].mxu1 %vm636_vm0, %v3269_v1  ;;  %v3424_v1 = vpack.c.bf16 %v3417_v41, %v3417_v41 }
 0x474   : > { %5028 = vmatpush3.bf16.msra.mxu1 %v3592_v46  ;;  %4971 = vmatprep.mubr.msk.bf16.mxu1 %vm5153_vm1, %v5152_v4 }
 0x475   : > { %5000 = vmatmul.mubr.msk.bf16.vlgmr.msra.gmra.mrb[212].mxu0 %vm636_vm0, %v3418_v7  ;;  %5029 = vmatprep.subr.bf16.mxu1 %v5152_v4 }
 0x476   : > { %5003 = vmatprep.mubr.msk.bf16.mxu0 %vm5153_vm1, %v5152_v4 }
 0x478   : > { %5030 = vmatpush3.bf16.msra.mxu1 %v3593_v54  ;;  %v3567_v54 = vsel %vm7360_vm6, %v3554_v63, 0.0 }
 0x479   : > { %v3580_v17 = vpack.c.bf16 %v3568_v5, %v3567_v54 }
 0x47b   : > { %4972 = vmatmul.mubr.msk.bf16.gmra.mrb[212].mxu1 %vm636_vm0, %v3270_v15 }
 0x47c   : > { %4975 = vmatprep.mubr.msk.bf16.mxu1 %vm5153_vm1, %v5152_v4 }
 0x47d   : > { %5004 = vmatmul.mubr.msk.bf16.gmra.mrb[216].mxu0 %vm636_vm0, %v3419_v13 }
 0x47e   : > { %5007 = vmatprep.mubr.msk.bf16.mxu0 %vm5153_vm1, %v5152_v4 }
 0x483   : > { %4976 = vmatmul.mubr.msk.bf16.gmra.mrb[216].mxu1 %vm636_vm0, %v3271_v57 }
 0x484   : > { %4979 = vmatprep.mubr.msk.bf16.mxu1 %vm5153_vm1, %v5152_v4 }
 0x485   : > { %5008 = vmatmul.mubr.msk.bf16.gmra.mrb[220].mxu0 %vm636_vm0, %v3420_v59 }
 0x486   : > { %5011 = vmatprep.mubr.msk.bf16.mxu0 %vm5153_vm1, %v5152_v4 }
 0x48b   : > { %4980 = vmatmul.mubr.msk.bf16.gmra.mrb[220].mxu1 %vm636_vm0, %v3272_v51 }
 0x48c   : > { %4983 = vmatprep.mubr.msk.bf16.mxu1 %vm5153_vm1, %v5152_v4 }
 0x48d   : > { %5012 = vmatmul.mubr.msk.bf16.gmra.mrb[224].mxu0 %vm636_vm0, %v3421_v3 }
 0x48e   : > { %5015 = vmatprep.mubr.msk.bf16.mxu0 %vm5153_vm1, %v5152_v4 }
 0x493   : > { %4984 = vmatmul.mubr.msk.bf16.gmra.mrb[224].mxu1 %vm636_vm0, %v3273_v35 }
 0x494   : > { %4987 = vmatprep.mubr.msk.bf16.mxu1 %vm5153_vm1, %v5152_v4 }
 0x495   : > { %5016 = vmatmul.mubr.msk.bf16.gmra.mrb[228].mxu0 %vm636_vm0, %v3422_v18 }
 0x496   : > { %5019 = vmatprep.mubr.msk.bf16.mxu0 %vm5153_vm1, %v5152_v4 }
 0x49b   : > { %4988 = vmatmul.mubr.msk.bf16.gmra.mrb[228].mxu1 %vm636_vm0, %v3274_v30 }
 0x49c   : > { %4991 = vmatprep.mubr.msk.bf16.mxu1 %vm5153_vm1, %v5152_v4 }
 0x49d   : > { %5020 = vmatmul.mubr.msk.bf16.gmra.mrb[232].mxu0 %vm636_vm0, %v3423_v20  ;;  %v2445_v38 = vpop.f32.mrb[124].mxu1 }
 0x49e   : > { %v4777_v44 = vpop.f32.mrb[125].mxu1  ;;  %5023 = vmatprep.mubr.msk.bf16.mxu0 %vm5153_vm1, %v5152_v4 }
 0x49f   : > { %v2554_v48 = vpop.f32.mrb[128].mxu0  ;;  %v2448_v6 = vpop.f32.mrb[126].mxu1 }
 0x4a0   : > { %v6795_v31 = vadd.f32 %v2554_v48, %v2445_v38  ;;  %v4809_v32 = vpop.f32.mrb[129].mxu0  ;;  %v4778_v53 = vpop.f32.mrb[127].mxu1  ;;  %v3582_v38 = vpack.c.bf16 %v3572_v55, %v3571_v52 }
 0x4a1   : > { %v2557_v46 = vpop.f32.mrb[130].mxu0 }
 0x4a2   : > { %v6797_v37 = vadd.f32 %v2557_v46, %v2448_v6  ;;  %v4810_v47 = vpop.f32.mrb[131].mxu0  ;;  %v3560_v6 = vld [vmem:[#allocation2 + $0x4b] sm:$0xff] }
 0x4a3   : > { %4992 = vmatmul.mubr.msk.bf16.gmra.mrb[232].mxu1 %vm636_vm0, %v3275_v27  ;;  %v3573_v32 = vsel %vm7366_vm13, %v3560_v6, 0.0  ;;  %v3574_v27 = vsel %vm7367_vm5, %v3561_v22, 0.0 }
 0x4a4   : > { %5031 = vmatprep.mubr.msk.bf16.mxu1 %vm5153_vm1, %v5152_v4 }
 0x4a5   : > { %5024 = vmatmul.mubr.msk.bf16.gmra.mrb[236].mxu0 %vm636_vm0, %v3424_v1 }
 0x4a6   : > { %v2453_v7 = vpop.f32.mrb[128].mxu1  ;;  %5063 = vmatprep.mubr.msk.bf16.mxu0 %vm5153_vm1, %v5152_v4 }
 0x4a7   : > { %v4781_v36 = vpop.f32.mrb[129].mxu1 }
 0x4a8   : > { %v2562_v2 = vpop.f32.mrb[132].mxu0  ;;  %v2456_v62 = vpop.f32.mrb[130].mxu1 }
 0x4a9   : > { %v6809_v15 = vadd.f32 %v2562_v2, %v2453_v7  ;;  %v4813_v13 = vpop.f32.mrb[133].mxu0  ;;  %v4782_v29 = vpop.f32.mrb[131].mxu1  ;;  %v3583_v7 = vpack.c.bf16 %v3574_v27, %v3573_v32  ;;  %v3562_v2 = vld [vmem:[#allocation2 + $0x5b] sm:$0xff] }
 0x4aa   : > { %v2565_v23 = vpop.f32.mrb[134].mxu0  ;;  %v3576_v13 = vsel %vm632_vm3, %v3563_v28, 0.0  ;;  %vm7369_vm3 = vcmp.ne.s32.totalorder %v5693_v45, 9 }
 0x4ab   : > { %v6811_v60 = vadd.f32 %v2565_v23, %v2456_v62  ;;  %v4814_v57 = vpop.f32.mrb[135].mxu0  ;;  %5032 = vmatmul.mubr.msk.bf16.vlgmr.msra.gmra.mrb[236].mxu1 %vm636_vm0, %v3580_v17  ;;  %v3575_v62 = vsel %vm7368_vm4, %v3562_v2, 0.0 }
 0x4ac   : > { %5035 = vmatprep.mubr.msk.bf16.mxu1 %vm5153_vm1, %v5152_v4 }
 0x4ae   : > { %v2461_v59 = vpop.f32.mrb[132].mxu1 }
 0x4af   : > { %v4785_v9 = vpop.f32.mrb[133].mxu1 }
 0x4b0   : > { %v2570_v19 = vpop.f32.mrb[136].mxu0  ;;  %v2464_v51 = vpop.f32.mrb[134].mxu1 }
 0x4b1   : > { %v6820_v3 = vadd.f32 %v2570_v19, %v2461_v59  ;;  %v4817_v8 = vpop.f32.mrb[137].mxu0  ;;  %v4786_v61 = vpop.f32.mrb[135].mxu1  ;;  %v3584_v59 = vpack.c.bf16 %v3576_v13, %v3575_v62  ;;  %v3564_v19 = vld [vmem:[#allocation2 + $0x6b] sm:$0xff] }
 0x4b2   : > { %v2573_v10 = vpop.f32.mrb[138].mxu0  ;;  %v3578_v8 = vsel %vm634_vm14, %v3565_v21, 0.0  ;;  %vm7370_vm14 = vcmask 257024  }
 0x4b3   : > { %v6822_v35 = vadd.f32 %v2573_v10, %v2464_v51  ;;  %v4818_v18 = vpop.f32.mrb[139].mxu0  ;;  %5036 = vmatmul.mubr.msk.bf16.gmra.mrb[240].mxu1 %vm636_vm0, %v3581_v49  ;;  %v3577_v51 = vsel %vm633_vm11, %v3564_v19, 0.0  ;;  %vm7371_vm11 = vmmov %vm7370_vm14 }
 0x4b4   : > { %5039 = vmatprep.mubr.msk.bf16.mxu1 %vm5153_vm1, %v5152_v4  ;;  %v3566_v18 = vld [vmem:[#allocation2 + $0x7b] sm:$0xf]  ;;  %v3585_v52 = vpack.c.bf16 %v3578_v8, %v3577_v51 }
 0x4b5   : > { %v3579_v39 = vsel %vm7369_vm3, %v3566_v18, 0.0 }
 0x4b6   : > { %v2469_v50 = vpop.f32.mrb[136].mxu1 }
 0x4b7   : > { %v4789_v16 = vpop.f32.mrb[137].mxu1 }
 0x4b8   : > { %v2578_v42 = vpop.f32.mrb[140].mxu0  ;;  %v2472_v30 = vpop.f32.mrb[138].mxu1 }
 0x4b9   : > { %v6831_v14 = vadd.f32 %v2578_v42, %v2469_v50  ;;  %v4821_v20 = vpop.f32.mrb[141].mxu0  ;;  %v4790_v12 = vpop.f32.mrb[139].mxu1  ;;  %v3586_v42 = vpack.c.bf16 %v3579_v39, %v3579_v39 }
 0x4ba   : > { %v2581_v44 = vpop.f32.mrb[142].mxu0 }
 0x4bb   : > { %v6833_v48 = vadd.f32 %v2581_v44, %v2472_v30  ;;  %v4822_v41 = vpop.f32.mrb[143].mxu0  ;;  %5040 = vmatmul.mubr.msk.bf16.gmra.mrb[244].mxu1 %vm636_vm0, %v3582_v38 }
 0x4bc   : > { %5043 = vmatprep.mubr.msk.bf16.mxu1 %vm5153_vm1, %v5152_v4 }
 0x4be   : > { %v2477_v11 = vpop.f32.mrb[140].mxu1 }
 0x4bf   : > { %v4793_v53 = vpop.f32.mrb[141].mxu1 }
 0x4c0   : > { %v2586_v46 = vpop.f32.mrb[144].mxu0  ;;  %v2480_v47 = vpop.f32.mrb[142].mxu1 }
 0x4c1   : > { %v6842_v1 = vadd.f32 %v2586_v46, %v2477_v11  ;;  %v4825_v63 = vpop.f32.mrb[145].mxu0  ;;  %v4794_v0 = vpop.f32.mrb[143].mxu1 }
 0x4c2   : > { %v2589_v54 = vpop.f32.mrb[146].mxu0 }
 0x4c3   : > { %v6844_v5 = vadd.f32 %v2589_v54, %v2480_v47  ;;  %v4826_v36 = vpop.f32.mrb[147].mxu0  ;;  %5044 = vmatmul.mubr.msk.bf16.gmra.mrb[248].mxu1 %vm636_vm0, %v3583_v7 }
 0x4c4   : > { %5047 = vmatprep.mubr.msk.bf16.mxu1 %vm5153_vm1, %v5152_v4 }
 0x4c6   : > { %v2485_v58 = vpop.f32.mrb[144].mxu1 }
 0x4c7   : > { %v4797_v29 = vpop.f32.mrb[145].mxu1 }
 0x4c8   : > { %v2594_v17 = vpop.f32.mrb[148].mxu0  ;;  %v2488_v23 = vpop.f32.mrb[146].mxu1 }
 0x4c9   : > { %v6853_v57 = vadd.f32 %v2594_v17, %v2485_v58  ;;  %v4829_v24 = vpop.f32.mrb[149].mxu0  ;;  %v4798_v25 = vpop.f32.mrb[147].mxu1 }
 0x4ca   : > { %v2597_v33 = vpop.f32.mrb[150].mxu0 }
 0x4cb   : > { %v6855_v26 = vadd.f32 %v2597_v33, %v2488_v23  ;;  %v4830_v9 = vpop.f32.mrb[151].mxu0  ;;  %5048 = vmatmul.mubr.msk.bf16.gmra.mrb[252].mxu1 %vm636_vm0, %v3584_v59 }
 0x4cc   : > { %5051 = vmatprep.mubr.msk.bf16.mxu1 %vm5153_vm1, %v5152_v4 }
 0x4ce   : > { %v2493_v56 = vpop.f32.mrb[148].mxu1 }
 0x4cf   : > { %v4801_v61 = vpop.f32.mrb[149].mxu1 }
 0x4d0   : > { %v2602_v49 = vpop.f32.mrb[152].mxu0  ;;  %v2496_v10 = vpop.f32.mrb[150].mxu1 }
 0x4d1   : > { %v6864_v34 = vadd.f32 %v2602_v49, %v2493_v56  ;;  %v4833_v43 = vpop.f32.mrb[153].mxu0  ;;  %v4802_v50 = vpop.f32.mrb[151].mxu1 }
 0x4d2   : > { %v2605_v55 = vpop.f32.mrb[154].mxu0 }
 0x4d3   : > { %v4834_v16 = vpop.f32.mrb[155].mxu0  ;;  %5052 = vmatmul.mubr.msk.bf16.gmra.mrb[0].mxu1 %vm636_vm0, %v3585_v52 }
 0x4d4   : > { %5055 = vmatprep.mubr.msk.bf16.mxu1 %vm5153_vm1, %v5152_v4 }
 0x4d6   : > { %v2703_v40 = vpop.f32.mrb[152].mxu1 }
 0x4d7   : > { %v2757_v30 = vadd.f32 %v2703_v40, %v6795_v31  ;;  %v4841_v20 = vpop.f32.mrb[153].mxu1 }
 0x4d8   : > { %v2865_v12 = vpop.f32.mrb[156].mxu0  ;;  %v2706_v38 = vpop.f32.mrb[154].mxu1 }
 0x4d9   : > { %v6872_v44 = vadd.f32 %v2865_v12, %v2757_v30  ;;  %v2758_v41 = vadd.f32 %v2706_v38, %v6797_v37  ;;  %v4873_v6 = vpop.f32.mrb[157].mxu0  ;;  %v4842_v22 = vpop.f32.mrb[155].mxu1 }
 0x4da   : > { %v2868_v11 = vpop.f32.mrb[158].mxu0 }
 0x4db   : > { %v6875_v32 = vadd.f32 %v2868_v11, %v2758_v41  ;;  %v4874_v45 = vpop.f32.mrb[159].mxu0  ;;  %5056 = vmatmul.mubr.msk.bf16.gmra.mrb[4].mxu1 %vm636_vm0, %v3586_v42 }
 0x4de   : > { %v2711_v27 = vpop.f32.mrb[156].mxu1 }
 0x4df   : > { %v2759_v53 = vadd.f32 %v2711_v27, %v6809_v15  ;;  %v4845_v46 = vpop.f32.mrb[157].mxu1 }
 0x4e0   : > { %v2873_v31 = vpop.f32.mrb[160].mxu0  ;;  %v2714_v47 = vpop.f32.mrb[158].mxu1 }
 0x4e1   : > { %v6879_v63 = vadd.f32 %v2873_v31, %v2759_v53  ;;  %v2760_v0 = vadd.f32 %v2714_v47, %v6811_v60  ;;  %v4877_v7 = vpop.f32.mrb[161].mxu0  ;;  %v4846_v37 = vpop.f32.mrb[159].mxu1 }
 0x4e2   : > { %v2876_v54 = vpop.f32.mrb[162].mxu0 }
 0x4e3   : > { %v6882_v36 = vadd.f32 %v2876_v54, %v2760_v0  ;;  %v4878_v2 = vpop.f32.mrb[163].mxu0 }
 0x4e6   : > { %v2719_v28 = vpop.f32.mrb[160].mxu1 }
 0x4e7   : > { %v2761_v58 = vadd.f32 %v2719_v28, %v6820_v3  ;;  %v4849_v62 = vpop.f32.mrb[161].mxu1 }
 0x4e8   : > { %v2881_v13 = vpop.f32.mrb[164].mxu0  ;;  %v2722_v29 = vpop.f32.mrb[162].mxu1 }
 0x4e9   : > { %v6885_v15 = vadd.f32 %v2881_v13, %v2761_v58  ;;  %v2762_v17 = vadd.f32 %v2722_v29, %v6822_v35  ;;  %v4881_v23 = vpop.f32.mrb[165].mxu0  ;;  %v4850_v24 = vpop.f32.mrb[163].mxu1 }
 0x4ea   : > { %v2884_v25 = vpop.f32.mrb[166].mxu0 }
 0x4eb   : > { %v6888_v60 = vadd.f32 %v2884_v25, %v2762_v17  ;;  %v4882_v59 = vpop.f32.mrb[167].mxu0 }
 0x4ee   : > { %v2727_v33 = vpop.f32.mrb[164].mxu1 }
 0x4ef   : > { %v2763_v9 = vadd.f32 %v2727_v33, %v6831_v14  ;;  %v4853_v19 = vpop.f32.mrb[165].mxu1 }
 0x4f0   : > { %v2889_v21 = vpop.f32.mrb[168].mxu0  ;;  %v2730_v56 = vpop.f32.mrb[166].mxu1 }
 0x4f1   : > { %v6891_v3 = vadd.f32 %v2889_v21, %v2763_v9  ;;  %v2764_v51 = vadd.f32 %v2730_v56, %v6833_v48  ;;  %v4885_v8 = vpop.f32.mrb[169].mxu0  ;;  %v4854_v61 = vpop.f32.mrb[167].mxu1 }
 0x4f2   : > { %v2892_v49 = vpop.f32.mrb[170].mxu0 }
 0x4f3   : > { %v6894_v35 = vadd.f32 %v2892_v49, %v2764_v51  ;;  %v4886_v10 = vpop.f32.mrb[171].mxu0 }
 0x4f6   : > { %v2735_v18 = vpop.f32.mrb[168].mxu1 }
 0x4f7   : > { %v2765_v43 = vadd.f32 %v2735_v18, %v6842_v1  ;;  %v4857_v50 = vpop.f32.mrb[169].mxu1 }
 0x4f8   : > { %v2897_v52 = vpop.f32.mrb[172].mxu0  ;;  %v2738_v55 = vpop.f32.mrb[170].mxu1 }
 0x4f9   : > { %v6897_v14 = vadd.f32 %v2897_v52, %v2765_v43  ;;  %v2766_v16 = vadd.f32 %v2738_v55, %v6844_v5  ;;  %v4889_v39 = vpop.f32.mrb[173].mxu0  ;;  %v4858_v40 = vpop.f32.mrb[171].mxu1 }
 0x4fa   : > { %v2900_v42 = vpop.f32.mrb[174].mxu0 }
 0x4fb   : > { %v6900_v48 = vadd.f32 %v2900_v42, %v2766_v16  ;;  %v4890_v30 = vpop.f32.mrb[175].mxu0 }
 0x4fe   : > { %v2743_v20 = vpop.f32.mrb[172].mxu1 }
 0x4ff   : > { %v2767_v12 = vadd.f32 %v2743_v20, %v6853_v57  ;;  %v4861_v38 = vpop.f32.mrb[173].mxu1 }
 0x500   : > { %v2905_v41 = vpop.f32.mrb[176].mxu0  ;;  %v2746_v6 = vpop.f32.mrb[174].mxu1 }
 0x501   : > { %v6903_v1 = vadd.f32 %v2905_v41, %v2767_v12  ;;  %v2768_v22 = vadd.f32 %v2746_v6, %v6855_v26  ;;  %v4893_v11 = vpop.f32.mrb[177].mxu0  ;;  %v4862_v45 = vpop.f32.mrb[175].mxu1 }
 0x502   : > { %v2908_v27 = vpop.f32.mrb[178].mxu0 }
 0x503   : > { %v6906_v5 = vadd.f32 %v2908_v27, %v2768_v22  ;;  %v4894_v53 = vpop.f32.mrb[179].mxu0 }
 0x506   : > { %v2751_v46 = vpop.f32.mrb[176].mxu1 }
 0x507   : > { %v2769_v31 = vadd.f32 %v2751_v46, %v6864_v34  ;;  %v4865_v47 = vpop.f32.mrb[177].mxu1 }
 0x508   : > { %v2913_v0 = vpop.f32.mrb[180].mxu0  ;;  %v2754_v7 = vpop.f32.mrb[178].mxu1 }
 0x509   : > { %v6909_v57 = vadd.f32 %v2913_v0, %v2769_v31  ;;  %v4897_v37 = vpop.f32.mrb[181].mxu0  ;;  %v4866_v54 = vpop.f32.mrb[179].mxu1 }
 0x50a   : > { %v2916_v2 = vpop.f32.mrb[182].mxu0 }
 0x50b   : > { %v4898_v28 = vpop.f32.mrb[183].mxu0 }
 0x50e   : > { %v3014_v58 = vpop.f32.mrb[180].mxu1 }
 0x50f   : > { %v3068_v26 = vadd.f32 %v3014_v58, %v6872_v44  ;;  %v4905_v62 = vpop.f32.mrb[181].mxu1 }
 0x510   : > { %v3176_v13 = vpop.f32.mrb[184].mxu0  ;;  %v3017_v29 = vpop.f32.mrb[182].mxu1 }
 0x511   : > { %v6912_v17 = vadd.f32 %v3176_v13, %v3068_v26  ;;  %v3069_v23 = vadd.f32 %v3017_v29, %v6875_v32  ;;  %v4937_v34 = vpop.f32.mrb[185].mxu0  ;;  %v4906_v24 = vpop.f32.mrb[183].mxu1 }
 0x512   : > { %v3179_v25 = vpop.f32.mrb[186].mxu0 }
 0x513   : > { %v6915_v59 = vadd.f32 %v3179_v25, %v3069_v23  ;;  %v4938_v33 = vpop.f32.mrb[187].mxu0 }
 0x516   : > { %v3022_v9 = vpop.f32.mrb[184].mxu1 }
 0x517   : > { %v3070_v19 = vadd.f32 %v3022_v9, %v6879_v63  ;;  %v4909_v21 = vpop.f32.mrb[185].mxu1 }
 0x518   : > { %v3184_v56 = vpop.f32.mrb[188].mxu0  ;;  %v3025_v51 = vpop.f32.mrb[186].mxu1 }
 0x519   : > { %v6918_v44 = vadd.f32 %v3184_v56, %v3070_v19  ;;  %v3071_v8 = vadd.f32 %v3025_v51, %v6882_v36  ;;  %v4941_v61 = vpop.f32.mrb[189].mxu0  ;;  %v4910_v49 = vpop.f32.mrb[187].mxu1 }
 0x51a   : > { %v3187_v10 = vpop.f32.mrb[190].mxu0 }
 0x51b   : > { %v6921_v32 = vadd.f32 %v3187_v10, %v3071_v8  ;;  %v4942_v18 = vpop.f32.mrb[191].mxu0 }
 0x51e   : > { %v3030_v43 = vpop.f32.mrb[188].mxu1 }
 0x51f   : > { %v3072_v50 = vadd.f32 %v3030_v43, %v6885_v15  ;;  %v4913_v52 = vpop.f32.mrb[189].mxu1 }
 0x520   : > { %v3192_v55 = vpop.f32.mrb[192].mxu0  ;;  %v3033_v16 = vpop.f32.mrb[190].mxu1 }
 0x521   : > { %v6924_v63 = vadd.f32 %v3192_v55, %v3072_v50  ;;  %v3073_v39 = vadd.f32 %v3033_v16, %v6888_v60  ;;  %v4945_v40 = vpop.f32.mrb[193].mxu0  ;;  %v4914_v42 = vpop.f32.mrb[191].mxu1 }
 0x522   : > { %v3195_v30 = vpop.f32.mrb[194].mxu0 }
 0x523   : > { %v6927_v36 = vadd.f32 %v3195_v30, %v3073_v39  ;;  %v4946_v20 = vpop.f32.mrb[195].mxu0 }
 0x526   : > { %v3038_v12 = vpop.f32.mrb[192].mxu1 }
 0x527   : > { %v3074_v38 = vadd.f32 %v3038_v12, %v6891_v3  ;;  %v4917_v41 = vpop.f32.mrb[193].mxu1 }
 0x528   : > { %v3200_v6 = vpop.f32.mrb[196].mxu0  ;;  %v3041_v22 = vpop.f32.mrb[194].mxu1 }
 0x529   : > { %v6930_v15 = vadd.f32 %v3200_v6, %v3074_v38  ;;  %v3075_v11 = vadd.f32 %v3041_v22, %v6894_v35  ;;  %v4949_v45 = vpop.f32.mrb[197].mxu0  ;;  %v4918_v27 = vpop.f32.mrb[195].mxu1 }
 0x52a   : > { %v3203_v53 = vpop.f32.mrb[198].mxu0 }
 0x52b   : > { %v6933_v60 = vadd.f32 %v3203_v53, %v3075_v11  ;;  %v4950_v46 = vpop.f32.mrb[199].mxu0 }
 0x52e   : > { %v3046_v31 = vpop.f32.mrb[196].mxu1 }
 0x52f   : > { %v3076_v47 = vadd.f32 %v3046_v31, %v6897_v14  ;;  %v4921_v0 = vpop.f32.mrb[197].mxu1 }
 0x530   : > { %v3208_v7 = vpop.f32.mrb[200].mxu0  ;;  %v3049_v37 = vpop.f32.mrb[198].mxu1 }
 0x531   : > { %v6936_v3 = vadd.f32 %v3208_v7, %v3076_v47  ;;  %v3077_v54 = vadd.f32 %v3049_v37, %v6900_v48  ;;  %v4953_v2 = vpop.f32.mrb[201].mxu0  ;;  %v4922_v28 = vpop.f32.mrb[199].mxu1 }
 0x532   : > { %v3211_v58 = vpop.f32.mrb[202].mxu0 }
 0x533   : > { %v6939_v35 = vadd.f32 %v3211_v58, %v3077_v54  ;;  %v4954_v26 = vpop.f32.mrb[203].mxu0 }
 0x536   : > { %v3054_v62 = vpop.f32.mrb[200].mxu1 }
 0x537   : > { %v3078_v13 = vadd.f32 %v3054_v62, %v6903_v1  ;;  %v4925_v29 = vpop.f32.mrb[201].mxu1 }
 0x538   : > { %v3216_v23 = vpop.f32.mrb[204].mxu0  ;;  %v3057_v34 = vpop.f32.mrb[202].mxu1 }
 0x539   : > { %v6942_v14 = vadd.f32 %v3216_v23, %v3078_v13  ;;  %v3079_v24 = vadd.f32 %v3057_v34, %v6906_v5  ;;  %v4957_v25 = vpop.f32.mrb[205].mxu0  ;;  %v4926_v33 = vpop.f32.mrb[203].mxu1 }
 0x53a   : > { %v3219_v9 = vpop.f32.mrb[206].mxu0 }
 0x53b   : > { %v6945_v48 = vadd.f32 %v3219_v9, %v3079_v24  ;;  %v4958_v19 = vpop.f32.mrb[207].mxu0 }
 0x53e   : > { %v3062_v21 = vpop.f32.mrb[204].mxu1 }
 0x53f   : > { %v3080_v56 = vadd.f32 %v3062_v21, %v6909_v57  ;;  %v4929_v51 = vpop.f32.mrb[205].mxu1 }
 0x540   : > { %v3224_v8 = vpop.f32.mrb[208].mxu0  ;;  %v3065_v61 = vpop.f32.mrb[206].mxu1 }
 0x541   : > { %v6948_v1 = vadd.f32 %v3224_v8, %v3080_v56  ;;  %v4961_v49 = vpop.f32.mrb[209].mxu0  ;;  %v4930_v10 = vpop.f32.mrb[207].mxu1 }
 0x542   : > { %v3227_v18 = vpop.f32.mrb[210].mxu0 }
 0x543   : > { %v4962_v43 = vpop.f32.mrb[211].mxu0 }
 0x546   : > { %v3338_v50 = vpop.f32.mrb[208].mxu1 }
 0x547   : > { %v3392_v5 = vadd.f32 %v3338_v50, %v6912_v17  ;;  %v4969_v52 = vpop.f32.mrb[209].mxu1 }
 0x548   : > { %v3487_v55 = vpop.f32.mrb[212].mxu0  ;;  %v3341_v16 = vpop.f32.mrb[210].mxu1 }
 0x549   : > { %v6951_v39 = vadd.f32 %v3487_v55, %v3392_v5  ;;  %v3393_v40 = vadd.f32 %v3341_v16, %v6915_v59  ;;  %v5001_v57 = vpop.f32.mrb[213].mxu0  ;;  %v4970_v42 = vpop.f32.mrb[211].mxu1 }
 0x54a   : > { %v3490_v30 = vpop.f32.mrb[214].mxu0 }
 0x54b   : > { %v6954_v20 = vadd.f32 %v3490_v30, %v3393_v40  ;;  %v5002_v12 = vpop.f32.mrb[215].mxu0 }
 0x54e   : > { %v3346_v38 = vpop.f32.mrb[212].mxu1 }
 0x54f   : > { %v3394_v41 = vadd.f32 %v3346_v38, %v6918_v44  ;;  %v4973_v6 = vpop.f32.mrb[213].mxu1 }
 0x550   : > { %v3495_v22 = vpop.f32.mrb[216].mxu0  ;;  %v3349_v11 = vpop.f32.mrb[214].mxu1 }
 0x551   : > { %v6957_v17 = vadd.f32 %v3495_v22, %v3394_v41  ;;  %v3395_v45 = vadd.f32 %v3349_v11, %v6921_v32  ;;  %v5005_v27 = vpop.f32.mrb[217].mxu0  ;;  %v4974_v53 = vpop.f32.mrb[215].mxu1 }
 0x552   : > { %v3498_v46 = vpop.f32.mrb[218].mxu0 }
 0x553   : > { %v6960_v59 = vadd.f32 %v3498_v46, %v3395_v45  ;;  %v5006_v31 = vpop.f32.mrb[219].mxu0 }
 0x556   : > { %v3354_v47 = vpop.f32.mrb[216].mxu1 }
 0x557   : > { %v3396_v0 = vadd.f32 %v3354_v47, %v6924_v63  ;;  %v4977_v7 = vpop.f32.mrb[217].mxu1 }
 0x558   : > { %v3503_v37 = vpop.f32.mrb[220].mxu0  ;;  %v3357_v54 = vpop.f32.mrb[218].mxu1 }
 0x559   : > { %v6963_v44 = vadd.f32 %v3503_v37, %v3396_v0  ;;  %v3397_v2 = vadd.f32 %v3357_v54, %v6927_v36  ;;  %v5009_v28 = vpop.f32.mrb[221].mxu0  ;;  %v4978_v58 = vpop.f32.mrb[219].mxu1 }
 0x55a   : > { %v3506_v26 = vpop.f32.mrb[222].mxu0 }
 0x55b   : > { %v6966_v32 = vadd.f32 %v3506_v26, %v3397_v2  ;;  %v5010_v62 = vpop.f32.mrb[223].mxu0 }
 0x55e   : > { %v3362_v13 = vpop.f32.mrb[220].mxu1 }
 0x55f   : > { %v3398_v29 = vadd.f32 %v3362_v13, %v6930_v15  ;;  %v4981_v23 = vpop.f32.mrb[221].mxu1 }
 0x560   : > { %v3511_v34 = vpop.f32.mrb[224].mxu0  ;;  %v3365_v24 = vpop.f32.mrb[222].mxu1 }
 0x561   : > { %v6969_v63 = vadd.f32 %v3511_v34, %v3398_v29  ;;  %v3399_v25 = vadd.f32 %v3365_v24, %v6933_v60  ;;  %v5013_v33 = vpop.f32.mrb[225].mxu0  ;;  %v4982_v9 = vpop.f32.mrb[223].mxu1  ;;  %v6996_v29 = vld [vmem:[%s7260_s6] ss:$0 sm:$0xff] }
 0x562   : > { %v3514_v19 = vpop.f32.mrb[226].mxu0 }
 0x563   : > { %v6972_v36 = vadd.f32 %v3514_v19, %v3399_v25  ;;  %v5014_v21 = vpop.f32.mrb[227].mxu0 }
 0x566   : > { %v3370_v56 = vpop.f32.mrb[224].mxu1 }
 0x567   : > { %v3400_v51 = vadd.f32 %v3370_v56, %v6936_v3  ;;  %v4985_v8 = vpop.f32.mrb[225].mxu1 }
 0x568   : > { %v3519_v61 = vpop.f32.mrb[228].mxu0  ;;  %v3373_v49 = vpop.f32.mrb[226].mxu1 }
 0x569   : > { %v6975_v15 = vadd.f32 %v3519_v61, %v3400_v51  ;;  %v3401_v10 = vadd.f32 %v3373_v49, %v6939_v35  ;;  %v5017_v18 = vpop.f32.mrb[229].mxu0  ;;  %v4986_v43 = vpop.f32.mrb[227].mxu1 }
 0x56a   : > { %v3522_v50 = vpop.f32.mrb[230].mxu0 }
 0x56b   : > { %v6978_v60 = vadd.f32 %v3522_v50, %v3401_v10  ;;  %v5018_v5 = vpop.f32.mrb[231].mxu0 }
 0x56e   : > { %v3378_v52 = vpop.f32.mrb[228].mxu1 }
 0x56f   : > { %v3402_v55 = vadd.f32 %v3378_v52, %v6942_v14  ;;  %v4989_v16 = vpop.f32.mrb[229].mxu1 }
 0x570   : > { %v3527_v40 = vpop.f32.mrb[232].mxu0  ;;  %v3381_v57 = vpop.f32.mrb[230].mxu1 }
 0x571   : > { %v6981_v3 = vadd.f32 %v3527_v40, %v3402_v55  ;;  %v3403_v42 = vadd.f32 %v3381_v57, %v6945_v48  ;;  %v5021_v30 = vpop.f32.mrb[233].mxu0  ;;  %v4990_v12 = vpop.f32.mrb[231].mxu1 }
 0x572   : > { %v3530_v38 = vpop.f32.mrb[234].mxu0 }
 0x573   : > { %v6984_v35 = vadd.f32 %v3530_v38, %v3403_v42  ;;  %v5022_v41 = vpop.f32.mrb[235].mxu0 }
 0x576   : > { %v3386_v6 = vpop.f32.mrb[232].mxu1 }
 0x577   : > { %v3404_v22 = vadd.f32 %v3386_v6, %v6948_v1  ;;  %v4993_v11 = vpop.f32.mrb[233].mxu1 }
 0x578   : > { %v3389_v45 = vpop.f32.mrb[234].mxu1  ;;  %v3535_v27 = vpop.f32.mrb[236].mxu0 }
 0x579   : > { %v6987_v14 = vadd.f32 %v3535_v27, %v3404_v22  ;;  %v4994_v53 = vpop.f32.mrb[235].mxu1  ;;  %v5025_v46 = vpop.f32.mrb[237].mxu0 }
 0x57a   : > { %v3538_v31 = vpop.f32.mrb[238].mxu0 }
 0x57b   : > { %v5026_v47 = vpop.f32.mrb[239].mxu0 }
 0x57e   : > { %v3649_v0 = vpop.f32.mrb[236].mxu1 }
 0x57f   : > { %v3703_v48 = vadd.f32 %v3649_v0, %v6951_v39  ;;  %v5033_v7 = vpop.f32.mrb[237].mxu1 }
 0x580   : > { %v3652_v37 = vpop.f32.mrb[238].mxu1 }
 0x581   : > { %v3704_v54 = vadd.f32 %v3652_v37, %v6954_v20  ;;  %v5034_v2 = vpop.f32.mrb[239].mxu1  ;;  %v7002_v20 = vadd.f32 %v6996_v29, %v3703_v48 }
 0x583   : > { %v6999_v39 = vadd.f32 %v6996_v29, %v3704_v54  ;;  %v3736_v19 = vsel %vm636_vm0, %v7002_v20, 0.0 }
 0x585   : > { %v3737_v25 = vsel %vm636_vm0, %v6999_v39, 0.0 }
 0x586   : > { %v3657_v28 = vpop.f32.mrb[240].mxu1  ;;  %v3738_v51 = vadd.f32 %v3737_v25, %v3736_v19 }
 0x587   : > { %v3705_v1 = vadd.f32 %v3657_v28, %v6957_v17  ;;  %v5037_v58 = vpop.f32.mrb[241].mxu1 }
 0x588   : > { %v3660_v26 = vpop.f32.mrb[242].mxu1 }
 0x589   : > { %v3706_v62 = vadd.f32 %v3660_v26, %v6960_v59  ;;  %v5038_v13 = vpop.f32.mrb[243].mxu1  ;;  %v7005_v34 = vadd.f32 %v6996_v29, %v3705_v1 }
 0x58b   : > { %v3739_v21 = vsel %vm636_vm0, %v7005_v34, 0.0  ;;  %v7016_v56 = vadd.f32 %v6996_v29, %v3706_v62 }
 0x58c   : > { %v3740_v8 = vadd.f32 %v3739_v21, %v3738_v51 }
 0x58d   : > { %v3741_v49 = vsel %vm636_vm0, %v7016_v56, 0.0 }
 0x58e   : > { %v3665_v23 = vpop.f32.mrb[244].mxu1  ;;  %v3742_v55 = vadd.f32 %v3741_v49, %v3740_v8 }
 0x58f   : > { %v3707_v17 = vadd.f32 %v3665_v23, %v6963_v44  ;;  %v5041_v24 = vpop.f32.mrb[245].mxu1 }
 0x590   : > { %v3668_v59 = vpop.f32.mrb[246].mxu1 }
 0x591   : > { %v3708_v33 = vadd.f32 %v3668_v59, %v6966_v32  ;;  %v5042_v9 = vpop.f32.mrb[247].mxu1  ;;  %v7019_v44 = vadd.f32 %v6996_v29, %v3707_v17 }
 0x593   : > { %v3743_v43 = vsel %vm636_vm0, %v7019_v44, 0.0  ;;  %v7027_v50 = vadd.f32 %v6996_v29, %v3708_v33 }
 0x594   : > { %v3744_v40 = vadd.f32 %v3743_v43, %v3742_v55 }
 0x595   : > { %v3745_v57 = vsel %vm636_vm0, %v7027_v50, 0.0 }
 0x596   : > { %v3673_v61 = vpop.f32.mrb[248].mxu1 }
 0x597   : > { %v3709_v32 = vadd.f32 %v3673_v61, %v6969_v63  ;;  %v5045_v10 = vpop.f32.mrb[249].mxu1 }
 0x598   : > { %v3676_v18 = vpop.f32.mrb[250].mxu1 }
 0x599   : > { %v3710_v5 = vadd.f32 %v3676_v18, %v6972_v36  ;;  %v5046_v52 = vpop.f32.mrb[251].mxu1  ;;  %v7031_v16 = vadd.f32 %v6996_v29, %v3709_v32  ;;  %v3746_v36 = vadd.f32 %v3745_v57, %v3744_v40 }
 0x59b   : > { %v3747_v42 = vsel %vm636_vm0, %v7031_v16, 0.0  ;;  %v7038_v30 = vadd.f32 %v6996_v29, %v3710_v5 }
 0x59c   : > { %v3748_v45 = vadd.f32 %v3747_v42, %v3746_v36 }
 0x59d   : > { %v3749_v27 = vsel %vm636_vm0, %v7038_v30, 0.0 }
 0x59e   : > { %v3681_v63 = vpop.f32.mrb[252].mxu1  ;;  %v3750_v31 = vadd.f32 %v3749_v27, %v3748_v45 }
 0x59f   : > { %v3711_v12 = vadd.f32 %v3681_v63, %v6975_v15  ;;  %v5049_v38 = vpop.f32.mrb[253].mxu1 }
 0x5a0   : > { %v3684_v41 = vpop.f32.mrb[254].mxu1 }
 0x5a1   : > { %v7042_v6 = vadd.f32 %v6996_v29, %v3711_v12  ;;  %v3712_v22 = vadd.f32 %v3684_v41, %v6978_v60  ;;  %v5050_v11 = vpop.f32.mrb[255].mxu1 }
 0x5a3   : > { %v3751_v53 = vsel %vm636_vm0, %v7042_v6, 0.0  ;;  %v3732_v46 = vadd.f32 %v6996_v29, %v3712_v22 }
 0x5a4   : > { %v3752_v48 = vadd.f32 %v3751_v53, %v3750_v31 }
 0x5a5   : > { %v3753_v37 = vsel %vm636_vm0, %v3732_v46, 0.0 }
 0x5a6   : > { %v3689_v15 = vpop.f32.mrb[0].mxu1  ;;  %v3754_v58 = vadd.f32 %v3753_v37, %v3752_v48 }
 0x5a7   : > { %v3713_v47 = vadd.f32 %v3689_v15, %v6981_v3  ;;  %v5053_v0 = vpop.f32.mrb[1].mxu1 }
 0x5a8   : > { %v3692_v7 = vpop.f32.mrb[2].mxu1 }
 0x5a9   : > { %v3733_v60 = vadd.f32 %v6996_v29, %v3713_v47  ;;  %v3714_v54 = vadd.f32 %v3692_v7, %v6984_v35  ;;  %v5054_v2 = vpop.f32.mrb[3].mxu1 }
 0x5ab   : > { %v3755_v28 = vsel %vm636_vm0, %v3733_v60, 0.0  ;;  %v3734_v1 = vadd.f32 %v6996_v29, %v3714_v54 }
 0x5ac   : > { %v3756_v62 = vadd.f32 %v3755_v28, %v3754_v58 }
 0x5ad   : > { %v3757_v23 = vsel %vm636_vm0, %v3734_v1, 0.0 }
 0x5ae   : > { %v3697_v26 = vpop.f32.mrb[4].mxu1  ;;  %v3758_v25 = vadd.f32 %v3757_v23, %v3756_v62 }
 0x5af   : > { %v3715_v13 = vadd.f32 %v3697_v26, %v6987_v14  ;;  %v5057_v3 = vpop.f32.mrb[5].mxu1 }
 0x5b0   : > { %v3700_v17 = vpop.f32.mrb[6].mxu1 }
 0x5b1   : > { %v3735_v24 = vadd.f32 %v6996_v29, %v3715_v13  ;;  %v5058_v59 = vpop.f32.mrb[7].mxu1 }
 0x5b3   : > { %v3759_v35 = vsel %vm7370_vm14, %v3735_v24, 0.0 }
 0x5b4   : > { %v3760_v33 = vadd.f32 %v3759_v35, %v3758_v25  ;;  %v3909_v25 = vld [vmem:[%s7263_s9] sm:$0xff]  ;;  %v3910_v35 = vld [vmem:[%s7263_s9 + $0x8] sm:$0xff] }
 0x5b6   : > { %3761 = vadd.xlane.f32.xlu1 %v3760_v33  ;;  %v3911_v33 = vld [vmem:[%s7263_s9 + $0x10] sm:$0xff] }
 0x643   : > { %v3762_v9 = vpop.xlane.xlu1 %3761 }
 0x644   : > { %v3763_v19 = vrot.slane %v3762_v9, 4 }
 0x646   : > { %v3764_v21 = vadd.f32 %v3763_v19, %v3762_v9  ;;  %v3913_v9 = vpack.c.bf16 %v3910_v35, %v3909_v25  ;;  %v3912_v19 = vld [vmem:[%s7263_s9 + $0x18] sm:$0xff] }
 0x648   : > { %v3765_v51 = vrot.slane %v3764_v21, 2  ;;  %5060 = vmatpush3.bf16.msra.mxu0 %v3913_v9 }
 0x649   : > { %5061 = vmatprep.subr.bf16.mxu0 %v5152_v4 }
 0x64a   : > { %v3766_v8 = vadd.f32 %v3765_v51, %v3764_v21  ;;  %v3914_v21 = vpack.c.bf16 %v3912_v19, %v3911_v33 }
 0x64c   : > { %v3767_v61 = vrot.slane %v3766_v8, 1  ;;  %5062 = vmatpush3.bf16.msra.mxu0 %v3914_v21 }
 0x64e   : > { %v3768_v49 = vadd.f32 %v3767_v61, %v3766_v8 }
 0x650   : > { %5126 = vpush %v3768_v49 }
 0x681   : > { %s5127_s15 = spop %5126 }
 0x682   : > { %v3770_v14 = vstv %s5127_s15 }
 0x683   : > { %v3771_v32 = vmul.f32 0.0003125, %v3770_v14 }
 0x685   : > { %v7061_v10 = vsub.f32 %v7002_v20, %v3771_v32  ;;  %v7064_v29 = vsub.f32 %v6999_v39, %v3771_v32  ;;  %v7067_v18 = vsub.f32 %v7005_v34, %v3771_v32  ;;  %v7070_v43 = vsub.f32 %v7016_v56, %v3771_v32 }
 0x686   : > { %v7077_v55 = vsub.f32 %v7019_v44, %v3771_v32  ;;  %v7082_v39 = vsub.f32 %v7027_v50, %v3771_v32  ;;  %v7089_v63 = vsub.f32 %v7031_v16, %v3771_v32  ;;  %v7095_v50 = vsub.f32 %v7038_v30, %v3771_v32 }
 0x687   : > { %v3785_v5 = vmul.f32 %v7061_v10, %v7061_v10  ;;  %v3786_v52 = vmul.f32 %v7064_v29, %v7064_v29  ;;  %v3787_v20 = vmul.f32 %v7067_v18, %v7067_v18  ;;  %v3788_v34 = vmul.f32 %v7070_v43, %v7070_v43 }
 0x688   : > { %v3789_v44 = vmul.f32 %v7077_v55, %v7077_v55  ;;  %v3790_v38 = vmul.f32 %v7082_v39, %v7082_v39  ;;  %v7101_v22 = vsub.f32 %v7042_v6, %v3771_v32  ;;  %v3791_v16 = vmul.f32 %v7089_v63, %v7089_v63 }
 0x689   : > { %v3798_v56 = vsel %vm636_vm0, %v3785_v5, 0.0  ;;  %v3799_v40 = vsel %vm636_vm0, %v3786_v52, 0.0  ;;  %v3801_v42 = vsel %vm636_vm0, %v3787_v20, 0.0  ;;  %v3803_v36 = vsel %vm636_vm0, %v3788_v34, 0.0 }
 0x68a   : > { %v3800_v57 = vadd.f32 %v3799_v40, %v3798_v56  ;;  %v3805_v11 = vsel %vm636_vm0, %v3789_v44, 0.0  ;;  %v7106_v27 = vsub.f32 %v3732_v46, %v3771_v32  ;;  %v3792_v30 = vmul.f32 %v7095_v50, %v7095_v50  ;;  %v7150_v40 = vld [vmem:[%s7261_s7] ss:$0 sm:$0xff] }
 0x68b   : > { %v3807_v53 = vsel %vm636_vm0, %v3790_v38, 0.0  ;;  %v7111_v15 = vsub.f32 %v3733_v60, %v3771_v32  ;;  %v3793_v6 = vmul.f32 %v7101_v22, %v7101_v22  ;;  %v3809_v47 = vsel %vm636_vm0, %v3791_v16, 0.0  ;;  %v7159_v38 = vld [vmem:[%s7262_s8] ss:$0 sm:$0xff] }
 0x68c   : > { %v3802_v12 = vadd.f32 %v3801_v42, %v3800_v57  ;;  %v7116_v48 = vsub.f32 %v3734_v1, %v3771_v32  ;;  %v3794_v46 = vmul.f32 %v7106_v27, %v7106_v27  ;;  %v3811_v7 = vsel %vm636_vm0, %v3792_v30, 0.0 }
 0x68d   : > { %v7121_v54 = vsub.f32 %v3735_v24, %v3771_v32  ;;  %v3795_v60 = vmul.f32 %v7111_v15, %v7111_v15  ;;  %v3813_v2 = vsel %vm636_vm0, %v3793_v6, 0.0 }
 0x68e   : > { %v3804_v41 = vadd.f32 %v3803_v36, %v3802_v12  ;;  %v3796_v58 = vmul.f32 %v7116_v48, %v7116_v48  ;;  %v3815_v1 = vsel %vm636_vm0, %v3794_v46, 0.0 }
 0x68f   : > { %v3797_v62 = vmul.f32 %v7121_v54, %v7121_v54  ;;  %v3817_v13 = vsel %vm636_vm0, %v3795_v60, 0.0 }
 0x690   : > { %v3806_v45 = vadd.f32 %v3805_v11, %v3804_v41  ;;  %v3819_v23 = vsel %vm636_vm0, %v3796_v58, 0.0 }
 0x691   : > { %v3821_v24 = vsel %vm7371_vm11, %v3797_v62, 0.0 }
 0x692   : > { %v3808_v31 = vadd.f32 %v3807_v53, %v3806_v45 }
 0x694   : > { %v3810_v0 = vadd.f32 %v3809_v47, %v3808_v31 }
 0x696   : > { %v3812_v37 = vadd.f32 %v3811_v7, %v3810_v0 }
 0x698   : > { %v3814_v28 = vadd.f32 %v3813_v2, %v3812_v37 }
 0x69a   : > { %v3816_v26 = vadd.f32 %v3815_v1, %v3814_v28 }
 0x69c   : > { %v3818_v3 = vadd.f32 %v3817_v13, %v3816_v26 }
 0x69e   : > { %v3820_v17 = vadd.f32 %v3819_v23, %v3818_v3 }
 0x6a0   : > { %v3822_v59 = vadd.f32 %v3821_v24, %v3820_v17 }
 0x6a2   : > { %3823 = vadd.xlane.f32.xlu1 %v3822_v59 }
 0x72f   : > { %v3824_v51 = vpop.xlane.xlu1 %3823 }
 0x730   : > { %v3825_v8 = vrot.slane %v3824_v51, 4 }
 0x732   : > { %v3826_v61 = vadd.f32 %v3825_v8, %v3824_v51 }
 0x734   : > { %v3827_v49 = vrot.slane %v3826_v61, 2 }
 0x736   : > { %v3828_v14 = vadd.f32 %v3827_v49, %v3826_v61 }
 0x738   : > { %v3829_v32 = vrot.slane %v3828_v14, 1 }
 0x73a   : > { %v3830_v5 = vadd.f32 %v3829_v32, %v3828_v14 }
 0x73c   : > { %5128 = vpush %v3830_v5 }
 0x76d   : > { %s5129_s26 = spop %5128 }
 0x76e   : > { %v3832_v52 = vstv %s5129_s26 }
 0x76f   : > { %v3833_v20 = vmul.f32 0.0003125, %v3832_v52 }
 0x771   : > { %v3834_v34 = vadd.f32 1e-05, %v3833_v20 }
 0x773   : > { %5142 = vrsqrt.f32 %v3834_v34 }
 0x77d   : > { %v5143_v56 = vpop.eup %5142 }
 0x77e   : > { %v3836_v57 = vmul.f32 %v5143_v56, %v7061_v10  ;;  %v3837_v44 = vmul.f32 %v5143_v56, %v7064_v29  ;;  %v3838_v42 = vmul.f32 %v5143_v56, %v7067_v18  ;;  %v3839_v12 = vmul.f32 %v5143_v56, %v7070_v43 }
 0x77f   : > { %v3840_v43 = vmul.f32 %v5143_v56, %v7077_v55  ;;  %v3841_v6 = vmul.f32 %v5143_v56, %v7082_v39  ;;  %v3842_v55 = vmul.f32 %v5143_v56, %v7089_v63  ;;  %v3843_v37 = vmul.f32 %v5143_v56, %v7095_v50 }
 0x780   : > { %v3856_v36 = vmul.f32 %v7150_v40, %v3836_v57  ;;  %v3857_v41 = vmul.f32 %v7150_v40, %v3837_v44  ;;  %v3858_v10 = vmul.f32 %v7150_v40, %v3838_v42  ;;  %v3859_v29 = vmul.f32 %v7150_v40, %v3839_v12 }
 0x781   : > { %v3860_v46 = vmul.f32 %v7150_v40, %v3840_v43  ;;  %v3861_v7 = vmul.f32 %v7150_v40, %v3841_v6  ;;  %v3862_v28 = vmul.f32 %v7150_v40, %v3842_v55  ;;  %v3863_v58 = vmul.f32 %v7150_v40, %v3843_v37 }
 0x782   : > { %v3876_v16 = vadd.f32 %v7159_v38, %v3856_v36  ;;  %v3877_v11 = vadd.f32 %v7159_v38, %v3857_v41  ;;  %v3878_v53 = vadd.f32 %v7159_v38, %v3858_v10  ;;  %v3879_v31 = vadd.f32 %v7159_v38, %v3859_v29 }
 0x783   : > { %v3880_v2 = vadd.f32 %v7159_v38, %v3860_v46  ;;  %v3881_v39 = vadd.f32 %v7159_v38, %v3861_v7  ;;  %v3882_v63 = vadd.f32 %v7159_v38, %v3862_v28  ;;  %v3883_v50 = vadd.f32 %v7159_v38, %v3863_v58 }
 0x784   : > { %v3889_v18 = vmax.f32 %v3876_v16, 0.0  ;;  %v3890_v45 = vmax.f32 %v3877_v11, 0.0  ;;  %v3891_v47 = vmax.f32 %v3878_v53, 0.0  ;;  %v3892_v0 = vmax.f32 %v3879_v31, 0.0 }
 0x785   : > { %v3893_v1 = vmax.f32 %v3880_v2, 0.0  ;;  %v3894_v26 = vmax.f32 %v3881_v39, 0.0  ;;  %v3844_v13 = vmul.f32 %v5143_v56, %v7101_v22  ;;  %v3845_v3 = vmul.f32 %v5143_v56, %v7106_v27 }
 0x786   : > { %v3902_v30 = vpack.c.bf16 %v3890_v45, %v3889_v18  ;;  %v3903_v60 = vpack.c.bf16 %v3892_v0, %v3891_v47  ;;  %v3895_v23 = vmax.f32 %v3882_v63, 0.0  ;;  %v3896_v17 = vmax.f32 %v3883_v50, 0.0 }
 0x787   : > { %v3904_v62 = vpack.c.bf16 %v3894_v26, %v3893_v1  ;;  %v3864_v24 = vmul.f32 %v7150_v40, %v3844_v13  ;;  %v3865_v59 = vmul.f32 %v7150_v40, %v3845_v3  ;;  %v3846_v22 = vmul.f32 %v5143_v56, %v7111_v15 }
 0x788   : > { %5064 = vmatmul.mubr.msk.bf16.vlgmr.msra.gmra.mrb[240].mxu0 %vm636_vm0, %v3902_v30  ;;  %v3905_v25 = vpack.c.bf16 %v3896_v17, %v3895_v23  ;;  %v3847_v27 = vmul.f32 %v5143_v56, %v7116_v48  ;;  %v3848_v15 = vmul.f32 %v5143_v56, %v7121_v54  ;;  %v4302_v54 = vld [vmem:[%s7264_s10] ss:$0 sm:$0xff] }
 0x789   : > { %5067 = vmatprep.mubr.msk.bf16.mxu0 %vm5153_vm1, %v5152_v4  ;;  %v3884_v35 = vadd.f32 %v7159_v38, %v3864_v24  ;;  %v3885_v33 = vadd.f32 %v7159_v38, %v3865_v59  ;;  %v3866_v21 = vmul.f32 %v7150_v40, %v3846_v22 }
 0x78a   : > { %v3867_v51 = vmul.f32 %v7150_v40, %v3847_v27  ;;  %v3868_v32 = vmul.f32 %v7150_v40, %v3848_v15 }
 0x78b   : > { %v3897_v9 = vmax.f32 %v3884_v35, 0.0  ;;  %v3898_v19 = vmax.f32 %v3885_v33, 0.0  ;;  %v3886_v61 = vadd.f32 %v7159_v38, %v3866_v21 }
 0x78c   : > { %v3887_v49 = vadd.f32 %v7159_v38, %v3867_v51  ;;  %v3888_v52 = vadd.f32 %v7159_v38, %v3868_v32 }
 0x78d   : > { %v3906_v8 = vpack.c.bf16 %v3898_v19, %v3897_v9  ;;  %v3899_v48 = vmax.f32 %v3886_v61, 0.0 }
 0x78e   : > { %v3900_v14 = vmax.f32 %v3887_v49, 0.0  ;;  %v3901_v20 = vmax.f32 %v3888_v52, 0.0 }
 0x790   : > { %5068 = vmatmul.mubr.msk.bf16.gmra.mrb[244].mxu0 %vm636_vm0, %v3903_v60  ;;  %v3907_v5 = vpack.c.bf16 %v3900_v14, %v3899_v48  ;;  %v3908_v34 = vpack.c.bf16 %v3901_v20, %v3901_v20 }
 0x791   : > { %5071 = vmatprep.mubr.msk.bf16.mxu0 %vm5153_vm1, %v5152_v4 }
 0x798   : > { %5072 = vmatmul.mubr.msk.bf16.gmra.mrb[248].mxu0 %vm636_vm0, %v3904_v62 }
 0x799   : > { %5075 = vmatprep.mubr.msk.bf16.mxu0 %vm5153_vm1, %v5152_v4 }
 0x7a0   : > { %5076 = vmatmul.mubr.msk.bf16.gmra.mrb[252].mxu0 %vm636_vm0, %v3905_v25 }
 0x7a1   : > { %5079 = vmatprep.mubr.msk.bf16.mxu0 %vm5153_vm1, %v5152_v4 }
 0x7a8   : > { %5080 = vmatmul.mubr.msk.bf16.gmra.mrb[0].mxu0 %vm636_vm0, %v3906_v8 }
 0x7a9   : > { %5083 = vmatprep.mubr.msk.bf16.mxu0 %vm5153_vm1, %v5152_v4 }
 0x7b0   : > { %5084 = vmatmul.mubr.msk.bf16.gmra.mrb[4].mxu0 %vm636_vm0, %v3907_v5 }
 0x7b1   : > { %5087 = vmatprep.mubr.msk.bf16.mxu0 %vm5153_vm1, %v5152_v4  ;;  %vm7372_vm1 = vmmov %vm7371_vm11 }
 0x7b8   : > { %5088 = vmatmul.mubr.msk.bf16.gmra.mrb[8].mxu0 %vm636_vm0, %v3908_v34 }
 0x85b   : > { %v3977_v56 = vpop.f32.mrb[240].mxu0 }
 0x85c   : > { %v3978_v4 = vadd.f32 %v4302_v54, %v3977_v56  ;;  %v5065_v40 = vpop.f32.mrb[241].mxu0 }
 0x85d   : > { %v3980_v57 = vpop.f32.mrb[242].mxu0 }
 0x85e   : > { %4031 = vst.msk [vmem:[%s7223_s19] sm:$0xff] %vm636_vm0, %v3978_v4  ;;  %v3981_v44 = vadd.f32 %v4302_v54, %v3980_v57  ;;  %v5066_v42 = vpop.f32.mrb[243].mxu0 }
 0x860   : > { %4032 = vst.msk [vmem:[%s7223_s19 + $0x8] sm:$0xff] %vm636_vm0, %v3981_v44 }
 0x863   : > { %v3985_v12 = vpop.f32.mrb[244].mxu0 }
 0x864   : > { %v3986_v38 = vadd.f32 %v4302_v54, %v3985_v12  ;;  %v5069_v36 = vpop.f32.mrb[245].mxu0 }
 0x865   : > { %v3988_v41 = vpop.f32.mrb[246].mxu0 }
 0x866   : > { %4033 = vst.msk [vmem:[%s7223_s19 + $0x10] sm:$0xff] %vm636_vm0, %v3986_v38  ;;  %v3989_v16 = vadd.f32 %v4302_v54, %v3988_v41  ;;  %v5070_v11 = vpop.f32.mrb[247].mxu0 }
 0x868   : > { %4034 = vst.msk [vmem:[%s7223_s19 + $0x18] sm:$0xff] %vm636_vm0, %v3989_v16 }
 0x86b   : > { %v3993_v10 = vpop.f32.mrb[248].mxu0 }
 0x86c   : > { %v3994_v29 = vadd.f32 %v4302_v54, %v3993_v10  ;;  %v5073_v18 = vpop.f32.mrb[249].mxu0 }
 0x86d   : > { %v3996_v45 = vpop.f32.mrb[250].mxu0 }
 0x86e   : > { %4035 = vst.msk [vmem:[%s7223_s19 + $0x20] sm:$0xff] %vm636_vm0, %v3994_v29  ;;  %v3997_v43 = vadd.f32 %v4302_v54, %v3996_v45  ;;  %v5074_v30 = vpop.f32.mrb[251].mxu0 }
 0x870   : > { %4036 = vst.msk [vmem:[%s7223_s19 + $0x28] sm:$0xff] %vm636_vm0, %v3997_v43 }
 0x873   : > { %v4001_v53 = vpop.f32.mrb[252].mxu0 }
 0x874   : > { %v4002_v31 = vadd.f32 %v4302_v54, %v4001_v53  ;;  %v5077_v6 = vpop.f32.mrb[253].mxu0 }
 0x875   : > { %v4004_v47 = vpop.f32.mrb[254].mxu0 }
 0x876   : > { %4037 = vst.msk [vmem:[%s7223_s19 + $0x30] sm:$0xff] %vm636_vm0, %v4002_v31  ;;  %v4005_v0 = vadd.f32 %v4302_v54, %v4004_v47  ;;  %v5078_v46 = vpop.f32.mrb[255].mxu0 }
 0x878   : > { %4038 = vst.msk [vmem:[%s7223_s19 + $0x38] sm:$0xff] %vm636_vm0, %v4005_v0 }
 0x87b   : > { %v4009_v7 = vpop.f32.mrb[0].mxu0 }
 0x87c   : > { %v4010_v55 = vadd.f32 %v4302_v54, %v4009_v7  ;;  %v5081_v37 = vpop.f32.mrb[1].mxu0 }
 0x87d   : > { %v4012_v60 = vpop.f32.mrb[2].mxu0 }
 0x87e   : > { %4039 = vst.msk [vmem:[%s7223_s19 + $0x40] sm:$0xff] %vm636_vm0, %v4010_v55  ;;  %v4013_v2 = vadd.f32 %v4302_v54, %v4012_v60  ;;  %v5082_v39 = vpop.f32.mrb[3].mxu0 }
 0x880   : > { %4040 = vst.msk [vmem:[%s7223_s19 + $0x48] sm:$0xff] %vm636_vm0, %v4013_v2 }
 0x883   : > { %v4017_v28 = vpop.f32.mrb[4].mxu0 }
 0x884   : > { %v4018_v58 = vadd.f32 %v4302_v54, %v4017_v28  ;;  %v5085_v1 = vpop.f32.mrb[5].mxu0 }
 0x885   : > { %v4020_v26 = vpop.f32.mrb[6].mxu0 }
 0x886   : > { %4041 = vst.msk [vmem:[%s7223_s19 + $0x50] sm:$0xff] %vm636_vm0, %v4018_v58  ;;  %v4021_v63 = vadd.f32 %v4302_v54, %v4020_v26  ;;  %v5086_v50 = vpop.f32.mrb[7].mxu0 }
 0x888   : > { %4042 = vst.msk [vmem:[%s7223_s19 + $0x58] sm:$0xff] %vm636_vm0, %v4021_v63 }
 0x88b   : > { %v4025_v62 = vpop.f32.mrb[8].mxu0 }
 0x88c   : > { %v4026_v13 = vadd.f32 %v4302_v54, %v4025_v62  ;;  %v5089_v3 = vpop.f32.mrb[9].mxu0 }
 0x88d   : > { %v4028_v23 = vpop.f32.mrb[10].mxu0 }
 0x88e   : > { %4043 = vst.msk [vmem:[%s7223_s19 + $0x60] sm:$0xf] %vm7372_vm1, %v4026_v13  ;;  %v5090_v17 = vpop.f32.mrb[11].mxu0 }
 0x88f PF: > { %s21_s17 = sadd.s32 1, %s5150_s17  }
 0x890   : > { %p18_p4 = scmp.ge.s32.totalorder %s21_s17, 4  }
 0x892   :  { %20 = sbr.rel (!%p18_p4) target bundleno = 1 (0x1), region = 110 }

</bundles_post_ra>
